<compile_context>
chip_gen: v7x
topology: tpu7x:2x2x1
jax: 0.10.0
libtpu: 0.0.40
codegen_flags: <defaults>
</compile_context>

<pallas_src>
import functools

import jax
import jax.numpy as jnp
from jax import lax
from jax.experimental import pallas as pl
from jax.experimental.pallas import tpu as pltpu

_SQRT_HALF = 0.7071067811865476


def _gelu_exact(x):
    # matches torch.nn.GELU() (erf form)
    return 0.5 * x * (1.0 + lax.erf(x * _SQRT_HALF))


def _round_up(x, m):
    return (x + m - 1) // m * m


@functools.lru_cache(maxsize=1)
def _mxu_pref():
    # 256 matches the 256-wide MXU on v6e/v7x; v5e's MXUs are 128-wide.
    try:
        kind = jax.devices()[0].device_kind.lower()
        if "v5 lite" in kind or "v5e" in kind or "v5lite" in kind:
            return 128
    except Exception:
        pass
    return 256


def _pick_tile(dim, pref, align):
    """Returns (tile, padded_dim) with tile | padded_dim and tile % align == 0."""
    if dim <= pref:
        t = _round_up(dim, align)
        return t, t
    return pref, _round_up(dim, pref)


# --------------------------------------------------------------------------
# Pallas kernel 1: single-K-step matmul with fused bias + activation epilogue
# A, W are bf16 in HBM/VMEM; accumulation and epilogue in f32.
# --------------------------------------------------------------------------
def _mm_kernel(a_ref, w_ref, b_ref, o_ref, *, act):
    r = jnp.dot(a_ref[...], w_ref[...], preferred_element_type=jnp.float32)
    r = r + b_ref[...]
    if act == "gelu":
        r = _gelu_exact(r)
    elif act == "leaky":
        r = jnp.where(r >= 0, r, 0.1 * r)
    o_ref[...] = r.astype(o_ref.dtype)


def pallas_matmul(a, w, b=None, act=None):
    M, K = a.shape
    K2, N = w.shape
    assert K == K2
    pref = _mxu_pref()
    tm, Mp = _pick_tile(M, pref, 16)     # 16: bf16 sublane packing
    tn, Np = _pick_tile(N, pref, 128)    # 128: lane width
    Kp = _round_up(K, 16)                # full K resident per block (K <= ~2.3k)

    a_p = jnp.pad(a.astype(jnp.bfloat16), ((0, Mp - M), (0, Kp - K)))
    w_p = jnp.pad(w.astype(jnp.bfloat16), ((0, Kp - K), (0, Np - N)))
    if b is None:
        b_p = jnp.zeros((1, Np), jnp.float32)
    else:
        b_p = jnp.pad(b.astype(jnp.float32), (0, Np - N)).reshape(1, Np)

    out = pl.pallas_call(
        functools.partial(_mm_kernel, act=act),
        out_shape=jax.ShapeDtypeStruct((Mp, Np), jnp.float32),
        grid=(Mp // tm, Np // tn),
        in_specs=[
            pl.BlockSpec((tm, Kp), lambda i, j: (i, 0)),
            pl.BlockSpec((Kp, tn), lambda i, j: (0, j)),
            pl.BlockSpec((1, tn), lambda i, j: (0, j)),
        ],
        out_specs=pl.BlockSpec((tm, tn), lambda i, j: (i, j)),
        compiler_params=pltpu.CompilerParams(
            dimension_semantics=("parallel", "parallel")),
    )(a_p, w_p, b_p)
    return out[:M, :N]


# --------------------------------------------------------------------------
# Pallas kernel 2: fused conv1x1 -> LeakyReLU(0.1) -> conv1x1 (FreBlock paths).
# The intermediate activation never leaves VMEM/vregs.
# --------------------------------------------------------------------------
def _fused_1x1_pair_kernel(a_ref, w1_ref, b1_ref, w2_ref, b2_ref, o_ref, *, slope):
    h = jnp.dot(a_ref[...], w1_ref[...], preferred_element_type=jnp.float32)
    h = h + b1_ref[...]
    h = jnp.where(h >= 0, h, slope * h)
    r = jnp.dot(h.astype(jnp.bfloat16), w2_ref[...],
                preferred_element_type=jnp.float32)
    r = r + b2_ref[...]
    o_ref[...] = r.astype(o_ref.dtype)


def fused_1x1_pair(x, p1, p2, slope=0.1):
    """x: NCHW.  conv1x1(p1) -> LeakyReLU(slope) -> conv1x1(p2)."""
    N, C, H, W = x.shape
    M = N * H * W
    a = jnp.transpose(x, (0, 2, 3, 1)).reshape(M, C)
    Cp = _round_up(C, 128)
    tm, Mp = _pick_tile(M, _mxu_pref(), 16)
    a_p = jnp.pad(a.astype(jnp.bfloat16), ((0, Mp - M), (0, Cp - C)))

    def wmat(p):
        wm = p["w"][:, :, 0, 0].T                    # (Cin, Cout)
        return jnp.pad(wm.astype(jnp.bfloat16), ((0, Cp - C), (0, Cp - C)))

    def bvec(p):
        bb = p["b"] if p["b"] is not None else jnp.zeros((C,), jnp.float32)
        return jnp.pad(bb.astype(jnp.float32), (0, Cp - C)).reshape(1, Cp)

    out = pl.pallas_call(
        functools.partial(_fused_1x1_pair_kernel, slope=slope),
        out_shape=jax.ShapeDtypeStruct((Mp, Cp), jnp.float32),
        grid=(Mp // tm,),
        in_specs=[
            pl.BlockSpec((tm, Cp), lambda i: (i, 0)),
            pl.BlockSpec((Cp, Cp), lambda i: (0, 0)),
            pl.BlockSpec((1, Cp), lambda i: (0, 0)),
            pl.BlockSpec((Cp, Cp), lambda i: (0, 0)),
            pl.BlockSpec((1, Cp), lambda i: (0, 0)),
        ],
        out_specs=pl.BlockSpec((tm, Cp), lambda i: (i, 0)),
        compiler_params=pltpu.CompilerParams(dimension_semantics=("parallel",)),
    )(a_p, wmat(p1), bvec(p1), wmat(p2), bvec(p2))
    y = out[:M, :C].reshape(N, H, W, C)
    return jnp.transpose(y, (0, 3, 1, 2))


# --------------------------------------------------------------------------
# Pallas kernel 3: InstanceNorm2d (affine=False, eps=1e-5) + GELU
# rows = N*C, cols = H*W ; var via E[x^2]-E[x]^2 so zero column padding is safe
# --------------------------------------------------------------------------
def _in_gelu_kernel(x_ref, o_ref, *, hw):
    x = x_ref[...]
    inv = 1.0 / hw
    mean = jnp.sum(x, axis=-1, keepdims=True) * inv
    ex2 = jnp.sum(x * x, axis=-1, keepdims=True) * inv
    var = ex2 - mean * mean
    y = (x - mean) * lax.rsqrt(var + 1e-5)
    o_ref[...] = _gelu_exact(y)


def instance_norm_gelu(x):
    N, C, H, W = x.shape
    rows, hw = N * C, H * W
    HWp = _round_up(hw, 128)
    Rp = _round_up(rows, 8)
    # Row tile as large as comfortably fits VMEM (~4 MiB per in/out block, safe
    # even on v7x's 64 MiB with double-buffering).
    max_rows = max(8, ((4 << 20) // (HWp * 4)) // 8 * 8)
    if Rp <= max_rows:
        tr = Rp
    else:
        tr = max_rows
        Rp = _round_up(rows, tr)
    xp = jnp.pad(x.reshape(rows, hw).astype(jnp.float32),
                 ((0, Rp - rows), (0, HWp - hw)))
    out = pl.pallas_call(
        functools.partial(_in_gelu_kernel, hw=float(hw)),
        out_shape=jax.ShapeDtypeStruct((Rp, HWp), jnp.float32),
        grid=(Rp // tr,),
        in_specs=[pl.BlockSpec((tr, HWp), lambda i: (i, 0))],
        out_specs=pl.BlockSpec((tr, HWp), lambda i: (i, 0)),
    )(xp)
    return out[:rows, :hw].reshape(N, C, H, W)


# --------------------------------------------------------------------------
# Convolution glue (im2col in JAX, matmul in Pallas)
# TODO(synk): 3x3 convs still build im2col host-side (up to 9x read dup);
#             in-kernel tap accumulation is a follow-up optimization.
# --------------------------------------------------------------------------
def conv2d(x, w, b, stride=1, padding=0, act=None, pad2=None):
    """x: NCHW, w: OIHW.  pad2 = ((top, bottom), (left, right)) overrides padding."""
    N, C, H, W = x.shape
    O, _, KH, KW = w.shape
    if pad2 is None:
        pad2 = ((padding, padding), (padding, padding))
    (pt, pb), (pleft, pright) = pad2
    xn = jnp.transpose(x, (0, 2, 3, 1))  # NHWC
    if pt or pb or pleft or pright:
        xn = jnp.pad(xn, ((0, 0), (pt, pb), (pleft, pright), (0, 0)))
    Ho = (H + pt + pb - KH) // stride + 1
    Wo = (W + pleft + pright - KW) // stride + 1
    if KH == 1 and KW == 1 and stride == 1:
        A = xn.reshape(N * Ho * Wo, C)
    else:
        cols = []
        for i in range(KH):
            for j in range(KW):
                cols.append(xn[:, i:i + stride * Ho:stride,
                               j:j + stride * Wo:stride, :])
        A = jnp.concatenate(cols, axis=-1).reshape(N * Ho * Wo, KH * KW * C)
    Wm = jnp.transpose(w, (2, 3, 1, 0)).reshape(KH * KW * C, O)
    out = pallas_matmul(A, Wm, b, act)
    return jnp.transpose(out.reshape(N, Ho, Wo, O), (0, 3, 1, 2))


def conv_transpose2d_4x4_s2(x, w, b, act):
    """PyTorch ConvTranspose2d(kernel=4, stride=2, padding=1) via sub-pixel
    decomposition: 4 phase 2x2 convs over the *non-dilated* input, interleaved.
    x: NCHW, w: (Cin, Cout, 4, 4)."""
    N, C, H, W = x.shape
    Cout = w.shape[1]
    # output row parity -> (kernel-row taps in window order, (pad_top, pad_bottom))
    row_cfg = {0: ([3, 1], (1, 0)), 1: ([2, 0], (0, 1))}
    col_cfg = {0: ([3, 1], (1, 0)), 1: ([2, 0], (0, 1))}
    phases = []
    for rp in (0, 1):
        kh_list, (pt, pb) = row_cfg[rp]
        row_phase = []
        for cp_ in (0, 1):
            kw_list, (pleft, pright) = col_cfg[cp_]
            wk = w[:, :, kh_list, :][:, :, :, kw_list]      # (Cin, Cout, 2, 2)
            wk = jnp.transpose(wk, (1, 0, 2, 3))            # OIHW
            y = conv2d(x, wk, b, stride=1, padding=0, act=act,
                       pad2=((pt, pb), (pleft, pright)))    # (N, Cout, H, W)
            row_phase.append(y)
        phases.append(row_phase)
    ee, eo = phases[0]
    oe, oo = phases[1]
    even_rows = jnp.stack([ee, eo], axis=-1).reshape(N, Cout, H, 2 * W)
    odd_rows = jnp.stack([oe, oo], axis=-1).reshape(N, Cout, H, 2 * W)
    out = jnp.stack([even_rows, odd_rows], axis=-2).reshape(N, Cout, 2 * H, 2 * W)
    return out


# --------------------------------------------------------------------------
# Module forwards
# --------------------------------------------------------------------------
def basic_conv(p, x, *, stride, norm=True, activation=True, transpose=False):
    act = None if norm else ("gelu" if activation else None)
    if transpose:
        # all transposed convs in f_net are kernel=4, stride=2, padding=1
        y = conv_transpose2d_4x4_s2(x, p["w"], p["b"], act)
    else:
        k = p["w"].shape[2]
        y = conv2d(x, p["w"], p["b"], stride=stride, padding=k // 2, act=act)
    if norm:
        assert activation, "only norm+GELU combination is used in f_net"
        y = instance_norm_gelu(y)
    return y


def fre_block(p, x_complex):
    mag = jnp.abs(x_complex)
    pha = jnp.angle(x_complex)
    mag = fused_1x1_pair(mag, p["mag1"], p["mag2"], slope=0.1)
    pha = fused_1x1_pair(pha, p["pha1"], p["pha2"], slope=0.1)
    real = mag * jnp.cos(pha)
    imag = mag * jnp.sin(pha)
    return lax.complex(real, imag)


def frb(p, x):
    C = x.shape[1]
    x1, x2 = x[:, :C // 2], x[:, C // 2:]
    H, W = x1.shape[2], x1.shape[3]
    xf = jnp.fft.rfft2(x1, norm="backward")
    xf = fre_block(p["fre"], xf)
    xfs = jnp.fft.irfft2(xf, s=(H, W), norm="backward").astype(x1.dtype)
    xfs = x1 + xfs
    # TODO(synk): the layer_1->GELU->layer_2 3x3 pair could be fused into one
    #             Pallas kernel with the intermediate kept in VMEM.
    xs = basic_conv(p["layer_1"], x2, stride=1, norm=False)
    xs = basic_conv(p["layer_2"], xs, stride=1, norm=False)
    xs = x2 + xs
    return jnp.concatenate([xfs, xs], axis=1)


def frb_seq(plist, x):
    for p in plist:
        x = frb(p, x)
    return x


def f_net_forward(params, img_low, pre_enhancement, color_shortcuts):
    x = jnp.concatenate([img_low, pre_enhancement], axis=1)  # (N, 6, H, W)
    x = basic_conv(params["conv_first"], x, stride=1)

    enc = params["encoder"]
    shortcuts = []
    x = basic_conv(enc[0], x, stride=1)
    x = frb_seq(enc[1], x); shortcuts.append(x)
    x = basic_conv(enc[2], x, stride=2)
    x = basic_conv(enc[3], x, stride=1)
    x = frb_seq(enc[4], x); shortcuts.append(x)
    x = basic_conv(enc[5], x, stride=2)
    x = basic_conv(enc[6], x, stride=1)
    x = frb_seq(enc[7], x); shortcuts.append(x)
    x = basic_conv(enc[8], x, stride=2)

    x = frb_seq(params["middle"], x)

    # TODO(synk): MultiScaleColorEncoder definition was not provided in the
    # reference source; substituting identity (fusion_feature = middle feats),
    # so color_shortcuts is accepted but unused.
    fusion_feature = x

    dec = params["decoder"]
    x = basic_conv(dec[0], fusion_feature, stride=2, transpose=True)
    x = jnp.concatenate([x, shortcuts[2]], axis=1)
    x = basic_conv(dec[1], x, stride=1)
    x = frb_seq(dec[2], x)
    x = basic_conv(dec[3], x, stride=2, transpose=True)
    x = jnp.concatenate([x, shortcuts[1]], axis=1)
    x = basic_conv(dec[4], x, stride=1)
    x = frb_seq(dec[5], x)
    x = basic_conv(dec[6], x, stride=2, transpose=True)
    x = jnp.concatenate([x, shortcuts[0]], axis=1)
    x = basic_conv(dec[7], x, stride=1)
    x = frb_seq(dec[8], x)

    x = conv2d(x, params["conv_last"]["w"], params["conv_last"]["b"],
               stride=1, padding=1, act=None)
    return (jnp.tanh(x) + 1.0) / 2.0


# --------------------------------------------------------------------------
# Deterministic parameter init (shapes mirror the PyTorch module)
# --------------------------------------------------------------------------
class KeyGen:
    def __init__(self, key):
        self.key = key

    def __call__(self):
        self.key, sub = jax.random.split(self.key)
        return sub


def _init_conv(key, cin, cout, k, bias, transpose=False):
    kw, kb = jax.random.split(key)
    fan_in = cin * k * k
    bound = 1.0 / (fan_in ** 0.5)
    shape = (cin, cout, k, k) if transpose else (cout, cin, k, k)
    w = jax.random.uniform(kw, shape, jnp.float32, -bound, bound)
    b = jax.random.uniform(kb, (cout,), jnp.float32, -bound, bound) if bias else None
    return {"w": w, "b": b}


def _init_frb(kg, channels):
    c = channels // 2
    return {
        "layer_1": _init_conv(kg(), c, c, 3, bias=True),
        "layer_2": _init_conv(kg(), c, c, 3, bias=True),
        "fre": {
            "mag1": _init_conv(kg(), c, c, 1, bias=True),
            "mag2": _init_conv(kg(), c, c, 1, bias=True),
            "pha1": _init_conv(kg(), c, c, 1, bias=True),
            "pha2": _init_conv(kg(), c, c, 1, bias=True),
        },
    }


def init_f_net(key, base=32, depth=(2, 2, 2, 2)):
    kg = KeyGen(key)
    p = {}
    p["conv_first"] = _init_conv(kg(), 6, base, 3, bias=False)
    enc = []
    enc.append(_init_conv(kg(), base, base, 3, bias=False))
    enc.append([_init_frb(kg, base) for _ in range(depth[0])])
    enc.append(_init_conv(kg(), base, base * 2, 3, bias=False))
    enc.append(_init_conv(kg(), base * 2, base * 2, 3, bias=False))
    enc.append([_init_frb(kg, base * 2) for _ in range(depth[1])])
    enc.append(_init_conv(kg(), base * 2, base * 4, 3, bias=False))
    enc.append(_init_conv(kg(), base * 4, base * 4, 3, bias=False))
    enc.append([_init_frb(kg, base * 4) for _ in range(depth[2])])
    enc.append(_init_conv(kg(), base * 4, base * 8, 3, bias=False))
    p["encoder"] = enc
    p["middle"] = [_init_frb(kg, base * 8) for _ in range(depth[3])]
    dec = []
    dec.append(_init_conv(kg(), base * 8, base * 4, 4, bias=False, transpose=True))
    dec.append(_init_conv(kg(), base * 8, base * 4, 3, bias=False))
    dec.append([_init_frb(kg, base * 4) for _ in range(depth[2])])
    dec.append(_init_conv(kg(), base * 4, base * 2, 4, bias=False, transpose=True))
    dec.append(_init_conv(kg(), base * 4, base * 2, 3, bias=False))
    dec.append([_init_frb(kg, base * 2) for _ in range(depth[1])])
    dec.append(_init_conv(kg(), base * 2, base, 4, bias=False, transpose=True))
    dec.append(_init_conv(kg(), base * 2, base, 3, bias=False))
    dec.append([_init_frb(kg, base) for _ in range(depth[0])])
    p["decoder"] = dec
    p["conv_last"] = _init_conv(kg(), base, 3, 3, bias=True)
    return p


# --------------------------------------------------------------------------
if __name__ == "__main__":
    master = jax.random.PRNGKey(0)
    pkey, k1, k2, k3, k4, k5 = jax.random.split(master, 6)
    params = init_f_net(pkey)

    N, H, W = 1, 16, 16
    img_low = jax.random.normal(k1, (N, 3, H, W), jnp.float32)
    pre_enhancement = jax.random.normal(k2, (N, 3, H, W), jnp.float32)
    # shapes that the (unimplemented) MultiScaleColorEncoder would expect
    color_shortcuts = [
        jax.random.normal(k3, (N, 32, H, W), jnp.float32),
        jax.random.normal(k4, (N, 64, H // 2, W // 2), jnp.float32),
        jax.random.normal(k5, (N, 128, H // 4, W // 4), jnp.float32),
    ]

    fwd = jax.jit(f_net_forward)
    out = fwd(params, img_low, pre_enhancement, color_shortcuts)
    jax.block_until_ready(out)
    assert out.shape == (N, 3, H, W), out.shape
    assert bool(jnp.all(jnp.isfinite(out)))
    print("KERNEL_OK")
</pallas_src>

<mosaic_0001>
module attributes {stable_mosaic.version = 11 : i64} {
  func.func @_mm_kernel(%arg0: i32, %arg1: i32, %arg2: memref<256x64xbf16, #tpu.memory_space<vmem>>, %arg3: memref<64x128xbf16, #tpu.memory_space<vmem>>, %arg4: memref<1x128xf32, #tpu.memory_space<vmem>>, %arg5: memref<256x128xf32, #tpu.memory_space<vmem>>) attributes {dimension_semantics = [#tpu.dimension_semantics<parallel>, #tpu.dimension_semantics<parallel>], iteration_bounds = array<i64: 1, 1>, scalar_prefetch = 0 : i64, scratch_operands = 0 : i64, tpu.core_type = #tpu.core_type<tc>, window_params = [{transform_indices = @transform_0, window_bounds = array<i64: 256, 64>}, {transform_indices = @transform_1, window_bounds = array<i64: 64, 128>}, {transform_indices = @transform_2, window_bounds = array<i64: 1, 128>}, {transform_indices = @transform_3, window_bounds = array<i64: 256, 128>}]} {
    %c0 = arith.constant 0 : index
    %c0_0 = arith.constant 0 : index
    %0 = vector.load %arg2[%c0, %c0_0] : memref<256x64xbf16, #tpu.memory_space<vmem>>, vector<256x64xbf16>
    %c0_1 = arith.constant 0 : index
    %c0_2 = arith.constant 0 : index
    %1 = vector.load %arg3[%c0_1, %c0_2] : memref<64x128xbf16, #tpu.memory_space<vmem>>, vector<64x128xbf16>
    %cst = arith.constant dense<0.000000e+00> : vector<256x128xf32>
    %2 = tpu.matmul %0, %1, %cst {dimension_numbers = #tpu.dot_dimension_numbers<[1], [0], [0], [1], [0, 0, 1, 1], [], []>} : vector<256x64xbf16>, vector<64x128xbf16>, vector<256x128xf32> -> vector<256x128xf32>
    %c0_3 = arith.constant 0 : index
    %c0_4 = arith.constant 0 : index
    %3 = vector.load %arg4[%c0_3, %c0_4] : memref<1x128xf32, #tpu.memory_space<vmem>>, vector<1x128xf32>
    %4 = vector.broadcast %3 : vector<1x128xf32> to vector<256x128xf32>
    %5 = arith.addf %2, %4 : vector<256x128xf32>
    %c0_5 = arith.constant 0 : index
    %c0_6 = arith.constant 0 : index
    %6 = vector.load %arg5[%c0_5, %c0_6] : memref<256x128xf32, #tpu.memory_space<vmem>>, vector<256x128xf32>
    tpu.vector_store %arg5[%c0_5, %c0_6], %5 {strides = array<i32>} : memref<256x128xf32, #tpu.memory_space<vmem>>, vector<256x128xf32>,
    return
  }
  func.func @transform_0(%arg0: i32, %arg1: i32) -> (i32, i32) {
    %c0_i32 = arith.constant 0 : i32
    %c0_i32_0 = arith.constant 0 : i32
    return %arg0, %c0_i32 : i32, i32
  }
  func.func @transform_1(%arg0: i32, %arg1: i32) -> (i32, i32) {
    %c0_i32 = arith.constant 0 : i32
    %c0_i32_0 = arith.constant 0 : i32
    return %c0_i32, %arg1 : i32, i32
  }
  func.func @transform_2(%arg0: i32, %arg1: i32) -> (i32, i32) {
    %c0_i32 = arith.constant 0 : i32
    %c0_i32_0 = arith.constant 0 : i32
    return %c0_i32, %arg1 : i32, i32
  }
  func.func @transform_3(%arg0: i32, %arg1: i32) -> (i32, i32) {
    %c0_i32 = arith.constant 0 : i32
    return %arg0, %arg1 : i32, i32
  }
}

module attributes {stable_mosaic.version = 11 : i64} {
  func.func @_in_gelu_kernel(%arg0: i32, %arg1: memref<32x256xf32, #tpu.memory_space<vmem>>, %arg2: memref<32x256xf32, #tpu.memory_space<vmem>>) attributes {dimension_semantics = [#tpu.dimension_semantics<arbitrary>], iteration_bounds = array<i64: 1>, scalar_prefetch = 0 : i64, scratch_operands = 0 : i64, tpu.core_type = #tpu.core_type<tc>, window_params = [{transform_indices = @transform_0, window_bounds = array<i64: 32, 256>}, {transform_indices = @transform_1, window_bounds = array<i64: 32, 256>}]} {
    %c0 = arith.constant 0 : index
    %c0_0 = arith.constant 0 : index
    %0 = vector.load %arg1[%c0, %c0_0] : memref<32x256xf32, #tpu.memory_space<vmem>>, vector<32x256xf32>
    %cst = arith.constant dense<0.000000e+00> : vector<32xf32>
    %1 = vector.multi_reduction <add>, %0, %cst [1] : vector<32x256xf32> to vector<32xf32>
    %2 = vector.shape_cast %1 : vector<32xf32> to vector<32x1xf32>
    %cst_1 = arith.constant 3.906250e-03 : f32
    %3 = vector.broadcast %cst_1 : f32 to vector<32x1xf32>
    %4 = arith.mulf %2, %3 : vector<32x1xf32>
    %5 = arith.mulf %0, %0 : vector<32x256xf32>
    %cst_2 = arith.constant dense<0.000000e+00> : vector<32xf32>
    %6 = vector.multi_reduction <add>, %5, %cst_2 [1] : vector<32x256xf32> to vector<32xf32>
    %7 = vector.shape_cast %6 : vector<32xf32> to vector<32x1xf32>
    %cst_3 = arith.constant 3.906250e-03 : f32
    %8 = vector.broadcast %cst_3 : f32 to vector<32x1xf32>
    %9 = arith.mulf %7, %8 : vector<32x1xf32>
    %10 = arith.mulf %4, %4 : vector<32x1xf32>
    %11 = arith.subf %9, %10 : vector<32x1xf32>
    %12 = vector.broadcast %4 : vector<32x1xf32> to vector<32x256xf32>
    %13 = arith.subf %0, %12 : vector<32x256xf32>
    %cst_4 = arith.constant 9.99999974E-6 : f32
    %14 = vector.broadcast %cst_4 : f32 to vector<32x1xf32>
    %15 = arith.addf %11, %14 : vector<32x1xf32>
    %16 = math.rsqrt %15 : vector<32x1xf32>
    %17 = vector.broadcast %16 : vector<32x1xf32> to vector<32x256xf32>
    %18 = arith.mulf %13, %17 : vector<32x256xf32>
    %cst_5 = arith.constant 5.000000e-01 : f32
    %19 = vector.broadcast %cst_5 : f32 to vector<32x256xf32>
    %20 = arith.mulf %19, %18 : vector<32x256xf32>
    %cst_6 = arith.constant 0.707106769 : f32
    %21 = vector.broadcast %cst_6 : f32 to vector<32x256xf32>
    %22 = arith.mulf %18, %21 : vector<32x256xf32>
    %23 = math.erf %22 : vector<32x256xf32>
    %cst_7 = arith.constant 1.000000e+00 : f32
    %24 = vector.broadcast %cst_7 : f32 to vector<32x256xf32>
    %25 = arith.addf %24, %23 : vector<32x256xf32>
    %26 = arith.mulf %20, %25 : vector<32x256xf32>
    %c0_8 = arith.constant 0 : index
    %c0_9 = arith.constant 0 : index
    %27 = vector.load %arg2[%c0_8, %c0_9] : memref<32x256xf32, #tpu.memory_space<vmem>>, vector<32x256xf32>
    tpu.vector_store %arg2[%c0_8, %c0_9], %26 {strides = array<i32>} : memref<32x256xf32, #tpu.memory_space<vmem>>, vector<32x256xf32>,
    return
  }
  func.func @transform_0(%arg0: i32) -> (i32, i32) {
    %c0_i32 = arith.constant 0 : i32
    %c0_i32_0 = arith.constant 0 : i32
    return %arg0, %c0_i32 : i32, i32
  }
  func.func @transform_1(%arg0: i32) -> (i32, i32) {
    %c0_i32 = arith.constant 0 : i32
    %c0_i32_0 = arith.constant 0 : i32
    return %arg0, %c0_i32 : i32, i32
  }
}

module attributes {stable_mosaic.version = 11 : i64} {
  func.func @_mm_kernel(%arg0: i32, %arg1: i32, %arg2: memref<256x288xbf16, #tpu.memory_space<vmem>>, %arg3: memref<288x128xbf16, #tpu.memory_space<vmem>>, %arg4: memref<1x128xf32, #tpu.memory_space<vmem>>, %arg5: memref<256x128xf32, #tpu.memory_space<vmem>>) attributes {dimension_semantics = [#tpu.dimension_semantics<parallel>, #tpu.dimension_semantics<parallel>], iteration_bounds = array<i64: 1, 1>, scalar_prefetch = 0 : i64, scratch_operands = 0 : i64, tpu.core_type = #tpu.core_type<tc>, window_params = [{transform_indices = @transform_0, window_bounds = array<i64: 256, 288>}, {transform_indices = @transform_1, window_bounds = array<i64: 288, 128>}, {transform_indices = @transform_2, window_bounds = array<i64: 1, 128>}, {transform_indices = @transform_3, window_bounds = array<i64: 256, 128>}]} {
    %c0 = arith.constant 0 : index
    %c0_0 = arith.constant 0 : index
    %0 = vector.load %arg2[%c0, %c0_0] : memref<256x288xbf16, #tpu.memory_space<vmem>>, vector<256x288xbf16>
    %c0_1 = arith.constant 0 : index
    %c0_2 = arith.constant 0 : index
    %1 = vector.load %arg3[%c0_1, %c0_2] : memref<288x128xbf16, #tpu.memory_space<vmem>>, vector<288x128xbf16>
    %cst = arith.constant dense<0.000000e+00> : vector<256x128xf32>
    %2 = tpu.matmul %0, %1, %cst {dimension_numbers = #tpu.dot_dimension_numbers<[1], [0], [0], [1], [0, 0, 1, 1], [], []>} : vector<256x288xbf16>, vector<288x128xbf16>, vector<256x128xf32> -> vector<256x128xf32>
    %c0_3 = arith.constant 0 : index
    %c0_4 = arith.constant 0 : index
    %3 = vector.load %arg4[%c0_3, %c0_4] : memref<1x128xf32, #tpu.memory_space<vmem>>, vector<1x128xf32>
    %4 = vector.broadcast %3 : vector<1x128xf32> to vector<256x128xf32>
    %5 = arith.addf %2, %4 : vector<256x128xf32>
    %c0_5 = arith.constant 0 : index
    %c0_6 = arith.constant 0 : index
    %6 = vector.load %arg5[%c0_5, %c0_6] : memref<256x128xf32, #tpu.memory_space<vmem>>, vector<256x128xf32>
    tpu.vector_store %arg5[%c0_5, %c0_6], %5 {strides = array<i32>} : memref<256x128xf32, #tpu.memory_space<vmem>>, vector<256x128xf32>,
    return
  }
  func.func @transform_0(%arg0: i32, %arg1: i32) -> (i32, i32) {
    %c0_i32 = arith.constant 0 : i32
    %c0_i32_0 = arith.constant 0 : i32
    return %arg0, %c0_i32 : i32, i32
  }
  func.func @transform_1(%arg0: i32, %arg1: i32) -> (i32, i32) {
    %c0_i32 = arith.constant 0 : i32
    %c0_i32_0 = arith.constant 0 : i32
    return %c0_i32, %arg1 : i32, i32
  }
  func.func @transform_2(%arg0: i32, %arg1: i32) -> (i32, i32) {
    %c0_i32 = arith.constant 0 : i32
    %c0_i32_0 = arith.constant 0 : i32
    return %c0_i32, %arg1 : i32, i32
  }
  func.func @transform_3(%arg0: i32, %arg1: i32) -> (i32, i32) {
    %c0_i32 = arith.constant 0 : i32
    return %arg0, %arg1 : i32, i32
  }
}

module attributes {stable_mosaic.version = 11 : i64} {
  func.func @_fused_1x1_pair_kernel(%arg0: i32, %arg1: memref<144x128xbf16, #tpu.memory_space<vmem>>, %arg2: memref<128x128xbf16, #tpu.memory_space<vmem>>, %arg3: memref<1x128xf32, #tpu.memory_space<vmem>>, %arg4: memref<128x128xbf16, #tpu.memory_space<vmem>>, %arg5: memref<1x128xf32, #tpu.memory_space<vmem>>, %arg6: memref<144x128xf32, #tpu.memory_space<vmem>>) attributes {dimension_semantics = [#tpu.dimension_semantics<parallel>], iteration_bounds = array<i64: 1>, scalar_prefetch = 0 : i64, scratch_operands = 0 : i64, tpu.core_type = #tpu.core_type<tc>, window_params = [{transform_indices = @transform_0, window_bounds = array<i64: 144, 128>}, {pipeline_mode = #tpu.pipeline_mode<synchronous>, transform_indices = @transform_1, window_bounds = array<i64: 128, 128>}, {pipeline_mode = #tpu.pipeline_mode<synchronous>, transform_indices = @transform_2, window_bounds = array<i64: 1, 128>}, {pipeline_mode = #tpu.pipeline_mode<synchronous>, transform_indices = @transform_3, window_bounds = array<i64: 128, 128>}, {pipeline_mode = #tpu.pipeline_mode<synchronous>, transform_indices = @transform_4, window_bounds = array<i64: 1, 128>}, {transform_indices = @transform_5, window_bounds = array<i64: 144, 128>}]} {
    %c0 = arith.constant 0 : index
    %c0_0 = arith.constant 0 : index
    %0 = vector.load %arg1[%c0, %c0_0] : memref<144x128xbf16, #tpu.memory_space<vmem>>, vector<144x128xbf16>
    %c0_1 = arith.constant 0 : index
    %c0_2 = arith.constant 0 : index
    %1 = vector.load %arg2[%c0_1, %c0_2] : memref<128x128xbf16, #tpu.memory_space<vmem>>, vector<128x128xbf16>
    %cst = arith.constant dense<0.000000e+00> : vector<144x128xf32>
    %2 = tpu.matmul %0, %1, %cst {dimension_numbers = #tpu.dot_dimension_numbers<[1], [0], [0], [1], [0, 0, 1, 1], [], []>} : vector<144x128xbf16>, vector<128x128xbf16>, vector<144x128xf32> -> vector<144x128xf32>
    %c0_3 = arith.constant 0 : index
    %c0_4 = arith.constant 0 : index
    %3 = vector.load %arg3[%c0_3, %c0_4] : memref<1x128xf32, #tpu.memory_space<vmem>>, vector<1x128xf32>
    %4 = vector.broadcast %3 : vector<1x128xf32> to vector<144x128xf32>
    %5 = arith.addf %2, %4 : vector<144x128xf32>
    %cst_5 = arith.constant 0.000000e+00 : f32
    %6 = vector.broadcast %cst_5 : f32 to vector<144x128xf32>
    %7 = arith.cmpf oge, %5, %6 : vector<144x128xf32>
    %cst_6 = arith.constant 1.000000e-01 : f32
    %8 = vector.broadcast %cst_6 : f32 to vector<144x128xf32>
    %9 = arith.mulf %8, %5 : vector<144x128xf32>
    %10 = arith.select %7, %5, %9 : vector<144x128xi1>, vector<144x128xf32>
    %11 = arith.truncf %10 : vector<144x128xf32> to vector<144x128xbf16>
    %c0_7 = arith.constant 0 : index
    %c0_8 = arith.constant 0 : index
    %12 = vector.load %arg4[%c0_7, %c0_8] : memref<128x128xbf16, #tpu.memory_space<vmem>>, vector<128x128xbf16>
    %cst_9 = arith.constant dense<0.000000e+00> : vector<144x128xf32>
    %13 = tpu.matmul %11, %12, %cst_9 {dimension_numbers = #tpu.dot_dimension_numbers<[1], [0], [0], [1], [0, 0, 1, 1], [], []>} : vector<144x128xbf16>, vector<128x128xbf16>, vector<144x128xf32> -> vector<144x128xf32>
    %c0_10 = arith.constant 0 : index
    %c0_11 = arith.constant 0 : index
    %14 = vector.load %arg5[%c0_10, %c0_11] : memref<1x128xf32, #tpu.memory_space<vmem>>, vector<1x128xf32>
    %15 = vector.broadcast %14 : vector<1x128xf32> to vector<144x128xf32>
    %16 = arith.addf %13, %15 : vector<144x128xf32>
    %c0_12 = arith.constant 0 : index
    %c0_13 = arith.constant 0 : index
    %17 = vector.load %arg6[%c0_12, %c0_13] : memref<144x128xf32, #tpu.memory_space<vmem>>, vector<144x128xf32>
    tpu.vector_store %arg6[%c0_12, %c0_13], %16 {strides = array<i32>} : memref<144x128xf32, #tpu.memory_space<vmem>>, vector<144x128xf32>,
    return
  }
  func.func @transform_0(%arg0: i32) -> (i32, i32) {
    %c0_i32 = arith.constant 0 : i32
    %c0_i32_0 = arith.constant 0 : i32
    return %arg0, %c0_i32 : i32, i32
  }
  func.func @transform_1(%arg0: i32) -> (i32, i32) {
    %c0_i32 = arith.constant 0 : i32
    %c0_i32_0 = arith.constant 0 : i32
    %c0_i32_1 = arith.constant 0 : i32
    return %c0_i32, %c0_i32_0 : i32, i32
  }
  func.func @transform_2(%arg0: i32) -> (i32, i32) {
    %c0_i32 = arith.constant 0 : i32
    %c0_i32_0 = arith.constant 0 : i32
    %c0_i32_1 = arith.constant 0 : i32
    return %c0_i32, %c0_i32_0 : i32, i32
  }
  func.func @transform_3(%arg0: i32) -> (i32, i32) {
    %c0_i32 = arith.constant 0 : i32
    %c0_i32_0 = arith.constant 0 : i32
    %c0_i32_1 = arith.constant 0 : i32
    return %c0_i32, %c0_i32_0 : i32, i32
  }
  func.func @transform_4(%arg0: i32) -> (i32, i32) {
    %c0_i32 = arith.constant 0 : i32
    %c0_i32_0 = arith.constant 0 : i32
    %c0_i32_1 = arith.constant 0 : i32
    return %c0_i32, %c0_i32_0 : i32, i32
  }
  func.func @transform_5(%arg0: i32) -> (i32, i32) {
    %c0_i32 = arith.constant 0 : i32
    %c0_i32_0 = arith.constant 0 : i32
    return %arg0, %c0_i32 : i32, i32
  }
}

module attributes {stable_mosaic.version = 11 : i64} {
  func.func @_mm_kernel(%arg0: i32, %arg1: i32, %arg2: memref<256x144xbf16, #tpu.memory_space<vmem>>, %arg3: memref<144x128xbf16, #tpu.memory_space<vmem>>, %arg4: memref<1x128xf32, #tpu.memory_space<vmem>>, %arg5: memref<256x128xf32, #tpu.memory_space<vmem>>) attributes {dimension_semantics = [#tpu.dimension_semantics<parallel>, #tpu.dimension_semantics<parallel>], iteration_bounds = array<i64: 1, 1>, scalar_prefetch = 0 : i64, scratch_operands = 0 : i64, tpu.core_type = #tpu.core_type<tc>, window_params = [{transform_indices = @transform_0, window_bounds = array<i64: 256, 144>}, {transform_indices = @transform_1, window_bounds = array<i64: 144, 128>}, {transform_indices = @transform_2, window_bounds = array<i64: 1, 128>}, {transform_indices = @transform_3, window_bounds = array<i64: 256, 128>}]} {
    %c0 = arith.constant 0 : index
    %c0_0 = arith.constant 0 : index
    %0 = vector.load %arg2[%c0, %c0_0] : memref<256x144xbf16, #tpu.memory_space<vmem>>, vector<256x144xbf16>
    %c0_1 = arith.constant 0 : index
    %c0_2 = arith.constant 0 : index
    %1 = vector.load %arg3[%c0_1, %c0_2] : memref<144x128xbf16, #tpu.memory_space<vmem>>, vector<144x128xbf16>
    %cst = arith.constant dense<0.000000e+00> : vector<256x128xf32>
    %2 = tpu.matmul %0, %1, %cst {dimension_numbers = #tpu.dot_dimension_numbers<[1], [0], [0], [1], [0, 0, 1, 1], [], []>} : vector<256x144xbf16>, vector<144x128xbf16>, vector<256x128xf32> -> vector<256x128xf32>
    %c0_3 = arith.constant 0 : index
    %c0_4 = arith.constant 0 : index
    %3 = vector.load %arg4[%c0_3, %c0_4] : memref<1x128xf32, #tpu.memory_space<vmem>>, vector<1x128xf32>
    %4 = vector.broadcast %3 : vector<1x128xf32> to vector<256x128xf32>
    %5 = arith.addf %2, %4 : vector<256x128xf32>
    %cst_5 = arith.constant 5.000000e-01 : f32
    %6 = vector.broadcast %cst_5 : f32 to vector<256x128xf32>
    %7 = arith.mulf %6, %5 : vector<256x128xf32>
    %cst_6 = arith.constant 0.707106769 : f32
    %8 = vector.broadcast %cst_6 : f32 to vector<256x128xf32>
    %9 = arith.mulf %5, %8 : vector<256x128xf32>
    %10 = math.erf %9 : vector<256x128xf32>
    %cst_7 = arith.constant 1.000000e+00 : f32
    %11 = vector.broadcast %cst_7 : f32 to vector<256x128xf32>
    %12 = arith.addf %11, %10 : vector<256x128xf32>
    %13 = arith.mulf %7, %12 : vector<256x128xf32>
    %c0_8 = arith.constant 0 : index
    %c0_9 = arith.constant 0 : index
    %14 = vector.load %arg5[%c0_8, %c0_9] : memref<256x128xf32, #tpu.memory_space<vmem>>, vector<256x128xf32>
    tpu.vector_store %arg5[%c0_8, %c0_9], %13 {strides = array<i32>} : memref<256x128xf32, #tpu.memory_space<vmem>>, vector<256x128xf32>,
    return
  }
  func.func @transform_0(%arg0: i32, %arg1: i32) -> (i32, i32) {
    %c0_i32 = arith.constant 0 : i32
    %c0_i32_0 = arith.constant 0 : i32
    return %arg0, %c0_i32 : i32, i32
  }
  func.func @transform_1(%arg0: i32, %arg1: i32) -> (i32, i32) {
    %c0_i32 = arith.constant 0 : i32
    %c0_i32_0 = arith.constant 0 : i32
    return %c0_i32, %arg1 : i32, i32
  }
  func.func @transform_2(%arg0: i32, %arg1: i32) -> (i32, i32) {
    %c0_i32 = arith.constant 0 : i32
    %c0_i32_0 = arith.constant 0 : i32
    return %c0_i32, %arg1 : i32, i32
  }
  func.func @transform_3(%arg0: i32, %arg1: i32) -> (i32, i32) {
    %c0_i32 = arith.constant 0 : i32
    return %arg0, %arg1 : i32, i32
  }
}

module attributes {stable_mosaic.version = 11 : i64} {
  func.func @_mm_kernel(%arg0: i32, %arg1: i32, %arg2: memref<64x288xbf16, #tpu.memory_space<vmem>>, %arg3: memref<288x128xbf16, #tpu.memory_space<vmem>>, %arg4: memref<1x128xf32, #tpu.memory_space<vmem>>, %arg5: memref<64x128xf32, #tpu.memory_space<vmem>>) attributes {dimension_semantics = [#tpu.dimension_semantics<parallel>, #tpu.dimension_semantics<parallel>], iteration_bounds = array<i64: 1, 1>, scalar_prefetch = 0 : i64, scratch_operands = 0 : i64, tpu.core_type = #tpu.core_type<tc>, window_params = [{transform_indices = @transform_0, window_bounds = array<i64: 64, 288>}, {transform_indices = @transform_1, window_bounds = array<i64: 288, 128>}, {transform_indices = @transform_2, window_bounds = array<i64: 1, 128>}, {transform_indices = @transform_3, window_bounds = array<i64: 64, 128>}]} {
    %c0 = arith.constant 0 : index
    %c0_0 = arith.constant 0 : index
    %0 = vector.load %arg2[%c0, %c0_0] : memref<64x288xbf16, #tpu.memory_space<vmem>>, vector<64x288xbf16>
    %c0_1 = arith.constant 0 : index
    %c0_2 = arith.constant 0 : index
    %1 = vector.load %arg3[%c0_1, %c0_2] : memref<288x128xbf16, #tpu.memory_space<vmem>>, vector<288x128xbf16>
    %cst = arith.constant dense<0.000000e+00> : vector<64x128xf32>
    %2 = tpu.matmul %0, %1, %cst {dimension_numbers = #tpu.dot_dimension_numbers<[1], [0], [0], [1], [0, 0, 1, 1], [], []>} : vector<64x288xbf16>, vector<288x128xbf16>, vector<64x128xf32> -> vector<64x128xf32>
    %c0_3 = arith.constant 0 : index
    %c0_4 = arith.constant 0 : index
    %3 = vector.load %arg4[%c0_3, %c0_4] : memref<1x128xf32, #tpu.memory_space<vmem>>, vector<1x128xf32>
    %4 = vector.broadcast %3 : vector<1x128xf32> to vector<64x128xf32>
    %5 = arith.addf %2, %4 : vector<64x128xf32>
    %c0_5 = arith.constant 0 : index
    %c0_6 = arith.constant 0 : index
    %6 = vector.load %arg5[%c0_5, %c0_6] : memref<64x128xf32, #tpu.memory_space<vmem>>, vector<64x128xf32>
    tpu.vector_store %arg5[%c0_5, %c0_6], %5 {strides = array<i32>} : memref<64x128xf32, #tpu.memory_space<vmem>>, vector<64x128xf32>,
    return
  }
  func.func @transform_0(%arg0: i32, %arg1: i32) -> (i32, i32) {
    %c0_i32 = arith.constant 0 : i32
    %c0_i32_0 = arith.constant 0 : i32
    return %arg0, %c0_i32 : i32, i32
  }
  func.func @transform_1(%arg0: i32, %arg1: i32) -> (i32, i32) {
    %c0_i32 = arith.constant 0 : i32
    %c0_i32_0 = arith.constant 0 : i32
    return %c0_i32, %arg1 : i32, i32
  }
  func.func @transform_2(%arg0: i32, %arg1: i32) -> (i32, i32) {
    %c0_i32 = arith.constant 0 : i32
    %c0_i32_0 = arith.constant 0 : i32
    return %c0_i32, %arg1 : i32, i32
  }
  func.func @transform_3(%arg0: i32, %arg1: i32) -> (i32, i32) {
    %c0_i32 = arith.constant 0 : i32
    return %arg0, %arg1 : i32, i32
  }
}

module attributes {stable_mosaic.version = 11 : i64} {
  func.func @_in_gelu_kernel(%arg0: i32, %arg1: memref<64x128xf32, #tpu.memory_space<vmem>>, %arg2: memref<64x128xf32, #tpu.memory_space<vmem>>) attributes {dimension_semantics = [#tpu.dimension_semantics<arbitrary>], iteration_bounds = array<i64: 1>, scalar_prefetch = 0 : i64, scratch_operands = 0 : i64, tpu.core_type = #tpu.core_type<tc>, window_params = [{transform_indices = @transform_0, window_bounds = array<i64: 64, 128>}, {transform_indices = @transform_1, window_bounds = array<i64: 64, 128>}]} {
    %c0 = arith.constant 0 : index
    %c0_0 = arith.constant 0 : index
    %0 = vector.load %arg1[%c0, %c0_0] : memref<64x128xf32, #tpu.memory_space<vmem>>, vector<64x128xf32>
    %cst = arith.constant dense<0.000000e+00> : vector<64xf32>
    %1 = vector.multi_reduction <add>, %0, %cst [1] : vector<64x128xf32> to vector<64xf32>
    %2 = vector.shape_cast %1 : vector<64xf32> to vector<64x1xf32>
    %cst_1 = arith.constant 1.562500e-02 : f32
    %3 = vector.broadcast %cst_1 : f32 to vector<64x1xf32>
    %4 = arith.mulf %2, %3 : vector<64x1xf32>
    %5 = arith.mulf %0, %0 : vector<64x128xf32>
    %cst_2 = arith.constant dense<0.000000e+00> : vector<64xf32>
    %6 = vector.multi_reduction <add>, %5, %cst_2 [1] : vector<64x128xf32> to vector<64xf32>
    %7 = vector.shape_cast %6 : vector<64xf32> to vector<64x1xf32>
    %cst_3 = arith.constant 1.562500e-02 : f32
    %8 = vector.broadcast %cst_3 : f32 to vector<64x1xf32>
    %9 = arith.mulf %7, %8 : vector<64x1xf32>
    %10 = arith.mulf %4, %4 : vector<64x1xf32>
    %11 = arith.subf %9, %10 : vector<64x1xf32>
    %12 = vector.broadcast %4 : vector<64x1xf32> to vector<64x128xf32>
    %13 = arith.subf %0, %12 : vector<64x128xf32>
    %cst_4 = arith.constant 9.99999974E-6 : f32
    %14 = vector.broadcast %cst_4 : f32 to vector<64x1xf32>
    %15 = arith.addf %11, %14 : vector<64x1xf32>
    %16 = math.rsqrt %15 : vector<64x1xf32>
    %17 = vector.broadcast %16 : vector<64x1xf32> to vector<64x128xf32>
    %18 = arith.mulf %13, %17 : vector<64x128xf32>
    %cst_5 = arith.constant 5.000000e-01 : f32
    %19 = vector.broadcast %cst_5 : f32 to vector<64x128xf32>
    %20 = arith.mulf %19, %18 : vector<64x128xf32>
    %cst_6 = arith.constant 0.707106769 : f32
    %21 = vector.broadcast %cst_6 : f32 to vector<64x128xf32>
    %22 = arith.mulf %18, %21 : vector<64x128xf32>
    %23 = math.erf %22 : vector<64x128xf32>
    %cst_7 = arith.constant 1.000000e+00 : f32
    %24 = vector.broadcast %cst_7 : f32 to vector<64x128xf32>
    %25 = arith.addf %24, %23 : vector<64x128xf32>
    %26 = arith.mulf %20, %25 : vector<64x128xf32>
    %c0_8 = arith.constant 0 : index
    %c0_9 = arith.constant 0 : index
    %27 = vector.load %arg2[%c0_8, %c0_9] : memref<64x128xf32, #tpu.memory_space<vmem>>, vector<64x128xf32>
    tpu.vector_store %arg2[%c0_8, %c0_9], %26 {strides = array<i32>} : memref<64x128xf32, #tpu.memory_space<vmem>>, vector<64x128xf32>,
    return
  }
  func.func @transform_0(%arg0: i32) -> (i32, i32) {
    %c0_i32 = arith.constant 0 : i32
    %c0_i32_0 = arith.constant 0 : i32
    return %arg0, %c0_i32 : i32, i32
  }
  func.func @transform_1(%arg0: i32) -> (i32, i32) {
    %c0_i32 = arith.constant 0 : i32
    %c0_i32_0 = arith.constant 0 : i32
    return %arg0, %c0_i32 : i32, i32
  }
}

module attributes {stable_mosaic.version = 11 : i64} {
  func.func @_mm_kernel(%arg0: i32, %arg1: i32, %arg2: memref<64x576xbf16, #tpu.memory_space<vmem>>, %arg3: memref<576x128xbf16, #tpu.memory_space<vmem>>, %arg4: memref<1x128xf32, #tpu.memory_space<vmem>>, %arg5: memref<64x128xf32, #tpu.memory_space<vmem>>) attributes {dimension_semantics = [#tpu.dimension_semantics<parallel>, #tpu.dimension_semantics<parallel>], iteration_bounds = array<i64: 1, 1>, scalar_prefetch = 0 : i64, scratch_operands = 0 : i64, tpu.core_type = #tpu.core_type<tc>, window_params = [{transform_indices = @transform_0, window_bounds = array<i64: 64, 576>}, {transform_indices = @transform_1, window_bounds = array<i64: 576, 128>}, {transform_indices = @transform_2, window_bounds = array<i64: 1, 128>}, {transform_indices = @transform_3, window_bounds = array<i64: 64, 128>}]} {
    %c0 = arith.constant 0 : index
    %c0_0 = arith.constant 0 : index
    %0 = vector.load %arg2[%c0, %c0_0] : memref<64x576xbf16, #tpu.memory_space<vmem>>, vector<64x576xbf16>
    %c0_1 = arith.constant 0 : index
    %c0_2 = arith.constant 0 : index
    %1 = vector.load %arg3[%c0_1, %c0_2] : memref<576x128xbf16, #tpu.memory_space<vmem>>, vector<576x128xbf16>
    %cst = arith.constant dense<0.000000e+00> : vector<64x128xf32>
    %2 = tpu.matmul %0, %1, %cst {dimension_numbers = #tpu.dot_dimension_numbers<[1], [0], [0], [1], [0, 0, 1, 1], [], []>} : vector<64x576xbf16>, vector<576x128xbf16>, vector<64x128xf32> -> vector<64x128xf32>
    %c0_3 = arith.constant 0 : index
    %c0_4 = arith.constant 0 : index
    %3 = vector.load %arg4[%c0_3, %c0_4] : memref<1x128xf32, #tpu.memory_space<vmem>>, vector<1x128xf32>
    %4 = vector.broadcast %3 : vector<1x128xf32> to vector<64x128xf32>
    %5 = arith.addf %2, %4 : vector<64x128xf32>
    %c0_5 = arith.constant 0 : index
    %c0_6 = arith.constant 0 : index
    %6 = vector.load %arg5[%c0_5, %c0_6] : memref<64x128xf32, #tpu.memory_space<vmem>>, vector<64x128xf32>
    tpu.vector_store %arg5[%c0_5, %c0_6], %5 {strides = array<i32>} : memref<64x128xf32, #tpu.memory_space<vmem>>, vector<64x128xf32>,
    return
  }
  func.func @transform_0(%arg0: i32, %arg1: i32) -> (i32, i32) {
    %c0_i32 = arith.constant 0 : i32
    %c0_i32_0 = arith.constant 0 : i32
    return %arg0, %c0_i32 : i32, i32
  }
  func.func @transform_1(%arg0: i32, %arg1: i32) -> (i32, i32) {
    %c0_i32 = arith.constant 0 : i32
    %c0_i32_0 = arith.constant 0 : i32
    return %c0_i32, %arg1 : i32, i32
  }
  func.func @transform_2(%arg0: i32, %arg1: i32) -> (i32, i32) {
    %c0_i32 = arith.constant 0 : i32
    %c0_i32_0 = arith.constant 0 : i32
    return %c0_i32, %arg1 : i32, i32
  }
  func.func @transform_3(%arg0: i32, %arg1: i32) -> (i32, i32) {
    %c0_i32 = arith.constant 0 : i32
    return %arg0, %arg1 : i32, i32
  }
}

module attributes {stable_mosaic.version = 11 : i64} {
  func.func @_fused_1x1_pair_kernel(%arg0: i32, %arg1: memref<48x128xbf16, #tpu.memory_space<vmem>>, %arg2: memref<128x128xbf16, #tpu.memory_space<vmem>>, %arg3: memref<1x128xf32, #tpu.memory_space<vmem>>, %arg4: memref<128x128xbf16, #tpu.memory_space<vmem>>, %arg5: memref<1x128xf32, #tpu.memory_space<vmem>>, %arg6: memref<48x128xf32, #tpu.memory_space<vmem>>) attributes {dimension_semantics = [#tpu.dimension_semantics<parallel>], iteration_bounds = array<i64: 1>, scalar_prefetch = 0 : i64, scratch_operands = 0 : i64, tpu.core_type = #tpu.core_type<tc>, window_params = [{transform_indices = @transform_0, window_bounds = array<i64: 48, 128>}, {pipeline_mode = #tpu.pipeline_mode<synchronous>, transform_indices = @transform_1, window_bounds = array<i64: 128, 128>}, {pipeline_mode = #tpu.pipeline_mode<synchronous>, transform_indices = @transform_2, window_bounds = array<i64: 1, 128>}, {pipeline_mode = #tpu.pipeline_mode<synchronous>, transform_indices = @transform_3, window_bounds = array<i64: 128, 128>}, {pipeline_mode = #tpu.pipeline_mode<synchronous>, transform_indices = @transform_4, window_bounds = array<i64: 1, 128>}, {transform_indices = @transform_5, window_bounds = array<i64: 48, 128>}]} {
    %c0 = arith.constant 0 : index
    %c0_0 = arith.constant 0 : index
    %0 = vector.load %arg1[%c0, %c0_0] : memref<48x128xbf16, #tpu.memory_space<vmem>>, vector<48x128xbf16>
    %c0_1 = arith.constant 0 : index
    %c0_2 = arith.constant 0 : index
    %1 = vector.load %arg2[%c0_1, %c0_2] : memref<128x128xbf16, #tpu.memory_space<vmem>>, vector<128x128xbf16>
    %cst = arith.constant dense<0.000000e+00> : vector<48x128xf32>
    %2 = tpu.matmul %0, %1, %cst {dimension_numbers = #tpu.dot_dimension_numbers<[1], [0], [0], [1], [0, 0, 1, 1], [], []>} : vector<48x128xbf16>, vector<128x128xbf16>, vector<48x128xf32> -> vector<48x128xf32>
    %c0_3 = arith.constant 0 : index
    %c0_4 = arith.constant 0 : index
    %3 = vector.load %arg3[%c0_3, %c0_4] : memref<1x128xf32, #tpu.memory_space<vmem>>, vector<1x128xf32>
    %4 = vector.broadcast %3 : vector<1x128xf32> to vector<48x128xf32>
    %5 = arith.addf %2, %4 : vector<48x128xf32>
    %cst_5 = arith.constant 0.000000e+00 : f32
    %6 = vector.broadcast %cst_5 : f32 to vector<48x128xf32>
    %7 = arith.cmpf oge, %5, %6 : vector<48x128xf32>
    %cst_6 = arith.constant 1.000000e-01 : f32
    %8 = vector.broadcast %cst_6 : f32 to vector<48x128xf32>
    %9 = arith.mulf %8, %5 : vector<48x128xf32>
    %10 = arith.select %7, %5, %9 : vector<48x128xi1>, vector<48x128xf32>
    %11 = arith.truncf %10 : vector<48x128xf32> to vector<48x128xbf16>
    %c0_7 = arith.constant 0 : index
    %c0_8 = arith.constant 0 : index
    %12 = vector.load %arg4[%c0_7, %c0_8] : memref<128x128xbf16, #tpu.memory_space<vmem>>, vector<128x128xbf16>
    %cst_9 = arith.constant dense<0.000000e+00> : vector<48x128xf32>
    %13 = tpu.matmul %11, %12, %cst_9 {dimension_numbers = #tpu.dot_dimension_numbers<[1], [0], [0], [1], [0, 0, 1, 1], [], []>} : vector<48x128xbf16>, vector<128x128xbf16>, vector<48x128xf32> -> vector<48x128xf32>
    %c0_10 = arith.constant 0 : index
    %c0_11 = arith.constant 0 : index
    %14 = vector.load %arg5[%c0_10, %c0_11] : memref<1x128xf32, #tpu.memory_space<vmem>>, vector<1x128xf32>
    %15 = vector.broadcast %14 : vector<1x128xf32> to vector<48x128xf32>
    %16 = arith.addf %13, %15 : vector<48x128xf32>
    %c0_12 = arith.constant 0 : index
    %c0_13 = arith.constant 0 : index
    %17 = vector.load %arg6[%c0_12, %c0_13] : memref<48x128xf32, #tpu.memory_space<vmem>>, vector<48x128xf32>
    tpu.vector_store %arg6[%c0_12, %c0_13], %16 {strides = array<i32>} : memref<48x128xf32, #tpu.memory_space<vmem>>, vector<48x128xf32>,
    return
  }
  func.func @transform_0(%arg0: i32) -> (i32, i32) {
    %c0_i32 = arith.constant 0 : i32
    %c0_i32_0 = arith.constant 0 : i32
    return %arg0, %c0_i32 : i32, i32
  }
  func.func @transform_1(%arg0: i32) -> (i32, i32) {
    %c0_i32 = arith.constant 0 : i32
    %c0_i32_0 = arith.constant 0 : i32
    %c0_i32_1 = arith.constant 0 : i32
    return %c0_i32, %c0_i32_0 : i32, i32
  }
  func.func @transform_2(%arg0: i32) -> (i32, i32) {
    %c0_i32 = arith.constant 0 : i32
    %c0_i32_0 = arith.constant 0 : i32
    %c0_i32_1 = arith.constant 0 : i32
    return %c0_i32, %c0_i32_0 : i32, i32
  }
  func.func @transform_3(%arg0: i32) -> (i32, i32) {
    %c0_i32 = arith.constant 0 : i32
    %c0_i32_0 = arith.constant 0 : i32
    %c0_i32_1 = arith.constant 0 : i32
    return %c0_i32, %c0_i32_0 : i32, i32
  }
  func.func @transform_4(%arg0: i32) -> (i32, i32) {
    %c0_i32 = arith.constant 0 : i32
    %c0_i32_0 = arith.constant 0 : i32
    %c0_i32_1 = arith.constant 0 : i32
    return %c0_i32, %c0_i32_0 : i32, i32
  }
  func.func @transform_5(%arg0: i32) -> (i32, i32) {
    %c0_i32 = arith.constant 0 : i32
    %c0_i32_0 = arith.constant 0 : i32
    return %arg0, %c0_i32 : i32, i32
  }
}

module attributes {stable_mosaic.version = 11 : i64} {
  func.func @_mm_kernel(%arg0: i32, %arg1: i32, %arg2: memref<64x288xbf16, #tpu.memory_space<vmem>>, %arg3: memref<288x128xbf16, #tpu.memory_space<vmem>>, %arg4: memref<1x128xf32, #tpu.memory_space<vmem>>, %arg5: memref<64x128xf32, #tpu.memory_space<vmem>>) attributes {dimension_semantics = [#tpu.dimension_semantics<parallel>, #tpu.dimension_semantics<parallel>], iteration_bounds = array<i64: 1, 1>, scalar_prefetch = 0 : i64, scratch_operands = 0 : i64, tpu.core_type = #tpu.core_type<tc>, window_params = [{transform_indices = @transform_0, window_bounds = array<i64: 64, 288>}, {transform_indices = @transform_1, window_bounds = array<i64: 288, 128>}, {transform_indices = @transform_2, window_bounds = array<i64: 1, 128>}, {transform_indices = @transform_3, window_bounds = array<i64: 64, 128>}]} {
    %c0 = arith.constant 0 : index
    %c0_0 = arith.constant 0 : index
    %0 = vector.load %arg2[%c0, %c0_0] : memref<64x288xbf16, #tpu.memory_space<vmem>>, vector<64x288xbf16>
    %c0_1 = arith.constant 0 : index
    %c0_2 = arith.constant 0 : index
    %1 = vector.load %arg3[%c0_1, %c0_2] : memref<288x128xbf16, #tpu.memory_space<vmem>>, vector<288x128xbf16>
    %cst = arith.constant dense<0.000000e+00> : vector<64x128xf32>
    %2 = tpu.matmul %0, %1, %cst {dimension_numbers = #tpu.dot_dimension_numbers<[1], [0], [0], [1], [0, 0, 1, 1], [], []>} : vector<64x288xbf16>, vector<288x128xbf16>, vector<64x128xf32> -> vector<64x128xf32>
    %c0_3 = arith.constant 0 : index
    %c0_4 = arith.constant 0 : index
    %3 = vector.load %arg4[%c0_3, %c0_4] : memref<1x128xf32, #tpu.memory_space<vmem>>, vector<1x128xf32>
    %4 = vector.broadcast %3 : vector<1x128xf32> to vector<64x128xf32>
    %5 = arith.addf %2, %4 : vector<64x128xf32>
    %cst_5 = arith.constant 5.000000e-01 : f32
    %6 = vector.broadcast %cst_5 : f32 to vector<64x128xf32>
    %7 = arith.mulf %6, %5 : vector<64x128xf32>
    %cst_6 = arith.constant 0.707106769 : f32
    %8 = vector.broadcast %cst_6 : f32 to vector<64x128xf32>
    %9 = arith.mulf %5, %8 : vector<64x128xf32>
    %10 = math.erf %9 : vector<64x128xf32>
    %cst_7 = arith.constant 1.000000e+00 : f32
    %11 = vector.broadcast %cst_7 : f32 to vector<64x128xf32>
    %12 = arith.addf %11, %10 : vector<64x128xf32>
    %13 = arith.mulf %7, %12 : vector<64x128xf32>
    %c0_8 = arith.constant 0 : index
    %c0_9 = arith.constant 0 : index
    %14 = vector.load %arg5[%c0_8, %c0_9] : memref<64x128xf32, #tpu.memory_space<vmem>>, vector<64x128xf32>
    tpu.vector_store %arg5[%c0_8, %c0_9], %13 {strides = array<i32>} : memref<64x128xf32, #tpu.memory_space<vmem>>, vector<64x128xf32>,
    return
  }
  func.func @transform_0(%arg0: i32, %arg1: i32) -> (i32, i32) {
    %c0_i32 = arith.constant 0 : i32
    %c0_i32_0 = arith.constant 0 : i32
    return %arg0, %c0_i32 : i32, i32
  }
  func.func @transform_1(%arg0: i32, %arg1: i32) -> (i32, i32) {
    %c0_i32 = arith.constant 0 : i32
    %c0_i32_0 = arith.constant 0 : i32
    return %c0_i32, %arg1 : i32, i32
  }
  func.func @transform_2(%arg0: i32, %arg1: i32) -> (i32, i32) {
    %c0_i32 = arith.constant 0 : i32
    %c0_i32_0 = arith.constant 0 : i32
    return %c0_i32, %arg1 : i32, i32
  }
  func.func @transform_3(%arg0: i32, %arg1: i32) -> (i32, i32) {
    %c0_i32 = arith.constant 0 : i32
    return %arg0, %arg1 : i32, i32
  }
}

module attributes {stable_mosaic.version = 11 : i64} {
  func.func @_mm_kernel(%arg0: i32, %arg1: i32, %arg2: memref<16x576xbf16, #tpu.memory_space<vmem>>, %arg3: memref<576x128xbf16, #tpu.memory_space<vmem>>, %arg4: memref<1x128xf32, #tpu.memory_space<vmem>>, %arg5: memref<16x128xf32, #tpu.memory_space<vmem>>) attributes {dimension_semantics = [#tpu.dimension_semantics<parallel>, #tpu.dimension_semantics<parallel>], iteration_bounds = array<i64: 1, 1>, scalar_prefetch = 0 : i64, scratch_operands = 0 : i64, tpu.core_type = #tpu.core_type<tc>, window_params = [{transform_indices = @transform_0, window_bounds = array<i64: 16, 576>}, {transform_indices = @transform_1, window_bounds = array<i64: 576, 128>}, {transform_indices = @transform_2, window_bounds = array<i64: 1, 128>}, {transform_indices = @transform_3, window_bounds = array<i64: 16, 128>}]} {
    %c0 = arith.constant 0 : index
    %c0_0 = arith.constant 0 : index
    %0 = vector.load %arg2[%c0, %c0_0] : memref<16x576xbf16, #tpu.memory_space<vmem>>, vector<16x576xbf16>
    %c0_1 = arith.constant 0 : index
    %c0_2 = arith.constant 0 : index
    %1 = vector.load %arg3[%c0_1, %c0_2] : memref<576x128xbf16, #tpu.memory_space<vmem>>, vector<576x128xbf16>
    %cst = arith.constant dense<0.000000e+00> : vector<16x128xf32>
    %2 = tpu.matmul %0, %1, %cst {dimension_numbers = #tpu.dot_dimension_numbers<[1], [0], [0], [1], [0, 0, 1, 1], [], []>} : vector<16x576xbf16>, vector<576x128xbf16>, vector<16x128xf32> -> vector<16x128xf32>
    %c0_3 = arith.constant 0 : index
    %c0_4 = arith.constant 0 : index
    %3 = vector.load %arg4[%c0_3, %c0_4] : memref<1x128xf32, #tpu.memory_space<vmem>>, vector<1x128xf32>
    %4 = vector.broadcast %3 : vector<1x128xf32> to vector<16x128xf32>
    %5 = arith.addf %2, %4 : vector<16x128xf32>
    %c0_5 = arith.constant 0 : index
    %c0_6 = arith.constant 0 : index
    %6 = vector.load %arg5[%c0_5, %c0_6] : memref<16x128xf32, #tpu.memory_space<vmem>>, vector<16x128xf32>
    tpu.vector_store %arg5[%c0_5, %c0_6], %5 {strides = array<i32>} : memref<16x128xf32, #tpu.memory_space<vmem>>, vector<16x128xf32>,
    return
  }
  func.func @transform_0(%arg0: i32, %arg1: i32) -> (i32, i32) {
    %c0_i32 = arith.constant 0 : i32
    %c0_i32_0 = arith.constant 0 : i32
    return %arg0, %c0_i32 : i32, i32
  }
  func.func @transform_1(%arg0: i32, %arg1: i32) -> (i32, i32) {
    %c0_i32 = arith.constant 0 : i32
    %c0_i32_0 = arith.constant 0 : i32
    return %c0_i32, %arg1 : i32, i32
  }
  func.func @transform_2(%arg0: i32, %arg1: i32) -> (i32, i32) {
    %c0_i32 = arith.constant 0 : i32
    %c0_i32_0 = arith.constant 0 : i32
    return %c0_i32, %arg1 : i32, i32
  }
  func.func @transform_3(%arg0: i32, %arg1: i32) -> (i32, i32) {
    %c0_i32 = arith.constant 0 : i32
    return %arg0, %arg1 : i32, i32
  }
}

module attributes {stable_mosaic.version = 11 : i64} {
  func.func @_in_gelu_kernel(%arg0: i32, %arg1: memref<128x128xf32, #tpu.memory_space<vmem>>, %arg2: memref<128x128xf32, #tpu.memory_space<vmem>>) attributes {dimension_semantics = [#tpu.dimension_semantics<arbitrary>], iteration_bounds = array<i64: 1>, scalar_prefetch = 0 : i64, scratch_operands = 0 : i64, tpu.core_type = #tpu.core_type<tc>, window_params = [{transform_indices = @transform_0, window_bounds = array<i64: 128, 128>}, {transform_indices = @transform_1, window_bounds = array<i64: 128, 128>}]} {
    %c0 = arith.constant 0 : index
    %c0_0 = arith.constant 0 : index
    %0 = vector.load %arg1[%c0, %c0_0] : memref<128x128xf32, #tpu.memory_space<vmem>>, vector<128x128xf32>
    %cst = arith.constant dense<0.000000e+00> : vector<128xf32>
    %1 = vector.multi_reduction <add>, %0, %cst [1] : vector<128x128xf32> to vector<128xf32>
    %2 = vector.shape_cast %1 : vector<128xf32> to vector<128x1xf32>
    %cst_1 = arith.constant 6.250000e-02 : f32
    %3 = vector.broadcast %cst_1 : f32 to vector<128x1xf32>
    %4 = arith.mulf %2, %3 : vector<128x1xf32>
    %5 = arith.mulf %0, %0 : vector<128x128xf32>
    %cst_2 = arith.constant dense<0.000000e+00> : vector<128xf32>
    %6 = vector.multi_reduction <add>, %5, %cst_2 [1] : vector<128x128xf32> to vector<128xf32>
    %7 = vector.shape_cast %6 : vector<128xf32> to vector<128x1xf32>
    %cst_3 = arith.constant 6.250000e-02 : f32
    %8 = vector.broadcast %cst_3 : f32 to vector<128x1xf32>
    %9 = arith.mulf %7, %8 : vector<128x1xf32>
    %10 = arith.mulf %4, %4 : vector<128x1xf32>
    %11 = arith.subf %9, %10 : vector<128x1xf32>
    %12 = vector.broadcast %4 : vector<128x1xf32> to vector<128x128xf32>
    %13 = arith.subf %0, %12 : vector<128x128xf32>
    %cst_4 = arith.constant 9.99999974E-6 : f32
    %14 = vector.broadcast %cst_4 : f32 to vector<128x1xf32>
    %15 = arith.addf %11, %14 : vector<128x1xf32>
    %16 = math.rsqrt %15 : vector<128x1xf32>
    %17 = vector.broadcast %16 : vector<128x1xf32> to vector<128x128xf32>
    %18 = arith.mulf %13, %17 : vector<128x128xf32>
    %cst_5 = arith.constant 5.000000e-01 : f32
    %19 = vector.broadcast %cst_5 : f32 to vector<128x128xf32>
    %20 = arith.mulf %19, %18 : vector<128x128xf32>
    %cst_6 = arith.constant 0.707106769 : f32
    %21 = vector.broadcast %cst_6 : f32 to vector<128x128xf32>
    %22 = arith.mulf %18, %21 : vector<128x128xf32>
    %23 = math.erf %22 : vector<128x128xf32>
    %cst_7 = arith.constant 1.000000e+00 : f32
    %24 = vector.broadcast %cst_7 : f32 to vector<128x128xf32>
    %25 = arith.addf %24, %23 : vector<128x128xf32>
    %26 = arith.mulf %20, %25 : vector<128x128xf32>
    %c0_8 = arith.constant 0 : index
    %c0_9 = arith.constant 0 : index
    %27 = vector.load %arg2[%c0_8, %c0_9] : memref<128x128xf32, #tpu.memory_space<vmem>>, vector<128x128xf32>
    tpu.vector_store %arg2[%c0_8, %c0_9], %26 {strides = array<i32>} : memref<128x128xf32, #tpu.memory_space<vmem>>, vector<128x128xf32>,
    return
  }
  func.func @transform_0(%arg0: i32) -> (i32, i32) {
    %c0_i32 = arith.constant 0 : i32
    %c0_i32_0 = arith.constant 0 : i32
    return %arg0, %c0_i32 : i32, i32
  }
  func.func @transform_1(%arg0: i32) -> (i32, i32) {
    %c0_i32 = arith.constant 0 : i32
    %c0_i32_0 = arith.constant 0 : i32
    return %arg0, %c0_i32 : i32, i32
  }
}

module attributes {stable_mosaic.version = 11 : i64} {
  func.func @_mm_kernel(%arg0: i32, %arg1: i32, %arg2: memref<16x1152xbf16, #tpu.memory_space<vmem>>, %arg3: memref<1152x128xbf16, #tpu.memory_space<vmem>>, %arg4: memref<1x128xf32, #tpu.memory_space<vmem>>, %arg5: memref<16x128xf32, #tpu.memory_space<vmem>>) attributes {dimension_semantics = [#tpu.dimension_semantics<parallel>, #tpu.dimension_semantics<parallel>], iteration_bounds = array<i64: 1, 1>, scalar_prefetch = 0 : i64, scratch_operands = 0 : i64, tpu.core_type = #tpu.core_type<tc>, window_params = [{transform_indices = @transform_0, window_bounds = array<i64: 16, 1152>}, {transform_indices = @transform_1, window_bounds = array<i64: 1152, 128>}, {transform_indices = @transform_2, window_bounds = array<i64: 1, 128>}, {transform_indices = @transform_3, window_bounds = array<i64: 16, 128>}]} {
    %c0 = arith.constant 0 : index
    %c0_0 = arith.constant 0 : index
    %0 = vector.load %arg2[%c0, %c0_0] : memref<16x1152xbf16, #tpu.memory_space<vmem>>, vector<16x1152xbf16>
    %c0_1 = arith.constant 0 : index
    %c0_2 = arith.constant 0 : index
    %1 = vector.load %arg3[%c0_1, %c0_2] : memref<1152x128xbf16, #tpu.memory_space<vmem>>, vector<1152x128xbf16>
    %cst = arith.constant dense<0.000000e+00> : vector<16x128xf32>
    %2 = tpu.matmul %0, %1, %cst {dimension_numbers = #tpu.dot_dimension_numbers<[1], [0], [0], [1], [0, 0, 1, 1], [], []>} : vector<16x1152xbf16>, vector<1152x128xbf16>, vector<16x128xf32> -> vector<16x128xf32>
    %c0_3 = arith.constant 0 : index
    %c0_4 = arith.constant 0 : index
    %3 = vector.load %arg4[%c0_3, %c0_4] : memref<1x128xf32, #tpu.memory_space<vmem>>, vector<1x128xf32>
    %4 = vector.broadcast %3 : vector<1x128xf32> to vector<16x128xf32>
    %5 = arith.addf %2, %4 : vector<16x128xf32>
    %c0_5 = arith.constant 0 : index
    %c0_6 = arith.constant 0 : index
    %6 = vector.load %arg5[%c0_5, %c0_6] : memref<16x128xf32, #tpu.memory_space<vmem>>, vector<16x128xf32>
    tpu.vector_store %arg5[%c0_5, %c0_6], %5 {strides = array<i32>} : memref<16x128xf32, #tpu.memory_space<vmem>>, vector<16x128xf32>,
    return
  }
  func.func @transform_0(%arg0: i32, %arg1: i32) -> (i32, i32) {
    %c0_i32 = arith.constant 0 : i32
    %c0_i32_0 = arith.constant 0 : i32
    return %arg0, %c0_i32 : i32, i32
  }
  func.func @transform_1(%arg0: i32, %arg1: i32) -> (i32, i32) {
    %c0_i32 = arith.constant 0 : i32
    %c0_i32_0 = arith.constant 0 : i32
    return %c0_i32, %arg1 : i32, i32
  }
  func.func @transform_2(%arg0: i32, %arg1: i32) -> (i32, i32) {
    %c0_i32 = arith.constant 0 : i32
    %c0_i32_0 = arith.constant 0 : i32
    return %c0_i32, %arg1 : i32, i32
  }
  func.func @transform_3(%arg0: i32, %arg1: i32) -> (i32, i32) {
    %c0_i32 = arith.constant 0 : i32
    return %arg0, %arg1 : i32, i32
  }
}

module attributes {stable_mosaic.version = 11 : i64} {
  func.func @_fused_1x1_pair_kernel(%arg0: i32, %arg1: memref<16x128xbf16, #tpu.memory_space<vmem>>, %arg2: memref<128x128xbf16, #tpu.memory_space<vmem>>, %arg3: memref<1x128xf32, #tpu.memory_space<vmem>>, %arg4: memref<128x128xbf16, #tpu.memory_space<vmem>>, %arg5: memref<1x128xf32, #tpu.memory_space<vmem>>, %arg6: memref<16x128xf32, #tpu.memory_space<vmem>>) attributes {dimension_semantics = [#tpu.dimension_semantics<parallel>], iteration_bounds = array<i64: 1>, scalar_prefetch = 0 : i64, scratch_operands = 0 : i64, tpu.core_type = #tpu.core_type<tc>, window_params = [{transform_indices = @transform_0, window_bounds = array<i64: 16, 128>}, {pipeline_mode = #tpu.pipeline_mode<synchronous>, transform_indices = @transform_1, window_bounds = array<i64: 128, 128>}, {pipeline_mode = #tpu.pipeline_mode<synchronous>, transform_indices = @transform_2, window_bounds = array<i64: 1, 128>}, {pipeline_mode = #tpu.pipeline_mode<synchronous>, transform_indices = @transform_3, window_bounds = array<i64: 128, 128>}, {pipeline_mode = #tpu.pipeline_mode<synchronous>, transform_indices = @transform_4, window_bounds = array<i64: 1, 128>}, {transform_indices = @transform_5, window_bounds = array<i64: 16, 128>}]} {
    %c0 = arith.constant 0 : index
    %c0_0 = arith.constant 0 : index
    %0 = vector.load %arg1[%c0, %c0_0] : memref<16x128xbf16, #tpu.memory_space<vmem>>, vector<16x128xbf16>
    %c0_1 = arith.constant 0 : index
    %c0_2 = arith.constant 0 : index
    %1 = vector.load %arg2[%c0_1, %c0_2] : memref<128x128xbf16, #tpu.memory_space<vmem>>, vector<128x128xbf16>
    %cst = arith.constant dense<0.000000e+00> : vector<16x128xf32>
    %2 = tpu.matmul %0, %1, %cst {dimension_numbers = #tpu.dot_dimension_numbers<[1], [0], [0], [1], [0, 0, 1, 1], [], []>} : vector<16x128xbf16>, vector<128x128xbf16>, vector<16x128xf32> -> vector<16x128xf32>
    %c0_3 = arith.constant 0 : index
    %c0_4 = arith.constant 0 : index
    %3 = vector.load %arg3[%c0_3, %c0_4] : memref<1x128xf32, #tpu.memory_space<vmem>>, vector<1x128xf32>
    %4 = vector.broadcast %3 : vector<1x128xf32> to vector<16x128xf32>
    %5 = arith.addf %2, %4 : vector<16x128xf32>
    %cst_5 = arith.constant 0.000000e+00 : f32
    %6 = vector.broadcast %cst_5 : f32 to vector<16x128xf32>
    %7 = arith.cmpf oge, %5, %6 : vector<16x128xf32>
    %cst_6 = arith.constant 1.000000e-01 : f32
    %8 = vector.broadcast %cst_6 : f32 to vector<16x128xf32>
    %9 = arith.mulf %8, %5 : vector<16x128xf32>
    %10 = arith.select %7, %5, %9 : vector<16x128xi1>, vector<16x128xf32>
    %11 = arith.truncf %10 : vector<16x128xf32> to vector<16x128xbf16>
    %c0_7 = arith.constant 0 : index
    %c0_8 = arith.constant 0 : index
    %12 = vector.load %arg4[%c0_7, %c0_8] : memref<128x128xbf16, #tpu.memory_space<vmem>>, vector<128x128xbf16>
    %cst_9 = arith.constant dense<0.000000e+00> : vector<16x128xf32>
    %13 = tpu.matmul %11, %12, %cst_9 {dimension_numbers = #tpu.dot_dimension_numbers<[1], [0], [0], [1], [0, 0, 1, 1], [], []>} : vector<16x128xbf16>, vector<128x128xbf16>, vector<16x128xf32> -> vector<16x128xf32>
    %c0_10 = arith.constant 0 : index
    %c0_11 = arith.constant 0 : index
    %14 = vector.load %arg5[%c0_10, %c0_11] : memref<1x128xf32, #tpu.memory_space<vmem>>, vector<1x128xf32>
    %15 = vector.broadcast %14 : vector<1x128xf32> to vector<16x128xf32>
    %16 = arith.addf %13, %15 : vector<16x128xf32>
    %c0_12 = arith.constant 0 : index
    %c0_13 = arith.constant 0 : index
    %17 = vector.load %arg6[%c0_12, %c0_13] : memref<16x128xf32, #tpu.memory_space<vmem>>, vector<16x128xf32>
    tpu.vector_store %arg6[%c0_12, %c0_13], %16 {strides = array<i32>} : memref<16x128xf32, #tpu.memory_space<vmem>>, vector<16x128xf32>,
    return
  }
  func.func @transform_0(%arg0: i32) -> (i32, i32) {
    %c0_i32 = arith.constant 0 : i32
    %c0_i32_0 = arith.constant 0 : i32
    return %arg0, %c0_i32 : i32, i32
  }
  func.func @transform_1(%arg0: i32) -> (i32, i32) {
    %c0_i32 = arith.constant 0 : i32
    %c0_i32_0 = arith.constant 0 : i32
    %c0_i32_1 = arith.constant 0 : i32
    return %c0_i32, %c0_i32_0 : i32, i32
  }
  func.func @transform_2(%arg0: i32) -> (i32, i32) {
    %c0_i32 = arith.constant 0 : i32
    %c0_i32_0 = arith.constant 0 : i32
    %c0_i32_1 = arith.constant 0 : i32
    return %c0_i32, %c0_i32_0 : i32, i32
  }
  func.func @transform_3(%arg0: i32) -> (i32, i32) {
    %c0_i32 = arith.constant 0 : i32
    %c0_i32_0 = arith.constant 0 : i32
    %c0_i32_1 = arith.constant 0 : i32
    return %c0_i32, %c0_i32_0 : i32, i32
  }
  func.func @transform_4(%arg0: i32) -> (i32, i32) {
    %c0_i32 = arith.constant 0 : i32
    %c0_i32_0 = arith.constant 0 : i32
    %c0_i32_1 = arith.constant 0 : i32
    return %c0_i32, %c0_i32_0 : i32, i32
  }
  func.func @transform_5(%arg0: i32) -> (i32, i32) {
    %c0_i32 = arith.constant 0 : i32
    %c0_i32_0 = arith.constant 0 : i32
    return %arg0, %c0_i32 : i32, i32
  }
}

module attributes {stable_mosaic.version = 11 : i64} {
  func.func @_mm_kernel(%arg0: i32, %arg1: i32, %arg2: memref<16x576xbf16, #tpu.memory_space<vmem>>, %arg3: memref<576x128xbf16, #tpu.memory_space<vmem>>, %arg4: memref<1x128xf32, #tpu.memory_space<vmem>>, %arg5: memref<16x128xf32, #tpu.memory_space<vmem>>) attributes {dimension_semantics = [#tpu.dimension_semantics<parallel>, #tpu.dimension_semantics<parallel>], iteration_bounds = array<i64: 1, 1>, scalar_prefetch = 0 : i64, scratch_operands = 0 : i64, tpu.core_type = #tpu.core_type<tc>, window_params = [{transform_indices = @transform_0, window_bounds = array<i64: 16, 576>}, {transform_indices = @transform_1, window_bounds = array<i64: 576, 128>}, {transform_indices = @transform_2, window_bounds = array<i64: 1, 128>}, {transform_indices = @transform_3, window_bounds = array<i64: 16, 128>}]} {
    %c0 = arith.constant 0 : index
    %c0_0 = arith.constant 0 : index
    %0 = vector.load %arg2[%c0, %c0_0] : memref<16x576xbf16, #tpu.memory_space<vmem>>, vector<16x576xbf16>
    %c0_1 = arith.constant 0 : index
    %c0_2 = arith.constant 0 : index
    %1 = vector.load %arg3[%c0_1, %c0_2] : memref<576x128xbf16, #tpu.memory_space<vmem>>, vector<576x128xbf16>
    %cst = arith.constant dense<0.000000e+00> : vector<16x128xf32>
    %2 = tpu.matmul %0, %1, %cst {dimension_numbers = #tpu.dot_dimension_numbers<[1], [0], [0], [1], [0, 0, 1, 1], [], []>} : vector<16x576xbf16>, vector<576x128xbf16>, vector<16x128xf32> -> vector<16x128xf32>
    %c0_3 = arith.constant 0 : index
    %c0_4 = arith.constant 0 : index
    %3 = vector.load %arg4[%c0_3, %c0_4] : memref<1x128xf32, #tpu.memory_space<vmem>>, vector<1x128xf32>
    %4 = vector.broadcast %3 : vector<1x128xf32> to vector<16x128xf32>
    %5 = arith.addf %2, %4 : vector<16x128xf32>
    %cst_5 = arith.constant 5.000000e-01 : f32
    %6 = vector.broadcast %cst_5 : f32 to vector<16x128xf32>
    %7 = arith.mulf %6, %5 : vector<16x128xf32>
    %cst_6 = arith.constant 0.707106769 : f32
    %8 = vector.broadcast %cst_6 : f32 to vector<16x128xf32>
    %9 = arith.mulf %5, %8 : vector<16x128xf32>
    %10 = math.erf %9 : vector<16x128xf32>
    %cst_7 = arith.constant 1.000000e+00 : f32
    %11 = vector.broadcast %cst_7 : f32 to vector<16x128xf32>
    %12 = arith.addf %11, %10 : vector<16x128xf32>
    %13 = arith.mulf %7, %12 : vector<16x128xf32>
    %c0_8 = arith.constant 0 : index
    %c0_9 = arith.constant 0 : index
    %14 = vector.load %arg5[%c0_8, %c0_9] : memref<16x128xf32, #tpu.memory_space<vmem>>, vector<16x128xf32>
    tpu.vector_store %arg5[%c0_8, %c0_9], %13 {strides = array<i32>} : memref<16x128xf32, #tpu.memory_space<vmem>>, vector<16x128xf32>,
    return
  }
  func.func @transform_0(%arg0: i32, %arg1: i32) -> (i32, i32) {
    %c0_i32 = arith.constant 0 : i32
    %c0_i32_0 = arith.constant 0 : i32
    return %arg0, %c0_i32 : i32, i32
  }
  func.func @transform_1(%arg0: i32, %arg1: i32) -> (i32, i32) {
    %c0_i32 = arith.constant 0 : i32
    %c0_i32_0 = arith.constant 0 : i32
    return %c0_i32, %arg1 : i32, i32
  }
  func.func @transform_2(%arg0: i32, %arg1: i32) -> (i32, i32) {
    %c0_i32 = arith.constant 0 : i32
    %c0_i32_0 = arith.constant 0 : i32
    return %c0_i32, %arg1 : i32, i32
  }
  func.func @transform_3(%arg0: i32, %arg1: i32) -> (i32, i32) {
    %c0_i32 = arith.constant 0 : i32
    return %arg0, %arg1 : i32, i32
  }
}

module attributes {stable_mosaic.version = 11 : i64} {
  func.func @_mm_kernel(%arg0: i32, %arg1: i32, %arg2: memref<16x1152xbf16, #tpu.memory_space<vmem>>, %arg3: memref<1152x256xbf16, #tpu.memory_space<vmem>>, %arg4: memref<1x256xf32, #tpu.memory_space<vmem>>, %arg5: memref<16x256xf32, #tpu.memory_space<vmem>>) attributes {dimension_semantics = [#tpu.dimension_semantics<parallel>, #tpu.dimension_semantics<parallel>], iteration_bounds = array<i64: 1, 1>, scalar_prefetch = 0 : i64, scratch_operands = 0 : i64, tpu.core_type = #tpu.core_type<tc>, window_params = [{transform_indices = @transform_0, window_bounds = array<i64: 16, 1152>}, {transform_indices = @transform_1, window_bounds = array<i64: 1152, 256>}, {transform_indices = @transform_2, window_bounds = array<i64: 1, 256>}, {transform_indices = @transform_3, window_bounds = array<i64: 16, 256>}]} {
    %c0 = arith.constant 0 : index
    %c0_0 = arith.constant 0 : index
    %0 = vector.load %arg2[%c0, %c0_0] : memref<16x1152xbf16, #tpu.memory_space<vmem>>, vector<16x1152xbf16>
    %c0_1 = arith.constant 0 : index
    %c0_2 = arith.constant 0 : index
    %1 = vector.load %arg3[%c0_1, %c0_2] : memref<1152x256xbf16, #tpu.memory_space<vmem>>, vector<1152x256xbf16>
    %cst = arith.constant dense<0.000000e+00> : vector<16x256xf32>
    %2 = tpu.matmul %0, %1, %cst {dimension_numbers = #tpu.dot_dimension_numbers<[1], [0], [0], [1], [0, 0, 1, 1], [], []>} : vector<16x1152xbf16>, vector<1152x256xbf16>, vector<16x256xf32> -> vector<16x256xf32>
    %c0_3 = arith.constant 0 : index
    %c0_4 = arith.constant 0 : index
    %3 = vector.load %arg4[%c0_3, %c0_4] : memref<1x256xf32, #tpu.memory_space<vmem>>, vector<1x256xf32>
    %4 = vector.broadcast %3 : vector<1x256xf32> to vector<16x256xf32>
    %5 = arith.addf %2, %4 : vector<16x256xf32>
    %c0_5 = arith.constant 0 : index
    %c0_6 = arith.constant 0 : index
    %6 = vector.load %arg5[%c0_5, %c0_6] : memref<16x256xf32, #tpu.memory_space<vmem>>, vector<16x256xf32>
    tpu.vector_store %arg5[%c0_5, %c0_6], %5 {strides = array<i32>} : memref<16x256xf32, #tpu.memory_space<vmem>>, vector<16x256xf32>,
    return
  }
  func.func @transform_0(%arg0: i32, %arg1: i32) -> (i32, i32) {
    %c0_i32 = arith.constant 0 : i32
    %c0_i32_0 = arith.constant 0 : i32
    return %arg0, %c0_i32 : i32, i32
  }
  func.func @transform_1(%arg0: i32, %arg1: i32) -> (i32, i32) {
    %c0_i32 = arith.constant 0 : i32
    %c0_i32_0 = arith.constant 0 : i32
    return %c0_i32, %arg1 : i32, i32
  }
  func.func @transform_2(%arg0: i32, %arg1: i32) -> (i32, i32) {
    %c0_i32 = arith.constant 0 : i32
    %c0_i32_0 = arith.constant 0 : i32
    return %c0_i32, %arg1 : i32, i32
  }
  func.func @transform_3(%arg0: i32, %arg1: i32) -> (i32, i32) {
    %c0_i32 = arith.constant 0 : i32
    return %arg0, %arg1 : i32, i32
  }
}

module attributes {stable_mosaic.version = 11 : i64} {
  func.func @_in_gelu_kernel(%arg0: i32, %arg1: memref<256x128xf32, #tpu.memory_space<vmem>>, %arg2: memref<256x128xf32, #tpu.memory_space<vmem>>) attributes {dimension_semantics = [#tpu.dimension_semantics<arbitrary>], iteration_bounds = array<i64: 1>, scalar_prefetch = 0 : i64, scratch_operands = 0 : i64, tpu.core_type = #tpu.core_type<tc>, window_params = [{transform_indices = @transform_0, window_bounds = array<i64: 256, 128>}, {transform_indices = @transform_1, window_bounds = array<i64: 256, 128>}]} {
    %c0 = arith.constant 0 : index
    %c0_0 = arith.constant 0 : index
    %0 = vector.load %arg1[%c0, %c0_0] : memref<256x128xf32, #tpu.memory_space<vmem>>, vector<256x128xf32>
    %cst = arith.constant dense<0.000000e+00> : vector<256xf32>
    %1 = vector.multi_reduction <add>, %0, %cst [1] : vector<256x128xf32> to vector<256xf32>
    %2 = vector.shape_cast %1 : vector<256xf32> to vector<256x1xf32>
    %cst_1 = arith.constant 2.500000e-01 : f32
    %3 = vector.broadcast %cst_1 : f32 to vector<256x1xf32>
    %4 = arith.mulf %2, %3 : vector<256x1xf32>
    %5 = arith.mulf %0, %0 : vector<256x128xf32>
    %cst_2 = arith.constant dense<0.000000e+00> : vector<256xf32>
    %6 = vector.multi_reduction <add>, %5, %cst_2 [1] : vector<256x128xf32> to vector<256xf32>
    %7 = vector.shape_cast %6 : vector<256xf32> to vector<256x1xf32>
    %cst_3 = arith.constant 2.500000e-01 : f32
    %8 = vector.broadcast %cst_3 : f32 to vector<256x1xf32>
    %9 = arith.mulf %7, %8 : vector<256x1xf32>
    %10 = arith.mulf %4, %4 : vector<256x1xf32>
    %11 = arith.subf %9, %10 : vector<256x1xf32>
    %12 = vector.broadcast %4 : vector<256x1xf32> to vector<256x128xf32>
    %13 = arith.subf %0, %12 : vector<256x128xf32>
    %cst_4 = arith.constant 9.99999974E-6 : f32
    %14 = vector.broadcast %cst_4 : f32 to vector<256x1xf32>
    %15 = arith.addf %11, %14 : vector<256x1xf32>
    %16 = math.rsqrt %15 : vector<256x1xf32>
    %17 = vector.broadcast %16 : vector<256x1xf32> to vector<256x128xf32>
    %18 = arith.mulf %13, %17 : vector<256x128xf32>
    %cst_5 = arith.constant 5.000000e-01 : f32
    %19 = vector.broadcast %cst_5 : f32 to vector<256x128xf32>
    %20 = arith.mulf %19, %18 : vector<256x128xf32>
    %cst_6 = arith.constant 0.707106769 : f32
    %21 = vector.broadcast %cst_6 : f32 to vector<256x128xf32>
    %22 = arith.mulf %18, %21 : vector<256x128xf32>
    %23 = math.erf %22 : vector<256x128xf32>
    %cst_7 = arith.constant 1.000000e+00 : f32
    %24 = vector.broadcast %cst_7 : f32 to vector<256x128xf32>
    %25 = arith.addf %24, %23 : vector<256x128xf32>
    %26 = arith.mulf %20, %25 : vector<256x128xf32>
    %c0_8 = arith.constant 0 : index
    %c0_9 = arith.constant 0 : index
    %27 = vector.load %arg2[%c0_8, %c0_9] : memref<256x128xf32, #tpu.memory_space<vmem>>, vector<256x128xf32>
    tpu.vector_store %arg2[%c0_8, %c0_9], %26 {strides = array<i32>} : memref<256x128xf32, #tpu.memory_space<vmem>>, vector<256x128xf32>,
    return
  }
  func.func @transform_0(%arg0: i32) -> (i32, i32) {
    %c0_i32 = arith.constant 0 : i32
    %c0_i32_0 = arith.constant 0 : i32
    return %arg0, %c0_i32 : i32, i32
  }
  func.func @transform_1(%arg0: i32) -> (i32, i32) {
    %c0_i32 = arith.constant 0 : i32
    %c0_i32_0 = arith.constant 0 : i32
    return %arg0, %c0_i32 : i32, i32
  }
}

module attributes {stable_mosaic.version = 11 : i64} {
  func.func @_mm_kernel(%arg0: i32, %arg1: i32, %arg2: memref<16x1152xbf16, #tpu.memory_space<vmem>>, %arg3: memref<1152x128xbf16, #tpu.memory_space<vmem>>, %arg4: memref<1x128xf32, #tpu.memory_space<vmem>>, %arg5: memref<16x128xf32, #tpu.memory_space<vmem>>) attributes {dimension_semantics = [#tpu.dimension_semantics<parallel>, #tpu.dimension_semantics<parallel>], iteration_bounds = array<i64: 1, 1>, scalar_prefetch = 0 : i64, scratch_operands = 0 : i64, tpu.core_type = #tpu.core_type<tc>, window_params = [{transform_indices = @transform_0, window_bounds = array<i64: 16, 1152>}, {transform_indices = @transform_1, window_bounds = array<i64: 1152, 128>}, {transform_indices = @transform_2, window_bounds = array<i64: 1, 128>}, {transform_indices = @transform_3, window_bounds = array<i64: 16, 128>}]} {
    %c0 = arith.constant 0 : index
    %c0_0 = arith.constant 0 : index
    %0 = vector.load %arg2[%c0, %c0_0] : memref<16x1152xbf16, #tpu.memory_space<vmem>>, vector<16x1152xbf16>
    %c0_1 = arith.constant 0 : index
    %c0_2 = arith.constant 0 : index
    %1 = vector.load %arg3[%c0_1, %c0_2] : memref<1152x128xbf16, #tpu.memory_space<vmem>>, vector<1152x128xbf16>
    %cst = arith.constant dense<0.000000e+00> : vector<16x128xf32>
    %2 = tpu.matmul %0, %1, %cst {dimension_numbers = #tpu.dot_dimension_numbers<[1], [0], [0], [1], [0, 0, 1, 1], [], []>} : vector<16x1152xbf16>, vector<1152x128xbf16>, vector<16x128xf32> -> vector<16x128xf32>
    %c0_3 = arith.constant 0 : index
    %c0_4 = arith.constant 0 : index
    %3 = vector.load %arg4[%c0_3, %c0_4] : memref<1x128xf32, #tpu.memory_space<vmem>>, vector<1x128xf32>
    %4 = vector.broadcast %3 : vector<1x128xf32> to vector<16x128xf32>
    %5 = arith.addf %2, %4 : vector<16x128xf32>
    %cst_5 = arith.constant 5.000000e-01 : f32
    %6 = vector.broadcast %cst_5 : f32 to vector<16x128xf32>
    %7 = arith.mulf %6, %5 : vector<16x128xf32>
    %cst_6 = arith.constant 0.707106769 : f32
    %8 = vector.broadcast %cst_6 : f32 to vector<16x128xf32>
    %9 = arith.mulf %5, %8 : vector<16x128xf32>
    %10 = math.erf %9 : vector<16x128xf32>
    %cst_7 = arith.constant 1.000000e+00 : f32
    %11 = vector.broadcast %cst_7 : f32 to vector<16x128xf32>
    %12 = arith.addf %11, %10 : vector<16x128xf32>
    %13 = arith.mulf %7, %12 : vector<16x128xf32>
    %c0_8 = arith.constant 0 : index
    %c0_9 = arith.constant 0 : index
    %14 = vector.load %arg5[%c0_8, %c0_9] : memref<16x128xf32, #tpu.memory_space<vmem>>, vector<16x128xf32>
    tpu.vector_store %arg5[%c0_8, %c0_9], %13 {strides = array<i32>} : memref<16x128xf32, #tpu.memory_space<vmem>>, vector<16x128xf32>,
    return
  }
  func.func @transform_0(%arg0: i32, %arg1: i32) -> (i32, i32) {
    %c0_i32 = arith.constant 0 : i32
    %c0_i32_0 = arith.constant 0 : i32
    return %arg0, %c0_i32 : i32, i32
  }
  func.func @transform_1(%arg0: i32, %arg1: i32) -> (i32, i32) {
    %c0_i32 = arith.constant 0 : i32
    %c0_i32_0 = arith.constant 0 : i32
    return %c0_i32, %arg1 : i32, i32
  }
  func.func @transform_2(%arg0: i32, %arg1: i32) -> (i32, i32) {
    %c0_i32 = arith.constant 0 : i32
    %c0_i32_0 = arith.constant 0 : i32
    return %c0_i32, %arg1 : i32, i32
  }
  func.func @transform_3(%arg0: i32, %arg1: i32) -> (i32, i32) {
    %c0_i32 = arith.constant 0 : i32
    return %arg0, %arg1 : i32, i32
  }
}

module attributes {stable_mosaic.version = 11 : i64} {
  func.func @_mm_kernel(%arg0: i32, %arg1: i32, %arg2: memref<16x1024xbf16, #tpu.memory_space<vmem>>, %arg3: memref<1024x128xbf16, #tpu.memory_space<vmem>>, %arg4: memref<1x128xf32, #tpu.memory_space<vmem>>, %arg5: memref<16x128xf32, #tpu.memory_space<vmem>>) attributes {dimension_semantics = [#tpu.dimension_semantics<parallel>, #tpu.dimension_semantics<parallel>], iteration_bounds = array<i64: 1, 1>, scalar_prefetch = 0 : i64, scratch_operands = 0 : i64, tpu.core_type = #tpu.core_type<tc>, window_params = [{transform_indices = @transform_0, window_bounds = array<i64: 16, 1024>}, {transform_indices = @transform_1, window_bounds = array<i64: 1024, 128>}, {transform_indices = @transform_2, window_bounds = array<i64: 1, 128>}, {transform_indices = @transform_3, window_bounds = array<i64: 16, 128>}]} {
    %c0 = arith.constant 0 : index
    %c0_0 = arith.constant 0 : index
    %0 = vector.load %arg2[%c0, %c0_0] : memref<16x1024xbf16, #tpu.memory_space<vmem>>, vector<16x1024xbf16>
    %c0_1 = arith.constant 0 : index
    %c0_2 = arith.constant 0 : index
    %1 = vector.load %arg3[%c0_1, %c0_2] : memref<1024x128xbf16, #tpu.memory_space<vmem>>, vector<1024x128xbf16>
    %cst = arith.constant dense<0.000000e+00> : vector<16x128xf32>
    %2 = tpu.matmul %0, %1, %cst {dimension_numbers = #tpu.dot_dimension_numbers<[1], [0], [0], [1], [0, 0, 1, 1], [], []>} : vector<16x1024xbf16>, vector<1024x128xbf16>, vector<16x128xf32> -> vector<16x128xf32>
    %c0_3 = arith.constant 0 : index
    %c0_4 = arith.constant 0 : index
    %3 = vector.load %arg4[%c0_3, %c0_4] : memref<1x128xf32, #tpu.memory_space<vmem>>, vector<1x128xf32>
    %4 = vector.broadcast %3 : vector<1x128xf32> to vector<16x128xf32>
    %5 = arith.addf %2, %4 : vector<16x128xf32>
    %c0_5 = arith.constant 0 : index
    %c0_6 = arith.constant 0 : index
    %6 = vector.load %arg5[%c0_5, %c0_6] : memref<16x128xf32, #tpu.memory_space<vmem>>, vector<16x128xf32>
    tpu.vector_store %arg5[%c0_5, %c0_6], %5 {strides = array<i32>} : memref<16x128xf32, #tpu.memory_space<vmem>>, vector<16x128xf32>,
    return
  }
  func.func @transform_0(%arg0: i32, %arg1: i32) -> (i32, i32) {
    %c0_i32 = arith.constant 0 : i32
    %c0_i32_0 = arith.constant 0 : i32
    return %arg0, %c0_i32 : i32, i32
  }
  func.func @transform_1(%arg0: i32, %arg1: i32) -> (i32, i32) {
    %c0_i32 = arith.constant 0 : i32
    %c0_i32_0 = arith.constant 0 : i32
    return %c0_i32, %arg1 : i32, i32
  }
  func.func @transform_2(%arg0: i32, %arg1: i32) -> (i32, i32) {
    %c0_i32 = arith.constant 0 : i32
    %c0_i32_0 = arith.constant 0 : i32
    return %c0_i32, %arg1 : i32, i32
  }
  func.func @transform_3(%arg0: i32, %arg1: i32) -> (i32, i32) {
    %c0_i32 = arith.constant 0 : i32
    return %arg0, %arg1 : i32, i32
  }
}

module attributes {stable_mosaic.version = 11 : i64} {
  func.func @_mm_kernel(%arg0: i32, %arg1: i32, %arg2: memref<16x2304xbf16, #tpu.memory_space<vmem>>, %arg3: memref<2304x128xbf16, #tpu.memory_space<vmem>>, %arg4: memref<1x128xf32, #tpu.memory_space<vmem>>, %arg5: memref<16x128xf32, #tpu.memory_space<vmem>>) attributes {dimension_semantics = [#tpu.dimension_semantics<parallel>, #tpu.dimension_semantics<parallel>], iteration_bounds = array<i64: 1, 1>, scalar_prefetch = 0 : i64, scratch_operands = 0 : i64, tpu.core_type = #tpu.core_type<tc>, window_params = [{transform_indices = @transform_0, window_bounds = array<i64: 16, 2304>}, {transform_indices = @transform_1, window_bounds = array<i64: 2304, 128>}, {transform_indices = @transform_2, window_bounds = array<i64: 1, 128>}, {transform_indices = @transform_3, window_bounds = array<i64: 16, 128>}]} {
    %c0 = arith.constant 0 : index
    %c0_0 = arith.constant 0 : index
    %0 = vector.load %arg2[%c0, %c0_0] : memref<16x2304xbf16, #tpu.memory_space<vmem>>, vector<16x2304xbf16>
    %c0_1 = arith.constant 0 : index
    %c0_2 = arith.constant 0 : index
    %1 = vector.load %arg3[%c0_1, %c0_2] : memref<2304x128xbf16, #tpu.memory_space<vmem>>, vector<2304x128xbf16>
    %cst = arith.constant dense<0.000000e+00> : vector<16x128xf32>
    %2 = tpu.matmul %0, %1, %cst {dimension_numbers = #tpu.dot_dimension_numbers<[1], [0], [0], [1], [0, 0, 1, 1], [], []>} : vector<16x2304xbf16>, vector<2304x128xbf16>, vector<16x128xf32> -> vector<16x128xf32>
    %c0_3 = arith.constant 0 : index
    %c0_4 = arith.constant 0 : index
    %3 = vector.load %arg4[%c0_3, %c0_4] : memref<1x128xf32, #tpu.memory_space<vmem>>, vector<1x128xf32>
    %4 = vector.broadcast %3 : vector<1x128xf32> to vector<16x128xf32>
    %5 = arith.addf %2, %4 : vector<16x128xf32>
    %c0_5 = arith.constant 0 : index
    %c0_6 = arith.constant 0 : index
    %6 = vector.load %arg5[%c0_5, %c0_6] : memref<16x128xf32, #tpu.memory_space<vmem>>, vector<16x128xf32>
    tpu.vector_store %arg5[%c0_5, %c0_6], %5 {strides = array<i32>} : memref<16x128xf32, #tpu.memory_space<vmem>>, vector<16x128xf32>,
    return
  }
  func.func @transform_0(%arg0: i32, %arg1: i32) -> (i32, i32) {
    %c0_i32 = arith.constant 0 : i32
    %c0_i32_0 = arith.constant 0 : i32
    return %arg0, %c0_i32 : i32, i32
  }
  func.func @transform_1(%arg0: i32, %arg1: i32) -> (i32, i32) {
    %c0_i32 = arith.constant 0 : i32
    %c0_i32_0 = arith.constant 0 : i32
    return %c0_i32, %arg1 : i32, i32
  }
  func.func @transform_2(%arg0: i32, %arg1: i32) -> (i32, i32) {
    %c0_i32 = arith.constant 0 : i32
    %c0_i32_0 = arith.constant 0 : i32
    return %c0_i32, %arg1 : i32, i32
  }
  func.func @transform_3(%arg0: i32, %arg1: i32) -> (i32, i32) {
    %c0_i32 = arith.constant 0 : i32
    return %arg0, %arg1 : i32, i32
  }
}

module attributes {stable_mosaic.version = 11 : i64} {
  func.func @_mm_kernel(%arg0: i32, %arg1: i32, %arg2: memref<16x512xbf16, #tpu.memory_space<vmem>>, %arg3: memref<512x128xbf16, #tpu.memory_space<vmem>>, %arg4: memref<1x128xf32, #tpu.memory_space<vmem>>, %arg5: memref<16x128xf32, #tpu.memory_space<vmem>>) attributes {dimension_semantics = [#tpu.dimension_semantics<parallel>, #tpu.dimension_semantics<parallel>], iteration_bounds = array<i64: 1, 1>, scalar_prefetch = 0 : i64, scratch_operands = 0 : i64, tpu.core_type = #tpu.core_type<tc>, window_params = [{transform_indices = @transform_0, window_bounds = array<i64: 16, 512>}, {transform_indices = @transform_1, window_bounds = array<i64: 512, 128>}, {transform_indices = @transform_2, window_bounds = array<i64: 1, 128>}, {transform_indices = @transform_3, window_bounds = array<i64: 16, 128>}]} {
    %c0 = arith.constant 0 : index
    %c0_0 = arith.constant 0 : index
    %0 = vector.load %arg2[%c0, %c0_0] : memref<16x512xbf16, #tpu.memory_space<vmem>>, vector<16x512xbf16>
    %c0_1 = arith.constant 0 : index
    %c0_2 = arith.constant 0 : index
    %1 = vector.load %arg3[%c0_1, %c0_2] : memref<512x128xbf16, #tpu.memory_space<vmem>>, vector<512x128xbf16>
    %cst = arith.constant dense<0.000000e+00> : vector<16x128xf32>
    %2 = tpu.matmul %0, %1, %cst {dimension_numbers = #tpu.dot_dimension_numbers<[1], [0], [0], [1], [0, 0, 1, 1], [], []>} : vector<16x512xbf16>, vector<512x128xbf16>, vector<16x128xf32> -> vector<16x128xf32>
    %c0_3 = arith.constant 0 : index
    %c0_4 = arith.constant 0 : index
    %3 = vector.load %arg4[%c0_3, %c0_4] : memref<1x128xf32, #tpu.memory_space<vmem>>, vector<1x128xf32>
    %4 = vector.broadcast %3 : vector<1x128xf32> to vector<16x128xf32>
    %5 = arith.addf %2, %4 : vector<16x128xf32>
    %c0_5 = arith.constant 0 : index
    %c0_6 = arith.constant 0 : index
    %6 = vector.load %arg5[%c0_5, %c0_6] : memref<16x128xf32, #tpu.memory_space<vmem>>, vector<16x128xf32>
    tpu.vector_store %arg5[%c0_5, %c0_6], %5 {strides = array<i32>} : memref<16x128xf32, #tpu.memory_space<vmem>>, vector<16x128xf32>,
    return
  }
  func.func @transform_0(%arg0: i32, %arg1: i32) -> (i32, i32) {
    %c0_i32 = arith.constant 0 : i32
    %c0_i32_0 = arith.constant 0 : i32
    return %arg0, %c0_i32 : i32, i32
  }
  func.func @transform_1(%arg0: i32, %arg1: i32) -> (i32, i32) {
    %c0_i32 = arith.constant 0 : i32
    %c0_i32_0 = arith.constant 0 : i32
    return %c0_i32, %arg1 : i32, i32
  }
  func.func @transform_2(%arg0: i32, %arg1: i32) -> (i32, i32) {
    %c0_i32 = arith.constant 0 : i32
    %c0_i32_0 = arith.constant 0 : i32
    return %c0_i32, %arg1 : i32, i32
  }
  func.func @transform_3(%arg0: i32, %arg1: i32) -> (i32, i32) {
    %c0_i32 = arith.constant 0 : i32
    return %arg0, %arg1 : i32, i32
  }
}

module attributes {stable_mosaic.version = 11 : i64} {
  func.func @_mm_kernel(%arg0: i32, %arg1: i32, %arg2: memref<64x1152xbf16, #tpu.memory_space<vmem>>, %arg3: memref<1152x128xbf16, #tpu.memory_space<vmem>>, %arg4: memref<1x128xf32, #tpu.memory_space<vmem>>, %arg5: memref<64x128xf32, #tpu.memory_space<vmem>>) attributes {dimension_semantics = [#tpu.dimension_semantics<parallel>, #tpu.dimension_semantics<parallel>], iteration_bounds = array<i64: 1, 1>, scalar_prefetch = 0 : i64, scratch_operands = 0 : i64, tpu.core_type = #tpu.core_type<tc>, window_params = [{transform_indices = @transform_0, window_bounds = array<i64: 64, 1152>}, {transform_indices = @transform_1, window_bounds = array<i64: 1152, 128>}, {transform_indices = @transform_2, window_bounds = array<i64: 1, 128>}, {transform_indices = @transform_3, window_bounds = array<i64: 64, 128>}]} {
    %c0 = arith.constant 0 : index
    %c0_0 = arith.constant 0 : index
    %0 = vector.load %arg2[%c0, %c0_0] : memref<64x1152xbf16, #tpu.memory_space<vmem>>, vector<64x1152xbf16>
    %c0_1 = arith.constant 0 : index
    %c0_2 = arith.constant 0 : index
    %1 = vector.load %arg3[%c0_1, %c0_2] : memref<1152x128xbf16, #tpu.memory_space<vmem>>, vector<1152x128xbf16>
    %cst = arith.constant dense<0.000000e+00> : vector<64x128xf32>
    %2 = tpu.matmul %0, %1, %cst {dimension_numbers = #tpu.dot_dimension_numbers<[1], [0], [0], [1], [0, 0, 1, 1], [], []>} : vector<64x1152xbf16>, vector<1152x128xbf16>, vector<64x128xf32> -> vector<64x128xf32>
    %c0_3 = arith.constant 0 : index
    %c0_4 = arith.constant 0 : index
    %3 = vector.load %arg4[%c0_3, %c0_4] : memref<1x128xf32, #tpu.memory_space<vmem>>, vector<1x128xf32>
    %4 = vector.broadcast %3 : vector<1x128xf32> to vector<64x128xf32>
    %5 = arith.addf %2, %4 : vector<64x128xf32>
    %c0_5 = arith.constant 0 : index
    %c0_6 = arith.constant 0 : index
    %6 = vector.load %arg5[%c0_5, %c0_6] : memref<64x128xf32, #tpu.memory_space<vmem>>, vector<64x128xf32>
    tpu.vector_store %arg5[%c0_5, %c0_6], %5 {strides = array<i32>} : memref<64x128xf32, #tpu.memory_space<vmem>>, vector<64x128xf32>,
    return
  }
  func.func @transform_0(%arg0: i32, %arg1: i32) -> (i32, i32) {
    %c0_i32 = arith.constant 0 : i32
    %c0_i32_0 = arith.constant 0 : i32
    return %arg0, %c0_i32 : i32, i32
  }
  func.func @transform_1(%arg0: i32, %arg1: i32) -> (i32, i32) {
    %c0_i32 = arith.constant 0 : i32
    %c0_i32_0 = arith.constant 0 : i32
    return %c0_i32, %arg1 : i32, i32
  }
  func.func @transform_2(%arg0: i32, %arg1: i32) -> (i32, i32) {
    %c0_i32 = arith.constant 0 : i32
    %c0_i32_0 = arith.constant 0 : i32
    return %c0_i32, %arg1 : i32, i32
  }
  func.func @transform_3(%arg0: i32, %arg1: i32) -> (i32, i32) {
    %c0_i32 = arith.constant 0 : i32
    return %arg0, %arg1 : i32, i32
  }
}

module attributes {stable_mosaic.version = 11 : i64} {
  func.func @_mm_kernel(%arg0: i32, %arg1: i32, %arg2: memref<64x256xbf16, #tpu.memory_space<vmem>>, %arg3: memref<256x128xbf16, #tpu.memory_space<vmem>>, %arg4: memref<1x128xf32, #tpu.memory_space<vmem>>, %arg5: memref<64x128xf32, #tpu.memory_space<vmem>>) attributes {dimension_semantics = [#tpu.dimension_semantics<parallel>, #tpu.dimension_semantics<parallel>], iteration_bounds = array<i64: 1, 1>, scalar_prefetch = 0 : i64, scratch_operands = 0 : i64, tpu.core_type = #tpu.core_type<tc>, window_params = [{transform_indices = @transform_0, window_bounds = array<i64: 64, 256>}, {transform_indices = @transform_1, window_bounds = array<i64: 256, 128>}, {transform_indices = @transform_2, window_bounds = array<i64: 1, 128>}, {transform_indices = @transform_3, window_bounds = array<i64: 64, 128>}]} {
    %c0 = arith.constant 0 : index
    %c0_0 = arith.constant 0 : index
    %0 = vector.load %arg2[%c0, %c0_0] : memref<64x256xbf16, #tpu.memory_space<vmem>>, vector<64x256xbf16>
    %c0_1 = arith.constant 0 : index
    %c0_2 = arith.constant 0 : index
    %1 = vector.load %arg3[%c0_1, %c0_2] : memref<256x128xbf16, #tpu.memory_space<vmem>>, vector<256x128xbf16>
    %cst = arith.constant dense<0.000000e+00> : vector<64x128xf32>
    %2 = tpu.matmul %0, %1, %cst {dimension_numbers = #tpu.dot_dimension_numbers<[1], [0], [0], [1], [0, 0, 1, 1], [], []>} : vector<64x256xbf16>, vector<256x128xbf16>, vector<64x128xf32> -> vector<64x128xf32>
    %c0_3 = arith.constant 0 : index
    %c0_4 = arith.constant 0 : index
    %3 = vector.load %arg4[%c0_3, %c0_4] : memref<1x128xf32, #tpu.memory_space<vmem>>, vector<1x128xf32>
    %4 = vector.broadcast %3 : vector<1x128xf32> to vector<64x128xf32>
    %5 = arith.addf %2, %4 : vector<64x128xf32>
    %c0_5 = arith.constant 0 : index
    %c0_6 = arith.constant 0 : index
    %6 = vector.load %arg5[%c0_5, %c0_6] : memref<64x128xf32, #tpu.memory_space<vmem>>, vector<64x128xf32>
    tpu.vector_store %arg5[%c0_5, %c0_6], %5 {strides = array<i32>} : memref<64x128xf32, #tpu.memory_space<vmem>>, vector<64x128xf32>,
    return
  }
  func.func @transform_0(%arg0: i32, %arg1: i32) -> (i32, i32) {
    %c0_i32 = arith.constant 0 : i32
    %c0_i32_0 = arith.constant 0 : i32
    return %arg0, %c0_i32 : i32, i32
  }
  func.func @transform_1(%arg0: i32, %arg1: i32) -> (i32, i32) {
    %c0_i32 = arith.constant 0 : i32
    %c0_i32_0 = arith.constant 0 : i32
    return %c0_i32, %arg1 : i32, i32
  }
  func.func @transform_2(%arg0: i32, %arg1: i32) -> (i32, i32) {
    %c0_i32 = arith.constant 0 : i32
    %c0_i32_0 = arith.constant 0 : i32
    return %c0_i32, %arg1 : i32, i32
  }
  func.func @transform_3(%arg0: i32, %arg1: i32) -> (i32, i32) {
    %c0_i32 = arith.constant 0 : i32
    return %arg0, %arg1 : i32, i32
  }
}

module attributes {stable_mosaic.version = 11 : i64} {
  func.func @_mm_kernel(%arg0: i32, %arg1: i32, %arg2: memref<256x576xbf16, #tpu.memory_space<vmem>>, %arg3: memref<576x128xbf16, #tpu.memory_space<vmem>>, %arg4: memref<1x128xf32, #tpu.memory_space<vmem>>, %arg5: memref<256x128xf32, #tpu.memory_space<vmem>>) attributes {dimension_semantics = [#tpu.dimension_semantics<parallel>, #tpu.dimension_semantics<parallel>], iteration_bounds = array<i64: 1, 1>, scalar_prefetch = 0 : i64, scratch_operands = 0 : i64, tpu.core_type = #tpu.core_type<tc>, window_params = [{transform_indices = @transform_0, window_bounds = array<i64: 256, 576>}, {transform_indices = @transform_1, window_bounds = array<i64: 576, 128>}, {transform_indices = @transform_2, window_bounds = array<i64: 1, 128>}, {transform_indices = @transform_3, window_bounds = array<i64: 256, 128>}]} {
    %c0 = arith.constant 0 : index
    %c0_0 = arith.constant 0 : index
    %0 = vector.load %arg2[%c0, %c0_0] : memref<256x576xbf16, #tpu.memory_space<vmem>>, vector<256x576xbf16>
    %c0_1 = arith.constant 0 : index
    %c0_2 = arith.constant 0 : index
    %1 = vector.load %arg3[%c0_1, %c0_2] : memref<576x128xbf16, #tpu.memory_space<vmem>>, vector<576x128xbf16>
    %cst = arith.constant dense<0.000000e+00> : vector<256x128xf32>
    %2 = tpu.matmul %0, %1, %cst {dimension_numbers = #tpu.dot_dimension_numbers<[1], [0], [0], [1], [0, 0, 1, 1], [], []>} : vector<256x576xbf16>, vector<576x128xbf16>, vector<256x128xf32> -> vector<256x128xf32>
    %c0_3 = arith.constant 0 : index
    %c0_4 = arith.constant 0 : index
    %3 = vector.load %arg4[%c0_3, %c0_4] : memref<1x128xf32, #tpu.memory_space<vmem>>, vector<1x128xf32>
    %4 = vector.broadcast %3 : vector<1x128xf32> to vector<256x128xf32>
    %5 = arith.addf %2, %4 : vector<256x128xf32>
    %c0_5 = arith.constant 0 : index
    %c0_6 = arith.constant 0 : index
    %6 = vector.load %arg5[%c0_5, %c0_6] : memref<256x128xf32, #tpu.memory_space<vmem>>, vector<256x128xf32>
    tpu.vector_store %arg5[%c0_5, %c0_6], %5 {strides = array<i32>} : memref<256x128xf32, #tpu.memory_space<vmem>>, vector<256x128xf32>,
    return
  }
  func.func @transform_0(%arg0: i32, %arg1: i32) -> (i32, i32) {
    %c0_i32 = arith.constant 0 : i32
    %c0_i32_0 = arith.constant 0 : i32
    return %arg0, %c0_i32 : i32, i32
  }
  func.func @transform_1(%arg0: i32, %arg1: i32) -> (i32, i32) {
    %c0_i32 = arith.constant 0 : i32
    %c0_i32_0 = arith.constant 0 : i32
    return %c0_i32, %arg1 : i32, i32
  }
  func.func @transform_2(%arg0: i32, %arg1: i32) -> (i32, i32) {
    %c0_i32 = arith.constant 0 : i32
    %c0_i32_0 = arith.constant 0 : i32
    return %c0_i32, %arg1 : i32, i32
  }
  func.func @transform_3(%arg0: i32, %arg1: i32) -> (i32, i32) {
    %c0_i32 = arith.constant 0 : i32
    return %arg0, %arg1 : i32, i32
  }
}

</mosaic_0001>

<bundles_post_ra>
// kernel: f_net_forward.93
= control target key start
LH: loop header
LB: loop body
LE: loop exit
PB: predicated region body
PF: predicated region fallthrough
CT: control target
= control target key end

     0   :  { %s270_s0 = inlined_call_operand.vmem [shape: f32[32,256], index: 0, kind: input, shape index: {}]   ;;  %s271_s1 = inlined_call_operand.vmem [shape: f32[32,256], index: 1, kind: output, shape index: {}]  }
   0x1   :  { %v177_v0 = vld [vmem:[%s270_s0 + $0x20] sm:$0xff]  ;;  %v182_v1 = vld [vmem:[%s270_s0 + $0x28] sm:$0xff]  ;;  %v199_v5 = vld [vmem:[%s270_s0 + $0x30] sm:$0xff] }
   0x2   :  { %v187_v2 = vld [vmem:[%s270_s0] sm:$0xff]  ;;  %v22_v3 = vadd.f32 %v182_v1, %v177_v0  ;;  %v194_v4 = vld [vmem:[%s270_s0 + $0x8] sm:$0xff]  ;;  %v204_v6 = vld [vmem:[%s270_s0 + $0x38] sm:$0xff]  ;;  %v38_v17 = vmul.f32 %v199_v5, %v199_v5  ;;  %v36_v20 = vmul.f32 %v177_v0, %v177_v0  ;;  %v37_v21 = vmul.f32 %v182_v1, %v182_v1 }
   0x3   :  { %v16_v7 = vadd.f32 %v194_v4, %v187_v2  ;;  %v211_v8 = vld [vmem:[%s270_s0 + $0x10] sm:$0xff]  ;;  %v216_v9 = vld [vmem:[%s270_s0 + $0x18] sm:$0xff]  ;;  %v25_v10 = vadd.f32 %v204_v6, %v199_v5  ;;  %v32_v14 = vmul.f32 %v187_v2, %v187_v2  ;;  %v33_v15 = vmul.f32 %v194_v4, %v194_v4 }
   0x4   :  { %23 = vadd.xlane.f32.xlu1 %v22_v3  ;;  %v34_v11 = vmul.f32 %v211_v8, %v211_v8  ;;  %v35_v12 = vmul.f32 %v216_v9, %v216_v9  ;;  %v19_v13 = vadd.f32 %v216_v9, %v211_v8  ;;  %v39_v18 = vmul.f32 %v204_v6, %v204_v6 }
   0x5   :  { %17 = vadd.xlane.f32.xlu0 %v16_v7  ;;  %v40_v19 = vadd.f32 %v33_v15, %v32_v14  ;;  %v46_v23 = vadd.f32 %v37_v21, %v36_v20 }
   0x6   :  { %v43_v16 = vadd.f32 %v35_v12, %v34_v11  ;;  %v49_v22 = vadd.f32 %v39_v18, %v38_v17 }
   0x8   :  { %26 = vadd.xlane.f32.xlu1 %v25_v10 }
   0x9   :  { %20 = vadd.xlane.f32.xlu0 %v19_v13 }
   0xc   :  { %44 = vadd.xlane.f32.xlu1 %v43_v16 }
   0xd   :  { %41 = vadd.xlane.f32.xlu0 %v40_v19 }
  0x10   :  { %50 = vadd.xlane.f32.xlu1 %v49_v22 }
  0x11   :  { %47 = vadd.xlane.f32.xlu0 %v46_v23 }
  0x91   :  { %v24_v24 = vpop.xlane.xlu1 %23 }
  0x92   :  { %v18_v25 = vpop.xlane.xlu0 %17  ;;  %v30_v35 = vmul.f32 0.00390625, %v24_v24 }
  0x93   :  { %v28_v28 = vmul.f32 0.00390625, %v18_v25 }
  0x94   :  { %v58_v46 = vmul.f32 %v30_v35, %v30_v35 }
  0x95   :  { %v27_v26 = vpop.xlane.xlu1 %26  ;;  %v56_v36 = vmul.f32 %v28_v28, %v28_v28  ;;  %v64_v55 = vsub.f32 %v187_v2, %v28_v28  ;;  %v65_v56 = vsub.f32 %v194_v4, %v28_v28 }
  0x96   :  { %v21_v27 = vpop.xlane.xlu0 %20  ;;  %v31_v31 = vmul.f32 0.00390625, %v27_v26 }
  0x97   :  { %v29_v29 = vmul.f32 0.00390625, %v21_v27 }
  0x98   :  { %v59_v42 = vmul.f32 %v31_v31, %v31_v31  ;;  %v70_v62 = vsub.f32 %v199_v5, %v31_v31  ;;  %v71_v63 = vsub.f32 %v204_v6, %v31_v31 }
  0x99   :  { %v45_v30 = vpop.xlane.xlu1 %44  ;;  %v57_v33 = vmul.f32 %v29_v29, %v29_v29  ;;  %v66_v52 = vsub.f32 %v211_v8, %v29_v29  ;;  %v67_v53 = vsub.f32 %v216_v9, %v29_v29  ;;  %v68_v8 = vsub.f32 %v177_v0, %v30_v35 }
  0x9a   :  { %v53_v32 = vmul.f32 0.00390625, %v45_v30  ;;  %v42_v34 = vpop.xlane.xlu0 %41  ;;  %v69_v9 = vsub.f32 %v182_v1, %v30_v35 }
  0x9b   :  { %v52_v37 = vmul.f32 0.00390625, %v42_v34 }
  0x9c   :  { %v61_v38 = vsub.f32 %v53_v32, %v57_v33 }
  0x9d   :  { %v60_v39 = vsub.f32 %v52_v37, %v56_v36  ;;  %v51_v40 = vpop.xlane.xlu1 %50 }
  0x9e   :  { %v73_v41 = vadd.f32 1e-05, %v61_v38  ;;  %v55_v43 = vmul.f32 0.00390625, %v51_v40  ;;  %v48_v44 = vpop.xlane.xlu0 %47 }
  0x9f   :  { %v72_v45 = vadd.f32 1e-05, %v60_v39  ;;  %v54_v47 = vmul.f32 0.00390625, %v48_v44 }
  0xa0   :  { %140 = vrsqrt.f32 %v73_v41  ;;  %v63_v48 = vsub.f32 %v55_v43, %v59_v42 }
  0xa1   :  { %142 = vrsqrt.f32 %v72_v45  ;;  %v62_v49 = vsub.f32 %v54_v47, %v58_v46 }
  0xa2   :  { %v75_v50 = vadd.f32 1e-05, %v63_v48 }
  0xa3   :  { %v74_v51 = vadd.f32 1e-05, %v62_v49 }
  0xa4   :  { %144 = vrsqrt.f32 %v75_v50 }
  0xa5   :  { %146 = vrsqrt.f32 %v74_v51 }
  0xaa   :  { %v141_v54 = vpop.eup %140 }
  0xab   :  { %v143_v57 = vpop.eup %142  ;;  %v82_v58 = vmul.f32 %v141_v54, %v66_v52  ;;  %v83_v59 = vmul.f32 %v141_v54, %v67_v53 }
  0xac   :  { %v80_v60 = vmul.f32 %v143_v57, %v64_v55  ;;  %v81_v61 = vmul.f32 %v143_v57, %v65_v56 }
  0xad   :  { %v98_v3 = vmul.f32 0.70710677, %v82_v58  ;;  %v99_v7 = vmul.f32 0.70710677, %v83_v59  ;;  %v90_v18 = vmul.f32 0.5, %v82_v58  ;;  %v91_v21 = vmul.f32 0.5, %v83_v59 }
  0xae   :  { %v145_v10 = vpop.eup %144  ;;  %v96_v11 = vmul.f32 0.70710677, %v80_v60  ;;  %v97_v2 = vmul.f32 0.70710677, %v81_v61  ;;  %v88_v25 = vmul.f32 0.5, %v80_v60  ;;  %v89_v29 = vmul.f32 0.5, %v81_v61 }
  0xaf   :  { %v147_v12 = vpop.eup %146  ;;  %148 = verf.f32 %v98_v3  ;;  %v86_v4 = vmul.f32 %v145_v10, %v70_v62  ;;  %v87_v13 = vmul.f32 %v145_v10, %v71_v63 }
  0xb0   :  { %150 = verf.f32 %v99_v7  ;;  %v84_v14 = vmul.f32 %v147_v12, %v68_v8  ;;  %v85_v15 = vmul.f32 %v147_v12, %v69_v9 }
  0xb1   :  { %152 = verf.f32 %v96_v11  ;;  %v102_v5 = vmul.f32 0.70710677, %v86_v4  ;;  %v103_v6 = vmul.f32 0.70710677, %v87_v13  ;;  %v94_v33 = vmul.f32 0.5, %v86_v4 }
  0xb2   :  { %154 = verf.f32 %v97_v2  ;;  %v100_v16 = vmul.f32 0.70710677, %v84_v14  ;;  %v101_v17 = vmul.f32 0.70710677, %v85_v15  ;;  %v95_v37 = vmul.f32 0.5, %v87_v13 }
  0xb3   :  { %156 = verf.f32 %v102_v5  ;;  %v92_v41 = vmul.f32 0.5, %v84_v14  ;;  %v93_v44 = vmul.f32 0.5, %v85_v15 }
  0xb4   :  { %158 = verf.f32 %v103_v6 }
  0xb5   :  { %160 = verf.f32 %v100_v16 }
  0xb6   :  { %162 = verf.f32 %v101_v17 }
  0xb9   :  { %v149_v0 = vpop.eup %148 }
  0xba   :  { %v151_v1 = vpop.eup %150  ;;  %v114_v19 = vadd.f32 1.0, %v149_v0 }
  0xbb   :  { %v153_v20 = vpop.eup %152  ;;  %v115_v22 = vadd.f32 1.0, %v151_v1 }
  0xbc   :  { %v155_v23 = vpop.eup %154  ;;  %v122_v24 = vmul.f32 %v114_v19, %v90_v18  ;;  %v112_v26 = vadd.f32 1.0, %v153_v20 }
  0xbd   :  { %v157_v27 = vpop.eup %156  ;;  %v123_v28 = vmul.f32 %v115_v22, %v91_v21  ;;  %v113_v30 = vadd.f32 1.0, %v155_v23 }
  0xbe   :  { %v159_v31 = vpop.eup %158  ;;  %130 = vst [vmem:[%s271_s1 + $0x10] sm:$0xff] %v122_v24  ;;  %v120_v32 = vmul.f32 %v112_v26, %v88_v25  ;;  %v118_v34 = vadd.f32 1.0, %v157_v27 }
  0xbf   :  { %v161_v35 = vpop.eup %160  ;;  %131 = vst [vmem:[%s271_s1 + $0x18] sm:$0xff] %v123_v28  ;;  %v121_v36 = vmul.f32 %v113_v30, %v89_v29  ;;  %v119_v38 = vadd.f32 1.0, %v159_v31 }
  0xc0   :  { %v163_v39 = vpop.eup %162  ;;  %128 = vst [vmem:[%s271_s1] sm:$0xff] %v120_v32  ;;  %v126_v40 = vmul.f32 %v118_v34, %v94_v33  ;;  %v116_v42 = vadd.f32 1.0, %v161_v35 }
  0xc1   :  { %129 = vst [vmem:[%s271_s1 + $0x8] sm:$0xff] %v121_v36  ;;  %v127_v43 = vmul.f32 %v119_v38, %v95_v37  ;;  %v117_v45 = vadd.f32 1.0, %v163_v39 }
  0xc2   :  { %134 = vst [vmem:[%s271_s1 + $0x30] sm:$0xff] %v126_v40  ;;  %v124_v46 = vmul.f32 %v116_v42, %v92_v41 }
  0xc3   :  { %135 = vst [vmem:[%s271_s1 + $0x38] sm:$0xff] %v127_v43  ;;  %v125_v47 = vmul.f32 %v117_v45, %v93_v44 }
  0xc4   :  { %132 = vst [vmem:[%s271_s1 + $0x20] sm:$0xff] %v124_v46 }
  0xc5   :  { %133 = vst [vmem:[%s271_s1 + $0x28] sm:$0xff] %v125_v47 }

// kernel: f_net_forward.92
= control target key start
LH: loop header
LB: loop body
LE: loop exit
PB: predicated region body
PF: predicated region fallthrough
CT: control target
= control target key end

     0   :  { %vm166_vm0 = vcmask 523264   ;;  %s766_s1 = inlined_call_operand.vmem [shape: bf16[64,128], index: 1, kind: input, shape index: {}]   ;;  %s767_s0 = inlined_call_operand.vmem [shape: bf16[256,64], index: 0, kind: input, shape index: {}]   ;;  %s768_s2 = inlined_call_operand.vmem [shape: f32[1,128], index: 2, kind: input, shape index: {}]   ;;  %s769_s3 = inlined_call_operand.vmem [shape: f32[256,128], index: 3, kind: output, shape index: {}]  }
   0x1   :  { %v517_v0 = vld [vmem:[%s766_s1] sm:$0xff]   ;;  %v518_v1 = vld [vmem:[%s766_s1 + $0x8] sm:$0xff]   ;;  %v519_v2 = vld [vmem:[%s766_s1 + $0x10] sm:$0xff]  }
   0x2   :  { %469 = vmatprep.subr.bf16.mxu0 %v517_v0  ;;  %509 = vmatprep.subr.bf16.mxu1 %v517_v0  ;;  %v521_v3 = vld [vmem:[%s767_s0] sm:$0xff]   ;;  %v520_v5 = vld [vmem:[%s766_s1 + $0x18] sm:$0xff]   ;;  %v523_v6 = vld [vmem:[%s767_s0 + $0x8] sm:$0xff]  }
   0x3   :  { %470 = vmatpush3.bf16.msra.mxu0 %v517_v0  ;;  %513 = vmatpush3.bf16.msra.mxu1 %v517_v0  ;;  %v522_v4 = vld [vmem:[%s767_s0 + $0x40] sm:$0xff]   ;;  %v524_v7 = vld [vmem:[%s767_s0 + $0x48] sm:$0xff]   ;;  %v525_v8 = vld [vmem:[%s767_s0 + $0x10] sm:$0xff]  }
   0x4   :  { %471 = vmatprep.subr.bf16.mxu0 %v518_v1  ;;  %510 = vmatprep.subr.bf16.mxu1 %v518_v1  ;;  %v526_v9 = vld [vmem:[%s767_s0 + $0x50] sm:$0xff]   ;;  %v527_v10 = vld [vmem:[%s767_s0 + $0x18] sm:$0xff]   ;;  %v529_v12 = vld [vmem:[%s767_s0 + $0x20] sm:$0xff]  }
   0x5   :  { %477 = vmatprep.mubr.msk.bf16.mxu0 %vm166_vm0, %v521_v3  ;;  %493 = vmatprep.mubr.msk.bf16.mxu1 %vm166_vm0, %v522_v4  ;;  %v528_v11 = vld [vmem:[%s767_s0 + $0x58] sm:$0xff]   ;;  %v530_v13 = vld [vmem:[%s767_s0 + $0x60] sm:$0xff]   ;;  %v531_v14 = vld [vmem:[%s767_s0 + $0x28] sm:$0xff]  }
   0x6   :  { %v532_v15 = vld [vmem:[%s767_s0 + $0x68] sm:$0xff]   ;;  %v533_v16 = vld [vmem:[%s767_s0 + $0x30] sm:$0xff]   ;;  %v535_v18 = vld [vmem:[%s767_s0 + $0x38] sm:$0xff]  }
   0x7   :  { %472 = vmatpush3.bf16.msra.mxu0 %v518_v1  ;;  %514 = vmatpush3.bf16.msra.mxu1 %v518_v1  ;;  %v534_v17 = vld [vmem:[%s767_s0 + $0x70] sm:$0xff]   ;;  %v536_v19 = vld [vmem:[%s767_s0 + $0x78] sm:$0xff]   ;;  %v636_v20 = vld [vmem:[%s768_s2] ss:$0 sm:$0xff] }
   0x8   :  { %473 = vmatprep.subr.bf16.mxu0 %v519_v2  ;;  %511 = vmatprep.subr.bf16.mxu1 %v519_v2 }
   0xb   :  { %474 = vmatpush3.bf16.msra.mxu0 %v519_v2  ;;  %515 = vmatpush3.bf16.msra.mxu1 %v519_v2 }
   0xc   :  { %475 = vmatprep.subr.bf16.mxu0 %v520_v5  ;;  %512 = vmatprep.subr.bf16.mxu1 %v520_v5 }
   0xf   :  { %476 = vmatpush3.bf16.msra.mxu0 %v520_v5  ;;  %516 = vmatpush3.bf16.msra.mxu1 %v520_v5 }
  0x12   :  { %478 = vmatmul.mubr.msk.bf16.vlgmr.msra.gmra.mrb[0].mxu0 %vm166_vm0, %v523_v6  ;;  %494 = vmatmul.mubr.msk.bf16.vlgmr.msra.gmra.mrb[0].mxu1 %vm166_vm0, %v524_v7 }
  0x13   :  { %481 = vmatprep.mubr.msk.bf16.mxu0 %vm166_vm0, %v525_v8  ;;  %497 = vmatprep.mubr.msk.bf16.mxu1 %vm166_vm0, %v526_v9 }
  0x1a   :  { %482 = vmatmul.mubr.msk.bf16.gmra.mrb[4].mxu0 %vm166_vm0, %v527_v10  ;;  %498 = vmatmul.mubr.msk.bf16.gmra.mrb[4].mxu1 %vm166_vm0, %v528_v11 }
  0x1b   :  { %485 = vmatprep.mubr.msk.bf16.mxu0 %vm166_vm0, %v529_v12  ;;  %501 = vmatprep.mubr.msk.bf16.mxu1 %vm166_vm0, %v530_v13 }
  0x22   :  { %486 = vmatmul.mubr.msk.bf16.gmra.mrb[8].mxu0 %vm166_vm0, %v531_v14  ;;  %502 = vmatmul.mubr.msk.bf16.gmra.mrb[8].mxu1 %vm166_vm0, %v532_v15 }
  0x23   :  { %489 = vmatprep.mubr.msk.bf16.mxu0 %vm166_vm0, %v533_v16  ;;  %505 = vmatprep.mubr.msk.bf16.mxu1 %vm166_vm0, %v534_v17 }
  0x2a   :  { %490 = vmatmul.mubr.msk.bf16.gmra.mrb[12].mxu0 %vm166_vm0, %v535_v18  ;;  %506 = vmatmul.mubr.msk.bf16.gmra.mrb[12].mxu1 %vm166_vm0, %v536_v19 }
  0xe5   :  { %v479_v21 = vpop.f32.mrb[0].mxu0  ;;  %v495_v22 = vpop.f32.mrb[0].mxu1 }
  0xe6   :  { %v258_v23 = vadd.f32 %v479_v21, %v636_v20  ;;  %v322_v24 = vadd.f32 %v495_v22, %v636_v20  ;;  %v249_v25 = vpop.f32.mrb[1].mxu0  ;;  %v313_v26 = vpop.f32.mrb[1].mxu1 }
  0xe7   :  { %v250_v27 = vadd.f32 %v636_v20, %v249_v25  ;;  %v314_v28 = vadd.f32 %v636_v20, %v313_v26  ;;  %v480_v29 = vpop.f32.mrb[2].mxu0  ;;  %v496_v30 = vpop.f32.mrb[2].mxu1 }
  0xe8   :  { %378 = vst [vmem:[%s769_s3 + $0x10] sm:$0xff] %v258_v23  ;;  %394 = vst [vmem:[%s769_s3 + $0x90] sm:$0xff] %v322_v24  ;;  %v261_v31 = vadd.f32 %v480_v29, %v636_v20  ;;  %v325_v32 = vadd.f32 %v496_v30, %v636_v20  ;;  %v252_v33 = vpop.f32.mrb[3].mxu0  ;;  %v316_v34 = vpop.f32.mrb[3].mxu1 }
  0xe9   :  { %376 = vst [vmem:[%s769_s3] sm:$0xff] %v250_v27  ;;  %392 = vst [vmem:[%s769_s3 + $0x80] sm:$0xff] %v314_v28  ;;  %v253_v35 = vadd.f32 %v636_v20, %v252_v33  ;;  %v317_v36 = vadd.f32 %v636_v20, %v316_v34 }
  0xea   :  { %379 = vst [vmem:[%s769_s3 + $0x18] sm:$0xff] %v261_v31  ;;  %395 = vst [vmem:[%s769_s3 + $0x98] sm:$0xff] %v325_v32 }
  0xeb   :  { %377 = vst [vmem:[%s769_s3 + $0x8] sm:$0xff] %v253_v35  ;;  %393 = vst [vmem:[%s769_s3 + $0x88] sm:$0xff] %v317_v36 }
  0xed   :  { %v483_v37 = vpop.f32.mrb[4].mxu0  ;;  %v499_v38 = vpop.f32.mrb[4].mxu1 }
  0xee   :  { %v274_v39 = vadd.f32 %v483_v37, %v636_v20  ;;  %v338_v40 = vadd.f32 %v499_v38, %v636_v20  ;;  %v265_v41 = vpop.f32.mrb[5].mxu0  ;;  %v329_v42 = vpop.f32.mrb[5].mxu1 }
  0xef   :  { %v266_v43 = vadd.f32 %v636_v20, %v265_v41  ;;  %v330_v44 = vadd.f32 %v636_v20, %v329_v42  ;;  %v484_v45 = vpop.f32.mrb[6].mxu0  ;;  %v500_v46 = vpop.f32.mrb[6].mxu1 }
  0xf0   :  { %382 = vst [vmem:[%s769_s3 + $0x30] sm:$0xff] %v274_v39  ;;  %398 = vst [vmem:[%s769_s3 + $0xb0] sm:$0xff] %v338_v40  ;;  %v277_v47 = vadd.f32 %v484_v45, %v636_v20  ;;  %v341_v48 = vadd.f32 %v500_v46, %v636_v20  ;;  %v268_v49 = vpop.f32.mrb[7].mxu0  ;;  %v332_v50 = vpop.f32.mrb[7].mxu1 }
  0xf1   :  { %380 = vst [vmem:[%s769_s3 + $0x20] sm:$0xff] %v266_v43  ;;  %396 = vst [vmem:[%s769_s3 + $0xa0] sm:$0xff] %v330_v44  ;;  %v269_v51 = vadd.f32 %v636_v20, %v268_v49  ;;  %v333_v52 = vadd.f32 %v636_v20, %v332_v50 }
  0xf2   :  { %383 = vst [vmem:[%s769_s3 + $0x38] sm:$0xff] %v277_v47  ;;  %399 = vst [vmem:[%s769_s3 + $0xb8] sm:$0xff] %v341_v48 }
  0xf3   :  { %381 = vst [vmem:[%s769_s3 + $0x28] sm:$0xff] %v269_v51  ;;  %397 = vst [vmem:[%s769_s3 + $0xa8] sm:$0xff] %v333_v52 }
  0xf5   :  { %v487_v53 = vpop.f32.mrb[8].mxu0  ;;  %v503_v54 = vpop.f32.mrb[8].mxu1 }
  0xf6   :  { %v290_v55 = vadd.f32 %v487_v53, %v636_v20  ;;  %v354_v56 = vadd.f32 %v503_v54, %v636_v20  ;;  %v281_v57 = vpop.f32.mrb[9].mxu0  ;;  %v345_v58 = vpop.f32.mrb[9].mxu1 }
  0xf7   :  { %v282_v59 = vadd.f32 %v636_v20, %v281_v57  ;;  %v346_v60 = vadd.f32 %v636_v20, %v345_v58  ;;  %v488_v61 = vpop.f32.mrb[10].mxu0  ;;  %v504_v62 = vpop.f32.mrb[10].mxu1 }
  0xf8   :  { %386 = vst [vmem:[%s769_s3 + $0x50] sm:$0xff] %v290_v55  ;;  %402 = vst [vmem:[%s769_s3 + $0xd0] sm:$0xff] %v354_v56  ;;  %v293_v63 = vadd.f32 %v488_v61, %v636_v20  ;;  %v357_v0 = vadd.f32 %v504_v62, %v636_v20  ;;  %v284_v1 = vpop.f32.mrb[11].mxu0  ;;  %v348_v2 = vpop.f32.mrb[11].mxu1 }
  0xf9   :  { %384 = vst [vmem:[%s769_s3 + $0x40] sm:$0xff] %v282_v59  ;;  %400 = vst [vmem:[%s769_s3 + $0xc0] sm:$0xff] %v346_v60  ;;  %v285_v3 = vadd.f32 %v636_v20, %v284_v1  ;;  %v349_v4 = vadd.f32 %v636_v20, %v348_v2 }
  0xfa   :  { %387 = vst [vmem:[%s769_s3 + $0x58] sm:$0xff] %v293_v63  ;;  %403 = vst [vmem:[%s769_s3 + $0xd8] sm:$0xff] %v357_v0 }
  0xfb   :  { %385 = vst [vmem:[%s769_s3 + $0x48] sm:$0xff] %v285_v3  ;;  %401 = vst [vmem:[%s769_s3 + $0xc8] sm:$0xff] %v349_v4 }
  0xfd   :  { %v491_v5 = vpop.f32.mrb[12].mxu0  ;;  %v507_v6 = vpop.f32.mrb[12].mxu1 }
  0xfe   :  { %v306_v7 = vadd.f32 %v491_v5, %v636_v20  ;;  %v370_v8 = vadd.f32 %v507_v6, %v636_v20  ;;  %v297_v9 = vpop.f32.mrb[13].mxu0  ;;  %v361_v10 = vpop.f32.mrb[13].mxu1 }
  0xff   :  { %v298_v11 = vadd.f32 %v636_v20, %v297_v9  ;;  %v362_v12 = vadd.f32 %v636_v20, %v361_v10  ;;  %v492_v13 = vpop.f32.mrb[14].mxu0  ;;  %v508_v14 = vpop.f32.mrb[14].mxu1 }
 0x100   :  { %390 = vst [vmem:[%s769_s3 + $0x70] sm:$0xff] %v306_v7  ;;  %406 = vst [vmem:[%s769_s3 + $0xf0] sm:$0xff] %v370_v8  ;;  %v309_v15 = vadd.f32 %v492_v13, %v636_v20  ;;  %v373_v16 = vadd.f32 %v508_v14, %v636_v20  ;;  %v300_v17 = vpop.f32.mrb[15].mxu0  ;;  %v364_v18 = vpop.f32.mrb[15].mxu1 }
 0x101   :  { %388 = vst [vmem:[%s769_s3 + $0x60] sm:$0xff] %v298_v11  ;;  %404 = vst [vmem:[%s769_s3 + $0xe0] sm:$0xff] %v362_v12  ;;  %v301_v19 = vadd.f32 %v636_v20, %v300_v17  ;;  %v365_v21 = vadd.f32 %v636_v20, %v364_v18 }
 0x102   :  { %391 = vst [vmem:[%s769_s3 + $0x78] sm:$0xff] %v309_v15  ;;  %407 = vst [vmem:[%s769_s3 + $0xf8] sm:$0xff] %v373_v16 }
 0x103   :  { %389 = vst [vmem:[%s769_s3 + $0x68] sm:$0xff] %v301_v19  ;;  %405 = vst [vmem:[%s769_s3 + $0xe8] sm:$0xff] %v365_v21 }

// kernel: f_net_forward.94
= control target key start
LH: loop header
LB: loop body
LE: loop exit
PB: predicated region body
PF: predicated region fallthrough
CT: control target
= control target key end

     0   :  { %vm470_vm0 = vcmask 261120   ;;  %s1621_s1 = inlined_call_operand.vmem [shape: bf16[288,128], index: 1, kind: input, shape index: {}]   ;;  %s1622_s0 = inlined_call_operand.vmem [shape: bf16[256,288], index: 0, kind: input, shape index: {}]   ;;  %s1623_s2 = inlined_call_operand.vmem [shape: f32[1,128], index: 2, kind: input, shape index: {}]   ;;  %s1624_s3 = inlined_call_operand.vmem [shape: f32[256,128], index: 3, kind: output, shape index: {}]  }
   0x1   :  { %v1142_v0 = vld [vmem:[%s1621_s1 + $0x40] sm:$0xff]   ;;  %v1144_v2 = vld [vmem:[%s1621_s1 + $0x48] sm:$0xff]   ;;  %v1146_v4 = vld [vmem:[%s1621_s1 + $0x50] sm:$0xff]  }
   0x2   :  { %v1143_v1 = vld [vmem:[%s1621_s1] sm:$0xff]   ;;  %960 = vmatprep.subr.bf16.mxu0 %v1142_v0  ;;  %1126 = vmatprep.subr.bf16.mxu1 %v1142_v0  ;;  %v1145_v3 = vld [vmem:[%s1621_s1 + $0x8] sm:$0xff]   ;;  %v1147_v5 = vld [vmem:[%s1621_s1 + $0x10] sm:$0xff]  }
   0x3   :  { %961 = vmatpush3.bf16.msra.mxu0 %v1143_v1  ;;  %1134 = vmatpush3.bf16.msra.mxu1 %v1143_v1  ;;  %v1148_v6 = vld [vmem:[%s1621_s1 + $0x58] sm:$0xff]   ;;  %v1150_v8 = vld [vmem:[%s1621_s1 + $0x60] sm:$0xff]   ;;  %v1152_v10 = vld [vmem:[%s1621_s1 + $0x68] sm:$0xff]  }
   0x4   :  { %962 = vmatprep.subr.bf16.mxu0 %v1144_v2  ;;  %1127 = vmatprep.subr.bf16.mxu1 %v1144_v2  ;;  %v1149_v7 = vld [vmem:[%s1621_s1 + $0x18] sm:$0xff]   ;;  %v1151_v9 = vld [vmem:[%s1621_s1 + $0x20] sm:$0xff]   ;;  %v1153_v13 = vld [vmem:[%s1621_s1 + $0x28] sm:$0xff]  }
   0x5   :  { %v1160_v11 = vld [vmem:[%s1622_s0 + $0x4] ss:$12 sps:$4 sm:$0xff]   ;;  %v1156_v16 = vld [vmem:[%s1621_s1 + $0x78] sm:$0xff]   ;;  %v1158_v19 = vld [vmem:[%s1622_s0] ss:$12 sps:$4 sm:$0xff]  }
   0x6   :  { %v1163_v12 = vld [vmem:[%s1622_s0 + $0x124] ss:$12 sps:$4 sm:$0xff]   ;;  %551 = vmatprep.mubr.bf16.mxu0 %v1160_v11  ;;  %v1157_v17 = vld [vmem:[%s1621_s1 + $0x38] sm:$0xff]   ;;  %v1161_v20 = vld [vmem:[%s1622_s0 + $0x120] ss:$12 sps:$4 sm:$0xff]  }
   0x7   :  { %963 = vmatpush3.bf16.msra.mxu0 %v1145_v3  ;;  %1135 = vmatpush3.bf16.msra.mxu1 %v1145_v3  ;;  %v1154_v14 = vld [vmem:[%s1621_s1 + $0x70] sm:$0xff]   ;;  %v1164_v18 = vld [vmem:[%s1621_s1 + $0x80] sm:$0xff]   ;;  %v1165_v21 = vld [vmem:[%s1622_s0 + $0x1c] ss:$12 sps:$4 sm:$0xff]  }
   0x8   :  { %964 = vmatprep.subr.bf16.mxu0 %v1146_v4  ;;  %1128 = vmatprep.subr.bf16.mxu1 %v1146_v4  ;;  %v1155_v15 = vld [vmem:[%s1621_s1 + $0x30] sm:$0xff]   ;;  %v1167_v22 = vld [vmem:[%s1622_s0 + $0x13c] ss:$12 sps:$4 sm:$0xff]   ;;  %v1169_v24 = vld [vmem:[%s1622_s0 + $0x18] ss:$12 sps:$4 sm:$0xff]  }
   0x9   :  { %647 = vmatprep.mubr.bf16.mxu1 %v1163_v12  ;;  %v1177_v23 = vld [vmem:[%s1621_s1 + $0x88] sm:$0xff]   ;;  %v1170_v25 = vld [vmem:[%s1622_s0 + $0x138] ss:$12 sps:$4 sm:$0xff]   ;;  %v1171_v26 = vld [vmem:[%s1622_s0 + $0x34] ss:$12 sps:$4 sm:$0xff]  }
   0xa   :  { %v1173_v27 = vld [vmem:[%s1622_s0 + $0x154] ss:$12 sps:$4 sm:$0xff]   ;;  %v1175_v28 = vld [vmem:[%s1622_s0 + $0x30] ss:$12 sps:$4 sm:$0xff]   ;;  %v1178_v30 = vld [vmem:[%s1622_s0 + $0x4c] ss:$12 sps:$4 sm:$0xff]  }
   0xb   :  { %965 = vmatpush3.bf16.msra.mxu0 %v1147_v5  ;;  %1136 = vmatpush3.bf16.msra.mxu1 %v1147_v5  ;;  %v1176_v29 = vld [vmem:[%s1622_s0 + $0x150] ss:$12 sps:$4 sm:$0xff]   ;;  %v1180_v31 = vld [vmem:[%s1622_s0 + $0x16c] ss:$12 sps:$4 sm:$0xff]   ;;  %v1182_v32 = vld [vmem:[%s1622_s0 + $0x48] ss:$12 sps:$4 sm:$0xff]  }
   0xc   :  { %966 = vmatprep.subr.bf16.mxu0 %v1148_v6  ;;  %1129 = vmatprep.subr.bf16.mxu1 %v1148_v6  ;;  %v1183_v33 = vld [vmem:[%s1622_s0 + $0x168] ss:$12 sps:$4 sm:$0xff]   ;;  %v1184_v34 = vld [vmem:[%s1622_s0 + $0x64] ss:$12 sps:$4 sm:$0xff]   ;;  %v1187_v36 = vld [vmem:[%s1622_s0 + $0x60] ss:$12 sps:$4 sm:$0xff]  }
   0xd   :  { %v1186_v35 = vld [vmem:[%s1622_s0 + $0x8] ss:$12 sps:$4 sm:$0xff]   ;;  %v1188_v37 = vld [vmem:[%s1622_s0 + $0x20] ss:$12 sps:$4 sm:$0xff]   ;;  %v1191_v39 = vld [vmem:[%s1622_s0 + $0x38] ss:$12 sps:$4 sm:$0xff]  }
   0xe   :  { %v1189_v38 = vld [vmem:[%s1622_s0 + $0x7c] ss:$12 sps:$4 sm:$0xff]   ;;  %v1192_v40 = vld [vmem:[%s1622_s0 + $0x78] ss:$12 sps:$4 sm:$0xff]   ;;  %v1194_v42 = vld [vmem:[%s1622_s0 + $0x94] ss:$12 sps:$4 sm:$0xff]  }
   0xf   :  { %967 = vmatpush3.bf16.msra.mxu0 %v1149_v7  ;;  %1137 = vmatpush3.bf16.msra.mxu1 %v1149_v7  ;;  %v1193_v41 = vld [vmem:[%s1622_s0 + $0x50] ss:$12 sps:$4 sm:$0xff]   ;;  %v1196_v43 = vld [vmem:[%s1622_s0 + $0x68] ss:$12 sps:$4 sm:$0xff]   ;;  %v1198_v45 = vld [vmem:[%s1622_s0 + $0x80] ss:$12 sps:$4 sm:$0xff]  }
  0x10   :  { %968 = vmatprep.subr.bf16.mxu0 %v1150_v8  ;;  %1130 = vmatprep.subr.bf16.mxu1 %v1150_v8  ;;  %v1197_v44 = vld [vmem:[%s1622_s0 + $0x90] ss:$12 sps:$4 sm:$0xff]   ;;  %v1199_v46 = vld [vmem:[%s1622_s0 + $0xac] ss:$12 sps:$4 sm:$0xff]   ;;  %v1202_v48 = vld [vmem:[%s1622_s0 + $0xa8] ss:$12 sps:$4 sm:$0xff]  }
  0x11   :  { %v1201_v47 = vld [vmem:[%s1622_s0 + $0x98] ss:$12 sps:$4 sm:$0xff]   ;;  %v1203_v49 = vld [vmem:[%s1622_s0 + $0xb0] ss:$12 sps:$4 sm:$0xff]   ;;  %v1206_v51 = vld [vmem:[%s1622_s0 + $0xc8] ss:$12 sps:$4 sm:$0xff]  }
  0x12   :  { %v1204_v50 = vld [vmem:[%s1622_s0 + $0xc4] ss:$12 sps:$4 sm:$0xff]   ;;  %v1207_v52 = vld [vmem:[%s1622_s0 + $0xc0] ss:$12 sps:$4 sm:$0xff]   ;;  %v1209_v54 = vld [vmem:[%s1622_s0 + $0xdc] ss:$12 sps:$4 sm:$0xff]  }
  0x13   :  { %969 = vmatpush3.bf16.msra.mxu0 %v1151_v9  ;;  %1138 = vmatpush3.bf16.msra.mxu1 %v1151_v9  ;;  %v1208_v53 = vld [vmem:[%s1622_s0 + $0xe0] ss:$12 sps:$4 sm:$0xff]   ;;  %v1211_v55 = vld [vmem:[%s1622_s0 + $0xf8] ss:$12 sps:$4 sm:$0xff]   ;;  %v1213_v57 = vld [vmem:[%s1622_s0 + $0x110] ss:$12 sps:$4 sm:$0xff]  }
  0x14   :  { %970 = vmatprep.subr.bf16.mxu0 %v1152_v10  ;;  %1131 = vmatprep.subr.bf16.mxu1 %v1152_v10  ;;  %v1212_v56 = vld [vmem:[%s1622_s0 + $0xd8] ss:$12 sps:$4 sm:$0xff]   ;;  %v1214_v58 = vld [vmem:[%s1622_s0 + $0xf4] ss:$12 sps:$4 sm:$0xff]   ;;  %v1217_v60 = vld [vmem:[%s1622_s0 + $0xf0] ss:$12 sps:$4 sm:$0xff]  }
  0x15   :  { %v1216_v59 = vld [vmem:[%s1622_s0 + $0x128] ss:$12 sps:$4 sm:$0xff]   ;;  %v1218_v61 = vld [vmem:[%s1622_s0 + $0x140] ss:$12 sps:$4 sm:$0xff]   ;;  %v1221_v63 = vld [vmem:[%s1622_s0 + $0x158] ss:$12 sps:$4 sm:$0xff]  }
  0x16   :  { %v1219_v62 = vld [vmem:[%s1622_s0 + $0x10c] ss:$12 sps:$4 sm:$0xff]   ;;  %v1222_v0 = vld [vmem:[%s1622_s0 + $0x108] ss:$12 sps:$4 sm:$0xff]   ;;  %v1223_v1 = vld [vmem:[%s1622_s0 + $0x170] ss:$12 sps:$4 sm:$0xff]  }
  0x17   :  { %971 = vmatpush3.bf16.msra.mxu0 %v1153_v13  ;;  %1139 = vmatpush3.bf16.msra.mxu1 %v1153_v13 }
  0x18   :  { %972 = vmatprep.subr.bf16.mxu0 %v1154_v14  ;;  %1132 = vmatprep.subr.bf16.mxu1 %v1154_v14 }
  0x1b   :  { %973 = vmatpush3.bf16.msra.mxu0 %v1155_v15  ;;  %1140 = vmatpush3.bf16.msra.mxu1 %v1155_v15 }
  0x1c   :  { %974 = vmatprep.subr.bf16.mxu0 %v1156_v16  ;;  %1133 = vmatprep.subr.bf16.mxu1 %v1156_v16 }
  0x1f   :  { %975 = vmatpush3.bf16.msra.mxu0 %v1157_v17  ;;  %1141 = vmatpush3.bf16.msra.mxu1 %v1157_v17 }
  0x20   :  { %1090 = vmatprep.subr.bf16.mxu1 %v1164_v18 }
  0x22   :  { %552 = vmatmul.mubr.bf16.vlgmr.msra.gmra.mrb[0].mxu0 %v1158_v19  ;;  %648 = vmatmul.mubr.bf16.vlgmr.msra.gmra.mrb[0].mxu1 %v1161_v20 }
  0x23   :  { %1091 = vmatpush3.bf16.msra.mxu1 %v1164_v18  ;;  %559 = vmatprep.mubr.bf16.mxu0 %v1165_v21 }
  0x24   :  { %655 = vmatprep.mubr.bf16.mxu1 %v1167_v22  ;;  %1092 = vmatprep.subr.bf16.mxu1 %v1177_v23 }
  0x27   :  { %1093 = vmatpush3.bf16.msra.mxu1 %v1177_v23 }
  0x2a   :  { %560 = vmatmul.mubr.bf16.gmra.mrb[4].mxu0 %v1169_v24  ;;  %656 = vmatmul.mubr.bf16.gmra.mrb[4].mxu1 %v1170_v25 }
  0x2b   :  { %567 = vmatprep.mubr.bf16.mxu0 %v1171_v26  ;;  %663 = vmatprep.mubr.bf16.mxu1 %v1173_v27 }
  0x32   :  { %568 = vmatmul.mubr.bf16.gmra.mrb[8].mxu0 %v1175_v28  ;;  %664 = vmatmul.mubr.bf16.gmra.mrb[8].mxu1 %v1176_v29 }
  0x33   :  { %575 = vmatprep.mubr.bf16.mxu0 %v1178_v30  ;;  %671 = vmatprep.mubr.bf16.mxu1 %v1180_v31 }
  0x3a   :  { %576 = vmatmul.mubr.bf16.gmra.mrb[12].mxu0 %v1182_v32  ;;  %672 = vmatmul.mubr.bf16.gmra.mrb[12].mxu1 %v1183_v33 }
  0x3b   :  { %583 = vmatprep.mubr.bf16.mxu0 %v1184_v34  ;;  %1094 = vmatprep.mubr.msk.bf16.mxu1 %vm470_vm0, %v1186_v35 }
  0x42   :  { %584 = vmatmul.mubr.bf16.gmra.mrb[16].mxu0 %v1187_v36  ;;  %1095 = vmatmul.mubr.msk.bf16.vlgmr.msra.gmra.mrb[16].mxu1 %vm470_vm0, %v1188_v37 }
  0x43   :  { %591 = vmatprep.mubr.bf16.mxu0 %v1189_v38  ;;  %1098 = vmatprep.mubr.msk.bf16.mxu1 %vm470_vm0, %v1191_v39 }
  0x4a   :  { %592 = vmatmul.mubr.bf16.gmra.mrb[20].mxu0 %v1192_v40  ;;  %1099 = vmatmul.mubr.msk.bf16.gmra.mrb[20].mxu1 %vm470_vm0, %v1193_v41 }
  0x4b   :  { %599 = vmatprep.mubr.bf16.mxu0 %v1194_v42  ;;  %1102 = vmatprep.mubr.msk.bf16.mxu1 %vm470_vm0, %v1196_v43 }
  0x52   :  { %600 = vmatmul.mubr.bf16.gmra.mrb[24].mxu0 %v1197_v44  ;;  %1103 = vmatmul.mubr.msk.bf16.gmra.mrb[24].mxu1 %vm470_vm0, %v1198_v45 }
  0x53   :  { %607 = vmatprep.mubr.bf16.mxu0 %v1199_v46  ;;  %1106 = vmatprep.mubr.msk.bf16.mxu1 %vm470_vm0, %v1201_v47 }
  0x5a   :  { %608 = vmatmul.mubr.bf16.gmra.mrb[28].mxu0 %v1202_v48  ;;  %1107 = vmatmul.mubr.msk.bf16.gmra.mrb[28].mxu1 %vm470_vm0, %v1203_v49 }
  0x5b   :  { %615 = vmatprep.mubr.bf16.mxu0 %v1204_v50  ;;  %1110 = vmatprep.mubr.msk.bf16.mxu1 %vm470_vm0, %v1206_v51  ;;  %v1477_v50 = vld [vmem:[%s1623_s2] ss:$0 sm:$0xff] }
  0x62   :  { %616 = vmatmul.mubr.bf16.gmra.mrb[32].mxu0 %v1207_v52  ;;  %1111 = vmatmul.mubr.msk.bf16.gmra.mrb[32].mxu1 %vm470_vm0, %v1208_v53 }
  0x63   :  { %623 = vmatprep.mubr.bf16.mxu0 %v1209_v54  ;;  %1114 = vmatprep.mubr.msk.bf16.mxu1 %vm470_vm0, %v1211_v55 }
  0x6a   :  { %624 = vmatmul.mubr.bf16.gmra.mrb[36].mxu0 %v1212_v56  ;;  %1115 = vmatmul.mubr.msk.bf16.gmra.mrb[36].mxu1 %vm470_vm0, %v1213_v57 }
  0x6b   :  { %631 = vmatprep.mubr.bf16.mxu0 %v1214_v58  ;;  %1118 = vmatprep.mubr.msk.bf16.mxu1 %vm470_vm0, %v1216_v59 }
  0x72   :  { %632 = vmatmul.mubr.bf16.gmra.mrb[40].mxu0 %v1217_v60  ;;  %1119 = vmatmul.mubr.msk.bf16.gmra.mrb[40].mxu1 %vm470_vm0, %v1218_v61 }
  0x73   :  { %639 = vmatprep.mubr.bf16.mxu0 %v1219_v62  ;;  %1122 = vmatprep.mubr.msk.bf16.mxu1 %vm470_vm0, %v1221_v63 }
  0x7a   :  { %640 = vmatmul.mubr.bf16.gmra.mrb[44].mxu0 %v1222_v0  ;;  %1123 = vmatmul.mubr.msk.bf16.gmra.mrb[44].mxu1 %vm470_vm0, %v1223_v1 }
  0xf5   :  { %v976_v2 = vpop.f32.mrb[0].mxu0  ;;  %v1048_v3 = vpop.f32.mrb[0].mxu1 }
  0xf6   :  { %v977_v4 = vpop.f32.mrb[1].mxu0  ;;  %v1049_v5 = vpop.f32.mrb[1].mxu1 }
  0xf7   :  { %v978_v6 = vadd.f32 %v977_v4, %v976_v2  ;;  %v979_v7 = vpop.f32.mrb[2].mxu0  ;;  %v1458_v8 = vadd.f32 %v1049_v5, %v1048_v3  ;;  %v1051_v9 = vpop.f32.mrb[2].mxu1 }
  0xf8   :  { %v980_v10 = vpop.f32.mrb[3].mxu0  ;;  %v1052_v11 = vpop.f32.mrb[3].mxu1 }
  0xf9   :  { %v981_v12 = vadd.f32 %v980_v10, %v979_v7  ;;  %v1460_v13 = vadd.f32 %v1052_v11, %v1051_v9  ;;  %v554_v54 = vadd.f32 %v978_v6, %v1477_v50 }
  0xfb   :  { %v557_v63 = vadd.f32 %v981_v12, %v1477_v50 }
  0xfd   :  { %v982_v14 = vpop.f32.mrb[4].mxu0  ;;  %v1054_v15 = vpop.f32.mrb[4].mxu1 }
  0xfe   :  { %v983_v16 = vpop.f32.mrb[5].mxu0  ;;  %v1055_v17 = vpop.f32.mrb[5].mxu1 }
  0xff   :  { %v984_v18 = vadd.f32 %v983_v16, %v982_v14  ;;  %v985_v19 = vpop.f32.mrb[6].mxu0  ;;  %v1462_v20 = vadd.f32 %v1055_v17, %v1054_v15  ;;  %v1057_v21 = vpop.f32.mrb[6].mxu1 }
 0x100   :  { %v986_v22 = vpop.f32.mrb[7].mxu0  ;;  %v1058_v23 = vpop.f32.mrb[7].mxu1 }
 0x101   :  { %v987_v24 = vadd.f32 %v986_v22, %v985_v19  ;;  %v1464_v25 = vadd.f32 %v1058_v23, %v1057_v21  ;;  %v562_v51 = vadd.f32 %v984_v18, %v1477_v50 }
 0x103   :  { %v565_v58 = vadd.f32 %v987_v24, %v1477_v50 }
 0x105   :  { %v988_v26 = vpop.f32.mrb[8].mxu0  ;;  %v1060_v27 = vpop.f32.mrb[8].mxu1 }
 0x106   :  { %v989_v28 = vpop.f32.mrb[9].mxu0  ;;  %v1061_v29 = vpop.f32.mrb[9].mxu1 }
 0x107   :  { %v990_v30 = vadd.f32 %v989_v28, %v988_v26  ;;  %v991_v31 = vpop.f32.mrb[10].mxu0  ;;  %v1466_v32 = vadd.f32 %v1061_v29, %v1060_v27  ;;  %v1063_v33 = vpop.f32.mrb[10].mxu1 }
 0x108   :  { %v992_v34 = vpop.f32.mrb[11].mxu0  ;;  %v1064_v35 = vpop.f32.mrb[11].mxu1 }
 0x109   :  { %v993_v36 = vadd.f32 %v992_v34, %v991_v31  ;;  %v1468_v37 = vadd.f32 %v1064_v35, %v1063_v33  ;;  %v570_v9 = vadd.f32 %v990_v30, %v1477_v50 }
 0x10b   :  { %v573_v19 = vadd.f32 %v993_v36, %v1477_v50 }
 0x10d   :  { %v994_v38 = vpop.f32.mrb[12].mxu0  ;;  %v1066_v39 = vpop.f32.mrb[12].mxu1 }
 0x10e   :  { %v995_v40 = vpop.f32.mrb[13].mxu0  ;;  %v1067_v41 = vpop.f32.mrb[13].mxu1 }
 0x10f   :  { %v996_v42 = vadd.f32 %v995_v40, %v994_v38  ;;  %v997_v43 = vpop.f32.mrb[14].mxu0  ;;  %v1470_v44 = vadd.f32 %v1067_v41, %v1066_v39  ;;  %v1069_v45 = vpop.f32.mrb[14].mxu1 }
 0x110   :  { %v998_v46 = vpop.f32.mrb[15].mxu0  ;;  %v1070_v47 = vpop.f32.mrb[15].mxu1 }
 0x111   :  { %v999_v48 = vadd.f32 %v998_v46, %v997_v43  ;;  %v1472_v49 = vadd.f32 %v1070_v47, %v1069_v45  ;;  %v578_v5 = vadd.f32 %v996_v42, %v1477_v50 }
 0x113   :  { %v581_v14 = vadd.f32 %v999_v48, %v1477_v50 }
 0x115   :  { %v1000_v52 = vpop.f32.mrb[16].mxu0  ;;  %v1096_v53 = vpop.f32.mrb[16].mxu1 }
 0x116   :  { %v723_v55 = vadd.f32 %v1096_v53, %v562_v51  ;;  %v1001_v56 = vpop.f32.mrb[17].mxu0  ;;  %v714_v57 = vpop.f32.mrb[17].mxu1 }
 0x117   :  { %v1002_v59 = vadd.f32 %v1001_v56, %v1000_v52  ;;  %v715_v60 = vadd.f32 %v714_v57, %v554_v54  ;;  %v1003_v61 = vpop.f32.mrb[18].mxu0  ;;  %v1097_v62 = vpop.f32.mrb[18].mxu1 }
 0x118   :  { %843 = vst [vmem:[%s1624_s3 + $0x10] sm:$0xff] %v723_v55  ;;  %v726_v0 = vadd.f32 %v1097_v62, %v565_v58  ;;  %v1004_v1 = vpop.f32.mrb[19].mxu0  ;;  %v717_v2 = vpop.f32.mrb[19].mxu1 }
 0x119   :  { %841 = vst [vmem:[%s1624_s3] sm:$0xff] %v715_v60  ;;  %v1005_v3 = vadd.f32 %v1004_v1, %v1003_v61  ;;  %v718_v4 = vadd.f32 %v717_v2, %v557_v63  ;;  %v586_v30 = vadd.f32 %v1002_v59, %v1477_v50 }
 0x11a   :  { %844 = vst [vmem:[%s1624_s3 + $0x18] sm:$0xff] %v726_v0 }
 0x11b   :  { %842 = vst [vmem:[%s1624_s3 + $0x8] sm:$0xff] %v718_v4  ;;  %v589_v41 = vadd.f32 %v1005_v3, %v1477_v50 }
 0x11d   :  { %v1006_v6 = vpop.f32.mrb[20].mxu0  ;;  %v1100_v7 = vpop.f32.mrb[20].mxu1 }
 0x11e   :  { %v739_v10 = vadd.f32 %v1100_v7, %v578_v5  ;;  %v1007_v11 = vpop.f32.mrb[21].mxu0  ;;  %v730_v12 = vpop.f32.mrb[21].mxu1 }
 0x11f   :  { %v1008_v15 = vadd.f32 %v1007_v11, %v1006_v6  ;;  %v731_v16 = vadd.f32 %v730_v12, %v570_v9  ;;  %v1009_v17 = vpop.f32.mrb[22].mxu0  ;;  %v1101_v18 = vpop.f32.mrb[22].mxu1 }
 0x120   :  { %847 = vst [vmem:[%s1624_s3 + $0x30] sm:$0xff] %v739_v10  ;;  %v742_v21 = vadd.f32 %v1101_v18, %v581_v14  ;;  %v1010_v22 = vpop.f32.mrb[23].mxu0  ;;  %v733_v23 = vpop.f32.mrb[23].mxu1 }
 0x121   :  { %845 = vst [vmem:[%s1624_s3 + $0x20] sm:$0xff] %v731_v16  ;;  %v1011_v24 = vadd.f32 %v1010_v22, %v1009_v17  ;;  %v734_v26 = vadd.f32 %v733_v23, %v573_v19  ;;  %v594_v27 = vadd.f32 %v1008_v15, %v1477_v50 }
 0x122   :  { %848 = vst [vmem:[%s1624_s3 + $0x38] sm:$0xff] %v742_v21 }
 0x123   :  { %846 = vst [vmem:[%s1624_s3 + $0x28] sm:$0xff] %v734_v26  ;;  %v597_v35 = vadd.f32 %v1011_v24, %v1477_v50 }
 0x125   :  { %v1012_v28 = vpop.f32.mrb[24].mxu0  ;;  %v1104_v29 = vpop.f32.mrb[24].mxu1 }
 0x126   :  { %v755_v31 = vadd.f32 %v1104_v29, %v594_v27  ;;  %v1013_v33 = vpop.f32.mrb[25].mxu0  ;;  %v746_v34 = vpop.f32.mrb[25].mxu1 }
 0x127   :  { %v1014_v36 = vadd.f32 %v1013_v33, %v1012_v28  ;;  %v747_v38 = vadd.f32 %v746_v34, %v586_v30  ;;  %v1015_v39 = vpop.f32.mrb[26].mxu0  ;;  %v1105_v40 = vpop.f32.mrb[26].mxu1 }
 0x128   :  { %851 = vst [vmem:[%s1624_s3 + $0x50] sm:$0xff] %v755_v31  ;;  %v758_v42 = vadd.f32 %v1105_v40, %v597_v35  ;;  %v1016_v43 = vpop.f32.mrb[27].mxu0  ;;  %v749_v45 = vpop.f32.mrb[27].mxu1 }
 0x129   :  { %849 = vst [vmem:[%s1624_s3 + $0x40] sm:$0xff] %v747_v38  ;;  %v1017_v46 = vadd.f32 %v1016_v43, %v1015_v39  ;;  %v750_v47 = vadd.f32 %v749_v45, %v589_v41  ;;  %v602_v52 = vadd.f32 %v1014_v36, %v1477_v50  ;;  %v658_v36 = vadd.f32 %v1462_v20, %v1477_v50 }
 0x12a   :  { %852 = vst [vmem:[%s1624_s3 + $0x58] sm:$0xff] %v758_v42  ;;  %v650_v41 = vadd.f32 %v1458_v8, %v1477_v50 }
 0x12b   :  { %850 = vst [vmem:[%s1624_s3 + $0x48] sm:$0xff] %v750_v47  ;;  %v605_v59 = vadd.f32 %v1017_v46, %v1477_v50  ;;  %v661_v46 = vadd.f32 %v1464_v25, %v1477_v50 }
 0x12d   :  { %v1018_v48 = vpop.f32.mrb[28].mxu0  ;;  %v1108_v51 = vpop.f32.mrb[28].mxu1 }
 0x12e   :  { %v1019_v53 = vpop.f32.mrb[29].mxu0  ;;  %v762_v54 = vpop.f32.mrb[29].mxu1 }
 0x12f   :  { %v1020_v55 = vadd.f32 %v1019_v53, %v1018_v48  ;;  %v763_v56 = vadd.f32 %v762_v54, %v602_v52  ;;  %v1021_v57 = vpop.f32.mrb[30].mxu0  ;;  %v1109_v58 = vpop.f32.mrb[30].mxu1  ;;  %v653_v52 = vadd.f32 %v1460_v13, %v1477_v50 }
 0x130   :  { %v1022_v60 = vpop.f32.mrb[31].mxu0  ;;  %v765_v61 = vpop.f32.mrb[31].mxu1 }
 0x131   :  { %v610_v62 = vadd.f32 %v1020_v55, %v1477_v50  ;;  %853 = vst [vmem:[%s1624_s3 + $0x60] sm:$0xff] %v763_v56  ;;  %v1023_v63 = vadd.f32 %v1022_v60, %v1021_v57  ;;  %v766_v0 = vadd.f32 %v765_v61, %v605_v59 }
 0x133   :  { %v771_v1 = vadd.f32 %v1108_v51, %v610_v62  ;;  %v613_v2 = vadd.f32 %v1023_v63, %v1477_v50  ;;  %854 = vst [vmem:[%s1624_s3 + $0x68] sm:$0xff] %v766_v0  ;;  %v666_v62 = vadd.f32 %v1466_v32, %v1477_v50 }
 0x135   :  { %855 = vst [vmem:[%s1624_s3 + $0x70] sm:$0xff] %v771_v1  ;;  %v774_v3 = vadd.f32 %v1109_v58, %v613_v2  ;;  %v1024_v4 = vpop.f32.mrb[32].mxu0  ;;  %v1112_v5 = vpop.f32.mrb[32].mxu1  ;;  %v674_v58 = vadd.f32 %v1470_v44, %v1477_v50  ;;  %v677_v2 = vadd.f32 %v1472_v49, %v1477_v50 }
 0x136   :  { %v1025_v6 = vpop.f32.mrb[33].mxu0  ;;  %v778_v7 = vpop.f32.mrb[33].mxu1 }
 0x137   :  { %856 = vst [vmem:[%s1624_s3 + $0x78] sm:$0xff] %v774_v3  ;;  %v1026_v9 = vadd.f32 %v1025_v6, %v1024_v4  ;;  %v1027_v10 = vpop.f32.mrb[34].mxu0  ;;  %v1113_v11 = vpop.f32.mrb[34].mxu1  ;;  %v669_v6 = vadd.f32 %v1468_v37, %v1477_v50 }
 0x138   :  { %v1028_v12 = vpop.f32.mrb[35].mxu0  ;;  %v781_v14 = vpop.f32.mrb[35].mxu1 }
 0x139   :  { %v618_v15 = vadd.f32 %v1026_v9, %v1477_v50  ;;  %v1029_v16 = vadd.f32 %v1028_v12, %v1027_v10 }
 0x13b   :  { %v779_v17 = vadd.f32 %v778_v7, %v618_v15  ;;  %v621_v18 = vadd.f32 %v1029_v16, %v1477_v50 }
 0x13d   :  { %857 = vst [vmem:[%s1624_s3 + $0x80] sm:$0xff] %v779_v17  ;;  %v782_v19 = vadd.f32 %v781_v14, %v621_v18  ;;  %v1030_v21 = vpop.f32.mrb[36].mxu0  ;;  %v1548_v22 = vpop.f32.mrb[36].mxu1 }
 0x13e   :  { %v1031_v23 = vpop.f32.mrb[37].mxu0  ;;  %v794_v24 = vpop.f32.mrb[37].mxu1 }
 0x13f   :  { %858 = vst [vmem:[%s1624_s3 + $0x88] sm:$0xff] %v782_v19  ;;  %v1032_v26 = vadd.f32 %v1031_v23, %v1030_v21  ;;  %v1033_v27 = vpop.f32.mrb[38].mxu0  ;;  %v1553_v28 = vpop.f32.mrb[38].mxu1 }
 0x140   :  { %v1034_v29 = vpop.f32.mrb[39].mxu0  ;;  %v797_v30 = vpop.f32.mrb[39].mxu1 }
 0x141   :  { %v626_v31 = vadd.f32 %v1032_v26, %v1477_v50  ;;  %v1035_v33 = vadd.f32 %v1034_v29, %v1033_v27 }
 0x143   :  { %v787_v34 = vadd.f32 %v1112_v5, %v626_v31  ;;  %v629_v35 = vadd.f32 %v1035_v33, %v1477_v50 }
 0x145   :  { %859 = vst [vmem:[%s1624_s3 + $0x90] sm:$0xff] %v787_v34  ;;  %v790_v38 = vadd.f32 %v1113_v11, %v629_v35  ;;  %v1036_v39 = vpop.f32.mrb[40].mxu0  ;;  %v1120_v40 = vpop.f32.mrb[40].mxu1 }
 0x146   :  { %v819_v42 = vadd.f32 %v1120_v40, %v658_v36  ;;  %v1037_v43 = vpop.f32.mrb[41].mxu0  ;;  %v810_v45 = vpop.f32.mrb[41].mxu1 }
 0x147   :  { %860 = vst [vmem:[%s1624_s3 + $0x98] sm:$0xff] %v790_v38  ;;  %v1038_v20 = vadd.f32 %v1037_v43, %v1036_v39  ;;  %v811_v47 = vadd.f32 %v810_v45, %v650_v41  ;;  %v1039_v48 = vpop.f32.mrb[42].mxu0  ;;  %v1121_v51 = vpop.f32.mrb[42].mxu1 }
 0x148   :  { %867 = vst [vmem:[%s1624_s3 + $0xd0] sm:$0xff] %v819_v42  ;;  %v822_v8 = vadd.f32 %v1121_v51, %v661_v46  ;;  %v1040_v53 = vpop.f32.mrb[43].mxu0  ;;  %v813_v54 = vpop.f32.mrb[43].mxu1 }
 0x149   :  { %v634_v25 = vadd.f32 %v1038_v20, %v1477_v50  ;;  %865 = vst [vmem:[%s1624_s3 + $0xc0] sm:$0xff] %v811_v47  ;;  %v1041_v55 = vadd.f32 %v1040_v53, %v1039_v48  ;;  %v814_v56 = vadd.f32 %v813_v54, %v653_v52 }
 0x14a   :  { %868 = vst [vmem:[%s1624_s3 + $0xd8] sm:$0xff] %v822_v8 }
 0x14b   :  { %v795_v13 = vadd.f32 %v794_v24, %v634_v25  ;;  %v637_v57 = vadd.f32 %v1041_v55, %v1477_v50  ;;  %866 = vst [vmem:[%s1624_s3 + $0xc8] sm:$0xff] %v814_v56 }
 0x14d   :  { %861 = vst [vmem:[%s1624_s3 + $0xa0] sm:$0xff] %v795_v13  ;;  %v798_v59 = vadd.f32 %v797_v30, %v637_v57  ;;  %v1042_v60 = vpop.f32.mrb[44].mxu0  ;;  %v1124_v61 = vpop.f32.mrb[44].mxu1 }
 0x14e   :  { %v835_v63 = vadd.f32 %v1124_v61, %v674_v58  ;;  %v1043_v0 = vpop.f32.mrb[45].mxu0  ;;  %v826_v1 = vpop.f32.mrb[45].mxu1 }
 0x14f   :  { %862 = vst [vmem:[%s1624_s3 + $0xa8] sm:$0xff] %v798_v59  ;;  %v1044_v44 = vadd.f32 %v1043_v0, %v1042_v60  ;;  %v827_v3 = vadd.f32 %v826_v1, %v666_v62  ;;  %v1045_v4 = vpop.f32.mrb[46].mxu0  ;;  %v1125_v5 = vpop.f32.mrb[46].mxu1 }
 0x150   :  { %871 = vst [vmem:[%s1624_s3 + $0xf0] sm:$0xff] %v835_v63  ;;  %v838_v32 = vadd.f32 %v1125_v5, %v677_v2  ;;  %v1046_v7 = vpop.f32.mrb[47].mxu0  ;;  %v829_v9 = vpop.f32.mrb[47].mxu1 }
 0x151   :  { %v642_v49 = vadd.f32 %v1044_v44, %v1477_v50  ;;  %869 = vst [vmem:[%s1624_s3 + $0xe0] sm:$0xff] %v827_v3  ;;  %v1047_v10 = vadd.f32 %v1046_v7, %v1045_v4  ;;  %v830_v11 = vadd.f32 %v829_v9, %v669_v6 }
 0x152   :  { %872 = vst [vmem:[%s1624_s3 + $0xf8] sm:$0xff] %v838_v32 }
 0x153   :  { %v803_v37 = vadd.f32 %v1548_v22, %v642_v49  ;;  %v645_v12 = vadd.f32 %v1047_v10, %v1477_v50  ;;  %870 = vst [vmem:[%s1624_s3 + $0xe8] sm:$0xff] %v830_v11 }
 0x155   :  { %863 = vst [vmem:[%s1624_s3 + $0xb0] sm:$0xff] %v803_v37  ;;  %v806_v14 = vadd.f32 %v1553_v28, %v645_v12 }
 0x157   :  { %864 = vst [vmem:[%s1624_s3 + $0xb8] sm:$0xff] %v806_v14 }

// kernel: f_net_forward.96
= control target key start
LH: loop header
LB: loop body
LE: loop exit
PB: predicated region body
PF: predicated region fallthrough
CT: control target
= control target key end

     0   :  { %v722_v0 = vmov 0.0   ;;  %vm723_vm0 = vmmov 0   ;;  %s981_s1 = inlined_call_operand.vmem [shape: bf16[128,128], index: 1, kind: input, shape index: {}]   ;;  %s982_s0 = inlined_call_operand.vmem [shape: bf16[144,128], index: 0, kind: input, shape index: {}]   ;;  %s983_s3 = inlined_call_operand.vmem [shape: bf16[128,128], index: 3, kind: input, shape index: {}]   ;;  %s984_s2 = inlined_call_operand.vmem [shape: f32[1,128], index: 2, kind: input, shape index: {}]   ;;  %s985_s4 = inlined_call_operand.vmem [shape: f32[1,128], index: 4, kind: input, shape index: {}]   ;;  %s986_s5 = inlined_call_operand.vmem [shape: f32[144,128], index: 5, kind: output, shape index: {}]  }
   0x1   :  { %591 = vmatprep.subr.bf16.mxu0 %v722_v0  ;;  %v697_v1 = vld [vmem:[%s981_s1] sm:$0xff]   ;;  %607 = vmatprep.mubr.msk.bf16.mxu0 %vm723_vm0, %v722_v0  ;;  %v698_v2 = vld [vmem:[%s981_s1 + $0x8] sm:$0xff]   ;;  %v699_v3 = vld [vmem:[%s981_s1 + $0x10] sm:$0xff]  }
   0x2   :  { %643 = vmatprep.subr.bf16.mxu1 %v722_v0  ;;  %659 = vmatprep.mubr.msk.bf16.mxu1 %vm723_vm0, %v722_v0  ;;  %v700_v4 = vld [vmem:[%s981_s1 + $0x18] sm:$0xff]   ;;  %v701_v5 = vld [vmem:[%s981_s1 + $0x20] sm:$0xff]   ;;  %v702_v7 = vld [vmem:[%s981_s1 + $0x28] sm:$0xff]  }
   0x3   :  { %592 = vmatpush3.bf16.msra.mxu0 %v697_v1  ;;  %v714_v6 = vld [vmem:[%s983_s3] sm:$0xff]   ;;  %v715_v8 = vld [vmem:[%s983_s3 + $0x8] sm:$0xff]   ;;  %v703_v9 = vld [vmem:[%s981_s1 + $0x30] sm:$0xff]  }
   0x4   :  { %593 = vmatprep.subr.bf16.mxu0 %v722_v0  ;;  %644 = vmatpush3.bf16.msra.mxu1 %v714_v6  ;;  %v716_v10 = vld [vmem:[%s983_s3 + $0x10] sm:$0xff]   ;;  %v704_v11 = vld [vmem:[%s981_s1 + $0x38] sm:$0xff]   ;;  %v705_v13 = vld [vmem:[%s982_s0] sm:$0xff]  }
   0x5   :  { %645 = vmatprep.subr.bf16.mxu1 %v722_v0  ;;  %v717_v12 = vld [vmem:[%s983_s3 + $0x18] sm:$0xff]   ;;  %v718_v14 = vld [vmem:[%s983_s3 + $0x20] sm:$0xff]   ;;  %v719_v15 = vld [vmem:[%s983_s3 + $0x28] sm:$0xff]  }
   0x6   :  { %v706_v16 = vld [vmem:[%s982_s0 + $0x8] sm:$0xff]   ;;  %v707_v17 = vld [vmem:[%s982_s0 + $0x10] sm:$0xff]   ;;  %v708_v18 = vld [vmem:[%s982_s0 + $0x18] sm:$0xff]  }
   0x7   :  { %594 = vmatpush3.bf16.msra.mxu0 %v698_v2  ;;  %v709_v19 = vld [vmem:[%s982_s0 + $0x20] sm:$0xff]   ;;  %v710_v20 = vld [vmem:[%s982_s0 + $0x28] sm:$0xff]   ;;  %v711_v21 = vld [vmem:[%s982_s0 + $0x30] sm:$0xff]  }
   0x8   :  { %595 = vmatprep.subr.bf16.mxu0 %v722_v0  ;;  %646 = vmatpush3.bf16.msra.mxu1 %v715_v8  ;;  %v712_v22 = vld [vmem:[%s982_s0 + $0x38] sm:$0xff]   ;;  %v713_v23 = vld [vmem:[%s982_s0 + $0x40] sm:$0xff]   ;;  %v720_v24 = vld [vmem:[%s983_s3 + $0x30] sm:$0xff]  }
   0x9   :  { %647 = vmatprep.subr.bf16.mxu1 %v722_v0  ;;  %v721_v25 = vld [vmem:[%s983_s3 + $0x38] sm:$0xff]   ;;  %v868_v26 = vld [vmem:[%s984_s2] ss:$0 sm:$0xff] }
   0xb   :  { %596 = vmatpush3.bf16.msra.mxu0 %v699_v3 }
   0xc   :  { %597 = vmatprep.subr.bf16.mxu0 %v722_v0  ;;  %648 = vmatpush3.bf16.msra.mxu1 %v716_v10 }
   0xd   :  { %649 = vmatprep.subr.bf16.mxu1 %v722_v0 }
   0xf   :  { %598 = vmatpush3.bf16.msra.mxu0 %v700_v4 }
  0x10   :  { %599 = vmatprep.subr.bf16.mxu0 %v722_v0  ;;  %650 = vmatpush3.bf16.msra.mxu1 %v717_v12 }
  0x11   :  { %651 = vmatprep.subr.bf16.mxu1 %v722_v0 }
  0x13   :  { %600 = vmatpush3.bf16.msra.mxu0 %v701_v5 }
  0x14   :  { %601 = vmatprep.subr.bf16.mxu0 %v722_v0  ;;  %652 = vmatpush3.bf16.msra.mxu1 %v718_v14 }
  0x15   :  { %653 = vmatprep.subr.bf16.mxu1 %v722_v0 }
  0x17   :  { %602 = vmatpush3.bf16.msra.mxu0 %v702_v7 }
  0x18   :  { %603 = vmatprep.subr.bf16.mxu0 %v722_v0  ;;  %654 = vmatpush3.bf16.msra.mxu1 %v719_v15 }
  0x19   :  { %655 = vmatprep.subr.bf16.mxu1 %v722_v0 }
  0x1b   :  { %604 = vmatpush3.bf16.msra.mxu0 %v703_v9 }
  0x1c   :  { %605 = vmatprep.subr.bf16.mxu0 %v722_v0  ;;  %656 = vmatpush3.bf16.msra.mxu1 %v720_v24 }
  0x1d   :  { %657 = vmatprep.subr.bf16.mxu1 %v722_v0 }
  0x1f   :  { %606 = vmatpush3.bf16.msra.mxu0 %v704_v11 }
  0x20   :  { %658 = vmatpush3.bf16.msra.mxu1 %v721_v25 }
  0x22   :  { %608 = vmatmul.mubr.bf16.vlgmr.msra.gmra.mrb[0].mxu0 %v705_v13 }
  0x23   :  { %611 = vmatprep.mubr.msk.bf16.mxu0 %vm723_vm0, %v722_v0 }
  0x2a   :  { %612 = vmatmul.mubr.bf16.gmra.mrb[4].mxu0 %v706_v16 }
  0x2b   :  { %615 = vmatprep.mubr.msk.bf16.mxu0 %vm723_vm0, %v722_v0 }
  0x32   :  { %616 = vmatmul.mubr.bf16.gmra.mrb[8].mxu0 %v707_v17 }
  0x33   :  { %619 = vmatprep.mubr.msk.bf16.mxu0 %vm723_vm0, %v722_v0 }
  0x3a   :  { %620 = vmatmul.mubr.bf16.gmra.mrb[12].mxu0 %v708_v18 }
  0x3b   :  { %623 = vmatprep.mubr.msk.bf16.mxu0 %vm723_vm0, %v722_v0 }
  0x42   :  { %624 = vmatmul.mubr.bf16.gmra.mrb[16].mxu0 %v709_v19 }
  0x43   :  { %627 = vmatprep.mubr.msk.bf16.mxu0 %vm723_vm0, %v722_v0 }
  0x4a   :  { %628 = vmatmul.mubr.bf16.gmra.mrb[20].mxu0 %v710_v20 }
  0x4b   :  { %631 = vmatprep.mubr.msk.bf16.mxu0 %vm723_vm0, %v722_v0 }
  0x52   :  { %632 = vmatmul.mubr.bf16.gmra.mrb[24].mxu0 %v711_v21 }
  0x53   :  { %635 = vmatprep.mubr.msk.bf16.mxu0 %vm723_vm0, %v722_v0 }
  0x5a   :  { %636 = vmatmul.mubr.bf16.gmra.mrb[28].mxu0 %v712_v22 }
  0x5b   :  { %639 = vmatprep.mubr.msk.bf16.mxu0 %vm723_vm0, %v722_v0 }
  0x62   :  { %640 = vmatmul.mubr.bf16.gmra.mrb[32].mxu0 %v713_v23 }
  0xf5   :  { %v198_v27 = vpop.f32.mrb[0].mxu0 }
  0xf6   :  { %v199_v28 = vadd.f32 %v868_v26, %v198_v27  ;;  %v609_v29 = vpop.f32.mrb[1].mxu0 }
  0xf7   :  { %v201_v30 = vpop.f32.mrb[2].mxu0 }
  0xf8   :  { %v287_v31 = vmul.f32 0.1, %v199_v28  ;;  %v202_v32 = vadd.f32 %v868_v26, %v201_v30  ;;  %v610_v33 = vpop.f32.mrb[3].mxu0  ;;  %vm269_vm1 = vcmp.ge.f32.partialorder %v199_v28, 0.0 }
  0xfa   :  { %vm270_vm2 = vcmp.ge.f32.partialorder %v202_v32, 0.0  ;;  %v288_v34 = vmul.f32 0.1, %v202_v32  ;;  %v305_v35 = vsel %vm269_vm1, %v199_v28, %v287_v31 }
  0xfc   :  { %v306_v36 = vsel %vm270_vm2, %v202_v32, %v288_v34 }
  0xfd   :  { %v206_v37 = vpop.f32.mrb[4].mxu0  ;;  %v323_v38 = vpack.c.bf16 %v306_v36, %v305_v35 }
  0xfe   :  { %v207_v39 = vadd.f32 %v868_v26, %v206_v37  ;;  %v613_v40 = vpop.f32.mrb[5].mxu0 }
  0xff   :  { %v209_v41 = vpop.f32.mrb[6].mxu0  ;;  %660 = vmatmul.mubr.bf16.vlgmr.msra.gmra.mrb[0].mxu1 %v323_v38 }
 0x100   :  { %v289_v42 = vmul.f32 0.1, %v207_v39  ;;  %v210_v43 = vadd.f32 %v868_v26, %v209_v41  ;;  %v614_v44 = vpop.f32.mrb[7].mxu0  ;;  %663 = vmatprep.mubr.msk.bf16.mxu1 %vm723_vm0, %v722_v0  ;;  %vm271_vm3 = vcmp.ge.f32.partialorder %v207_v39, 0.0 }
 0x102   :  { %vm272_vm4 = vcmp.ge.f32.partialorder %v210_v43, 0.0  ;;  %v290_v45 = vmul.f32 0.1, %v210_v43  ;;  %v307_v46 = vsel %vm271_vm3, %v207_v39, %v289_v42 }
 0x104   :  { %v308_v47 = vsel %vm272_vm4, %v210_v43, %v290_v45 }
 0x105   :  { %v214_v48 = vpop.f32.mrb[8].mxu0  ;;  %v324_v49 = vpack.c.bf16 %v308_v47, %v307_v46 }
 0x106   :  { %v215_v50 = vadd.f32 %v868_v26, %v214_v48  ;;  %v617_v51 = vpop.f32.mrb[9].mxu0 }
 0x107   :  { %v217_v52 = vpop.f32.mrb[10].mxu0  ;;  %664 = vmatmul.mubr.bf16.gmra.mrb[4].mxu1 %v324_v49 }
 0x108   :  { %v291_v53 = vmul.f32 0.1, %v215_v50  ;;  %v218_v54 = vadd.f32 %v868_v26, %v217_v52  ;;  %v618_v55 = vpop.f32.mrb[11].mxu0  ;;  %667 = vmatprep.mubr.msk.bf16.mxu1 %vm723_vm0, %v722_v0  ;;  %vm273_vm5 = vcmp.ge.f32.partialorder %v215_v50, 0.0 }
 0x10a   :  { %vm274_vm6 = vcmp.ge.f32.partialorder %v218_v54, 0.0  ;;  %v292_v56 = vmul.f32 0.1, %v218_v54  ;;  %v309_v57 = vsel %vm273_vm5, %v215_v50, %v291_v53 }
 0x10c   :  { %v310_v58 = vsel %vm274_vm6, %v218_v54, %v292_v56 }
 0x10d   :  { %v222_v59 = vpop.f32.mrb[12].mxu0  ;;  %v325_v60 = vpack.c.bf16 %v310_v58, %v309_v57 }
 0x10e   :  { %v223_v61 = vadd.f32 %v868_v26, %v222_v59  ;;  %v621_v62 = vpop.f32.mrb[13].mxu0 }
 0x10f   :  { %v225_v63 = vpop.f32.mrb[14].mxu0  ;;  %668 = vmatmul.mubr.bf16.gmra.mrb[8].mxu1 %v325_v60 }
 0x110   :  { %v293_v1 = vmul.f32 0.1, %v223_v61  ;;  %v226_v2 = vadd.f32 %v868_v26, %v225_v63  ;;  %v622_v3 = vpop.f32.mrb[15].mxu0  ;;  %671 = vmatprep.mubr.msk.bf16.mxu1 %vm723_vm0, %v722_v0  ;;  %vm275_vm7 = vcmp.ge.f32.partialorder %v223_v61, 0.0 }
 0x112   :  { %vm276_vm8 = vcmp.ge.f32.partialorder %v226_v2, 0.0  ;;  %v294_v4 = vmul.f32 0.1, %v226_v2  ;;  %v311_v5 = vsel %vm275_vm7, %v223_v61, %v293_v1  ;;  %v907_v1 = vld [vmem:[%s985_s4] ss:$0 sm:$0xff] }
 0x114   :  { %v312_v6 = vsel %vm276_vm8, %v226_v2, %v294_v4 }
 0x115   :  { %v230_v7 = vpop.f32.mrb[16].mxu0  ;;  %v326_v8 = vpack.c.bf16 %v312_v6, %v311_v5 }
 0x116   :  { %v231_v9 = vadd.f32 %v868_v26, %v230_v7  ;;  %v625_v10 = vpop.f32.mrb[17].mxu0 }
 0x117   :  { %v233_v11 = vpop.f32.mrb[18].mxu0  ;;  %672 = vmatmul.mubr.bf16.gmra.mrb[12].mxu1 %v326_v8 }
 0x118   :  { %v295_v12 = vmul.f32 0.1, %v231_v9  ;;  %v234_v13 = vadd.f32 %v868_v26, %v233_v11  ;;  %v626_v14 = vpop.f32.mrb[19].mxu0  ;;  %675 = vmatprep.mubr.msk.bf16.mxu1 %vm723_vm0, %v722_v0  ;;  %vm277_vm9 = vcmp.ge.f32.partialorder %v231_v9, 0.0 }
 0x11a   :  { %vm278_vm10 = vcmp.ge.f32.partialorder %v234_v13, 0.0  ;;  %v296_v15 = vmul.f32 0.1, %v234_v13  ;;  %v313_v16 = vsel %vm277_vm9, %v231_v9, %v295_v12 }
 0x11c   :  { %v314_v17 = vsel %vm278_vm10, %v234_v13, %v296_v15 }
 0x11d   :  { %v238_v18 = vpop.f32.mrb[20].mxu0  ;;  %v327_v19 = vpack.c.bf16 %v314_v17, %v313_v16 }
 0x11e   :  { %v239_v20 = vadd.f32 %v868_v26, %v238_v18  ;;  %v629_v21 = vpop.f32.mrb[21].mxu0 }
 0x11f   :  { %v241_v22 = vpop.f32.mrb[22].mxu0  ;;  %676 = vmatmul.mubr.bf16.gmra.mrb[16].mxu1 %v327_v19 }
 0x120   :  { %v297_v23 = vmul.f32 0.1, %v239_v20  ;;  %v242_v24 = vadd.f32 %v868_v26, %v241_v22  ;;  %v630_v25 = vpop.f32.mrb[23].mxu0  ;;  %679 = vmatprep.mubr.msk.bf16.mxu1 %vm723_vm0, %v722_v0  ;;  %vm279_vm11 = vcmp.ge.f32.partialorder %v239_v20, 0.0 }
 0x122   :  { %vm280_vm12 = vcmp.ge.f32.partialorder %v242_v24, 0.0  ;;  %v298_v27 = vmul.f32 0.1, %v242_v24  ;;  %v315_v28 = vsel %vm279_vm11, %v239_v20, %v297_v23 }
 0x124   :  { %v316_v29 = vsel %vm280_vm12, %v242_v24, %v298_v27 }
 0x125   :  { %v246_v30 = vpop.f32.mrb[24].mxu0  ;;  %v328_v31 = vpack.c.bf16 %v316_v29, %v315_v28 }
 0x126   :  { %v247_v32 = vadd.f32 %v868_v26, %v246_v30  ;;  %v633_v33 = vpop.f32.mrb[25].mxu0 }
 0x127   :  { %v249_v34 = vpop.f32.mrb[26].mxu0  ;;  %680 = vmatmul.mubr.bf16.gmra.mrb[20].mxu1 %v328_v31 }
 0x128   :  { %v299_v35 = vmul.f32 0.1, %v247_v32  ;;  %v250_v36 = vadd.f32 %v868_v26, %v249_v34  ;;  %v634_v37 = vpop.f32.mrb[27].mxu0  ;;  %683 = vmatprep.mubr.msk.bf16.mxu1 %vm723_vm0, %v722_v0  ;;  %vm281_vm13 = vcmp.ge.f32.partialorder %v247_v32, 0.0 }
 0x12a   :  { %vm282_vm14 = vcmp.ge.f32.partialorder %v250_v36, 0.0  ;;  %v300_v38 = vmul.f32 0.1, %v250_v36  ;;  %v317_v39 = vsel %vm281_vm13, %v247_v32, %v299_v35 }
 0x12c   :  { %v318_v40 = vsel %vm282_vm14, %v250_v36, %v300_v38 }
 0x12d   :  { %v254_v41 = vpop.f32.mrb[28].mxu0  ;;  %v329_v42 = vpack.c.bf16 %v318_v40, %v317_v39 }
 0x12e   :  { %v255_v43 = vadd.f32 %v868_v26, %v254_v41  ;;  %v637_v44 = vpop.f32.mrb[29].mxu0 }
 0x12f   :  { %v257_v45 = vpop.f32.mrb[30].mxu0  ;;  %684 = vmatmul.mubr.bf16.gmra.mrb[24].mxu1 %v329_v42 }
 0x130   :  { %v301_v46 = vmul.f32 0.1, %v255_v43  ;;  %v258_v47 = vadd.f32 %v868_v26, %v257_v45  ;;  %v638_v48 = vpop.f32.mrb[31].mxu0  ;;  %687 = vmatprep.mubr.msk.bf16.mxu1 %vm723_vm0, %v722_v0  ;;  %vm283_vm15 = vcmp.ge.f32.partialorder %v255_v43, 0.0 }
 0x132   :  { %vm284_vm1 = vcmp.ge.f32.partialorder %v258_v47, 0.0  ;;  %v302_v49 = vmul.f32 0.1, %v258_v47  ;;  %v319_v50 = vsel %vm283_vm15, %v255_v43, %v301_v46 }
 0x134   :  { %v320_v51 = vsel %vm284_vm1, %v258_v47, %v302_v49 }
 0x135   :  { %v262_v52 = vpop.f32.mrb[32].mxu0  ;;  %v330_v53 = vpack.c.bf16 %v320_v51, %v319_v50 }
 0x136   :  { %v263_v54 = vadd.f32 %v868_v26, %v262_v52  ;;  %v641_v55 = vpop.f32.mrb[33].mxu0 }
 0x137   :  { %v265_v56 = vpop.f32.mrb[34].mxu0  ;;  %688 = vmatmul.mubr.bf16.gmra.mrb[28].mxu1 %v330_v53 }
 0x138   :  { %v303_v57 = vmul.f32 0.1, %v263_v54  ;;  %v266_v58 = vadd.f32 %v868_v26, %v265_v56  ;;  %v642_v59 = vpop.f32.mrb[35].mxu0  ;;  %691 = vmatprep.mubr.msk.bf16.mxu1 %vm723_vm0, %v722_v0  ;;  %vm285_vm2 = vcmp.ge.f32.partialorder %v263_v54, 0.0 }
 0x13a   :  { %vm286_vm3 = vcmp.ge.f32.partialorder %v266_v58, 0.0  ;;  %v304_v60 = vmul.f32 0.1, %v266_v58  ;;  %v321_v61 = vsel %vm285_vm2, %v263_v54, %v303_v57 }
 0x13c   :  { %v322_v62 = vsel %vm286_vm3, %v266_v58, %v304_v60 }
 0x13d   :  { %v331_v63 = vpack.c.bf16 %v322_v62, %v321_v61 }
 0x13f   :  { %692 = vmatmul.mubr.bf16.gmra.mrb[32].mxu1 %v331_v63 }
 0x1d2   :  { %v437_v2 = vpop.f32.mrb[0].mxu1 }
 0x1d3   :  { %v438_v3 = vadd.f32 %v907_v1, %v437_v2  ;;  %v661_v26 = vpop.f32.mrb[1].mxu1 }
 0x1d4   :  { %v440_v4 = vpop.f32.mrb[2].mxu1 }
 0x1d5   :  { %508 = vst [vmem:[%s986_s5] sm:$0xff] %v438_v3  ;;  %v441_v0 = vadd.f32 %v907_v1, %v440_v4  ;;  %v662_v5 = vpop.f32.mrb[3].mxu1 }
 0x1d7   :  { %509 = vst [vmem:[%s986_s5 + $0x8] sm:$0xff] %v441_v0 }
 0x1da   :  { %v445_v6 = vpop.f32.mrb[4].mxu1 }
 0x1db   :  { %v446_v7 = vadd.f32 %v907_v1, %v445_v6  ;;  %v665_v8 = vpop.f32.mrb[5].mxu1 }
 0x1dc   :  { %v448_v9 = vpop.f32.mrb[6].mxu1 }
 0x1dd   :  { %510 = vst [vmem:[%s986_s5 + $0x10] sm:$0xff] %v446_v7  ;;  %v449_v10 = vadd.f32 %v907_v1, %v448_v9  ;;  %v666_v11 = vpop.f32.mrb[7].mxu1 }
 0x1df   :  { %511 = vst [vmem:[%s986_s5 + $0x18] sm:$0xff] %v449_v10 }
 0x1e2   :  { %v453_v12 = vpop.f32.mrb[8].mxu1 }
 0x1e3   :  { %v454_v13 = vadd.f32 %v907_v1, %v453_v12  ;;  %v669_v14 = vpop.f32.mrb[9].mxu1 }
 0x1e4   :  { %v456_v15 = vpop.f32.mrb[10].mxu1 }
 0x1e5   :  { %512 = vst [vmem:[%s986_s5 + $0x20] sm:$0xff] %v454_v13  ;;  %v457_v16 = vadd.f32 %v907_v1, %v456_v15  ;;  %v670_v17 = vpop.f32.mrb[11].mxu1 }
 0x1e7   :  { %513 = vst [vmem:[%s986_s5 + $0x28] sm:$0xff] %v457_v16 }
 0x1ea   :  { %v461_v18 = vpop.f32.mrb[12].mxu1 }
 0x1eb   :  { %v462_v19 = vadd.f32 %v907_v1, %v461_v18  ;;  %v673_v20 = vpop.f32.mrb[13].mxu1 }
 0x1ec   :  { %v464_v21 = vpop.f32.mrb[14].mxu1 }
 0x1ed   :  { %514 = vst [vmem:[%s986_s5 + $0x30] sm:$0xff] %v462_v19  ;;  %v465_v22 = vadd.f32 %v907_v1, %v464_v21  ;;  %v674_v23 = vpop.f32.mrb[15].mxu1 }
 0x1ef   :  { %515 = vst [vmem:[%s986_s5 + $0x38] sm:$0xff] %v465_v22 }
 0x1f2   :  { %v469_v24 = vpop.f32.mrb[16].mxu1 }
 0x1f3   :  { %v470_v25 = vadd.f32 %v907_v1, %v469_v24  ;;  %v677_v27 = vpop.f32.mrb[17].mxu1 }
 0x1f4   :  { %v472_v28 = vpop.f32.mrb[18].mxu1 }
 0x1f5   :  { %516 = vst [vmem:[%s986_s5 + $0x40] sm:$0xff] %v470_v25  ;;  %v473_v29 = vadd.f32 %v907_v1, %v472_v28  ;;  %v678_v30 = vpop.f32.mrb[19].mxu1 }
 0x1f7   :  { %517 = vst [vmem:[%s986_s5 + $0x48] sm:$0xff] %v473_v29 }
 0x1fa   :  { %v477_v31 = vpop.f32.mrb[20].mxu1 }
 0x1fb   :  { %v478_v32 = vadd.f32 %v907_v1, %v477_v31  ;;  %v681_v33 = vpop.f32.mrb[21].mxu1 }
 0x1fc   :  { %v480_v34 = vpop.f32.mrb[22].mxu1 }
 0x1fd   :  { %518 = vst [vmem:[%s986_s5 + $0x50] sm:$0xff] %v478_v32  ;;  %v481_v35 = vadd.f32 %v907_v1, %v480_v34  ;;  %v682_v36 = vpop.f32.mrb[23].mxu1 }
 0x1ff   :  { %519 = vst [vmem:[%s986_s5 + $0x58] sm:$0xff] %v481_v35 }
 0x202   :  { %v485_v37 = vpop.f32.mrb[24].mxu1 }
 0x203   :  { %v486_v38 = vadd.f32 %v907_v1, %v485_v37  ;;  %v685_v39 = vpop.f32.mrb[25].mxu1 }
 0x204   :  { %v488_v40 = vpop.f32.mrb[26].mxu1 }
 0x205   :  { %520 = vst [vmem:[%s986_s5 + $0x60] sm:$0xff] %v486_v38  ;;  %v489_v41 = vadd.f32 %v907_v1, %v488_v40  ;;  %v686_v42 = vpop.f32.mrb[27].mxu1 }
 0x207   :  { %521 = vst [vmem:[%s986_s5 + $0x68] sm:$0xff] %v489_v41 }
 0x20a   :  { %v493_v43 = vpop.f32.mrb[28].mxu1 }
 0x20b   :  { %v494_v44 = vadd.f32 %v907_v1, %v493_v43  ;;  %v689_v45 = vpop.f32.mrb[29].mxu1 }
 0x20c   :  { %v496_v46 = vpop.f32.mrb[30].mxu1 }
 0x20d   :  { %522 = vst [vmem:[%s986_s5 + $0x70] sm:$0xff] %v494_v44  ;;  %v497_v47 = vadd.f32 %v907_v1, %v496_v46  ;;  %v690_v48 = vpop.f32.mrb[31].mxu1 }
 0x20f   :  { %523 = vst [vmem:[%s986_s5 + $0x78] sm:$0xff] %v497_v47 }
 0x212   :  { %v501_v49 = vpop.f32.mrb[32].mxu1 }
 0x213   :  { %v502_v50 = vadd.f32 %v907_v1, %v501_v49  ;;  %v693_v51 = vpop.f32.mrb[33].mxu1 }
 0x214   :  { %v504_v52 = vpop.f32.mrb[34].mxu1 }
 0x215   :  { %524 = vst [vmem:[%s986_s5 + $0x80] sm:$0xff] %v502_v50  ;;  %v505_v53 = vadd.f32 %v907_v1, %v504_v52  ;;  %v694_v54 = vpop.f32.mrb[35].mxu1 }
 0x217   :  { %525 = vst [vmem:[%s986_s5 + $0x88] sm:$0xff] %v505_v53 }

// kernel: reverse.18
= control target key start
LH: loop header
LB: loop body
LE: loop exit
PB: predicated region body
PF: predicated region fallthrough
CT: control target
= control target key end

     0   :  { %s176_s0 = inlined_call_operand.vmem [shape: f32[1,16,16,7], index: 0, kind: input, shape index: {}]   ;;  %s177_s1 = inlined_call_operand.vmem [shape: f32[1,16,16,7], index: 1, kind: output, shape index: {}]  }
   0x1   :  { %v56_v0 = vld [vmem:[%s176_s0 + $0x60] sm:$0xff]  ;;  %v57_v1 = vld [vmem:[%s176_s0 + $0x50] sm:$0xff]  ;;  %v68_v7 = vld [vmem:[%s176_s0 + $0x68] sm:$0xff] }
   0x2   :  { %v59_v2 = vld [vmem:[%s176_s0 + $0x40] sm:$0xff]  ;;  %4 = vst [vmem:[%s177_s1] sm:$0xff] %v56_v0  ;;  %58 = vst [vmem:[%s177_s1 + $0x10] sm:$0xff] %v57_v1  ;;  %v61_v3 = vld [vmem:[%s176_s0 + $0x30] sm:$0xff] }
   0x3   :  { %60 = vst [vmem:[%s177_s1 + $0x20] sm:$0xff] %v59_v2  ;;  %v63_v4 = vld [vmem:[%s176_s0 + $0x20] sm:$0xff]  ;;  %v65_v5 = vld [vmem:[%s176_s0 + $0x10] sm:$0xff]  ;;  %62 = vst [vmem:[%s177_s1 + $0x30] sm:$0xff] %v61_v3 }
   0x4   :  { %64 = vst [vmem:[%s177_s1 + $0x40] sm:$0xff] %v63_v4  ;;  %66 = vst [vmem:[%s177_s1 + $0x50] sm:$0xff] %v65_v5  ;;  %v25_v6 = vld [vmem:[%s176_s0] sm:$0xff]  ;;  %v70_v8 = vld [vmem:[%s176_s0 + $0x58] sm:$0xff] }
   0x5   :  { %67 = vst [vmem:[%s177_s1 + $0x60] sm:$0xff] %v25_v6  ;;  %69 = vst [vmem:[%s177_s1 + $0x8] sm:$0xff] %v68_v7  ;;  %v72_v9 = vld [vmem:[%s176_s0 + $0x48] sm:$0xff]  ;;  %v74_v10 = vld [vmem:[%s176_s0 + $0x38] sm:$0xff] }
   0x6   :  { %71 = vst [vmem:[%s177_s1 + $0x18] sm:$0xff] %v70_v8  ;;  %v76_v11 = vld [vmem:[%s176_s0 + $0x28] sm:$0xff]  ;;  %73 = vst [vmem:[%s177_s1 + $0x28] sm:$0xff] %v72_v9  ;;  %v78_v12 = vld [vmem:[%s176_s0 + $0x18] sm:$0xff] }
   0x7   :  { %75 = vst [vmem:[%s177_s1 + $0x38] sm:$0xff] %v74_v10  ;;  %77 = vst [vmem:[%s177_s1 + $0x48] sm:$0xff] %v76_v11  ;;  %v80_v13 = vld [vmem:[%s176_s0 + $0x8] sm:$0xff] }
   0x8   :  { %79 = vst [vmem:[%s177_s1 + $0x58] sm:$0xff] %v78_v12  ;;  %81 = vst [vmem:[%s177_s1 + $0x68] sm:$0xff] %v80_v13 }

// kernel: f_net_forward.100
= control target key start
LH: loop header
LB: loop body
LE: loop exit
PB: predicated region body
PF: predicated region fallthrough
CT: control target
= control target key end

     0   :  { %v874_v0 = vmov 0   ;;  %vm270_vm0 = vcmask 130048   ;;  %s1251_s1 = inlined_call_operand.vmem [shape: bf16[144,128], index: 1, kind: input, shape index: {}]   ;;  %s1252_s0 = inlined_call_operand.vmem [shape: bf16[256,144], index: 0, kind: input, shape index: {}]   ;;  %s1253_s2 = inlined_call_operand.vmem [shape: f32[1,128], index: 2, kind: input, shape index: {}]   ;;  %s1254_s3 = inlined_call_operand.vmem [shape: f32[256,128], index: 3, kind: output, shape index: {}]  }
   0x1   :  { %319 = vmatprep.subr.bf16.mxu0 %v874_v0  ;;  %734 = vmatprep.subr.bf16.mxu1 %v874_v0  ;;  %v753_v1 = vld [vmem:[%s1251_s1] sm:$0xff]   ;;  %v754_v2 = vld [vmem:[%s1251_s1 + $0x8] sm:$0xff]   ;;  %v755_v3 = vld [vmem:[%s1251_s1 + $0x10] sm:$0xff]  }
   0x2   :  { %320 = vmatpush1.bf16.msra.mxu0 %v753_v1  ;;  %743 = vmatpush1.bf16.msra.mxu1 %v753_v1  ;;  %v756_v4 = vld [vmem:[%s1251_s1 + $0x18] sm:$0xff]   ;;  %v764_v5 = vld [vmem:[%s1252_s0 + $0x4] ss:$8 sps:$4 sm:$0xff]   ;;  %v759_v9 = vld [vmem:[%s1251_s1 + $0x30] sm:$0xff]  }
   0x3   :  { %321 = vmatprep.subr.bf16.mxu0 %v874_v0  ;;  %735 = vmatprep.subr.bf16.mxu1 %v874_v0  ;;  %v767_v6 = vld [vmem:[%s1252_s0 + $0x84] ss:$8 sps:$4 sm:$0xff]   ;;  %v760_v10 = vld [vmem:[%s1251_s1 + $0x38] sm:$0xff]   ;;  %v762_v12 = vld [vmem:[%s1252_s0] ss:$8 sps:$4 sm:$0xff]  }
   0x4   :  { %718 = vmatprep.mubr.msk.bf16.mxu0 %vm270_vm0, %v764_v5  ;;  %726 = vmatprep.mubr.msk.bf16.mxu1 %vm270_vm0, %v767_v6  ;;  %v757_v7 = vld [vmem:[%s1251_s1 + $0x20] sm:$0xff]   ;;  %v758_v8 = vld [vmem:[%s1251_s1 + $0x28] sm:$0xff]   ;;  %v768_v14 = vld [vmem:[%s1252_s0 + $0x14] ss:$8 sps:$4 sm:$0xff]  }
   0x5   :  { %v761_v11 = vld [vmem:[%s1251_s1 + $0x40] sm:$0xff]   ;;  %v770_v15 = vld [vmem:[%s1252_s0 + $0x94] ss:$8 sps:$4 sm:$0xff]   ;;  %v772_v16 = vld [vmem:[%s1252_s0 + $0x10] ss:$8 sps:$4 sm:$0xff]  }
   0x6   :  { %322 = vmatpush1.bf16.msra.mxu0 %v754_v2  ;;  %744 = vmatpush1.bf16.msra.mxu1 %v754_v2  ;;  %v765_v13 = vld [vmem:[%s1252_s0 + $0x80] ss:$8 sps:$4 sm:$0xff]   ;;  %v773_v17 = vld [vmem:[%s1252_s0 + $0x90] ss:$8 sps:$4 sm:$0xff]   ;;  %v774_v18 = vld [vmem:[%s1252_s0 + $0x24] ss:$8 sps:$4 sm:$0xff]  }
   0x7   :  { %323 = vmatprep.subr.bf16.mxu0 %v874_v0  ;;  %736 = vmatprep.subr.bf16.mxu1 %v874_v0  ;;  %v776_v19 = vld [vmem:[%s1252_s0 + $0xa4] ss:$8 sps:$4 sm:$0xff]   ;;  %v778_v20 = vld [vmem:[%s1252_s0 + $0x20] ss:$8 sps:$4 sm:$0xff]   ;;  %v780_v22 = vld [vmem:[%s1252_s0 + $0x34] ss:$8 sps:$4 sm:$0xff]  }
   0x8   :  { %v779_v21 = vld [vmem:[%s1252_s0 + $0xa0] ss:$8 sps:$4 sm:$0xff]   ;;  %v782_v23 = vld [vmem:[%s1252_s0 + $0xb4] ss:$8 sps:$4 sm:$0xff]   ;;  %v784_v24 = vld [vmem:[%s1252_s0 + $0x30] ss:$8 sps:$4 sm:$0xff]  }
   0x9   :  { %v785_v25 = vld [vmem:[%s1252_s0 + $0xb0] ss:$8 sps:$4 sm:$0xff]   ;;  %v786_v26 = vld [vmem:[%s1252_s0 + $0x44] ss:$8 sps:$4 sm:$0xff]   ;;  %v790_v28 = vld [vmem:[%s1252_s0 + $0x40] ss:$8 sps:$4 sm:$0xff]  }
   0xa   :  { %324 = vmatpush1.bf16.msra.mxu0 %v755_v3  ;;  %745 = vmatpush1.bf16.msra.mxu1 %v755_v3  ;;  %v788_v27 = vld [vmem:[%s1252_s0 + $0xc4] ss:$8 sps:$4 sm:$0xff]   ;;  %v791_v29 = vld [vmem:[%s1252_s0 + $0xc0] ss:$8 sps:$4 sm:$0xff]   ;;  %v792_v30 = vld [vmem:[%s1252_s0 + $0x54] ss:$8 sps:$4 sm:$0xff]  }
   0xb   :  { %325 = vmatprep.subr.bf16.mxu0 %v874_v0  ;;  %737 = vmatprep.subr.bf16.mxu1 %v874_v0  ;;  %v794_v31 = vld [vmem:[%s1252_s0 + $0xd4] ss:$8 sps:$4 sm:$0xff]   ;;  %v796_v32 = vld [vmem:[%s1252_s0 + $0x50] ss:$8 sps:$4 sm:$0xff]   ;;  %v798_v34 = vld [vmem:[%s1252_s0 + $0x64] ss:$8 sps:$4 sm:$0xff]  }
   0xc   :  { %v797_v33 = vld [vmem:[%s1252_s0 + $0xd0] ss:$8 sps:$4 sm:$0xff]   ;;  %v800_v35 = vld [vmem:[%s1252_s0 + $0xe4] ss:$8 sps:$4 sm:$0xff]   ;;  %v802_v36 = vld [vmem:[%s1252_s0 + $0x60] ss:$8 sps:$4 sm:$0xff]  }
   0xd   :  { %v803_v37 = vld [vmem:[%s1252_s0 + $0xe0] ss:$8 sps:$4 sm:$0xff]   ;;  %v804_v38 = vld [vmem:[%s1252_s0 + $0x74] ss:$8 sps:$4 sm:$0xff]   ;;  %v808_v40 = vld [vmem:[%s1252_s0 + $0x70] ss:$8 sps:$4 sm:$0xff]  }
   0xe   :  { %326 = vmatpush1.bf16.msra.mxu0 %v756_v4  ;;  %746 = vmatpush1.bf16.msra.mxu1 %v756_v4  ;;  %v806_v39 = vld [vmem:[%s1252_s0 + $0xf4] ss:$8 sps:$4 sm:$0xff]   ;;  %v809_v41 = vld [vmem:[%s1252_s0 + $0xf0] ss:$8 sps:$4 sm:$0xff]   ;;  %v1037_v42 = vld [vmem:[%s1253_s2] ss:$0 sm:$0xff] }
   0xf   :  { %327 = vmatprep.subr.bf16.mxu0 %v874_v0  ;;  %738 = vmatprep.subr.bf16.mxu1 %v874_v0 }
  0x12   :  { %328 = vmatpush1.bf16.msra.mxu0 %v757_v7  ;;  %747 = vmatpush1.bf16.msra.mxu1 %v757_v7 }
  0x13   :  { %329 = vmatprep.subr.bf16.mxu0 %v874_v0  ;;  %739 = vmatprep.subr.bf16.mxu1 %v874_v0 }
  0x16   :  { %330 = vmatpush1.bf16.msra.mxu0 %v758_v8  ;;  %748 = vmatpush1.bf16.msra.mxu1 %v758_v8 }
  0x17   :  { %331 = vmatprep.subr.bf16.mxu0 %v874_v0  ;;  %740 = vmatprep.subr.bf16.mxu1 %v874_v0 }
  0x1a   :  { %332 = vmatpush1.bf16.msra.mxu0 %v759_v9  ;;  %749 = vmatpush1.bf16.msra.mxu1 %v759_v9 }
  0x1b   :  { %333 = vmatprep.subr.bf16.mxu0 %v874_v0  ;;  %741 = vmatprep.subr.bf16.mxu1 %v874_v0 }
  0x1e   :  { %334 = vmatpush1.bf16.msra.mxu0 %v760_v10  ;;  %750 = vmatpush1.bf16.msra.mxu1 %v760_v10 }
  0x1f   :  { %335 = vmatprep.subr.bf16.mxu0 %v874_v0  ;;  %742 = vmatprep.subr.bf16.mxu1 %v874_v0 }
  0x22   :  { %336 = vmatpush1.bf16.msra.mxu0 %v761_v11  ;;  %751 = vmatpush1.bf16.msra.mxu1 %v761_v11 }
  0x25   :  { %352 = vmatmul.mubr.bf16.vlgmr.msra.gmra.mrb[0].mxu0 %v762_v12  ;;  %416 = vmatmul.mubr.bf16.vlgmr.msra.gmra.mrb[0].mxu1 %v765_v13 }
  0x26   :  { %719 = vmatprep.mubr.msk.bf16.mxu0 %vm270_vm0, %v768_v14  ;;  %727 = vmatprep.mubr.msk.bf16.mxu1 %vm270_vm0, %v770_v15 }
  0x2d   :  { %360 = vmatmul.mubr.bf16.gmra.mrb[4].mxu0 %v772_v16  ;;  %424 = vmatmul.mubr.bf16.gmra.mrb[4].mxu1 %v773_v17 }
  0x2e   :  { %720 = vmatprep.mubr.msk.bf16.mxu0 %vm270_vm0, %v774_v18  ;;  %728 = vmatprep.mubr.msk.bf16.mxu1 %vm270_vm0, %v776_v19 }
  0x35   :  { %368 = vmatmul.mubr.bf16.gmra.mrb[8].mxu0 %v778_v20  ;;  %432 = vmatmul.mubr.bf16.gmra.mrb[8].mxu1 %v779_v21 }
  0x36   :  { %721 = vmatprep.mubr.msk.bf16.mxu0 %vm270_vm0, %v780_v22  ;;  %729 = vmatprep.mubr.msk.bf16.mxu1 %vm270_vm0, %v782_v23 }
  0x3d   :  { %376 = vmatmul.mubr.bf16.gmra.mrb[12].mxu0 %v784_v24  ;;  %440 = vmatmul.mubr.bf16.gmra.mrb[12].mxu1 %v785_v25 }
  0x3e   :  { %722 = vmatprep.mubr.msk.bf16.mxu0 %vm270_vm0, %v786_v26  ;;  %730 = vmatprep.mubr.msk.bf16.mxu1 %vm270_vm0, %v788_v27 }
  0x45   :  { %384 = vmatmul.mubr.bf16.gmra.mrb[16].mxu0 %v790_v28  ;;  %448 = vmatmul.mubr.bf16.gmra.mrb[16].mxu1 %v791_v29 }
  0x46   :  { %723 = vmatprep.mubr.msk.bf16.mxu0 %vm270_vm0, %v792_v30  ;;  %731 = vmatprep.mubr.msk.bf16.mxu1 %vm270_vm0, %v794_v31 }
  0x4d   :  { %392 = vmatmul.mubr.bf16.gmra.mrb[20].mxu0 %v796_v32  ;;  %456 = vmatmul.mubr.bf16.gmra.mrb[20].mxu1 %v797_v33 }
  0x4e   :  { %724 = vmatprep.mubr.msk.bf16.mxu0 %vm270_vm0, %v798_v34  ;;  %732 = vmatprep.mubr.msk.bf16.mxu1 %vm270_vm0, %v800_v35 }
  0x55   :  { %400 = vmatmul.mubr.bf16.gmra.mrb[24].mxu0 %v802_v36  ;;  %464 = vmatmul.mubr.bf16.gmra.mrb[24].mxu1 %v803_v37 }
  0x56   :  { %725 = vmatprep.mubr.msk.bf16.mxu0 %vm270_vm0, %v804_v38  ;;  %733 = vmatprep.mubr.msk.bf16.mxu1 %vm270_vm0, %v806_v39 }
  0x5d   :  { %408 = vmatmul.mubr.bf16.gmra.mrb[28].mxu0 %v808_v40  ;;  %472 = vmatmul.mubr.bf16.gmra.mrb[28].mxu1 %v809_v41 }
  0xf8   :  { %v353_v43 = vpop.f32.mrb[0].mxu0  ;;  %v417_v44 = vpop.f32.mrb[0].mxu1 }
  0xf9   :  { %v354_v45 = vadd.f32 %v1037_v42, %v353_v43  ;;  %v418_v46 = vadd.f32 %v1037_v42, %v417_v44  ;;  %v355_v47 = vpop.f32.mrb[1].mxu0  ;;  %v419_v48 = vpop.f32.mrb[1].mxu1 }
  0xfa   :  { %v356_v49 = vpop.f32.mrb[2].mxu0  ;;  %v420_v50 = vpop.f32.mrb[2].mxu1 }
  0xfb   :  { %v512_v51 = vmul.f32 0.70710677, %v354_v45  ;;  %v528_v52 = vmul.f32 0.70710677, %v418_v46  ;;  %v357_v53 = vadd.f32 %v1037_v42, %v356_v49  ;;  %v421_v54 = vadd.f32 %v1037_v42, %v420_v50  ;;  %v358_v55 = vpop.f32.mrb[3].mxu0  ;;  %v422_v56 = vpop.f32.mrb[3].mxu1 }
  0xfc   :  { %v480_v13 = vmul.f32 0.5, %v354_v45  ;;  %v496_v15 = vmul.f32 0.5, %v418_v46 }
  0xfd   :  { %810 = verf.f32 %v512_v51  ;;  %v513_v57 = vmul.f32 0.70710677, %v357_v53  ;;  %v529_v58 = vmul.f32 0.70710677, %v421_v54  ;;  %v481_v29 = vmul.f32 0.5, %v357_v53 }
  0xfe   :  { %812 = verf.f32 %v528_v52  ;;  %v497_v34 = vmul.f32 0.5, %v421_v54 }
  0xff   :  { %814 = verf.f32 %v513_v57 }
 0x100   :  { %v361_v59 = vpop.f32.mrb[4].mxu0  ;;  %v425_v60 = vpop.f32.mrb[4].mxu1  ;;  %816 = verf.f32 %v529_v58 }
 0x101   :  { %v362_v61 = vadd.f32 %v1037_v42, %v361_v59  ;;  %v426_v62 = vadd.f32 %v1037_v42, %v425_v60  ;;  %v363_v63 = vpop.f32.mrb[5].mxu0  ;;  %v427_v0 = vpop.f32.mrb[5].mxu1 }
 0x102   :  { %v364_v1 = vpop.f32.mrb[6].mxu0  ;;  %v428_v2 = vpop.f32.mrb[6].mxu1 }
 0x103   :  { %v514_v3 = vmul.f32 0.70710677, %v362_v61  ;;  %v530_v4 = vmul.f32 0.70710677, %v426_v62  ;;  %v1046_v5 = vadd.f32 %v1037_v42, %v364_v1  ;;  %v1049_v6 = vadd.f32 %v1037_v42, %v428_v2  ;;  %v366_v7 = vpop.f32.mrb[7].mxu0  ;;  %v430_v8 = vpop.f32.mrb[7].mxu1 }
 0x104   :  { %v482_v46 = vmul.f32 0.5, %v362_v61  ;;  %v498_v48 = vmul.f32 0.5, %v426_v62 }
 0x105   :  { %818 = verf.f32 %v514_v3  ;;  %v515_v9 = vmul.f32 0.70710677, %v1046_v5  ;;  %v531_v11 = vmul.f32 0.70710677, %v1049_v6  ;;  %v483_v62 = vmul.f32 0.5, %v1046_v5 }
 0x106   :  { %820 = verf.f32 %v530_v4  ;;  %v499_v3 = vmul.f32 0.5, %v1049_v6 }
 0x107   :  { %v811_v10 = vpop.eup %810  ;;  %822 = verf.f32 %v515_v9 }
 0x108   :  { %v813_v12 = vpop.eup %812  ;;  %v576_v14 = vadd.f32 1.0, %v811_v10  ;;  %v369_v16 = vpop.f32.mrb[8].mxu0  ;;  %824 = verf.f32 %v531_v11 }
 0x109   :  { %v433_v17 = vpop.f32.mrb[8].mxu1  ;;  %v592_v18 = vadd.f32 1.0, %v813_v12  ;;  %v1054_v19 = vadd.f32 %v1037_v42, %v369_v16  ;;  %v371_v21 = vpop.f32.mrb[9].mxu0 }
 0x10a   :  { %v1057_v20 = vadd.f32 %v1037_v42, %v433_v17  ;;  %v435_v22 = vpop.f32.mrb[9].mxu1  ;;  %v815_v23 = vpop.eup %814  ;;  %v608_v24 = vmul.f32 %v576_v14, %v480_v13 }
 0x10b   :  { %v372_v25 = vpop.f32.mrb[10].mxu0  ;;  %v436_v26 = vpop.f32.mrb[10].mxu1  ;;  %v624_v28 = vmul.f32 %v592_v18, %v496_v15  ;;  %v577_v30 = vadd.f32 1.0, %v815_v23  ;;  %v516_v31 = vmul.f32 0.70710677, %v1054_v19  ;;  %v484_v14 = vmul.f32 0.5, %v1054_v19 }
 0x10c   :  { %v817_v27 = vpop.eup %816  ;;  %v374_v32 = vpop.f32.mrb[11].mxu0  ;;  %640 = vst [vmem:[%s1254_s3] sm:$0xff] %v608_v24  ;;  %v532_v36 = vmul.f32 0.70710677, %v1057_v20  ;;  %v1065_v37 = vadd.f32 %v1037_v42, %v372_v25  ;;  %v1071_v39 = vadd.f32 %v1037_v42, %v436_v26  ;;  %v500_v16 = vmul.f32 0.5, %v1057_v20 }
 0x10d   :  { %v438_v33 = vpop.f32.mrb[11].mxu1  ;;  %v593_v35 = vadd.f32 1.0, %v817_v27  ;;  %656 = vst [vmem:[%s1254_s3 + $0x80] sm:$0xff] %v624_v28  ;;  %v609_v38 = vmul.f32 %v577_v30, %v481_v29  ;;  %826 = verf.f32 %v516_v31 }
 0x10e   :  { %828 = verf.f32 %v532_v36  ;;  %v517_v41 = vmul.f32 0.70710677, %v1065_v37  ;;  %v533_v44 = vmul.f32 0.70710677, %v1071_v39  ;;  %v485_v20 = vmul.f32 0.5, %v1065_v37 }
 0x10f   :  { %v625_v40 = vmul.f32 %v593_v35, %v497_v34  ;;  %v819_v43 = vpop.eup %818  ;;  %641 = vst [vmem:[%s1254_s3 + $0x8] sm:$0xff] %v609_v38  ;;  %v501_v35 = vmul.f32 0.5, %v1071_v39 }
 0x110   :  { %v821_v45 = vpop.eup %820  ;;  %v578_v47 = vadd.f32 1.0, %v819_v43  ;;  %830 = verf.f32 %v517_v41  ;;  %v377_v49 = vpop.f32.mrb[12].mxu0 }
 0x111   :  { %657 = vst [vmem:[%s1254_s3 + $0x88] sm:$0xff] %v625_v40  ;;  %v441_v50 = vpop.f32.mrb[12].mxu1  ;;  %v594_v51 = vadd.f32 1.0, %v821_v45  ;;  %832 = verf.f32 %v533_v44  ;;  %v1082_v52 = vadd.f32 %v1037_v42, %v377_v49  ;;  %v379_v54 = vpop.f32.mrb[13].mxu0 }
 0x112   :  { %v1085_v53 = vadd.f32 %v1037_v42, %v441_v50  ;;  %v443_v55 = vpop.f32.mrb[13].mxu1  ;;  %v823_v56 = vpop.eup %822  ;;  %v610_v57 = vmul.f32 %v578_v47, %v482_v46 }
 0x113   :  { %v380_v58 = vpop.f32.mrb[14].mxu0  ;;  %v444_v59 = vpop.f32.mrb[14].mxu1  ;;  %v626_v61 = vmul.f32 %v594_v51, %v498_v48  ;;  %v579_v63 = vadd.f32 1.0, %v823_v56  ;;  %v518_v0 = vmul.f32 0.70710677, %v1082_v52  ;;  %v486_v47 = vmul.f32 0.5, %v1082_v52 }
 0x114   :  { %v825_v60 = vpop.eup %824  ;;  %v382_v1 = vpop.f32.mrb[15].mxu0  ;;  %642 = vst [vmem:[%s1254_s3 + $0x10] sm:$0xff] %v610_v57  ;;  %v534_v7 = vmul.f32 0.70710677, %v1085_v53  ;;  %v1095_v8 = vadd.f32 %v1037_v42, %v380_v58  ;;  %v1101_v9 = vadd.f32 %v1037_v42, %v444_v59  ;;  %v502_v49 = vmul.f32 0.5, %v1085_v53 }
 0x115   :  { %v446_v2 = vpop.f32.mrb[15].mxu1  ;;  %v595_v4 = vadd.f32 1.0, %v825_v60  ;;  %658 = vst [vmem:[%s1254_s3 + $0x90] sm:$0xff] %v626_v61  ;;  %v611_v5 = vmul.f32 %v579_v63, %v483_v62  ;;  %834 = verf.f32 %v518_v0 }
 0x116   :  { %836 = verf.f32 %v534_v7  ;;  %v519_v11 = vmul.f32 0.70710677, %v1095_v8  ;;  %v535_v12 = vmul.f32 0.70710677, %v1101_v9  ;;  %v487_v53 = vmul.f32 0.5, %v1095_v8 }
 0x117   :  { %v627_v10 = vmul.f32 %v595_v4, %v499_v3  ;;  %v827_v6 = vpop.eup %826  ;;  %643 = vst [vmem:[%s1254_s3 + $0x18] sm:$0xff] %v611_v5  ;;  %v503_v4 = vmul.f32 0.5, %v1101_v9 }
 0x118   :  { %v829_v13 = vpop.eup %828  ;;  %v580_v15 = vadd.f32 1.0, %v827_v6  ;;  %838 = verf.f32 %v519_v11  ;;  %v385_v17 = vpop.f32.mrb[16].mxu0 }
 0x119   :  { %659 = vst [vmem:[%s1254_s3 + $0x98] sm:$0xff] %v627_v10  ;;  %v449_v18 = vpop.f32.mrb[16].mxu1  ;;  %v596_v21 = vadd.f32 1.0, %v829_v13  ;;  %840 = verf.f32 %v535_v12  ;;  %v1114_v22 = vadd.f32 %v1037_v42, %v385_v17  ;;  %v387_v24 = vpop.f32.mrb[17].mxu0 }
 0x11a   :  { %v1117_v23 = vadd.f32 %v1037_v42, %v449_v18  ;;  %v451_v25 = vpop.f32.mrb[17].mxu1  ;;  %v831_v26 = vpop.eup %830  ;;  %v612_v27 = vmul.f32 %v580_v15, %v484_v14 }
 0x11b   :  { %v388_v28 = vpop.f32.mrb[18].mxu0  ;;  %v452_v19 = vpop.f32.mrb[18].mxu1  ;;  %v628_v30 = vmul.f32 %v596_v21, %v500_v16  ;;  %v581_v31 = vadd.f32 1.0, %v831_v26  ;;  %v520_v32 = vmul.f32 0.70710677, %v1114_v22  ;;  %v488_v15 = vmul.f32 0.5, %v1114_v22 }
 0x11c   :  { %v833_v29 = vpop.eup %832  ;;  %v390_v33 = vpop.f32.mrb[19].mxu0  ;;  %644 = vst [vmem:[%s1254_s3 + $0x20] sm:$0xff] %v612_v27  ;;  %v536_v38 = vmul.f32 0.70710677, %v1117_v23  ;;  %v1127_v40 = vadd.f32 %v1037_v42, %v388_v28  ;;  %v1133_v41 = vadd.f32 %v1037_v42, %v452_v19  ;;  %v504_v17 = vmul.f32 0.5, %v1117_v23 }
 0x11d   :  { %v454_v34 = vpop.f32.mrb[19].mxu1  ;;  %v597_v36 = vadd.f32 1.0, %v833_v29  ;;  %660 = vst [vmem:[%s1254_s3 + $0xa0] sm:$0xff] %v628_v30  ;;  %v613_v37 = vmul.f32 %v581_v31, %v485_v20  ;;  %842 = verf.f32 %v520_v32 }
 0x11e   :  { %844 = verf.f32 %v536_v38  ;;  %v521_v44 = vmul.f32 0.70710677, %v1127_v40  ;;  %v537_v45 = vmul.f32 0.70710677, %v1133_v41  ;;  %v489_v23 = vmul.f32 0.5, %v1127_v40 }
 0x11f   :  { %v629_v43 = vmul.f32 %v597_v36, %v501_v35  ;;  %v835_v39 = vpop.eup %834  ;;  %645 = vst [vmem:[%s1254_s3 + $0x28] sm:$0xff] %v613_v37  ;;  %v505_v36 = vmul.f32 0.5, %v1133_v41 }
 0x120   :  { %v837_v46 = vpop.eup %836  ;;  %v582_v48 = vadd.f32 1.0, %v835_v39  ;;  %846 = verf.f32 %v521_v44  ;;  %v393_v50 = vpop.f32.mrb[20].mxu0 }
 0x121   :  { %661 = vst [vmem:[%s1254_s3 + $0xa8] sm:$0xff] %v629_v43  ;;  %v457_v51 = vpop.f32.mrb[20].mxu1  ;;  %v598_v54 = vadd.f32 1.0, %v837_v46  ;;  %848 = verf.f32 %v537_v45  ;;  %v1146_v55 = vadd.f32 %v1037_v42, %v393_v50  ;;  %v395_v57 = vpop.f32.mrb[21].mxu0 }
 0x122   :  { %v1149_v56 = vadd.f32 %v1037_v42, %v457_v51  ;;  %v459_v58 = vpop.f32.mrb[21].mxu1  ;;  %v839_v59 = vpop.eup %838  ;;  %v614_v60 = vmul.f32 %v582_v48, %v486_v47 }
 0x123   :  { %v396_v61 = vpop.f32.mrb[22].mxu0  ;;  %v460_v52 = vpop.f32.mrb[22].mxu1  ;;  %v630_v63 = vmul.f32 %v598_v54, %v502_v49  ;;  %v583_v0 = vadd.f32 1.0, %v839_v59  ;;  %v522_v1 = vmul.f32 0.70710677, %v1146_v55  ;;  %v490_v48 = vmul.f32 0.5, %v1146_v55 }
 0x124   :  { %v841_v62 = vpop.eup %840  ;;  %v398_v2 = vpop.f32.mrb[23].mxu0  ;;  %646 = vst [vmem:[%s1254_s3 + $0x30] sm:$0xff] %v614_v60  ;;  %v538_v5 = vmul.f32 0.70710677, %v1149_v56  ;;  %v1159_v10 = vadd.f32 %v1037_v42, %v396_v61  ;;  %v1165_v11 = vadd.f32 %v1037_v42, %v460_v52  ;;  %v506_v50 = vmul.f32 0.5, %v1149_v56 }
 0x125   :  { %v462_v3 = vpop.f32.mrb[23].mxu1  ;;  %v599_v7 = vadd.f32 1.0, %v841_v62  ;;  %662 = vst [vmem:[%s1254_s3 + $0xb0] sm:$0xff] %v630_v63  ;;  %v615_v8 = vmul.f32 %v583_v0, %v487_v53  ;;  %850 = verf.f32 %v522_v1 }
 0x126   :  { %852 = verf.f32 %v538_v5  ;;  %v523_v12 = vmul.f32 0.70710677, %v1159_v10  ;;  %v539_v13 = vmul.f32 0.70710677, %v1165_v11  ;;  %v491_v1 = vmul.f32 0.5, %v1159_v10 }
 0x127   :  { %v631_v6 = vmul.f32 %v599_v7, %v503_v4  ;;  %v843_v9 = vpop.eup %842  ;;  %647 = vst [vmem:[%s1254_s3 + $0x38] sm:$0xff] %v615_v8  ;;  %v507_v7 = vmul.f32 0.5, %v1165_v11 }
 0x128   :  { %v845_v14 = vpop.eup %844  ;;  %v584_v16 = vadd.f32 1.0, %v843_v9  ;;  %854 = verf.f32 %v523_v12  ;;  %v401_v18 = vpop.f32.mrb[24].mxu0 }
 0x129   :  { %663 = vst [vmem:[%s1254_s3 + $0xb8] sm:$0xff] %v631_v6  ;;  %v465_v21 = vpop.f32.mrb[24].mxu1  ;;  %v600_v24 = vadd.f32 1.0, %v845_v14  ;;  %856 = verf.f32 %v539_v13  ;;  %v1178_v25 = vadd.f32 %v1037_v42, %v401_v18  ;;  %v403_v27 = vpop.f32.mrb[25].mxu0 }
 0x12a   :  { %v1181_v26 = vadd.f32 %v1037_v42, %v465_v21  ;;  %v467_v28 = vpop.f32.mrb[25].mxu1  ;;  %v847_v19 = vpop.eup %846  ;;  %v616_v29 = vmul.f32 %v584_v16, %v488_v15 }
 0x12b   :  { %v404_v30 = vpop.f32.mrb[26].mxu0  ;;  %v468_v22 = vpop.f32.mrb[26].mxu1  ;;  %v632_v31 = vmul.f32 %v600_v24, %v504_v17  ;;  %v585_v32 = vadd.f32 1.0, %v847_v19  ;;  %v524_v33 = vmul.f32 0.70710677, %v1178_v25  ;;  %v492_v16 = vmul.f32 0.5, %v1178_v25 }
 0x12c   :  { %v849_v20 = vpop.eup %848  ;;  %v406_v34 = vpop.f32.mrb[27].mxu0  ;;  %648 = vst [vmem:[%s1254_s3 + $0x40] sm:$0xff] %v616_v29  ;;  %v540_v37 = vmul.f32 0.70710677, %v1181_v26  ;;  %v1191_v43 = vadd.f32 %v1037_v42, %v404_v30  ;;  %v469_v44 = vadd.f32 %v1037_v42, %v468_v22 }
 0x12d   :  { %v470_v35 = vpop.f32.mrb[27].mxu1  ;;  %v601_v38 = vadd.f32 1.0, %v849_v20  ;;  %664 = vst [vmem:[%s1254_s3 + $0xc0] sm:$0xff] %v632_v31  ;;  %v617_v40 = vmul.f32 %v585_v32, %v489_v23  ;;  %858 = verf.f32 %v524_v33 }
 0x12e   :  { %860 = verf.f32 %v540_v37  ;;  %v525_v45 = vmul.f32 0.70710677, %v1191_v43  ;;  %v541_v41 = vmul.f32 0.70710677, %v469_v44  ;;  %v493_v19 = vmul.f32 0.5, %v1191_v43 }
 0x12f   :  { %v633_v39 = vmul.f32 %v601_v38, %v505_v36  ;;  %v851_v46 = vpop.eup %850  ;;  %649 = vst [vmem:[%s1254_s3 + $0x48] sm:$0xff] %v617_v40  ;;  %v509_v30 = vmul.f32 0.5, %v469_v44 }
 0x130   :  { %v853_v47 = vpop.eup %852  ;;  %v586_v49 = vadd.f32 1.0, %v851_v46  ;;  %862 = verf.f32 %v525_v45  ;;  %v409_v51 = vpop.f32.mrb[28].mxu0 }
 0x131   :  { %665 = vst [vmem:[%s1254_s3 + $0xc8] sm:$0xff] %v633_v39  ;;  %v473_v54 = vpop.f32.mrb[28].mxu1  ;;  %v602_v57 = vadd.f32 1.0, %v853_v47  ;;  %864 = verf.f32 %v541_v41  ;;  %v410_v58 = vadd.f32 %v1037_v42, %v409_v51  ;;  %v411_v60 = vpop.f32.mrb[29].mxu0 }
 0x132   :  { %v474_v59 = vadd.f32 %v1037_v42, %v473_v54  ;;  %v475_v61 = vpop.f32.mrb[29].mxu1  ;;  %v855_v52 = vpop.eup %854  ;;  %v618_v62 = vmul.f32 %v586_v49, %v490_v48 }
 0x133   :  { %v412_v63 = vpop.f32.mrb[30].mxu0  ;;  %v476_v53 = vpop.f32.mrb[30].mxu1  ;;  %v634_v55 = vmul.f32 %v602_v57, %v506_v50  ;;  %v587_v56 = vadd.f32 1.0, %v855_v52  ;;  %v526_v2 = vmul.f32 0.70710677, %v410_v58  ;;  %v494_v23 = vmul.f32 0.5, %v410_v58 }
 0x134   :  { %v857_v0 = vpop.eup %856  ;;  %v414_v3 = vpop.f32.mrb[31].mxu0  ;;  %650 = vst [vmem:[%s1254_s3 + $0x50] sm:$0xff] %v618_v62  ;;  %v542_v8 = vmul.f32 0.70710677, %v474_v59  ;;  %v413_v6 = vadd.f32 %v1037_v42, %v412_v63  ;;  %v477_v10 = vadd.f32 %v1037_v42, %v476_v53  ;;  %v508_v42 = vmul.f32 0.5, %v1181_v26 }
 0x135   :  { %v478_v4 = vpop.f32.mrb[31].mxu1  ;;  %v603_v5 = vadd.f32 1.0, %v857_v0  ;;  %666 = vst [vmem:[%s1254_s3 + $0xd0] sm:$0xff] %v634_v55  ;;  %v619_v12 = vmul.f32 %v587_v56, %v491_v1  ;;  %866 = verf.f32 %v526_v2  ;;  %v510_v33 = vmul.f32 0.5, %v474_v59 }
 0x136   :  { %868 = verf.f32 %v542_v8  ;;  %v527_v13 = vmul.f32 0.70710677, %v413_v6  ;;  %v543_v11 = vmul.f32 0.70710677, %v477_v10  ;;  %v495_v43 = vmul.f32 0.5, %v413_v6 }
 0x137   :  { %v635_v9 = vmul.f32 %v603_v5, %v507_v7  ;;  %v859_v14 = vpop.eup %858  ;;  %651 = vst [vmem:[%s1254_s3 + $0x58] sm:$0xff] %v619_v12  ;;  %v511_v44 = vmul.f32 0.5, %v477_v10 }
 0x138   :  { %v861_v15 = vpop.eup %860  ;;  %v588_v17 = vadd.f32 1.0, %v859_v14  ;;  %870 = verf.f32 %v527_v13 }
 0x139   :  { %667 = vst [vmem:[%s1254_s3 + $0xd8] sm:$0xff] %v635_v9  ;;  %v604_v18 = vadd.f32 1.0, %v861_v15  ;;  %872 = verf.f32 %v543_v11 }
 0x13a   :  { %v863_v21 = vpop.eup %862  ;;  %v620_v24 = vmul.f32 %v588_v17, %v492_v16 }
 0x13b   :  { %v865_v27 = vpop.eup %864  ;;  %v636_v28 = vmul.f32 %v604_v18, %v508_v42  ;;  %v589_v29 = vadd.f32 1.0, %v863_v21 }
 0x13c   :  { %652 = vst [vmem:[%s1254_s3 + $0x60] sm:$0xff] %v620_v24  ;;  %v605_v22 = vadd.f32 1.0, %v865_v27 }
 0x13d   :  { %668 = vst [vmem:[%s1254_s3 + $0xe0] sm:$0xff] %v636_v28  ;;  %v621_v25 = vmul.f32 %v589_v29, %v493_v19 }
 0x13e   :  { %v637_v26 = vmul.f32 %v605_v22, %v509_v30 }
 0x13f   :  { %v867_v20 = vpop.eup %866  ;;  %653 = vst [vmem:[%s1254_s3 + $0x68] sm:$0xff] %v621_v25 }
 0x140   :  { %v869_v31 = vpop.eup %868  ;;  %669 = vst [vmem:[%s1254_s3 + $0xe8] sm:$0xff] %v637_v26  ;;  %v590_v32 = vadd.f32 1.0, %v867_v20 }
 0x141   :  { %v606_v34 = vadd.f32 1.0, %v869_v31 }
 0x142   :  { %v871_v35 = vpop.eup %870  ;;  %v622_v36 = vmul.f32 %v590_v32, %v494_v23 }
 0x143   :  { %v873_v38 = vpop.eup %872  ;;  %v638_v37 = vmul.f32 %v606_v34, %v510_v33  ;;  %v591_v40 = vadd.f32 1.0, %v871_v35 }
 0x144   :  { %654 = vst [vmem:[%s1254_s3 + $0x70] sm:$0xff] %v622_v36  ;;  %v607_v39 = vadd.f32 1.0, %v873_v38 }
 0x145   :  { %670 = vst [vmem:[%s1254_s3 + $0xf0] sm:$0xff] %v638_v37  ;;  %v623_v45 = vmul.f32 %v591_v40, %v495_v43 }
 0x146   :  { %v639_v46 = vmul.f32 %v607_v39, %v511_v44 }
 0x147   :  { %655 = vst [vmem:[%s1254_s3 + $0x78] sm:$0xff] %v623_v45 }
 0x148   :  { %671 = vst [vmem:[%s1254_s3 + $0xf8] sm:$0xff] %v639_v46 }

// kernel: f_net_forward.104
= control target key start
LH: loop header
LB: loop body
LE: loop exit
PB: predicated region body
PF: predicated region fallthrough
CT: control target
= control target key end

     0   :  { %vm242_vm0 = vcmask 261120   ;;  %s681_s1 = inlined_call_operand.vmem [shape: bf16[288,128], index: 1, kind: input, shape index: {}]   ;;  %s682_s0 = inlined_call_operand.vmem [shape: bf16[64,288], index: 0, kind: input, shape index: {}]   ;;  %s683_s2 = inlined_call_operand.vmem [shape: f32[1,128], index: 2, kind: input, shape index: {}]   ;;  %s684_s3 = inlined_call_operand.vmem [shape: f32[64,128], index: 3, kind: output, shape index: {}]  }
   0x1   :  { %v506_v0 = vld [vmem:[%s681_s1 + $0x40] sm:$0xff]   ;;  %v508_v2 = vld [vmem:[%s681_s1 + $0x48] sm:$0xff]   ;;  %v510_v4 = vld [vmem:[%s681_s1 + $0x50] sm:$0xff]  }
   0x2   :  { %v507_v1 = vld [vmem:[%s681_s1] sm:$0xff]   ;;  %432 = vmatprep.subr.bf16.mxu0 %v506_v0  ;;  %490 = vmatprep.subr.bf16.mxu1 %v506_v0  ;;  %v509_v3 = vld [vmem:[%s681_s1 + $0x8] sm:$0xff]   ;;  %v511_v5 = vld [vmem:[%s681_s1 + $0x10] sm:$0xff]  }
   0x3   :  { %433 = vmatpush3.bf16.msra.mxu0 %v507_v1  ;;  %498 = vmatpush3.bf16.msra.mxu1 %v507_v1  ;;  %v512_v6 = vld [vmem:[%s681_s1 + $0x58] sm:$0xff]   ;;  %v514_v8 = vld [vmem:[%s681_s1 + $0x60] sm:$0xff]   ;;  %v516_v10 = vld [vmem:[%s681_s1 + $0x68] sm:$0xff]  }
   0x4   :  { %434 = vmatprep.subr.bf16.mxu0 %v508_v2  ;;  %491 = vmatprep.subr.bf16.mxu1 %v508_v2  ;;  %v513_v7 = vld [vmem:[%s681_s1 + $0x18] sm:$0xff]   ;;  %v515_v9 = vld [vmem:[%s681_s1 + $0x20] sm:$0xff]   ;;  %v517_v13 = vld [vmem:[%s681_s1 + $0x28] sm:$0xff]  }
   0x5   :  { %v524_v11 = vld [vmem:[%s682_s0 + $0x4] ss:$12 sps:$4 sm:$0xff]   ;;  %v527_v12 = vld [vmem:[%s682_s0 + $0x4c] ss:$12 sps:$4 sm:$0xff]   ;;  %v525_v20 = vld [vmem:[%s682_s0 + $0x48] ss:$12 sps:$4 sm:$0xff]  }
   0x6   :  { %v518_v14 = vld [vmem:[%s681_s1 + $0x70] sm:$0xff]   ;;  %287 = vmatprep.mubr.bf16.mxu0 %v524_v11  ;;  %311 = vmatprep.mubr.bf16.mxu1 %v527_v12  ;;  %v520_v16 = vld [vmem:[%s681_s1 + $0x78] sm:$0xff]   ;;  %v528_v18 = vld [vmem:[%s681_s1 + $0x80] sm:$0xff]  }
   0x7   :  { %435 = vmatpush3.bf16.msra.mxu0 %v509_v3  ;;  %499 = vmatpush3.bf16.msra.mxu1 %v509_v3  ;;  %v519_v15 = vld [vmem:[%s681_s1 + $0x30] sm:$0xff]   ;;  %v521_v17 = vld [vmem:[%s681_s1 + $0x38] sm:$0xff]   ;;  %v522_v19 = vld [vmem:[%s682_s0] ss:$12 sps:$4 sm:$0xff]  }
   0x8   :  { %436 = vmatprep.subr.bf16.mxu0 %v510_v4  ;;  %492 = vmatprep.subr.bf16.mxu1 %v510_v4  ;;  %v530_v21 = vld [vmem:[%s682_s0 + $0x1c] ss:$12 sps:$4 sm:$0xff]   ;;  %v533_v24 = vld [vmem:[%s682_s0 + $0x18] ss:$12 sps:$4 sm:$0xff]   ;;  %v534_v25 = vld [vmem:[%s682_s0 + $0x20] ss:$12 sps:$4 sm:$0xff]  }
   0x9   :  { %v529_v22 = vld [vmem:[%s681_s1 + $0x88] sm:$0xff]   ;;  %v535_v26 = vld [vmem:[%s682_s0 + $0x34] ss:$12 sps:$4 sm:$0xff]   ;;  %v537_v27 = vld [vmem:[%s682_s0 + $0x38] ss:$12 sps:$4 sm:$0xff]  }
   0xa   :  { %v532_v23 = vld [vmem:[%s682_s0 + $0x8] ss:$12 sps:$4 sm:$0xff]   ;;  %v538_v28 = vld [vmem:[%s682_s0 + $0x30] ss:$12 sps:$4 sm:$0xff]   ;;  %v397_v42 = vld [vmem:[%s683_s2] ss:$0 sm:$0xff] }
   0xb   :  { %437 = vmatpush3.bf16.msra.mxu0 %v511_v5  ;;  %500 = vmatpush3.bf16.msra.mxu1 %v511_v5  ;;  %v539_v29 = vld [vmem:[%s682_s0 + $0x50] ss:$12 sps:$4 sm:$0xff]  }
   0xc   :  { %438 = vmatprep.subr.bf16.mxu0 %v512_v6  ;;  %493 = vmatprep.subr.bf16.mxu1 %v512_v6 }
   0xf   :  { %439 = vmatpush3.bf16.msra.mxu0 %v513_v7  ;;  %501 = vmatpush3.bf16.msra.mxu1 %v513_v7 }
  0x10   :  { %440 = vmatprep.subr.bf16.mxu0 %v514_v8  ;;  %494 = vmatprep.subr.bf16.mxu1 %v514_v8 }
  0x13   :  { %441 = vmatpush3.bf16.msra.mxu0 %v515_v9  ;;  %502 = vmatpush3.bf16.msra.mxu1 %v515_v9 }
  0x14   :  { %442 = vmatprep.subr.bf16.mxu0 %v516_v10  ;;  %495 = vmatprep.subr.bf16.mxu1 %v516_v10 }
  0x17   :  { %443 = vmatpush3.bf16.msra.mxu0 %v517_v13  ;;  %503 = vmatpush3.bf16.msra.mxu1 %v517_v13 }
  0x18   :  { %444 = vmatprep.subr.bf16.mxu0 %v518_v14  ;;  %496 = vmatprep.subr.bf16.mxu1 %v518_v14 }
  0x1b   :  { %445 = vmatpush3.bf16.msra.mxu0 %v519_v15  ;;  %504 = vmatpush3.bf16.msra.mxu1 %v519_v15 }
  0x1c   :  { %446 = vmatprep.subr.bf16.mxu0 %v520_v16  ;;  %497 = vmatprep.subr.bf16.mxu1 %v520_v16 }
  0x1f   :  { %447 = vmatpush3.bf16.msra.mxu0 %v521_v17  ;;  %505 = vmatpush3.bf16.msra.mxu1 %v521_v17 }
  0x20   :  { %478 = vmatprep.subr.bf16.mxu1 %v528_v18 }
  0x22   :  { %288 = vmatmul.mubr.bf16.vlgmr.msra.gmra.mrb[0].mxu0 %v522_v19  ;;  %312 = vmatmul.mubr.bf16.vlgmr.msra.gmra.mrb[0].mxu1 %v525_v20 }
  0x23   :  { %479 = vmatpush3.bf16.msra.mxu1 %v528_v18  ;;  %295 = vmatprep.mubr.bf16.mxu0 %v530_v21 }
  0x24   :  { %480 = vmatprep.subr.bf16.mxu1 %v529_v22  ;;  %482 = vmatprep.mubr.msk.bf16.mxu1 %vm242_vm0, %v532_v23 }
  0x27   :  { %481 = vmatpush3.bf16.msra.mxu1 %v529_v22 }
  0x2a   :  { %296 = vmatmul.mubr.bf16.gmra.mrb[4].mxu0 %v533_v24  ;;  %483 = vmatmul.mubr.msk.bf16.vlgmr.msra.gmra.mrb[4].mxu1 %vm242_vm0, %v534_v25 }
  0x2b   :  { %303 = vmatprep.mubr.bf16.mxu0 %v535_v26  ;;  %486 = vmatprep.mubr.msk.bf16.mxu1 %vm242_vm0, %v537_v27 }
  0x32   :  { %304 = vmatmul.mubr.bf16.gmra.mrb[8].mxu0 %v538_v28  ;;  %487 = vmatmul.mubr.msk.bf16.gmra.mrb[8].mxu1 %vm242_vm0, %v539_v29 }
  0xf5   :  { %v448_v30 = vpop.f32.mrb[0].mxu0  ;;  %v466_v31 = vpop.f32.mrb[0].mxu1 }
  0xf6   :  { %v449_v32 = vpop.f32.mrb[1].mxu0  ;;  %v467_v33 = vpop.f32.mrb[1].mxu1 }
  0xf7   :  { %v450_v34 = vadd.f32 %v449_v32, %v448_v30  ;;  %v451_v35 = vpop.f32.mrb[2].mxu0  ;;  %v468_v36 = vadd.f32 %v467_v33, %v466_v31  ;;  %v469_v37 = vpop.f32.mrb[2].mxu1 }
  0xf8   :  { %v452_v38 = vpop.f32.mrb[3].mxu0  ;;  %v470_v39 = vpop.f32.mrb[3].mxu1 }
  0xf9   :  { %v453_v40 = vadd.f32 %v452_v38, %v451_v35  ;;  %v471_v41 = vadd.f32 %v470_v39, %v469_v37  ;;  %v290_v45 = vadd.f32 %v450_v34, %v397_v42  ;;  %v314_v60 = vadd.f32 %v468_v36, %v397_v42 }
  0xfb   :  { %v293_v52 = vadd.f32 %v453_v40, %v397_v42  ;;  %v317_v3 = vadd.f32 %v471_v41, %v397_v42 }
  0xfd   :  { %v454_v43 = vpop.f32.mrb[4].mxu0  ;;  %v484_v44 = vpop.f32.mrb[4].mxu1 }
  0xfe   :  { %v455_v46 = vpop.f32.mrb[5].mxu0  ;;  %v354_v47 = vpop.f32.mrb[5].mxu1 }
  0xff   :  { %v456_v48 = vadd.f32 %v455_v46, %v454_v43  ;;  %v355_v49 = vadd.f32 %v354_v47, %v290_v45  ;;  %v457_v50 = vpop.f32.mrb[6].mxu0  ;;  %v485_v51 = vpop.f32.mrb[6].mxu1 }
 0x100   :  { %v458_v53 = vpop.f32.mrb[7].mxu0  ;;  %v357_v54 = vpop.f32.mrb[7].mxu1 }
 0x101   :  { %v298_v55 = vadd.f32 %v456_v48, %v397_v42  ;;  %385 = vst [vmem:[%s684_s3] sm:$0xff] %v355_v49  ;;  %v459_v56 = vadd.f32 %v458_v53, %v457_v50  ;;  %v358_v57 = vadd.f32 %v357_v54, %v293_v52 }
 0x103   :  { %v363_v58 = vadd.f32 %v484_v44, %v298_v55  ;;  %v301_v59 = vadd.f32 %v459_v56, %v397_v42  ;;  %386 = vst [vmem:[%s684_s3 + $0x8] sm:$0xff] %v358_v57 }
 0x105   :  { %387 = vst [vmem:[%s684_s3 + $0x10] sm:$0xff] %v363_v58  ;;  %v366_v61 = vadd.f32 %v485_v51, %v301_v59  ;;  %v460_v62 = vpop.f32.mrb[8].mxu0  ;;  %v488_v63 = vpop.f32.mrb[8].mxu1 }
 0x106   :  { %v379_v0 = vadd.f32 %v488_v63, %v314_v60  ;;  %v461_v1 = vpop.f32.mrb[9].mxu0  ;;  %v370_v2 = vpop.f32.mrb[9].mxu1 }
 0x107   :  { %388 = vst [vmem:[%s684_s3 + $0x18] sm:$0xff] %v366_v61  ;;  %v462_v4 = vadd.f32 %v461_v1, %v460_v62  ;;  %v463_v5 = vpop.f32.mrb[10].mxu0  ;;  %v489_v6 = vpop.f32.mrb[10].mxu1 }
 0x108   :  { %391 = vst [vmem:[%s684_s3 + $0x30] sm:$0xff] %v379_v0  ;;  %v382_v7 = vadd.f32 %v489_v6, %v317_v3  ;;  %v464_v8 = vpop.f32.mrb[11].mxu0  ;;  %v373_v9 = vpop.f32.mrb[11].mxu1 }
 0x109   :  { %v306_v10 = vadd.f32 %v462_v4, %v397_v42  ;;  %v465_v11 = vadd.f32 %v464_v8, %v463_v5 }
 0x10a   :  { %392 = vst [vmem:[%s684_s3 + $0x38] sm:$0xff] %v382_v7 }
 0x10b   :  { %v371_v12 = vadd.f32 %v370_v2, %v306_v10  ;;  %v309_v13 = vadd.f32 %v465_v11, %v397_v42 }
 0x10d   :  { %389 = vst [vmem:[%s684_s3 + $0x20] sm:$0xff] %v371_v12  ;;  %v374_v14 = vadd.f32 %v373_v9, %v309_v13 }
 0x10f   :  { %390 = vst [vmem:[%s684_s3 + $0x28] sm:$0xff] %v374_v14 }

// kernel: f_net_forward.105
= control target key start
LH: loop header
LB: loop body
LE: loop exit
PB: predicated region body
PF: predicated region fallthrough
CT: control target
= control target key end

     0   :  { %s340_s0 = inlined_call_operand.vmem [shape: f32[64,128], index: 0, kind: input, shape index: {}]   ;;  %s341_s1 = inlined_call_operand.vmem [shape: f32[64,128], index: 1, kind: output, shape index: {}]  }
   0x1   :  { %v217_v0 = vld [vmem:[%s340_s0 + $0x10] sm:$0xff]  ;;  %v222_v1 = vld [vmem:[%s340_s0] sm:$0xff]  ;;  %v229_v2 = vld [vmem:[%s340_s0 + $0x18] sm:$0xff] }
   0x2   :  { %20 = vadd.xlane.f32.xlu1 %v217_v0  ;;  %16 = vadd.xlane.f32.xlu0 %v222_v1  ;;  %v234_v3 = vld [vmem:[%s340_s0 + $0x8] sm:$0xff]  ;;  %v246_v5 = vld [vmem:[%s340_s0 + $0x20] sm:$0xff]  ;;  %v253_v6 = vld [vmem:[%s340_s0 + $0x38] sm:$0xff]  ;;  %v40_v9 = vmul.f32 %v222_v1, %v222_v1  ;;  %v43_v10 = vmul.f32 %v229_v2, %v229_v2  ;;  %v42_v11 = vmul.f32 %v217_v0, %v217_v0 }
   0x3   :  { %v241_v4 = vld [vmem:[%s340_s0 + $0x28] sm:$0xff]  ;;  %v258_v7 = vld [vmem:[%s340_s0 + $0x30] sm:$0xff]  ;;  %v41_v8 = vmul.f32 %v234_v3, %v234_v3  ;;  %v44_v13 = vmul.f32 %v246_v5, %v246_v5  ;;  %v47_v14 = vmul.f32 %v253_v6, %v253_v6 }
   0x4   :  { %v45_v12 = vmul.f32 %v241_v4, %v241_v4  ;;  %v46_v15 = vmul.f32 %v258_v7, %v258_v7 }
   0x6   :  { %22 = vadd.xlane.f32.xlu1 %v229_v2  ;;  %18 = vadd.xlane.f32.xlu0 %v234_v3 }
   0xa   :  { %26 = vadd.xlane.f32.xlu1 %v241_v4  ;;  %24 = vadd.xlane.f32.xlu0 %v246_v5 }
   0xe   :  { %30 = vadd.xlane.f32.xlu1 %v253_v6  ;;  %28 = vadd.xlane.f32.xlu0 %v258_v7 }
  0x12   :  { %50 = vadd.xlane.f32.xlu1 %v41_v8  ;;  %48 = vadd.xlane.f32.xlu0 %v40_v9 }
  0x16   :  { %54 = vadd.xlane.f32.xlu1 %v43_v10  ;;  %52 = vadd.xlane.f32.xlu0 %v42_v11 }
  0x1a   :  { %58 = vadd.xlane.f32.xlu1 %v45_v12  ;;  %56 = vadd.xlane.f32.xlu0 %v44_v13 }
  0x1e   :  { %62 = vadd.xlane.f32.xlu1 %v47_v14  ;;  %60 = vadd.xlane.f32.xlu0 %v46_v15 }
  0x8f   :  { %v21_v16 = vpop.xlane.xlu1 %20  ;;  %v17_v17 = vpop.xlane.xlu0 %16 }
  0x90   :  { %v32_v24 = vmul.f32 0.015625, %v17_v17  ;;  %v278_v26 = vmul.f32 0.015625, %v21_v16 }
  0x92   :  { %v72_v30 = vmul.f32 %v32_v24, %v32_v24  ;;  %v74_v37 = vmul.f32 %v278_v26, %v278_v26  ;;  %v88_v16 = vsub.f32 %v222_v1, %v32_v24 }
  0x93   :  { %v23_v18 = vpop.xlane.xlu1 %22  ;;  %v19_v19 = vpop.xlane.xlu0 %18 }
  0x94   :  { %v33_v25 = vmul.f32 0.015625, %v19_v19  ;;  %v280_v27 = vmul.f32 0.015625, %v23_v18 }
  0x96   :  { %v73_v31 = vmul.f32 %v33_v25, %v33_v25  ;;  %v75_v38 = vmul.f32 %v280_v27, %v280_v27  ;;  %v89_v14 = vsub.f32 %v234_v3, %v33_v25 }
  0x97   :  { %v27_v20 = vpop.xlane.xlu1 %26  ;;  %v25_v21 = vpop.xlane.xlu0 %24 }
  0x98   :  { %v282_v34 = vmul.f32 0.015625, %v27_v20  ;;  %v288_v39 = vmul.f32 0.015625, %v25_v21 }
  0x9a   :  { %v77_v46 = vmul.f32 %v282_v34, %v282_v34  ;;  %v76_v49 = vmul.f32 %v288_v39, %v288_v39  ;;  %v93_v24 = vsub.f32 %v241_v4, %v282_v34 }
  0x9b   :  { %v31_v22 = vpop.xlane.xlu1 %30  ;;  %v29_v23 = vpop.xlane.xlu0 %28 }
  0x9c   :  { %v294_v50 = vmul.f32 0.015625, %v31_v22  ;;  %v296_v51 = vmul.f32 0.015625, %v29_v23  ;;  %v91_v22 = vsub.f32 %v229_v2, %v280_v27  ;;  %v92_v2 = vsub.f32 %v246_v5, %v288_v39 }
  0x9e   :  { %v79_v60 = vmul.f32 %v294_v50, %v294_v50  ;;  %v78_v61 = vmul.f32 %v296_v51, %v296_v51 }
  0x9f   :  { %v51_v28 = vpop.xlane.xlu1 %50  ;;  %v49_v29 = vpop.xlane.xlu0 %48 }
  0xa0   :  { %v65_v32 = vmul.f32 0.015625, %v51_v28  ;;  %v64_v33 = vmul.f32 0.015625, %v49_v29  ;;  %v90_v29 = vsub.f32 %v217_v0, %v278_v26  ;;  %v95_v26 = vsub.f32 %v253_v6, %v294_v50 }
  0xa2   :  { %v81_v35 = vsub.f32 %v65_v32, %v73_v31  ;;  %v80_v36 = vsub.f32 %v64_v33, %v72_v30 }
  0xa3   :  { %v55_v40 = vpop.xlane.xlu1 %54  ;;  %v53_v41 = vpop.xlane.xlu0 %52 }
  0xa4   :  { %v97_v42 = vadd.f32 1e-05, %v81_v35  ;;  %v96_v43 = vadd.f32 1e-05, %v80_v36  ;;  %v67_v44 = vmul.f32 0.015625, %v55_v40  ;;  %v66_v45 = vmul.f32 0.015625, %v53_v41 }
  0xa6   :  { %172 = vrsqrt.f32 %v97_v42  ;;  %v83_v47 = vsub.f32 %v67_v44, %v75_v38  ;;  %v82_v48 = vsub.f32 %v66_v45, %v74_v37  ;;  %v94_v38 = vsub.f32 %v258_v7, %v296_v51 }
  0xa7   :  { %174 = vrsqrt.f32 %v96_v43  ;;  %v59_v52 = vpop.xlane.xlu1 %58  ;;  %v57_v53 = vpop.xlane.xlu0 %56 }
  0xa8   :  { %v99_v54 = vadd.f32 1e-05, %v83_v47  ;;  %v98_v55 = vadd.f32 1e-05, %v82_v48  ;;  %v69_v56 = vmul.f32 0.015625, %v59_v52  ;;  %v68_v57 = vmul.f32 0.015625, %v57_v53 }
  0xaa   :  { %176 = vrsqrt.f32 %v99_v54  ;;  %v85_v58 = vsub.f32 %v69_v56, %v77_v46  ;;  %v84_v59 = vsub.f32 %v68_v57, %v76_v49 }
  0xab   :  { %178 = vrsqrt.f32 %v98_v55  ;;  %v63_v62 = vpop.xlane.xlu1 %62  ;;  %v61_v63 = vpop.xlane.xlu0 %60 }
  0xac   :  { %v101_v8 = vadd.f32 1e-05, %v85_v58  ;;  %v100_v9 = vadd.f32 1e-05, %v84_v59  ;;  %v71_v10 = vmul.f32 0.015625, %v63_v62  ;;  %v70_v11 = vmul.f32 0.015625, %v61_v63 }
  0xae   :  { %180 = vrsqrt.f32 %v101_v8  ;;  %v87_v12 = vsub.f32 %v71_v10, %v79_v60  ;;  %v86_v13 = vsub.f32 %v70_v11, %v78_v61 }
  0xaf   :  { %182 = vrsqrt.f32 %v100_v9 }
  0xb0   :  { %v173_v15 = vpop.eup %172  ;;  %v103_v17 = vadd.f32 1e-05, %v87_v12  ;;  %v102_v18 = vadd.f32 1e-05, %v86_v13 }
  0xb1   :  { %v175_v19 = vpop.eup %174  ;;  %v113_v20 = vmul.f32 %v173_v15, %v89_v14 }
  0xb2   :  { %v112_v21 = vmul.f32 %v175_v19, %v88_v16  ;;  %184 = vrsqrt.f32 %v103_v17 }
  0xb3   :  { %v129_v23 = vmul.f32 0.70710677, %v113_v20  ;;  %186 = vrsqrt.f32 %v102_v18  ;;  %v121_v43 = vmul.f32 0.5, %v113_v20 }
  0xb4   :  { %v177_v28 = vpop.eup %176  ;;  %v128_v3 = vmul.f32 0.70710677, %v112_v21  ;;  %v120_v46 = vmul.f32 0.5, %v112_v21 }
  0xb5   :  { %v179_v25 = vpop.eup %178  ;;  %188 = verf.f32 %v129_v23  ;;  %v115_v30 = vmul.f32 %v177_v28, %v91_v22 }
  0xb6   :  { %190 = verf.f32 %v128_v3  ;;  %v114_v1 = vmul.f32 %v179_v25, %v90_v29 }
  0xb7   :  { %v131_v31 = vmul.f32 0.70710677, %v115_v30  ;;  %v123_v50 = vmul.f32 0.5, %v115_v30 }
  0xb8   :  { %v181_v32 = vpop.eup %180  ;;  %v130_v27 = vmul.f32 0.70710677, %v114_v1  ;;  %v122_v52 = vmul.f32 0.5, %v114_v1 }
  0xb9   :  { %v183_v33 = vpop.eup %182  ;;  %192 = verf.f32 %v131_v31  ;;  %v117_v35 = vmul.f32 %v181_v32, %v93_v24 }
  0xba   :  { %194 = verf.f32 %v130_v27  ;;  %v116_v0 = vmul.f32 %v183_v33, %v92_v2 }
  0xbb   :  { %v133_v36 = vmul.f32 0.70710677, %v117_v35  ;;  %v125_v58 = vmul.f32 0.5, %v117_v35 }
  0xbc   :  { %v185_v37 = vpop.eup %184  ;;  %v132_v4 = vmul.f32 0.70710677, %v116_v0  ;;  %v124_v60 = vmul.f32 0.5, %v116_v0 }
  0xbd   :  { %v187_v34 = vpop.eup %186  ;;  %196 = verf.f32 %v133_v36  ;;  %v119_v40 = vmul.f32 %v185_v37, %v95_v26 }
  0xbe   :  { %198 = verf.f32 %v132_v4  ;;  %v118_v5 = vmul.f32 %v187_v34, %v94_v38 }
  0xbf   :  { %v189_v39 = vpop.eup %188  ;;  %v135_v41 = vmul.f32 0.70710677, %v119_v40  ;;  %v127_v10 = vmul.f32 0.5, %v119_v40 }
  0xc0   :  { %v191_v42 = vpop.eup %190  ;;  %v145_v44 = vadd.f32 1.0, %v189_v39  ;;  %v134_v45 = vmul.f32 0.70710677, %v118_v5  ;;  %v126_v12 = vmul.f32 0.5, %v118_v5 }
  0xc1   :  { %v144_v47 = vadd.f32 1.0, %v191_v42  ;;  %200 = verf.f32 %v135_v41 }
  0xc2   :  { %v153_v6 = vmul.f32 %v145_v44, %v121_v43  ;;  %202 = verf.f32 %v134_v45 }
  0xc3   :  { %v193_v48 = vpop.eup %192  ;;  %v152_v49 = vmul.f32 %v144_v47, %v120_v46 }
  0xc4   :  { %v195_v7 = vpop.eup %194  ;;  %161 = vst [vmem:[%s341_s1 + $0x8] sm:$0xff] %v153_v6  ;;  %v147_v51 = vadd.f32 1.0, %v193_v48 }
  0xc5   :  { %160 = vst [vmem:[%s341_s1] sm:$0xff] %v152_v49  ;;  %v146_v53 = vadd.f32 1.0, %v195_v7 }
  0xc6   :  { %v155_v54 = vmul.f32 %v147_v51, %v123_v50 }
  0xc7   :  { %v197_v55 = vpop.eup %196  ;;  %v154_v56 = vmul.f32 %v146_v53, %v122_v52 }
  0xc8   :  { %v199_v57 = vpop.eup %198  ;;  %163 = vst [vmem:[%s341_s1 + $0x18] sm:$0xff] %v155_v54  ;;  %v149_v59 = vadd.f32 1.0, %v197_v55 }
  0xc9   :  { %162 = vst [vmem:[%s341_s1 + $0x10] sm:$0xff] %v154_v56  ;;  %v148_v61 = vadd.f32 1.0, %v199_v57 }
  0xca   :  { %v157_v62 = vmul.f32 %v149_v59, %v125_v58 }
  0xcb   :  { %v201_v63 = vpop.eup %200  ;;  %v156_v8 = vmul.f32 %v148_v61, %v124_v60 }
  0xcc   :  { %v203_v9 = vpop.eup %202  ;;  %165 = vst [vmem:[%s341_s1 + $0x28] sm:$0xff] %v157_v62  ;;  %v151_v11 = vadd.f32 1.0, %v201_v63 }
  0xcd   :  { %164 = vst [vmem:[%s341_s1 + $0x20] sm:$0xff] %v156_v8  ;;  %v150_v13 = vadd.f32 1.0, %v203_v9 }
  0xce   :  { %v159_v14 = vmul.f32 %v151_v11, %v127_v10 }
  0xcf   :  { %v158_v15 = vmul.f32 %v150_v13, %v126_v12 }
  0xd0   :  { %167 = vst [vmem:[%s341_s1 + $0x38] sm:$0xff] %v159_v14 }
  0xd1   :  { %166 = vst [vmem:[%s341_s1 + $0x30] sm:$0xff] %v158_v15 }

// kernel: f_net_forward.106
= control target key start
LH: loop header
LB: loop body
LE: loop exit
PB: predicated region body
PF: predicated region fallthrough
CT: control target
= control target key end

     0   :  { %vm434_vm0 = vcmask 523264   ;;  %s1109_s1 = inlined_call_operand.vmem [shape: bf16[576,128], index: 1, kind: input, shape index: {}]   ;;  %s1110_s0 = inlined_call_operand.vmem [shape: bf16[64,576], index: 0, kind: input, shape index: {}]   ;;  %s1111_s2 = inlined_call_operand.vmem [shape: f32[1,128], index: 2, kind: input, shape index: {}]   ;;  %s1112_s3 = inlined_call_operand.vmem [shape: f32[64,128], index: 3, kind: output, shape index: {}]  }
   0x1   :  { %v827_v0 = vld [vmem:[%s1109_s1 + $0x40] sm:$0xff]   ;;  %v831_v4 = vld [vmem:[%s1109_s1 + $0x48] sm:$0xff]   ;;  %v835_v8 = vld [vmem:[%s1109_s1 + $0x50] sm:$0xff]  }
   0x2   :  { %v828_v1 = vld [vmem:[%s1109_s1 + $0xc0] sm:$0xff]   ;;  %715 = vmatprep.subr.bf16.mxu0 %v827_v0  ;;  %v832_v5 = vld [vmem:[%s1109_s1 + $0xc8] sm:$0xff]   ;;  %v836_v9 = vld [vmem:[%s1109_s1 + $0xd0] sm:$0xff]  }
   0x3   :  { %v829_v2 = vld [vmem:[%s1109_s1] sm:$0xff]   ;;  %755 = vmatprep.subr.bf16.mxu1 %v828_v1  ;;  %v833_v6 = vld [vmem:[%s1109_s1 + $0x8] sm:$0xff]   ;;  %v837_v10 = vld [vmem:[%s1109_s1 + $0x10] sm:$0xff]  }
   0x4   :  { %v830_v3 = vld [vmem:[%s1109_s1 + $0x80] sm:$0xff]   ;;  %716 = vmatpush3.bf16.msra.mxu0 %v829_v2  ;;  %v834_v7 = vld [vmem:[%s1109_s1 + $0x88] sm:$0xff]   ;;  %v838_v11 = vld [vmem:[%s1109_s1 + $0x90] sm:$0xff]  }
   0x5   :  { %756 = vmatpush3.bf16.msra.mxu1 %v830_v3  ;;  %717 = vmatprep.subr.bf16.mxu0 %v831_v4  ;;  %v839_v12 = vld [vmem:[%s1109_s1 + $0x58] sm:$0xff]   ;;  %v843_v16 = vld [vmem:[%s1109_s1 + $0x60] sm:$0xff]   ;;  %v847_v20 = vld [vmem:[%s1109_s1 + $0x68] sm:$0xff]  }
   0x6   :  { %757 = vmatprep.subr.bf16.mxu1 %v832_v5  ;;  %v840_v13 = vld [vmem:[%s1109_s1 + $0xd8] sm:$0xff]   ;;  %v844_v17 = vld [vmem:[%s1109_s1 + $0xe0] sm:$0xff]   ;;  %v848_v21 = vld [vmem:[%s1109_s1 + $0xe8] sm:$0xff]  }
   0x7   :  { %v841_v14 = vld [vmem:[%s1109_s1 + $0x18] sm:$0xff]   ;;  %v845_v18 = vld [vmem:[%s1109_s1 + $0x20] sm:$0xff]   ;;  %v849_v22 = vld [vmem:[%s1109_s1 + $0x28] sm:$0xff]  }
   0x8   :  { %718 = vmatpush3.bf16.msra.mxu0 %v833_v6  ;;  %v842_v15 = vld [vmem:[%s1109_s1 + $0x98] sm:$0xff]   ;;  %v846_v19 = vld [vmem:[%s1109_s1 + $0xa0] sm:$0xff]   ;;  %v850_v23 = vld [vmem:[%s1109_s1 + $0xa8] sm:$0xff]  }
   0x9   :  { %758 = vmatpush3.bf16.msra.mxu1 %v834_v7  ;;  %719 = vmatprep.subr.bf16.mxu0 %v835_v8  ;;  %v851_v24 = vld [vmem:[%s1109_s1 + $0x70] sm:$0xff]   ;;  %v855_v28 = vld [vmem:[%s1109_s1 + $0x78] sm:$0xff]   ;;  %v864_v35 = vld [vmem:[%s1110_s0 + $0xc] ss:$20 sps:$4 sm:$0xff]  }
   0xa   :  { %759 = vmatprep.subr.bf16.mxu1 %v836_v9  ;;  %v852_v25 = vld [vmem:[%s1109_s1 + $0xf0] sm:$0xff]   ;;  %v856_v29 = vld [vmem:[%s1109_s1 + $0xf8] sm:$0xff]   ;;  %v865_v36 = vld [vmem:[%s1109_s1 + $0x100] sm:$0xff]   ;;  %544 = vmatprep.mubr.bf16.mxu1 %v864_v35 }
   0xb   :  { %v853_v26 = vld [vmem:[%s1109_s1 + $0x30] sm:$0xff]   ;;  %v857_v30 = vld [vmem:[%s1109_s1 + $0x38] sm:$0xff]   ;;  %v866_v37 = vld [vmem:[%s1110_s0 + $0x2c] ss:$20 sps:$4 sm:$0xff]  }
   0xc   :  { %720 = vmatpush3.bf16.msra.mxu0 %v837_v10  ;;  %v854_v27 = vld [vmem:[%s1109_s1 + $0xb0] sm:$0xff]   ;;  %v858_v31 = vld [vmem:[%s1109_s1 + $0xb8] sm:$0xff]   ;;  %v872_v39 = vld [vmem:[%s1109_s1 + $0x108] sm:$0xff]  }
   0xd   :  { %760 = vmatpush3.bf16.msra.mxu1 %v838_v11  ;;  %721 = vmatprep.subr.bf16.mxu0 %v839_v12  ;;  %v859_v32 = vld [vmem:[%s1110_s0] ss:$20 sps:$4 sm:$0xff]   ;;  %v861_v33 = vld [vmem:[%s1110_s0 + $0x4] ss:$20 sps:$4 sm:$0xff]   ;;  %v862_v34 = vld [vmem:[%s1110_s0 + $0x8] ss:$20 sps:$4 sm:$0xff]  }
   0xe   :  { %761 = vmatprep.subr.bf16.mxu1 %v840_v13  ;;  %479 = vmatprep.mubr.bf16.mxu0 %v861_v33  ;;  %v868_v38 = vld [vmem:[%s1110_s0 + $0x34] ss:$20 sps:$4 sm:$0xff]   ;;  %v871_v41 = vld [vmem:[%s1110_s0 + $0x30] ss:$20 sps:$4 sm:$0xff]   ;;  %v886_v45 = vld [vmem:[%s1109_s1 + $0x118] sm:$0xff]  }
   0xf   :  { %v870_v40 = vld [vmem:[%s1110_s0 + $0x28] ss:$20 sps:$4 sm:$0xff]   ;;  %v879_v44 = vld [vmem:[%s1109_s1 + $0x110] sm:$0xff]   ;;  %v878_v47 = vld [vmem:[%s1110_s0 + $0x58] ss:$20 sps:$4 sm:$0xff]  }
  0x10   :  { %722 = vmatpush3.bf16.msra.mxu0 %v841_v14  ;;  %v873_v42 = vld [vmem:[%s1110_s0 + $0x54] ss:$20 sps:$4 sm:$0xff]   ;;  %v875_v43 = vld [vmem:[%s1110_s0 + $0x5c] ss:$20 sps:$4 sm:$0xff]   ;;  %v882_v49 = vld [vmem:[%s1110_s0 + $0x84] ss:$20 sps:$4 sm:$0xff]  }
  0x11   :  { %762 = vmatpush3.bf16.msra.mxu1 %v842_v15  ;;  %723 = vmatprep.subr.bf16.mxu0 %v843_v16  ;;  %v877_v46 = vld [vmem:[%s1110_s0 + $0x50] ss:$20 sps:$4 sm:$0xff]   ;;  %v884_v50 = vld [vmem:[%s1110_s0 + $0x78] ss:$20 sps:$4 sm:$0xff]   ;;  %v885_v51 = vld [vmem:[%s1110_s0 + $0x80] ss:$20 sps:$4 sm:$0xff]  }
  0x12   :  { %763 = vmatprep.subr.bf16.mxu1 %v844_v17  ;;  %v880_v48 = vld [vmem:[%s1110_s0 + $0x7c] ss:$20 sps:$4 sm:$0xff]   ;;  %v888_v53 = vld [vmem:[%s1110_s0 + $0x60] ss:$20 sps:$4 sm:$0xff]   ;;  %v889_v54 = vld [vmem:[%s1110_s0 + $0x38] ss:$20 sps:$4 sm:$0xff]  }
  0x13   :  { %v887_v52 = vld [vmem:[%s1110_s0 + $0x10] ss:$20 sps:$4 sm:$0xff]   ;;  %v890_v55 = vld [vmem:[%s1110_s0 + $0x88] ss:$20 sps:$4 sm:$0xff]   ;;  %v654_v58 = vld [vmem:[%s1111_s2] ss:$0 sm:$0xff] }
  0x14   :  { %724 = vmatpush3.bf16.msra.mxu0 %v845_v18 }
  0x15   :  { %764 = vmatpush3.bf16.msra.mxu1 %v846_v19  ;;  %725 = vmatprep.subr.bf16.mxu0 %v847_v20 }
  0x16   :  { %765 = vmatprep.subr.bf16.mxu1 %v848_v21 }
  0x18   :  { %726 = vmatpush3.bf16.msra.mxu0 %v849_v22 }
  0x19   :  { %766 = vmatpush3.bf16.msra.mxu1 %v850_v23  ;;  %727 = vmatprep.subr.bf16.mxu0 %v851_v24 }
  0x1a   :  { %767 = vmatprep.subr.bf16.mxu1 %v852_v25 }
  0x1c   :  { %728 = vmatpush3.bf16.msra.mxu0 %v853_v26 }
  0x1d   :  { %768 = vmatpush3.bf16.msra.mxu1 %v854_v27  ;;  %729 = vmatprep.subr.bf16.mxu0 %v855_v28 }
  0x1e   :  { %769 = vmatprep.subr.bf16.mxu1 %v856_v29 }
  0x20   :  { %730 = vmatpush3.bf16.msra.mxu0 %v857_v30 }
  0x21   :  { %770 = vmatpush3.bf16.msra.mxu1 %v858_v31  ;;  %803 = vmatprep.subr.bf16.mxu0 %v865_v36 }
  0x22   :  { %819 = vmatprep.subr.bf16.mxu1 %v865_v36 }
  0x23   :  { %480 = vmatmul.mubr.bf16.vlgmr.msra.gmra.mrb[0].mxu0 %v859_v32 }
  0x24   :  { %545 = vmatmul.mubr.bf16.vlgmr.msra.gmra.mrb[0].mxu1 %v862_v34  ;;  %804 = vmatpush3.bf16.msra.mxu0 %v865_v36 }
  0x25   :  { %823 = vmatpush3.bf16.msra.mxu1 %v865_v36  ;;  %487 = vmatprep.mubr.bf16.mxu0 %v866_v37 }
  0x26   :  { %552 = vmatprep.mubr.bf16.mxu1 %v868_v38  ;;  %805 = vmatprep.subr.bf16.mxu0 %v872_v39 }
  0x27   :  { %820 = vmatprep.subr.bf16.mxu1 %v872_v39 }
  0x28   :  { %806 = vmatpush3.bf16.msra.mxu0 %v872_v39 }
  0x29   :  { %824 = vmatpush3.bf16.msra.mxu1 %v872_v39  ;;  %807 = vmatprep.subr.bf16.mxu0 %v879_v44 }
  0x2a   :  { %821 = vmatprep.subr.bf16.mxu1 %v879_v44 }
  0x2b   :  { %488 = vmatmul.mubr.bf16.gmra.mrb[4].mxu0 %v870_v40 }
  0x2c   :  { %553 = vmatmul.mubr.bf16.gmra.mrb[4].mxu1 %v871_v41  ;;  %495 = vmatprep.mubr.bf16.mxu0 %v873_v42 }
  0x2d   :  { %560 = vmatprep.mubr.bf16.mxu1 %v875_v43  ;;  %808 = vmatpush3.bf16.msra.mxu0 %v879_v44 }
  0x2e   :  { %825 = vmatpush3.bf16.msra.mxu1 %v879_v44  ;;  %809 = vmatprep.subr.bf16.mxu0 %v886_v45 }
  0x2f   :  { %822 = vmatprep.subr.bf16.mxu1 %v886_v45 }
  0x31   :  { %810 = vmatpush3.bf16.msra.mxu0 %v886_v45 }
  0x32   :  { %826 = vmatpush3.bf16.msra.mxu1 %v886_v45 }
  0x33   :  { %496 = vmatmul.mubr.bf16.gmra.mrb[8].mxu0 %v877_v46 }
  0x34   :  { %561 = vmatmul.mubr.bf16.gmra.mrb[8].mxu1 %v878_v47  ;;  %503 = vmatprep.mubr.bf16.mxu0 %v880_v48 }
  0x35   :  { %568 = vmatprep.mubr.bf16.mxu1 %v882_v49 }
  0x3b   :  { %504 = vmatmul.mubr.bf16.gmra.mrb[12].mxu0 %v884_v50 }
  0x3c   :  { %569 = vmatmul.mubr.bf16.gmra.mrb[12].mxu1 %v885_v51  ;;  %811 = vmatprep.mubr.msk.bf16.mxu0 %vm434_vm0, %v887_v52 }
  0x3d   :  { %815 = vmatprep.mubr.msk.bf16.mxu1 %vm434_vm0, %v888_v53 }
  0x43   :  { %812 = vmatmul.mubr.msk.bf16.vlgmr.msra.gmra.mrb[16].mxu0 %vm434_vm0, %v889_v54 }
  0x44   :  { %816 = vmatmul.mubr.msk.bf16.vlgmr.msra.gmra.mrb[16].mxu1 %vm434_vm0, %v890_v55 }
  0xf6   :  { %v731_v56 = vpop.f32.mrb[0].mxu0 }
  0xf7   :  { %v771_v57 = vpop.f32.mrb[0].mxu1  ;;  %v732_v59 = vpop.f32.mrb[1].mxu0 }
  0xf8   :  { %v733_v60 = vadd.f32 %v732_v59, %v731_v56  ;;  %v772_v61 = vpop.f32.mrb[1].mxu1  ;;  %v734_v62 = vpop.f32.mrb[2].mxu0 }
  0xf9   :  { %v773_v63 = vadd.f32 %v772_v61, %v771_v57  ;;  %v774_v0 = vpop.f32.mrb[2].mxu1  ;;  %v735_v1 = vpop.f32.mrb[3].mxu0 }
  0xfa   :  { %v482_v2 = vadd.f32 %v733_v60, %v654_v58  ;;  %v736_v3 = vadd.f32 %v735_v1, %v734_v62  ;;  %v775_v4 = vpop.f32.mrb[3].mxu1 }
  0xfb   :  { %v776_v5 = vadd.f32 %v775_v4, %v774_v0 }
  0xfc   :  { %v485_v6 = vadd.f32 %v736_v3, %v654_v58  ;;  %v547_v7 = vadd.f32 %v773_v63, %v482_v2 }
  0xfe   :  { %v737_v8 = vpop.f32.mrb[4].mxu0  ;;  %v1082_v9 = vadd.f32 %v776_v5, %v485_v6 }
  0xff   :  { %v777_v10 = vpop.f32.mrb[4].mxu1  ;;  %v738_v11 = vpop.f32.mrb[5].mxu0 }
 0x100   :  { %v739_v12 = vadd.f32 %v738_v11, %v737_v8  ;;  %v778_v13 = vpop.f32.mrb[5].mxu1  ;;  %v740_v14 = vpop.f32.mrb[6].mxu0 }
 0x101   :  { %v779_v15 = vadd.f32 %v778_v13, %v777_v10  ;;  %v780_v16 = vpop.f32.mrb[6].mxu1  ;;  %v741_v17 = vpop.f32.mrb[7].mxu0 }
 0x102   :  { %v490_v18 = vadd.f32 %v739_v12, %v654_v58  ;;  %v742_v19 = vadd.f32 %v741_v17, %v740_v14  ;;  %v781_v20 = vpop.f32.mrb[7].mxu1 }
 0x103   :  { %v782_v21 = vadd.f32 %v781_v20, %v780_v16 }
 0x104   :  { %v493_v22 = vadd.f32 %v742_v19, %v654_v58  ;;  %v555_v23 = vadd.f32 %v779_v15, %v490_v18 }
 0x106   :  { %v743_v24 = vpop.f32.mrb[8].mxu0  ;;  %v558_v25 = vadd.f32 %v782_v21, %v493_v22 }
 0x107   :  { %v783_v26 = vpop.f32.mrb[8].mxu1  ;;  %v744_v27 = vpop.f32.mrb[9].mxu0 }
 0x108   :  { %v745_v28 = vadd.f32 %v744_v27, %v743_v24  ;;  %v784_v29 = vpop.f32.mrb[9].mxu1  ;;  %v746_v30 = vpop.f32.mrb[10].mxu0 }
 0x109   :  { %v785_v31 = vadd.f32 %v784_v29, %v783_v26  ;;  %v786_v32 = vpop.f32.mrb[10].mxu1  ;;  %v747_v33 = vpop.f32.mrb[11].mxu0 }
 0x10a   :  { %v498_v34 = vadd.f32 %v745_v28, %v654_v58  ;;  %v748_v35 = vadd.f32 %v747_v33, %v746_v30  ;;  %v787_v36 = vpop.f32.mrb[11].mxu1 }
 0x10b   :  { %v788_v37 = vadd.f32 %v787_v36, %v786_v32 }
 0x10c   :  { %v501_v38 = vadd.f32 %v748_v35, %v654_v58  ;;  %v563_v39 = vadd.f32 %v785_v31, %v498_v34 }
 0x10e   :  { %v749_v40 = vpop.f32.mrb[12].mxu0  ;;  %v566_v41 = vadd.f32 %v788_v37, %v501_v38 }
 0x10f   :  { %v789_v42 = vpop.f32.mrb[12].mxu1  ;;  %v750_v43 = vpop.f32.mrb[13].mxu0 }
 0x110   :  { %v751_v44 = vadd.f32 %v750_v43, %v749_v40  ;;  %v790_v45 = vpop.f32.mrb[13].mxu1  ;;  %v752_v46 = vpop.f32.mrb[14].mxu0 }
 0x111   :  { %v791_v47 = vadd.f32 %v790_v45, %v789_v42  ;;  %v792_v48 = vpop.f32.mrb[14].mxu1  ;;  %v753_v49 = vpop.f32.mrb[15].mxu0 }
 0x112   :  { %v506_v50 = vadd.f32 %v751_v44, %v654_v58  ;;  %v754_v51 = vadd.f32 %v753_v49, %v752_v46  ;;  %v793_v52 = vpop.f32.mrb[15].mxu1 }
 0x113   :  { %v794_v53 = vadd.f32 %v793_v52, %v792_v48 }
 0x114   :  { %v509_v54 = vadd.f32 %v754_v51, %v654_v58  ;;  %v571_v55 = vadd.f32 %v791_v47, %v506_v50 }
 0x116   :  { %v813_v56 = vpop.f32.mrb[16].mxu0  ;;  %v574_v57 = vadd.f32 %v794_v53, %v509_v54 }
 0x117   :  { %v620_v59 = vadd.f32 %v813_v56, %v555_v23  ;;  %v817_v60 = vpop.f32.mrb[16].mxu1  ;;  %v611_v61 = vpop.f32.mrb[17].mxu0 }
 0x118   :  { %v636_v62 = vadd.f32 %v817_v60, %v571_v55  ;;  %v612_v63 = vadd.f32 %v611_v61, %v547_v7  ;;  %v627_v0 = vpop.f32.mrb[17].mxu1  ;;  %v814_v1 = vpop.f32.mrb[18].mxu0 }
 0x119   :  { %644 = vst [vmem:[%s1112_s3 + $0x10] sm:$0xff] %v620_v59  ;;  %v628_v2 = vadd.f32 %v627_v0, %v563_v39  ;;  %v623_v3 = vadd.f32 %v814_v1, %v558_v25  ;;  %v818_v4 = vpop.f32.mrb[18].mxu1  ;;  %v614_v5 = vpop.f32.mrb[19].mxu0 }
 0x11a   :  { %648 = vst [vmem:[%s1112_s3 + $0x30] sm:$0xff] %v636_v62  ;;  %642 = vst [vmem:[%s1112_s3] sm:$0xff] %v612_v63  ;;  %v639_v58 = vadd.f32 %v818_v4, %v574_v57  ;;  %v615_v6 = vadd.f32 %v614_v5, %v1082_v9  ;;  %v630_v7 = vpop.f32.mrb[19].mxu1 }
 0x11b   :  { %646 = vst [vmem:[%s1112_s3 + $0x20] sm:$0xff] %v628_v2  ;;  %645 = vst [vmem:[%s1112_s3 + $0x18] sm:$0xff] %v623_v3  ;;  %v631_v8 = vadd.f32 %v630_v7, %v566_v41 }
 0x11c   :  { %649 = vst [vmem:[%s1112_s3 + $0x38] sm:$0xff] %v639_v58  ;;  %643 = vst [vmem:[%s1112_s3 + $0x8] sm:$0xff] %v615_v6 }
 0x11d   :  { %647 = vst [vmem:[%s1112_s3 + $0x28] sm:$0xff] %v631_v8 }

// kernel: reverse.22
= control target key start
LH: loop header
LB: loop body
LE: loop exit
PB: predicated region body
PF: predicated region fallthrough
CT: control target
= control target key end

     0   :  { %s44_s0 = inlined_call_operand.vmem [shape: f32[1,32,8,3], index: 0, kind: input, shape index: {}]   ;;  %s45_s1 = inlined_call_operand.vmem [shape: f32[1,32,8,3], index: 1, kind: output, shape index: {}]  }
   0x1   :  { %v12_v0 = vld [vmem:[%s44_s0 + $0x10] sm:$0xff]  ;;  %v13_v1 = vld [vmem:[%s44_s0 + $0x8] sm:$0xff]  ;;  %v9_v2 = vld [vmem:[%s44_s0] sm:$0xff] }
   0x2   :  { %4 = vst [vmem:[%s45_s1] sm:$0xff] %v12_v0  ;;  %14 = vst [vmem:[%s45_s1 + $0x8] sm:$0xff] %v13_v1 }
   0x3   :  { %15 = vst [vmem:[%s45_s1 + $0x10] sm:$0xff] %v9_v2 }

// kernel: f_net_forward.108
= control target key start
LH: loop header
LB: loop body
LE: loop exit
PB: predicated region body
PF: predicated region fallthrough
CT: control target
= control target key end

     0   :  { %v452_v0 = vmov 0.0   ;;  %vm453_vm0 = vmmov 0   ;;  %s593_s1 = inlined_call_operand.vmem [shape: bf16[128,128], index: 1, kind: input, shape index: {}]   ;;  %s594_s0 = inlined_call_operand.vmem [shape: bf16[48,128], index: 0, kind: input, shape index: {}]   ;;  %s595_s3 = inlined_call_operand.vmem [shape: bf16[128,128], index: 3, kind: input, shape index: {}]   ;;  %s596_s2 = inlined_call_operand.vmem [shape: f32[1,128], index: 2, kind: input, shape index: {}]   ;;  %s597_s4 = inlined_call_operand.vmem [shape: f32[1,128], index: 4, kind: input, shape index: {}]   ;;  %s598_s5 = inlined_call_operand.vmem [shape: f32[48,128], index: 5, kind: output, shape index: {}]  }
   0x1   :  { %375 = vmatprep.subr.bf16.mxu0 %v452_v0  ;;  %v433_v1 = vld [vmem:[%s593_s1] sm:$0xff]   ;;  %391 = vmatprep.mubr.msk.bf16.mxu0 %vm453_vm0, %v452_v0  ;;  %v434_v2 = vld [vmem:[%s593_s1 + $0x8] sm:$0xff]   ;;  %v435_v3 = vld [vmem:[%s593_s1 + $0x10] sm:$0xff]  }
   0x2   :  { %403 = vmatprep.subr.bf16.mxu1 %v452_v0  ;;  %419 = vmatprep.mubr.msk.bf16.mxu1 %vm453_vm0, %v452_v0  ;;  %v436_v4 = vld [vmem:[%s593_s1 + $0x18] sm:$0xff]   ;;  %v444_v5 = vld [vmem:[%s595_s3] sm:$0xff]   ;;  %v445_v6 = vld [vmem:[%s595_s3 + $0x8] sm:$0xff]  }
   0x3   :  { %376 = vmatpush3.bf16.msra.mxu0 %v433_v1  ;;  %404 = vmatpush3.bf16.msra.mxu1 %v444_v5  ;;  %v437_v7 = vld [vmem:[%s593_s1 + $0x20] sm:$0xff]   ;;  %v446_v8 = vld [vmem:[%s595_s3 + $0x10] sm:$0xff]   ;;  %v438_v9 = vld [vmem:[%s593_s1 + $0x28] sm:$0xff]  }
   0x4   :  { %377 = vmatprep.subr.bf16.mxu0 %v452_v0  ;;  %405 = vmatprep.subr.bf16.mxu1 %v452_v0  ;;  %v447_v10 = vld [vmem:[%s595_s3 + $0x18] sm:$0xff]   ;;  %v439_v11 = vld [vmem:[%s593_s1 + $0x30] sm:$0xff]   ;;  %v448_v12 = vld [vmem:[%s595_s3 + $0x20] sm:$0xff]  }
   0x5   :  { %v440_v13 = vld [vmem:[%s593_s1 + $0x38] sm:$0xff]   ;;  %v441_v14 = vld [vmem:[%s594_s0] sm:$0xff]   ;;  %v449_v15 = vld [vmem:[%s595_s3 + $0x28] sm:$0xff]  }
   0x6   :  { %v442_v16 = vld [vmem:[%s594_s0 + $0x8] sm:$0xff]   ;;  %v443_v17 = vld [vmem:[%s594_s0 + $0x10] sm:$0xff]   ;;  %v451_v19 = vld [vmem:[%s595_s3 + $0x38] sm:$0xff]  }
   0x7   :  { %378 = vmatpush3.bf16.msra.mxu0 %v434_v2  ;;  %406 = vmatpush3.bf16.msra.mxu1 %v445_v6  ;;  %v450_v18 = vld [vmem:[%s595_s3 + $0x30] sm:$0xff]   ;;  %v332_v20 = vld [vmem:[%s596_s2] ss:$0 sm:$0xff] }
   0x8   :  { %379 = vmatprep.subr.bf16.mxu0 %v452_v0  ;;  %407 = vmatprep.subr.bf16.mxu1 %v452_v0  ;;  %v344_v54 = vld [vmem:[%s597_s4] ss:$0 sm:$0xff] }
   0xb   :  { %380 = vmatpush3.bf16.msra.mxu0 %v435_v3  ;;  %408 = vmatpush3.bf16.msra.mxu1 %v446_v8 }
   0xc   :  { %381 = vmatprep.subr.bf16.mxu0 %v452_v0  ;;  %409 = vmatprep.subr.bf16.mxu1 %v452_v0 }
   0xf   :  { %382 = vmatpush3.bf16.msra.mxu0 %v436_v4  ;;  %410 = vmatpush3.bf16.msra.mxu1 %v447_v10 }
  0x10   :  { %383 = vmatprep.subr.bf16.mxu0 %v452_v0  ;;  %411 = vmatprep.subr.bf16.mxu1 %v452_v0 }
  0x13   :  { %384 = vmatpush3.bf16.msra.mxu0 %v437_v7  ;;  %412 = vmatpush3.bf16.msra.mxu1 %v448_v12 }
  0x14   :  { %385 = vmatprep.subr.bf16.mxu0 %v452_v0  ;;  %413 = vmatprep.subr.bf16.mxu1 %v452_v0 }
  0x17   :  { %386 = vmatpush3.bf16.msra.mxu0 %v438_v9  ;;  %414 = vmatpush3.bf16.msra.mxu1 %v449_v15 }
  0x18   :  { %387 = vmatprep.subr.bf16.mxu0 %v452_v0  ;;  %415 = vmatprep.subr.bf16.mxu1 %v452_v0 }
  0x1b   :  { %388 = vmatpush3.bf16.msra.mxu0 %v439_v11  ;;  %416 = vmatpush3.bf16.msra.mxu1 %v450_v18 }
  0x1c   :  { %389 = vmatprep.subr.bf16.mxu0 %v452_v0  ;;  %417 = vmatprep.subr.bf16.mxu1 %v452_v0 }
  0x1f   :  { %390 = vmatpush3.bf16.msra.mxu0 %v440_v13  ;;  %418 = vmatpush3.bf16.msra.mxu1 %v451_v19 }
  0x22   :  { %392 = vmatmul.mubr.bf16.vlgmr.msra.gmra.mrb[0].mxu0 %v441_v14 }
  0x23   :  { %395 = vmatprep.mubr.msk.bf16.mxu0 %vm453_vm0, %v452_v0 }
  0x2a   :  { %396 = vmatmul.mubr.bf16.gmra.mrb[4].mxu0 %v442_v16 }
  0x2b   :  { %399 = vmatprep.mubr.msk.bf16.mxu0 %vm453_vm0, %v452_v0 }
  0x32   :  { %400 = vmatmul.mubr.bf16.gmra.mrb[8].mxu0 %v443_v17 }
  0xf5   :  { %v150_v21 = vpop.f32.mrb[0].mxu0 }
  0xf6   :  { %v151_v22 = vadd.f32 %v332_v20, %v150_v21  ;;  %v393_v23 = vpop.f32.mrb[1].mxu0 }
  0xf7   :  { %v153_v24 = vpop.f32.mrb[2].mxu0 }
  0xf8   :  { %v179_v25 = vmul.f32 0.1, %v151_v22  ;;  %v154_v26 = vadd.f32 %v332_v20, %v153_v24  ;;  %v394_v27 = vpop.f32.mrb[3].mxu0  ;;  %vm173_vm1 = vcmp.ge.f32.partialorder %v151_v22, 0.0 }
  0xfa   :  { %vm174_vm2 = vcmp.ge.f32.partialorder %v154_v26, 0.0  ;;  %v180_v28 = vmul.f32 0.1, %v154_v26  ;;  %v185_v29 = vsel %vm173_vm1, %v151_v22, %v179_v25 }
  0xfc   :  { %v186_v30 = vsel %vm174_vm2, %v154_v26, %v180_v28 }
  0xfd   :  { %v158_v31 = vpop.f32.mrb[4].mxu0  ;;  %v191_v32 = vpack.c.bf16 %v186_v30, %v185_v29 }
  0xfe   :  { %v159_v33 = vadd.f32 %v332_v20, %v158_v31  ;;  %v397_v34 = vpop.f32.mrb[5].mxu0 }
  0xff   :  { %v161_v35 = vpop.f32.mrb[6].mxu0  ;;  %420 = vmatmul.mubr.bf16.vlgmr.msra.gmra.mrb[0].mxu1 %v191_v32 }
 0x100   :  { %v181_v36 = vmul.f32 0.1, %v159_v33  ;;  %v162_v37 = vadd.f32 %v332_v20, %v161_v35  ;;  %v398_v38 = vpop.f32.mrb[7].mxu0  ;;  %423 = vmatprep.mubr.msk.bf16.mxu1 %vm453_vm0, %v452_v0  ;;  %vm175_vm3 = vcmp.ge.f32.partialorder %v159_v33, 0.0 }
 0x102   :  { %vm176_vm4 = vcmp.ge.f32.partialorder %v162_v37, 0.0  ;;  %v182_v39 = vmul.f32 0.1, %v162_v37  ;;  %v187_v40 = vsel %vm175_vm3, %v159_v33, %v181_v36 }
 0x104   :  { %v188_v41 = vsel %vm176_vm4, %v162_v37, %v182_v39 }
 0x105   :  { %v166_v42 = vpop.f32.mrb[8].mxu0  ;;  %v192_v43 = vpack.c.bf16 %v188_v41, %v187_v40 }
 0x106   :  { %v167_v44 = vadd.f32 %v332_v20, %v166_v42  ;;  %v401_v45 = vpop.f32.mrb[9].mxu0 }
 0x107   :  { %v169_v46 = vpop.f32.mrb[10].mxu0  ;;  %424 = vmatmul.mubr.bf16.gmra.mrb[4].mxu1 %v192_v43 }
 0x108   :  { %v183_v47 = vmul.f32 0.1, %v167_v44  ;;  %v170_v48 = vadd.f32 %v332_v20, %v169_v46  ;;  %v402_v49 = vpop.f32.mrb[11].mxu0  ;;  %427 = vmatprep.mubr.msk.bf16.mxu1 %vm453_vm0, %v452_v0  ;;  %vm177_vm5 = vcmp.ge.f32.partialorder %v167_v44, 0.0 }
 0x10a   :  { %vm178_vm6 = vcmp.ge.f32.partialorder %v170_v48, 0.0  ;;  %v184_v50 = vmul.f32 0.1, %v170_v48  ;;  %v189_v51 = vsel %vm177_vm5, %v167_v44, %v183_v47 }
 0x10c   :  { %v190_v52 = vsel %vm178_vm6, %v170_v48, %v184_v50 }
 0x10d   :  { %v193_v53 = vpack.c.bf16 %v190_v52, %v189_v51 }
 0x10f   :  { %428 = vmatmul.mubr.bf16.gmra.mrb[8].mxu1 %v193_v53 }
 0x1d2   :  { %v299_v55 = vpop.f32.mrb[0].mxu1 }
 0x1d3   :  { %v300_v56 = vadd.f32 %v344_v54, %v299_v55  ;;  %v421_v57 = vpop.f32.mrb[1].mxu1 }
 0x1d4   :  { %v302_v58 = vpop.f32.mrb[2].mxu1 }
 0x1d5   :  { %322 = vst [vmem:[%s598_s5] sm:$0xff] %v300_v56  ;;  %v303_v59 = vadd.f32 %v344_v54, %v302_v58  ;;  %v422_v60 = vpop.f32.mrb[3].mxu1 }
 0x1d7   :  { %323 = vst [vmem:[%s598_s5 + $0x8] sm:$0xff] %v303_v59 }
 0x1da   :  { %v307_v61 = vpop.f32.mrb[4].mxu1 }
 0x1db   :  { %v308_v62 = vadd.f32 %v344_v54, %v307_v61  ;;  %v425_v63 = vpop.f32.mrb[5].mxu1 }
 0x1dc   :  { %v310_v0 = vpop.f32.mrb[6].mxu1 }
 0x1dd   :  { %324 = vst [vmem:[%s598_s5 + $0x10] sm:$0xff] %v308_v62  ;;  %v311_v1 = vadd.f32 %v344_v54, %v310_v0  ;;  %v426_v2 = vpop.f32.mrb[7].mxu1 }
 0x1df   :  { %325 = vst [vmem:[%s598_s5 + $0x18] sm:$0xff] %v311_v1 }
 0x1e2   :  { %v315_v3 = vpop.f32.mrb[8].mxu1 }
 0x1e3   :  { %v316_v4 = vadd.f32 %v344_v54, %v315_v3  ;;  %v429_v5 = vpop.f32.mrb[9].mxu1 }
 0x1e4   :  { %v318_v6 = vpop.f32.mrb[10].mxu1 }
 0x1e5   :  { %326 = vst [vmem:[%s598_s5 + $0x20] sm:$0xff] %v316_v4  ;;  %v319_v7 = vadd.f32 %v344_v54, %v318_v6  ;;  %v430_v8 = vpop.f32.mrb[11].mxu1 }
 0x1e7   :  { %327 = vst [vmem:[%s598_s5 + $0x28] sm:$0xff] %v319_v7 }

// kernel: f_net_forward.112
= control target key start
LH: loop header
LB: loop body
LE: loop exit
PB: predicated region body
PF: predicated region fallthrough
CT: control target
= control target key end

     0   :  { %vm242_vm0 = vcmask 261120   ;;  %s737_s1 = inlined_call_operand.vmem [shape: bf16[288,128], index: 1, kind: input, shape index: {}]   ;;  %s738_s0 = inlined_call_operand.vmem [shape: bf16[64,288], index: 0, kind: input, shape index: {}]   ;;  %s739_s2 = inlined_call_operand.vmem [shape: f32[1,128], index: 2, kind: input, shape index: {}]   ;;  %s740_s3 = inlined_call_operand.vmem [shape: f32[64,128], index: 3, kind: output, shape index: {}]  }
   0x1   :  { %v546_v0 = vld [vmem:[%s737_s1 + $0x40] sm:$0xff]   ;;  %v548_v2 = vld [vmem:[%s737_s1 + $0x48] sm:$0xff]   ;;  %v550_v4 = vld [vmem:[%s737_s1 + $0x50] sm:$0xff]  }
   0x2   :  { %v547_v1 = vld [vmem:[%s737_s1] sm:$0xff]   ;;  %472 = vmatprep.subr.bf16.mxu0 %v546_v0  ;;  %530 = vmatprep.subr.bf16.mxu1 %v546_v0  ;;  %v549_v3 = vld [vmem:[%s737_s1 + $0x8] sm:$0xff]   ;;  %v551_v5 = vld [vmem:[%s737_s1 + $0x10] sm:$0xff]  }
   0x3   :  { %473 = vmatpush3.bf16.msra.mxu0 %v547_v1  ;;  %538 = vmatpush3.bf16.msra.mxu1 %v547_v1  ;;  %v552_v6 = vld [vmem:[%s737_s1 + $0x58] sm:$0xff]   ;;  %v554_v8 = vld [vmem:[%s737_s1 + $0x60] sm:$0xff]   ;;  %v556_v10 = vld [vmem:[%s737_s1 + $0x68] sm:$0xff]  }
   0x4   :  { %474 = vmatprep.subr.bf16.mxu0 %v548_v2  ;;  %531 = vmatprep.subr.bf16.mxu1 %v548_v2  ;;  %v553_v7 = vld [vmem:[%s737_s1 + $0x18] sm:$0xff]   ;;  %v555_v9 = vld [vmem:[%s737_s1 + $0x20] sm:$0xff]   ;;  %v557_v13 = vld [vmem:[%s737_s1 + $0x28] sm:$0xff]  }
   0x5   :  { %v564_v11 = vld [vmem:[%s738_s0 + $0x4] ss:$12 sps:$4 sm:$0xff]   ;;  %v567_v12 = vld [vmem:[%s738_s0 + $0x4c] ss:$12 sps:$4 sm:$0xff]   ;;  %v565_v20 = vld [vmem:[%s738_s0 + $0x48] ss:$12 sps:$4 sm:$0xff]  }
   0x6   :  { %v558_v14 = vld [vmem:[%s737_s1 + $0x70] sm:$0xff]   ;;  %287 = vmatprep.mubr.bf16.mxu0 %v564_v11  ;;  %311 = vmatprep.mubr.bf16.mxu1 %v567_v12  ;;  %v560_v16 = vld [vmem:[%s737_s1 + $0x78] sm:$0xff]   ;;  %v568_v18 = vld [vmem:[%s737_s1 + $0x80] sm:$0xff]  }
   0x7   :  { %475 = vmatpush3.bf16.msra.mxu0 %v549_v3  ;;  %539 = vmatpush3.bf16.msra.mxu1 %v549_v3  ;;  %v559_v15 = vld [vmem:[%s737_s1 + $0x30] sm:$0xff]   ;;  %v561_v17 = vld [vmem:[%s737_s1 + $0x38] sm:$0xff]   ;;  %v562_v19 = vld [vmem:[%s738_s0] ss:$12 sps:$4 sm:$0xff]  }
   0x8   :  { %476 = vmatprep.subr.bf16.mxu0 %v550_v4  ;;  %532 = vmatprep.subr.bf16.mxu1 %v550_v4  ;;  %v570_v21 = vld [vmem:[%s738_s0 + $0x1c] ss:$12 sps:$4 sm:$0xff]   ;;  %v573_v24 = vld [vmem:[%s738_s0 + $0x18] ss:$12 sps:$4 sm:$0xff]   ;;  %v574_v25 = vld [vmem:[%s738_s0 + $0x20] ss:$12 sps:$4 sm:$0xff]  }
   0x9   :  { %v569_v22 = vld [vmem:[%s737_s1 + $0x88] sm:$0xff]   ;;  %v575_v26 = vld [vmem:[%s738_s0 + $0x34] ss:$12 sps:$4 sm:$0xff]   ;;  %v577_v27 = vld [vmem:[%s738_s0 + $0x38] ss:$12 sps:$4 sm:$0xff]  }
   0xa   :  { %v572_v23 = vld [vmem:[%s738_s0 + $0x8] ss:$12 sps:$4 sm:$0xff]   ;;  %v578_v28 = vld [vmem:[%s738_s0 + $0x30] ss:$12 sps:$4 sm:$0xff]   ;;  %v437_v42 = vld [vmem:[%s739_s2] ss:$0 sm:$0xff] }
   0xb   :  { %477 = vmatpush3.bf16.msra.mxu0 %v551_v5  ;;  %540 = vmatpush3.bf16.msra.mxu1 %v551_v5  ;;  %v579_v29 = vld [vmem:[%s738_s0 + $0x50] ss:$12 sps:$4 sm:$0xff]  }
   0xc   :  { %478 = vmatprep.subr.bf16.mxu0 %v552_v6  ;;  %533 = vmatprep.subr.bf16.mxu1 %v552_v6 }
   0xf   :  { %479 = vmatpush3.bf16.msra.mxu0 %v553_v7  ;;  %541 = vmatpush3.bf16.msra.mxu1 %v553_v7 }
  0x10   :  { %480 = vmatprep.subr.bf16.mxu0 %v554_v8  ;;  %534 = vmatprep.subr.bf16.mxu1 %v554_v8 }
  0x13   :  { %481 = vmatpush3.bf16.msra.mxu0 %v555_v9  ;;  %542 = vmatpush3.bf16.msra.mxu1 %v555_v9 }
  0x14   :  { %482 = vmatprep.subr.bf16.mxu0 %v556_v10  ;;  %535 = vmatprep.subr.bf16.mxu1 %v556_v10 }
  0x17   :  { %483 = vmatpush3.bf16.msra.mxu0 %v557_v13  ;;  %543 = vmatpush3.bf16.msra.mxu1 %v557_v13 }
  0x18   :  { %484 = vmatprep.subr.bf16.mxu0 %v558_v14  ;;  %536 = vmatprep.subr.bf16.mxu1 %v558_v14 }
  0x1b   :  { %485 = vmatpush3.bf16.msra.mxu0 %v559_v15  ;;  %544 = vmatpush3.bf16.msra.mxu1 %v559_v15 }
  0x1c   :  { %486 = vmatprep.subr.bf16.mxu0 %v560_v16  ;;  %537 = vmatprep.subr.bf16.mxu1 %v560_v16 }
  0x1f   :  { %487 = vmatpush3.bf16.msra.mxu0 %v561_v17  ;;  %545 = vmatpush3.bf16.msra.mxu1 %v561_v17 }
  0x20   :  { %518 = vmatprep.subr.bf16.mxu1 %v568_v18 }
  0x22   :  { %288 = vmatmul.mubr.bf16.vlgmr.msra.gmra.mrb[0].mxu0 %v562_v19  ;;  %312 = vmatmul.mubr.bf16.vlgmr.msra.gmra.mrb[0].mxu1 %v565_v20 }
  0x23   :  { %519 = vmatpush3.bf16.msra.mxu1 %v568_v18  ;;  %295 = vmatprep.mubr.bf16.mxu0 %v570_v21 }
  0x24   :  { %520 = vmatprep.subr.bf16.mxu1 %v569_v22  ;;  %522 = vmatprep.mubr.msk.bf16.mxu1 %vm242_vm0, %v572_v23 }
  0x27   :  { %521 = vmatpush3.bf16.msra.mxu1 %v569_v22 }
  0x2a   :  { %296 = vmatmul.mubr.bf16.gmra.mrb[4].mxu0 %v573_v24  ;;  %523 = vmatmul.mubr.msk.bf16.vlgmr.msra.gmra.mrb[4].mxu1 %vm242_vm0, %v574_v25 }
  0x2b   :  { %303 = vmatprep.mubr.bf16.mxu0 %v575_v26  ;;  %526 = vmatprep.mubr.msk.bf16.mxu1 %vm242_vm0, %v577_v27 }
  0x32   :  { %304 = vmatmul.mubr.bf16.gmra.mrb[8].mxu0 %v578_v28  ;;  %527 = vmatmul.mubr.msk.bf16.gmra.mrb[8].mxu1 %vm242_vm0, %v579_v29 }
  0xf5   :  { %v488_v30 = vpop.f32.mrb[0].mxu0  ;;  %v506_v31 = vpop.f32.mrb[0].mxu1 }
  0xf6   :  { %v489_v32 = vpop.f32.mrb[1].mxu0  ;;  %v507_v33 = vpop.f32.mrb[1].mxu1 }
  0xf7   :  { %v490_v34 = vadd.f32 %v489_v32, %v488_v30  ;;  %v491_v35 = vpop.f32.mrb[2].mxu0  ;;  %v508_v36 = vadd.f32 %v507_v33, %v506_v31  ;;  %v509_v37 = vpop.f32.mrb[2].mxu1 }
  0xf8   :  { %v492_v38 = vpop.f32.mrb[3].mxu0  ;;  %v510_v39 = vpop.f32.mrb[3].mxu1 }
  0xf9   :  { %v493_v40 = vadd.f32 %v492_v38, %v491_v35  ;;  %v511_v41 = vadd.f32 %v510_v39, %v509_v37  ;;  %v290_v45 = vadd.f32 %v490_v34, %v437_v42  ;;  %v314_v62 = vadd.f32 %v508_v36, %v437_v42 }
  0xfb   :  { %v293_v53 = vadd.f32 %v493_v40, %v437_v42  ;;  %v317_v6 = vadd.f32 %v511_v41, %v437_v42 }
  0xfd   :  { %v494_v43 = vpop.f32.mrb[4].mxu0  ;;  %v524_v44 = vpop.f32.mrb[4].mxu1 }
  0xfe   :  { %v495_v46 = vpop.f32.mrb[5].mxu0  ;;  %v354_v47 = vpop.f32.mrb[5].mxu1 }
  0xff   :  { %v496_v48 = vadd.f32 %v495_v46, %v494_v43  ;;  %v355_v49 = vadd.f32 %v354_v47, %v290_v45  ;;  %v497_v50 = vpop.f32.mrb[6].mxu0  ;;  %v525_v51 = vpop.f32.mrb[6].mxu1 }
 0x100   :  { %v498_v52 = vpop.f32.mrb[7].mxu0  ;;  %v357_v54 = vpop.f32.mrb[7].mxu1 }
 0x101   :  { %v298_v55 = vadd.f32 %v496_v48, %v437_v42  ;;  %v393_v56 = vmul.f32 0.70710677, %v355_v49  ;;  %v499_v57 = vadd.f32 %v498_v52, %v497_v50  ;;  %v358_v58 = vadd.f32 %v357_v54, %v293_v53 }
 0x102   :  { %v385_v23 = vmul.f32 0.5, %v355_v49 }
 0x103   :  { %v363_v59 = vadd.f32 %v524_v44, %v298_v55  ;;  %580 = verf.f32 %v393_v56  ;;  %v301_v60 = vadd.f32 %v499_v57, %v437_v42  ;;  %v394_v61 = vmul.f32 0.70710677, %v358_v58 }
 0x104   :  { %v386_v29 = vmul.f32 0.5, %v358_v58 }
 0x105   :  { %v395_v63 = vmul.f32 0.70710677, %v363_v59  ;;  %v366_v0 = vadd.f32 %v525_v51, %v301_v60  ;;  %v500_v1 = vpop.f32.mrb[8].mxu0  ;;  %v528_v2 = vpop.f32.mrb[8].mxu1  ;;  %582 = verf.f32 %v394_v61  ;;  %v387_v31 = vmul.f32 0.5, %v363_v59 }
 0x106   :  { %v379_v3 = vadd.f32 %v528_v2, %v314_v62  ;;  %v501_v4 = vpop.f32.mrb[9].mxu0  ;;  %v370_v5 = vpop.f32.mrb[9].mxu1 }
 0x107   :  { %584 = verf.f32 %v395_v63  ;;  %v396_v7 = vmul.f32 0.70710677, %v366_v0  ;;  %v502_v8 = vadd.f32 %v501_v4, %v500_v1  ;;  %v503_v9 = vpop.f32.mrb[10].mxu0  ;;  %v529_v10 = vpop.f32.mrb[10].mxu1  ;;  %v388_v37 = vmul.f32 0.5, %v366_v0 }
 0x108   :  { %v399_v11 = vmul.f32 0.70710677, %v379_v3  ;;  %v382_v12 = vadd.f32 %v529_v10, %v317_v6  ;;  %v504_v13 = vpop.f32.mrb[11].mxu0  ;;  %v373_v14 = vpop.f32.mrb[11].mxu1  ;;  %v391_v39 = vmul.f32 0.5, %v379_v3 }
 0x109   :  { %586 = verf.f32 %v396_v7  ;;  %v306_v15 = vadd.f32 %v502_v8, %v437_v42  ;;  %v505_v16 = vadd.f32 %v504_v13, %v503_v9 }
 0x10a   :  { %588 = verf.f32 %v399_v11  ;;  %v400_v17 = vmul.f32 0.70710677, %v382_v12  ;;  %v392_v44 = vmul.f32 0.5, %v382_v12 }
 0x10b   :  { %v371_v18 = vadd.f32 %v370_v5, %v306_v15  ;;  %v309_v19 = vadd.f32 %v505_v16, %v437_v42 }
 0x10c   :  { %590 = verf.f32 %v400_v17 }
 0x10d   :  { %v581_v20 = vpop.eup %580  ;;  %v397_v21 = vmul.f32 0.70710677, %v371_v18  ;;  %v374_v22 = vadd.f32 %v373_v14, %v309_v19  ;;  %v389_v48 = vmul.f32 0.5, %v371_v18 }
 0x10e   :  { %v409_v24 = vadd.f32 1.0, %v581_v20 }
 0x10f   :  { %592 = verf.f32 %v397_v21  ;;  %v398_v25 = vmul.f32 0.70710677, %v374_v22  ;;  %v583_v26 = vpop.eup %582  ;;  %v390_v52 = vmul.f32 0.5, %v374_v22 }
 0x110   :  { %v417_v27 = vmul.f32 %v409_v24, %v385_v23  ;;  %v410_v30 = vadd.f32 1.0, %v583_v26 }
 0x111   :  { %v585_v28 = vpop.eup %584  ;;  %594 = verf.f32 %v398_v25 }
 0x112   :  { %v411_v32 = vadd.f32 1.0, %v585_v28  ;;  %425 = vst [vmem:[%s740_s3] sm:$0xff] %v417_v27  ;;  %v418_v34 = vmul.f32 %v410_v30, %v386_v29 }
 0x113   :  { %v587_v33 = vpop.eup %586 }
 0x114   :  { %v589_v35 = vpop.eup %588  ;;  %v419_v36 = vmul.f32 %v411_v32, %v387_v31  ;;  %v412_v38 = vadd.f32 1.0, %v587_v33  ;;  %426 = vst [vmem:[%s740_s3 + $0x8] sm:$0xff] %v418_v34 }
 0x115   :  { %v415_v40 = vadd.f32 1.0, %v589_v35 }
 0x116   :  { %v591_v41 = vpop.eup %590  ;;  %427 = vst [vmem:[%s740_s3 + $0x10] sm:$0xff] %v419_v36  ;;  %v420_v42 = vmul.f32 %v412_v38, %v388_v37 }
 0x117   :  { %v423_v43 = vmul.f32 %v415_v40, %v391_v39  ;;  %v416_v45 = vadd.f32 1.0, %v591_v41 }
 0x118   :  { %428 = vst [vmem:[%s740_s3 + $0x18] sm:$0xff] %v420_v42 }
 0x119   :  { %v593_v46 = vpop.eup %592  ;;  %431 = vst [vmem:[%s740_s3 + $0x30] sm:$0xff] %v423_v43  ;;  %v424_v47 = vmul.f32 %v416_v45, %v392_v44 }
 0x11a   :  { %v413_v49 = vadd.f32 1.0, %v593_v46 }
 0x11b   :  { %v595_v50 = vpop.eup %594  ;;  %432 = vst [vmem:[%s740_s3 + $0x38] sm:$0xff] %v424_v47 }
 0x11c   :  { %v421_v51 = vmul.f32 %v413_v49, %v389_v48  ;;  %v414_v53 = vadd.f32 1.0, %v595_v50 }
 0x11e   :  { %429 = vst [vmem:[%s740_s3 + $0x20] sm:$0xff] %v421_v51  ;;  %v422_v54 = vmul.f32 %v414_v53, %v390_v52 }
 0x120   :  { %430 = vst [vmem:[%s740_s3 + $0x28] sm:$0xff] %v422_v54 }

// kernel: f_net_forward.116
= control target key start
LH: loop header
LB: loop body
LE: loop exit
PB: predicated region body
PF: predicated region fallthrough
CT: control target
= control target key end

     0   :  { %v623_v33 = vmov 0.0   ;;  %vm624_vm0 = vmmov 0   ;;  %vm341_vm1 = vcmask 523264   ;;  %s777_s1 = inlined_call_operand.vmem [shape: bf16[576,128], index: 1, kind: input, shape index: {}]   ;;  %s778_s0 = inlined_call_operand.vmem [shape: bf16[16,576], index: 0, kind: input, shape index: {}]   ;;  %s779_s2 = inlined_call_operand.vmem [shape: f32[1,128], index: 2, kind: input, shape index: {}]   ;;  %s780_s3 = inlined_call_operand.vmem [shape: f32[16,128], index: 3, kind: output, shape index: {}]  }
   0x1   :  { %v580_v0 = vld [vmem:[%s777_s1 + $0x40] sm:$0xff]   ;;  %v584_v4 = vld [vmem:[%s777_s1 + $0x48] sm:$0xff]   ;;  %v588_v8 = vld [vmem:[%s777_s1 + $0x50] sm:$0xff]  }
   0x2   :  { %v581_v1 = vld [vmem:[%s777_s1] sm:$0xff]   ;;  %517 = vmatprep.subr.bf16.mxu0 %v580_v0  ;;  %v585_v5 = vld [vmem:[%s777_s1 + $0x8] sm:$0xff]   ;;  %v589_v9 = vld [vmem:[%s777_s1 + $0x10] sm:$0xff]  }
   0x3   :  { %v582_v2 = vld [vmem:[%s777_s1 + $0xc0] sm:$0xff]   ;;  %518 = vmatpush3.bf16.msra.mxu0 %v581_v1  ;;  %v586_v6 = vld [vmem:[%s777_s1 + $0xc8] sm:$0xff]   ;;  %v590_v10 = vld [vmem:[%s777_s1 + $0xd0] sm:$0xff]  }
   0x4   :  { %v583_v3 = vld [vmem:[%s777_s1 + $0x80] sm:$0xff]   ;;  %539 = vmatprep.subr.bf16.mxu1 %v582_v2  ;;  %519 = vmatprep.subr.bf16.mxu0 %v584_v4  ;;  %v587_v7 = vld [vmem:[%s777_s1 + $0x88] sm:$0xff]   ;;  %v591_v11 = vld [vmem:[%s777_s1 + $0x90] sm:$0xff]  }
   0x5   :  { %540 = vmatpush3.bf16.msra.mxu1 %v583_v3  ;;  %v592_v12 = vld [vmem:[%s777_s1 + $0x58] sm:$0xff]   ;;  %v596_v16 = vld [vmem:[%s777_s1 + $0x60] sm:$0xff]   ;;  %v600_v20 = vld [vmem:[%s777_s1 + $0x68] sm:$0xff]  }
   0x6   :  { %541 = vmatprep.subr.bf16.mxu1 %v586_v6  ;;  %v593_v13 = vld [vmem:[%s777_s1 + $0x18] sm:$0xff]   ;;  %v597_v17 = vld [vmem:[%s777_s1 + $0x20] sm:$0xff]   ;;  %v601_v21 = vld [vmem:[%s777_s1 + $0x28] sm:$0xff]  }
   0x7   :  { %520 = vmatpush3.bf16.msra.mxu0 %v585_v5  ;;  %v594_v14 = vld [vmem:[%s777_s1 + $0xd8] sm:$0xff]   ;;  %v598_v18 = vld [vmem:[%s777_s1 + $0xe0] sm:$0xff]   ;;  %v602_v22 = vld [vmem:[%s777_s1 + $0xe8] sm:$0xff]  }
   0x8   :  { %521 = vmatprep.subr.bf16.mxu0 %v588_v8  ;;  %v595_v15 = vld [vmem:[%s777_s1 + $0x98] sm:$0xff]   ;;  %v599_v19 = vld [vmem:[%s777_s1 + $0xa0] sm:$0xff]   ;;  %v603_v23 = vld [vmem:[%s777_s1 + $0xa8] sm:$0xff]  }
   0x9   :  { %542 = vmatpush3.bf16.msra.mxu1 %v587_v7  ;;  %v604_v24 = vld [vmem:[%s777_s1 + $0x70] sm:$0xff]   ;;  %v608_v28 = vld [vmem:[%s777_s1 + $0x78] sm:$0xff]   ;;  %v617_v36 = vld [vmem:[%s778_s0 + $0xc] ss:$20 sps:$4 sm:$0xff]  }
   0xa   :  { %543 = vmatprep.subr.bf16.mxu1 %v590_v10  ;;  %v605_v25 = vld [vmem:[%s777_s1 + $0x30] sm:$0xff]   ;;  %v609_v29 = vld [vmem:[%s777_s1 + $0x38] sm:$0xff]   ;;  %v618_v37 = vld [vmem:[%s777_s1 + $0x100] sm:$0xff]   ;;  %418 = vmatprep.mubr.bf16.mxu1 %v617_v36 }
   0xb   :  { %522 = vmatpush3.bf16.msra.mxu0 %v589_v9  ;;  %v606_v26 = vld [vmem:[%s777_s1 + $0xf0] sm:$0xff]   ;;  %v610_v30 = vld [vmem:[%s777_s1 + $0xf8] sm:$0xff]   ;;  %v619_v38 = vld [vmem:[%s777_s1 + $0x108] sm:$0xff]  }
   0xc   :  { %523 = vmatprep.subr.bf16.mxu0 %v592_v12  ;;  %v607_v27 = vld [vmem:[%s777_s1 + $0xb0] sm:$0xff]   ;;  %v613_v32 = vld [vmem:[%s778_s0 + $0x4] ss:$20 sps:$4 sm:$0xff]   ;;  %v615_v35 = vld [vmem:[%s778_s0 + $0x8] ss:$20 sps:$4 sm:$0xff]  }
   0xd   :  { %544 = vmatpush3.bf16.msra.mxu1 %v591_v11  ;;  %v611_v31 = vld [vmem:[%s778_s0] ss:$20 sps:$4 sm:$0xff]   ;;  %v614_v34 = vld [vmem:[%s777_s1 + $0xb8] sm:$0xff]   ;;  %377 = vmatprep.mubr.bf16.mxu0 %v613_v32  ;;  %v622_v41 = vld [vmem:[%s778_s0 + $0x10] ss:$20 sps:$4 sm:$0xff]  }
   0xe   :  { %545 = vmatprep.subr.bf16.mxu1 %v594_v14  ;;  %v620_v39 = vld [vmem:[%s777_s1 + $0x110] sm:$0xff]   ;;  %v621_v40 = vld [vmem:[%s777_s1 + $0x118] sm:$0xff]   ;;  %v474_v43 = vld [vmem:[%s779_s2] ss:$0 sm:$0xff] }
   0xf   :  { %524 = vmatpush3.bf16.msra.mxu0 %v593_v13 }
  0x10   :  { %525 = vmatprep.subr.bf16.mxu0 %v596_v16 }
  0x11   :  { %546 = vmatpush3.bf16.msra.mxu1 %v595_v15 }
  0x12   :  { %547 = vmatprep.subr.bf16.mxu1 %v598_v18 }
  0x13   :  { %526 = vmatpush3.bf16.msra.mxu0 %v597_v17 }
  0x14   :  { %527 = vmatprep.subr.bf16.mxu0 %v600_v20 }
  0x15   :  { %548 = vmatpush3.bf16.msra.mxu1 %v599_v19 }
  0x16   :  { %549 = vmatprep.subr.bf16.mxu1 %v602_v22 }
  0x17   :  { %528 = vmatpush3.bf16.msra.mxu0 %v601_v21 }
  0x18   :  { %529 = vmatprep.subr.bf16.mxu0 %v604_v24 }
  0x19   :  { %550 = vmatpush3.bf16.msra.mxu1 %v603_v23 }
  0x1a   :  { %551 = vmatprep.subr.bf16.mxu1 %v606_v26 }
  0x1b   :  { %530 = vmatpush3.bf16.msra.mxu0 %v605_v25 }
  0x1c   :  { %531 = vmatprep.subr.bf16.mxu0 %v608_v28 }
  0x1d   :  { %552 = vmatpush3.bf16.msra.mxu1 %v607_v27 }
  0x1e   :  { %553 = vmatprep.subr.bf16.mxu1 %v610_v30 }
  0x1f   :  { %532 = vmatpush3.bf16.msra.mxu0 %v609_v29 }
  0x20   :  { %566 = vmatprep.subr.bf16.mxu0 %v623_v33 }
  0x21   :  { %554 = vmatpush3.bf16.msra.mxu1 %v614_v34 }
  0x22   :  { %378 = vmatmul.mubr.bf16.vlgmr.msra.gmra.mrb[0].mxu0 %v611_v31 }
  0x23   :  { %574 = vmatprep.mubr.msk.bf16.mxu0 %vm624_vm0, %v623_v33  ;;  %567 = vmatpush3.bf16.msra.mxu0 %v618_v37 }
  0x24   :  { %419 = vmatmul.mubr.bf16.vlgmr.msra.gmra.mrb[0].mxu1 %v615_v35  ;;  %568 = vmatprep.subr.bf16.mxu0 %v623_v33 }
  0x27   :  { %569 = vmatpush3.bf16.msra.mxu0 %v619_v38 }
  0x28   :  { %570 = vmatprep.subr.bf16.mxu0 %v623_v33 }
  0x2b   :  { %571 = vmatpush3.bf16.msra.mxu0 %v620_v39 }
  0x2c   :  { %572 = vmatprep.subr.bf16.mxu0 %v623_v33 }
  0x2f   :  { %573 = vmatpush3.bf16.msra.mxu0 %v621_v40 }
  0x32   :  { %575 = vmatmul.mubr.msk.bf16.vlgmr.msra.gmra.mrb[4].mxu0 %vm341_vm1, %v622_v41 }
  0xf5   :  { %v533_v42 = vpop.f32.mrb[0].mxu0 }
  0xf6   :  { %v534_v44 = vpop.f32.mrb[1].mxu0 }
  0xf7   :  { %v535_v45 = vadd.f32 %v534_v44, %v533_v42  ;;  %v536_v46 = vpop.f32.mrb[2].mxu0  ;;  %v555_v47 = vpop.f32.mrb[0].mxu1 }
  0xf8   :  { %v537_v48 = vpop.f32.mrb[3].mxu0  ;;  %v556_v51 = vpop.f32.mrb[1].mxu1 }
  0xf9   :  { %v380_v49 = vadd.f32 %v535_v45, %v474_v43  ;;  %v538_v50 = vadd.f32 %v537_v48, %v536_v46  ;;  %v557_v52 = vadd.f32 %v556_v51, %v555_v47  ;;  %v558_v53 = vpop.f32.mrb[2].mxu1 }
  0xfa   :  { %v559_v55 = vpop.f32.mrb[3].mxu1 }
  0xfb   :  { %v383_v54 = vadd.f32 %v538_v50, %v474_v43  ;;  %v560_v56 = vadd.f32 %v559_v55, %v558_v53  ;;  %v421_v57 = vadd.f32 %v557_v52, %v380_v49 }
  0xfd   :  { %v424_v58 = vadd.f32 %v560_v56, %v383_v54 }
 0x105   :  { %v461_v59 = vpop.f32.mrb[4].mxu0 }
 0x106   :  { %v462_v60 = vadd.f32 %v461_v59, %v421_v57  ;;  %v576_v61 = vpop.f32.mrb[5].mxu0 }
 0x107   :  { %v464_v62 = vpop.f32.mrb[6].mxu0 }
 0x108   :  { %468 = vst [vmem:[%s780_s3] sm:$0xff] %v462_v60  ;;  %v465_v63 = vadd.f32 %v464_v62, %v424_v58  ;;  %v577_v0 = vpop.f32.mrb[7].mxu0 }
 0x10a   :  { %469 = vst [vmem:[%s780_s3 + $0x8] sm:$0xff] %v465_v63 }

// kernel: f_net_forward.117
= control target key start
LH: loop header
LB: loop body
LE: loop exit
PB: predicated region body
PF: predicated region fallthrough
CT: control target
= control target key end

     0   :  { %s754_s0 = inlined_call_operand.vmem [shape: f32[128,128], index: 0, kind: input, shape index: {}]   ;;  %s755_s1 = inlined_call_operand.vmem [shape: f32[128,128], index: 1, kind: output, shape index: {}]  }
   0x1   :  { %v409_v0 = vld [vmem:[%s754_s0 + $0x10] sm:$0xff]  ;;  %v414_v1 = vld [vmem:[%s754_s0] sm:$0xff]  ;;  %v421_v2 = vld [vmem:[%s754_s0 + $0x18] sm:$0xff] }
   0x2   :  { %28 = vadd.xlane.f32.xlu1 %v409_v0  ;;  %24 = vadd.xlane.f32.xlu0 %v414_v1  ;;  %v426_v3 = vld [vmem:[%s754_s0 + $0x8] sm:$0xff]  ;;  %v438_v5 = vld [vmem:[%s754_s0 + $0x20] sm:$0xff]  ;;  %v445_v6 = vld [vmem:[%s754_s0 + $0x38] sm:$0xff]  ;;  %v72_v17 = vmul.f32 %v414_v1, %v414_v1  ;;  %v75_v18 = vmul.f32 %v421_v2, %v421_v2  ;;  %v74_v19 = vmul.f32 %v409_v0, %v409_v0 }
   0x3   :  { %v433_v4 = vld [vmem:[%s754_s0 + $0x28] sm:$0xff]  ;;  %v450_v7 = vld [vmem:[%s754_s0 + $0x30] sm:$0xff]  ;;  %v462_v9 = vld [vmem:[%s754_s0 + $0x40] sm:$0xff]  ;;  %v73_v16 = vmul.f32 %v426_v3, %v426_v3  ;;  %v76_v21 = vmul.f32 %v438_v5, %v438_v5  ;;  %v79_v22 = vmul.f32 %v445_v6, %v445_v6 }
   0x4   :  { %v457_v8 = vld [vmem:[%s754_s0 + $0x48] sm:$0xff]  ;;  %v469_v10 = vld [vmem:[%s754_s0 + $0x58] sm:$0xff]  ;;  %v474_v11 = vld [vmem:[%s754_s0 + $0x50] sm:$0xff]  ;;  %v77_v20 = vmul.f32 %v433_v4, %v433_v4  ;;  %v78_v23 = vmul.f32 %v450_v7, %v450_v7  ;;  %v80_v25 = vmul.f32 %v462_v9, %v462_v9 }
   0x5   :  { %v481_v12 = vld [vmem:[%s754_s0 + $0x68] sm:$0xff]  ;;  %v486_v13 = vld [vmem:[%s754_s0 + $0x60] sm:$0xff]  ;;  %v493_v14 = vld [vmem:[%s754_s0 + $0x78] sm:$0xff]  ;;  %v81_v24 = vmul.f32 %v457_v8, %v457_v8  ;;  %v83_v26 = vmul.f32 %v469_v10, %v469_v10  ;;  %v82_v27 = vmul.f32 %v474_v11, %v474_v11 }
   0x6   :  { %30 = vadd.xlane.f32.xlu1 %v421_v2  ;;  %26 = vadd.xlane.f32.xlu0 %v426_v3  ;;  %v498_v15 = vld [vmem:[%s754_s0 + $0x70] sm:$0xff]  ;;  %v85_v28 = vmul.f32 %v481_v12, %v481_v12  ;;  %v84_v29 = vmul.f32 %v486_v13, %v486_v13  ;;  %v87_v30 = vmul.f32 %v493_v14, %v493_v14 }
   0x7   :  { %v86_v31 = vmul.f32 %v498_v15, %v498_v15 }
   0xa   :  { %34 = vadd.xlane.f32.xlu1 %v433_v4  ;;  %32 = vadd.xlane.f32.xlu0 %v438_v5 }
   0xe   :  { %38 = vadd.xlane.f32.xlu1 %v445_v6  ;;  %36 = vadd.xlane.f32.xlu0 %v450_v7 }
  0x12   :  { %42 = vadd.xlane.f32.xlu1 %v457_v8  ;;  %40 = vadd.xlane.f32.xlu0 %v462_v9 }
  0x16   :  { %46 = vadd.xlane.f32.xlu1 %v469_v10  ;;  %44 = vadd.xlane.f32.xlu0 %v474_v11 }
  0x1a   :  { %50 = vadd.xlane.f32.xlu1 %v481_v12  ;;  %48 = vadd.xlane.f32.xlu0 %v486_v13 }
  0x1e   :  { %54 = vadd.xlane.f32.xlu1 %v493_v14  ;;  %52 = vadd.xlane.f32.xlu0 %v498_v15 }
  0x22   :  { %90 = vadd.xlane.f32.xlu1 %v73_v16  ;;  %88 = vadd.xlane.f32.xlu0 %v72_v17 }
  0x26   :  { %94 = vadd.xlane.f32.xlu1 %v75_v18  ;;  %92 = vadd.xlane.f32.xlu0 %v74_v19 }
  0x2a   :  { %98 = vadd.xlane.f32.xlu1 %v77_v20  ;;  %96 = vadd.xlane.f32.xlu0 %v76_v21 }
  0x2e   :  { %102 = vadd.xlane.f32.xlu1 %v79_v22  ;;  %100 = vadd.xlane.f32.xlu0 %v78_v23 }
  0x32   :  { %106 = vadd.xlane.f32.xlu1 %v81_v24  ;;  %104 = vadd.xlane.f32.xlu0 %v80_v25 }
  0x36   :  { %110 = vadd.xlane.f32.xlu1 %v83_v26  ;;  %108 = vadd.xlane.f32.xlu0 %v82_v27 }
  0x3a   :  { %114 = vadd.xlane.f32.xlu1 %v85_v28  ;;  %112 = vadd.xlane.f32.xlu0 %v84_v29 }
  0x3e   :  { %118 = vadd.xlane.f32.xlu1 %v87_v30  ;;  %116 = vadd.xlane.f32.xlu0 %v86_v31 }
  0x8f   :  { %v29_v32 = vpop.xlane.xlu1 %28  ;;  %v25_v33 = vpop.xlane.xlu0 %24 }
  0x90   :  { %v546_v48 = vmul.f32 0.0625, %v25_v33  ;;  %v550_v50 = vmul.f32 0.0625, %v29_v32 }
  0x92   :  { %v136_v54 = vmul.f32 %v546_v48, %v546_v48  ;;  %v138_v61 = vmul.f32 %v550_v50, %v550_v50 }
  0x93   :  { %v31_v34 = vpop.xlane.xlu1 %30  ;;  %v27_v35 = vpop.xlane.xlu0 %26 }
  0x94   :  { %v548_v49 = vmul.f32 0.0625, %v27_v35  ;;  %v552_v51 = vmul.f32 0.0625, %v31_v34  ;;  %v170_v34 = vsub.f32 %v409_v0, %v550_v50  ;;  %v168_v35 = vsub.f32 %v414_v1, %v546_v48 }
  0x96   :  { %v137_v55 = vmul.f32 %v548_v49, %v548_v49  ;;  %v139_v62 = vmul.f32 %v552_v51, %v552_v51 }
  0x97   :  { %v35_v36 = vpop.xlane.xlu1 %34  ;;  %v33_v37 = vpop.xlane.xlu0 %32 }
  0x98   :  { %v558_v58 = vmul.f32 0.0625, %v35_v36  ;;  %v564_v63 = vmul.f32 0.0625, %v33_v37  ;;  %v171_v36 = vsub.f32 %v421_v2, %v552_v51  ;;  %v169_v37 = vsub.f32 %v426_v3, %v548_v49 }
  0x9a   :  { %v141_v22 = vmul.f32 %v558_v58, %v558_v58  ;;  %v140_v25 = vmul.f32 %v564_v63, %v564_v63  ;;  %v172_v49 = vsub.f32 %v438_v5, %v564_v63 }
  0x9b   :  { %v39_v38 = vpop.xlane.xlu1 %38  ;;  %v37_v39 = vpop.xlane.xlu0 %36 }
  0x9c   :  { %v570_v26 = vmul.f32 0.0625, %v39_v38  ;;  %v572_v27 = vmul.f32 0.0625, %v37_v39 }
  0x9f   :  { %v43_v40 = vpop.xlane.xlu1 %42  ;;  %v41_v41 = vpop.xlane.xlu0 %40 }
  0xa0   :  { %v582_v38 = vmul.f32 0.0625, %v43_v40  ;;  %v173_v40 = vsub.f32 %v433_v4, %v558_v58 }
  0xa3   :  { %v534_v42 = vpop.xlane.xlu1 %46  ;;  %v536_v43 = vpop.xlane.xlu0 %44 }
  0xa4   :  { %v603_v4 = vmul.f32 0.0625, %v534_v42  ;;  %v606_v58 = vmul.f32 0.0625, %v536_v43 }
  0xa7   :  { %v538_v44 = vpop.xlane.xlu1 %50  ;;  %v540_v45 = vpop.xlane.xlu0 %48 }
  0xa8   :  { %v613_v42 = vmul.f32 0.0625, %v538_v44 }
  0xab   :  { %v542_v46 = vpop.xlane.xlu1 %54  ;;  %v544_v47 = vpop.xlane.xlu0 %52 }
  0xaf   :  { %v91_v52 = vpop.xlane.xlu1 %90  ;;  %v89_v53 = vpop.xlane.xlu0 %88 }
  0xb0   :  { %v121_v56 = vmul.f32 0.0625, %v91_v52  ;;  %v120_v57 = vmul.f32 0.0625, %v89_v53  ;;  %v143_v53 = vmul.f32 %v570_v26, %v570_v26 }
  0xb2   :  { %v153_v59 = vsub.f32 %v121_v56, %v137_v55  ;;  %v152_v60 = vsub.f32 %v120_v57, %v136_v54  ;;  %v142_v54 = vmul.f32 %v572_v27, %v572_v27  ;;  %v588_v55 = vmul.f32 0.0625, %v41_v41 }
  0xb3   :  { %v95_v16 = vpop.xlane.xlu1 %94  ;;  %v93_v17 = vpop.xlane.xlu0 %92  ;;  %v175_v57 = vsub.f32 %v445_v6, %v570_v26  ;;  %v174_v41 = vsub.f32 %v450_v7, %v572_v27 }
  0xb4   :  { %v185_v18 = vadd.f32 1e-05, %v153_v59  ;;  %v184_v19 = vadd.f32 1e-05, %v152_v60  ;;  %v123_v20 = vmul.f32 0.0625, %v95_v16  ;;  %v122_v21 = vmul.f32 0.0625, %v93_v17 }
  0xb5   :  { %v145_v59 = vmul.f32 %v582_v38, %v582_v38 }
  0xb6   :  { %332 = vrsqrt.f32 %v185_v18  ;;  %v155_v23 = vsub.f32 %v123_v20, %v139_v62  ;;  %v154_v24 = vsub.f32 %v122_v21, %v138_v61  ;;  %v144_v62 = vmul.f32 %v588_v55, %v588_v55 }
  0xb7   :  { %334 = vrsqrt.f32 %v184_v19  ;;  %v99_v28 = vpop.xlane.xlu1 %98  ;;  %v97_v29 = vpop.xlane.xlu0 %96 }
  0xb8   :  { %v187_v30 = vadd.f32 1e-05, %v155_v23  ;;  %v186_v31 = vadd.f32 1e-05, %v154_v24  ;;  %v125_v32 = vmul.f32 0.0625, %v99_v28  ;;  %v124_v33 = vmul.f32 0.0625, %v97_v29 }
  0xb9   :  { %v177_v24 = vsub.f32 %v457_v8, %v582_v38 }
  0xba   :  { %336 = vrsqrt.f32 %v187_v30  ;;  %v157_v39 = vsub.f32 %v125_v32, %v141_v22  ;;  %v156_v52 = vsub.f32 %v124_v33, %v140_v25  ;;  %v176_v25 = vsub.f32 %v462_v9, %v588_v55 }
  0xbb   :  { %338 = vrsqrt.f32 %v186_v31  ;;  %v103_v1 = vpop.xlane.xlu1 %102  ;;  %v101_v48 = vpop.xlane.xlu0 %100  ;;  %v147_v31 = vmul.f32 %v603_v4, %v603_v4  ;;  %v146_v32 = vmul.f32 %v606_v58, %v606_v58 }
  0xbc   :  { %v189_v2 = vadd.f32 1e-05, %v157_v39  ;;  %v188_v51 = vadd.f32 1e-05, %v156_v52  ;;  %v127_v56 = vmul.f32 0.0625, %v103_v1  ;;  %v126_v3 = vmul.f32 0.0625, %v101_v48 }
  0xbe   :  { %340 = vrsqrt.f32 %v189_v2  ;;  %v159_v60 = vsub.f32 %v127_v56, %v143_v53  ;;  %v158_v61 = vsub.f32 %v126_v3, %v142_v54  ;;  %v149_v56 = vmul.f32 %v613_v42, %v613_v42 }
  0xbf   :  { %342 = vrsqrt.f32 %v188_v51  ;;  %v107_v16 = vpop.xlane.xlu1 %106  ;;  %v105_v17 = vpop.xlane.xlu0 %104 }
  0xc0   :  { %v333_v18 = vpop.eup %332  ;;  %v191_v19 = vadd.f32 1e-05, %v159_v60  ;;  %v190_v20 = vadd.f32 1e-05, %v158_v61  ;;  %v129_v21 = vmul.f32 0.0625, %v107_v16  ;;  %v128_v22 = vmul.f32 0.0625, %v105_v17 }
  0xc1   :  { %v335_v23 = vpop.eup %334  ;;  %v615_v43 = vmul.f32 %v333_v18, %v169_v37  ;;  %v625_v37 = vmul.f32 0.0625, %v540_v45  ;;  %v642_v17 = vmul.f32 0.0625, %v544_v47 }
  0xc2   :  { %v617_v28 = vmul.f32 %v335_v23, %v168_v35  ;;  %344 = vrsqrt.f32 %v191_v19  ;;  %v161_v29 = vsub.f32 %v129_v21, %v145_v59  ;;  %v160_v30 = vsub.f32 %v128_v22, %v144_v62 }
  0xc3   :  { %v249_v33 = vmul.f32 0.70710677, %v615_v43  ;;  %346 = vrsqrt.f32 %v190_v20  ;;  %v111_v39 = vpop.xlane.xlu1 %110  ;;  %v109_v52 = vpop.xlane.xlu0 %108  ;;  %v638_v59 = vmul.f32 0.0625, %v542_v46  ;;  %v148_v20 = vmul.f32 %v625_v37, %v625_v37 }
  0xc4   :  { %v337_v44 = vpop.eup %336  ;;  %v248_v35 = vmul.f32 0.70710677, %v617_v28  ;;  %v193_v53 = vadd.f32 1e-05, %v161_v29  ;;  %v131_v54 = vmul.f32 0.0625, %v111_v39  ;;  %v130_v51 = vmul.f32 0.0625, %v109_v52 }
  0xc5   :  { %v339_v1 = vpop.eup %338  ;;  %348 = verf.f32 %v249_v33  ;;  %v628_v48 = vmul.f32 %v337_v44, %v171_v36  ;;  %v192_v2 = vadd.f32 1e-05, %v160_v30  ;;  %v151_v22 = vmul.f32 %v638_v59, %v638_v59 }
  0xc6   :  { %350 = verf.f32 %v248_v35  ;;  %v635_v3 = vmul.f32 %v339_v1, %v170_v34  ;;  %v163_v45 = vsub.f32 %v131_v54, %v147_v31  ;;  %v162_v36 = vsub.f32 %v130_v51, %v146_v32 }
  0xc7   :  { %v251_v60 = vmul.f32 0.70710677, %v628_v48  ;;  %352 = vrsqrt.f32 %v193_v53  ;;  %v115_v61 = vpop.xlane.xlu1 %114  ;;  %v113_v62 = vpop.xlane.xlu0 %112  ;;  %v150_v32 = vmul.f32 %v642_v17, %v642_v17  ;;  %v233_v1 = vmul.f32 0.5, %v615_v43 }
  0xc8   :  { %v341_v16 = vpop.eup %340  ;;  %v250_v18 = vmul.f32 0.70710677, %v635_v3  ;;  %354 = vrsqrt.f32 %v192_v2  ;;  %v195_v0 = vadd.f32 1e-05, %v163_v45  ;;  %v194_v46 = vadd.f32 1e-05, %v162_v36 }
  0xc9   :  { %v343_v50 = vpop.eup %342  ;;  %356 = verf.f32 %v251_v60  ;;  %v645_v34 = vmul.f32 %v341_v16, %v173_v40  ;;  %v133_v19 = vmul.f32 0.0625, %v115_v61  ;;  %v132_v47 = vmul.f32 0.0625, %v113_v62 }
  0xca   :  { %358 = verf.f32 %v250_v18  ;;  %v652_v21 = vmul.f32 %v343_v50, %v172_v49  ;;  %v179_v43 = vsub.f32 %v469_v10, %v603_v4  ;;  %v178_v10 = vsub.f32 %v474_v11, %v606_v58 }
  0xcb   :  { %v253_v23 = vmul.f32 0.70710677, %v645_v34  ;;  %360 = vrsqrt.f32 %v195_v0  ;;  %v165_v40 = vsub.f32 %v133_v19, %v149_v56  ;;  %v119_v29 = vpop.xlane.xlu1 %118  ;;  %v117_v30 = vpop.xlane.xlu0 %116  ;;  %v164_v5 = vsub.f32 %v132_v47, %v148_v20 }
  0xcc   :  { %v345_v31 = vpop.eup %344  ;;  %v252_v33 = vmul.f32 0.70710677, %v652_v21  ;;  %362 = vrsqrt.f32 %v194_v46  ;;  %v135_v52 = vmul.f32 0.0625, %v119_v29  ;;  %v134_v53 = vmul.f32 0.0625, %v117_v30 }
  0xcd   :  { %v347_v63 = vpop.eup %346  ;;  %364 = verf.f32 %v253_v23  ;;  %v663_v49 = vmul.f32 %v345_v31, %v175_v57  ;;  %v197_v39 = vadd.f32 1e-05, %v165_v40  ;;  %v196_v35 = vadd.f32 1e-05, %v164_v5 }
  0xce   :  { %366 = verf.f32 %v252_v33  ;;  %v668_v44 = vmul.f32 %v347_v63, %v174_v41  ;;  %v167_v51 = vsub.f32 %v135_v52, %v151_v22  ;;  %v232_v57 = vmul.f32 0.5, %v617_v28 }
  0xcf   :  { %v349_v54 = vpop.eup %348  ;;  %v255_v2 = vmul.f32 0.70710677, %v663_v49  ;;  %368 = vrsqrt.f32 %v197_v39  ;;  %v166_v41 = vsub.f32 %v134_v53, %v150_v32  ;;  %v235_v8 = vmul.f32 0.5, %v628_v48 }
  0xd0   :  { %v351_v6 = vpop.eup %350  ;;  %v281_v26 = vadd.f32 1.0, %v349_v54  ;;  %v254_v56 = vmul.f32 0.70710677, %v668_v44  ;;  %370 = vrsqrt.f32 %v196_v35  ;;  %v199_v27 = vadd.f32 1e-05, %v167_v51 }
  0xd1   :  { %v353_v45 = vpop.eup %352  ;;  %v280_v7 = vadd.f32 1.0, %v351_v6  ;;  %372 = verf.f32 %v255_v2  ;;  %v198_v18 = vadd.f32 1e-05, %v166_v41  ;;  %v234_v9 = vmul.f32 0.5, %v635_v3 }
  0xd2   :  { %v355_v60 = vpop.eup %354  ;;  %v297_v36 = vmul.f32 %v281_v26, %v233_v1  ;;  %374 = verf.f32 %v254_v56  ;;  %v679_v61 = vmul.f32 %v353_v45, %v177_v24  ;;  %v181_v47 = vsub.f32 %v481_v12, %v613_v42 }
  0xd3   :  { %v357_v28 = vpop.eup %356  ;;  %v296_v62 = vmul.f32 %v280_v7, %v232_v57  ;;  %v684_v16 = vmul.f32 %v355_v60, %v176_v25  ;;  %376 = vrsqrt.f32 %v199_v27  ;;  %v237_v3 = vmul.f32 0.5, %v645_v34 }
  0xd4   :  { %v359_v0 = vpop.eup %358  ;;  %313 = vst [vmem:[%s755_s1 + $0x8] sm:$0xff] %v297_v36  ;;  %v283_v38 = vadd.f32 1.0, %v357_v28  ;;  %v257_v4 = vmul.f32 0.70710677, %v679_v61  ;;  %378 = vrsqrt.f32 %v198_v18  ;;  %v180_v29 = vsub.f32 %v486_v13, %v625_v37 }
  0xd5   :  { %v361_v24 = vpop.eup %360  ;;  %312 = vst [vmem:[%s755_s1] sm:$0xff] %v296_v62  ;;  %v282_v55 = vadd.f32 1.0, %v359_v0  ;;  %v256_v25 = vmul.f32 0.70710677, %v684_v16  ;;  %v236_v30 = vmul.f32 0.5, %v652_v21  ;;  %v183_v13 = vsub.f32 %v493_v14, %v638_v59 }
  0xd6   :  { %v363_v11 = vpop.eup %362  ;;  %v299_v58 = vmul.f32 %v283_v38, %v235_v8  ;;  %380 = verf.f32 %v257_v4  ;;  %v227_v50 = vmul.f32 %v361_v24, %v179_v43  ;;  %v239_v37 = vmul.f32 0.5, %v663_v49 }
  0xd7   :  { %v365_v46 = vpop.eup %364  ;;  %v298_v48 = vmul.f32 %v282_v55, %v234_v9  ;;  %382 = verf.f32 %v256_v25  ;;  %v226_v19 = vmul.f32 %v363_v11, %v178_v10  ;;  %v238_v53 = vmul.f32 0.5, %v668_v44 }
  0xd8   :  { %v367_v20 = vpop.eup %366  ;;  %315 = vst [vmem:[%s755_s1 + $0x18] sm:$0xff] %v299_v58  ;;  %v285_v22 = vadd.f32 1.0, %v365_v46  ;;  %v259_v23 = vmul.f32 0.70710677, %v227_v50  ;;  %v182_v14 = vsub.f32 %v498_v15, %v642_v17  ;;  %v241_v15 = vmul.f32 0.5, %v679_v61 }
  0xd9   :  { %v369_v40 = vpop.eup %368  ;;  %314 = vst [vmem:[%s755_s1 + $0x10] sm:$0xff] %v298_v48  ;;  %v284_v31 = vadd.f32 1.0, %v367_v20  ;;  %v258_v12 = vmul.f32 0.70710677, %v226_v19  ;;  %v240_v44 = vmul.f32 0.5, %v684_v16  ;;  %v243_v36 = vmul.f32 0.5, %v227_v50 }
  0xda   :  { %v371_v42 = vpop.eup %370  ;;  %v301_v32 = vmul.f32 %v285_v22, %v237_v3  ;;  %384 = verf.f32 %v259_v23  ;;  %v229_v33 = vmul.f32 %v369_v40, %v181_v47  ;;  %v242_v61 = vmul.f32 0.5, %v226_v19 }
  0xdb   :  { %v373_v5 = vpop.eup %372  ;;  %v300_v34 = vmul.f32 %v284_v31, %v236_v30  ;;  %386 = verf.f32 %v258_v12  ;;  %v228_v63 = vmul.f32 %v371_v42, %v180_v29 }
  0xdc   :  { %v375_v39 = vpop.eup %374  ;;  %317 = vst [vmem:[%s755_s1 + $0x28] sm:$0xff] %v301_v32  ;;  %v287_v21 = vadd.f32 1.0, %v373_v5  ;;  %v261_v52 = vmul.f32 0.70710677, %v229_v33  ;;  %v245_v8 = vmul.f32 0.5, %v229_v33 }
  0xdd   :  { %v377_v35 = vpop.eup %376  ;;  %316 = vst [vmem:[%s755_s1 + $0x20] sm:$0xff] %v300_v34  ;;  %v286_v54 = vadd.f32 1.0, %v375_v39  ;;  %v260_v1 = vmul.f32 0.70710677, %v228_v63  ;;  %v244_v4 = vmul.f32 0.5, %v228_v63 }
  0xde   :  { %v303_v59 = vmul.f32 %v287_v21, %v239_v37  ;;  %388 = verf.f32 %v261_v52  ;;  %v231_v2 = vmul.f32 %v377_v35, %v183_v13  ;;  %v379_v51 = vpop.eup %378 }
  0xdf   :  { %v302_v6 = vmul.f32 %v286_v54, %v238_v53  ;;  %390 = verf.f32 %v260_v1  ;;  %v230_v57 = vmul.f32 %v379_v51, %v182_v14 }
  0xe0   :  { %v381_v49 = vpop.eup %380  ;;  %319 = vst [vmem:[%s755_s1 + $0x38] sm:$0xff] %v303_v59  ;;  %v263_v26 = vmul.f32 0.70710677, %v231_v2  ;;  %v247_v11 = vmul.f32 0.5, %v231_v2 }
  0xe1   :  { %v383_v56 = vpop.eup %382  ;;  %318 = vst [vmem:[%s755_s1 + $0x30] sm:$0xff] %v302_v6  ;;  %v289_v17 = vadd.f32 1.0, %v381_v49  ;;  %v262_v7 = vmul.f32 0.70710677, %v230_v57  ;;  %v246_v48 = vmul.f32 0.5, %v230_v57 }
  0xe2   :  { %v288_v45 = vadd.f32 1.0, %v383_v56  ;;  %392 = verf.f32 %v263_v26 }
  0xe3   :  { %v305_v27 = vmul.f32 %v289_v17, %v241_v15  ;;  %394 = verf.f32 %v262_v7 }
  0xe4   :  { %v385_v41 = vpop.eup %384  ;;  %v304_v60 = vmul.f32 %v288_v45, %v240_v44 }
  0xe5   :  { %v387_v43 = vpop.eup %386  ;;  %321 = vst [vmem:[%s755_s1 + $0x48] sm:$0xff] %v305_v27  ;;  %v291_v28 = vadd.f32 1.0, %v385_v41 }
  0xe6   :  { %320 = vst [vmem:[%s755_s1 + $0x40] sm:$0xff] %v304_v60  ;;  %v290_v62 = vadd.f32 1.0, %v387_v43 }
  0xe7   :  { %v307_v16 = vmul.f32 %v291_v28, %v243_v36 }
  0xe8   :  { %v389_v18 = vpop.eup %388  ;;  %v306_v0 = vmul.f32 %v290_v62, %v242_v61 }
  0xe9   :  { %v391_v10 = vpop.eup %390  ;;  %323 = vst [vmem:[%s755_s1 + $0x58] sm:$0xff] %v307_v16  ;;  %v293_v38 = vadd.f32 1.0, %v389_v18 }
  0xea   :  { %322 = vst [vmem:[%s755_s1 + $0x50] sm:$0xff] %v306_v0  ;;  %v292_v24 = vadd.f32 1.0, %v391_v10 }
  0xeb   :  { %v309_v9 = vmul.f32 %v293_v38, %v245_v8 }
  0xec   :  { %v393_v55 = vpop.eup %392  ;;  %v308_v25 = vmul.f32 %v292_v24, %v244_v4 }
  0xed   :  { %325 = vst [vmem:[%s755_s1 + $0x68] sm:$0xff] %v309_v9  ;;  %v295_v58 = vadd.f32 1.0, %v393_v55  ;;  %v395_v50 = vpop.eup %394 }
  0xee   :  { %324 = vst [vmem:[%s755_s1 + $0x60] sm:$0xff] %v308_v25  ;;  %v294_v19 = vadd.f32 1.0, %v395_v50 }
  0xef   :  { %v311_v46 = vmul.f32 %v295_v58, %v247_v11 }
  0xf0   :  { %v310_v20 = vmul.f32 %v294_v19, %v246_v48 }
  0xf1   :  { %327 = vst [vmem:[%s755_s1 + $0x78] sm:$0xff] %v311_v46 }
  0xf2   :  { %326 = vst [vmem:[%s755_s1 + $0x70] sm:$0xff] %v310_v20 }

// kernel: f_net_forward.118
= control target key start
LH: loop header
LB: loop body
LE: loop exit
PB: predicated region body
PF: predicated region fallthrough
CT: control target
= control target key end

     0   :  { %vm1152_vm0 = vmmov 0   ;;  %s1425_s1 = inlined_call_operand.vmem [shape: bf16[1152,128], index: 1, kind: input, shape index: {}]   ;;  %s1426_s0 = inlined_call_operand.vmem [shape: bf16[16,1152], index: 0, kind: input, shape index: {}]   ;;  %s1427_s2 = inlined_call_operand.vmem [shape: f32[1,128], index: 2, kind: input, shape index: {}]   ;;  %s1428_s3 = inlined_call_operand.vmem [shape: f32[16,128], index: 3, kind: output, shape index: {}]  }
   0x1   :  { %v1066_v0 = vld [vmem:[%s1425_s1 + $0x40] sm:$0xff]   ;;  %v1070_v4 = vld [vmem:[%s1425_s1 + $0x48] sm:$0xff]   ;;  %v1074_v8 = vld [vmem:[%s1425_s1 + $0x50] sm:$0xff]  }
   0x2   :  { %v1067_v1 = vld [vmem:[%s1425_s1] sm:$0xff]   ;;  %947 = vmatprep.subr.bf16.mxu0 %v1066_v0  ;;  %v1071_v5 = vld [vmem:[%s1425_s1 + $0x8] sm:$0xff]   ;;  %v1075_v9 = vld [vmem:[%s1425_s1 + $0x10] sm:$0xff]  }
   0x3   :  { %v1068_v2 = vld [vmem:[%s1425_s1 + $0xc0] sm:$0xff]   ;;  %948 = vmatpush3.bf16.msra.mxu0 %v1067_v1  ;;  %v1072_v6 = vld [vmem:[%s1425_s1 + $0xc8] sm:$0xff]   ;;  %v1076_v10 = vld [vmem:[%s1425_s1 + $0xd0] sm:$0xff]  }
   0x4   :  { %v1069_v3 = vld [vmem:[%s1425_s1 + $0x80] sm:$0xff]   ;;  %969 = vmatprep.subr.bf16.mxu1 %v1068_v2  ;;  %949 = vmatprep.subr.bf16.mxu0 %v1070_v4  ;;  %v1073_v7 = vld [vmem:[%s1425_s1 + $0x88] sm:$0xff]   ;;  %v1077_v11 = vld [vmem:[%s1425_s1 + $0x90] sm:$0xff]  }
   0x5   :  { %970 = vmatpush3.bf16.msra.mxu1 %v1069_v3  ;;  %v1078_v12 = vld [vmem:[%s1425_s1 + $0x58] sm:$0xff]   ;;  %v1082_v16 = vld [vmem:[%s1425_s1 + $0x60] sm:$0xff]   ;;  %v1086_v20 = vld [vmem:[%s1425_s1 + $0x68] sm:$0xff]  }
   0x6   :  { %971 = vmatprep.subr.bf16.mxu1 %v1072_v6  ;;  %v1079_v13 = vld [vmem:[%s1425_s1 + $0x18] sm:$0xff]   ;;  %v1083_v17 = vld [vmem:[%s1425_s1 + $0x20] sm:$0xff]   ;;  %v1087_v21 = vld [vmem:[%s1425_s1 + $0x28] sm:$0xff]   ;;  %v1151_v6 = vmov 0.0  }
   0x7   :  { %950 = vmatpush3.bf16.msra.mxu0 %v1071_v5  ;;  %v1080_v14 = vld [vmem:[%s1425_s1 + $0xd8] sm:$0xff]   ;;  %v1084_v18 = vld [vmem:[%s1425_s1 + $0xe0] sm:$0xff]   ;;  %v1088_v22 = vld [vmem:[%s1425_s1 + $0xe8] sm:$0xff]  }
   0x8   :  { %951 = vmatprep.subr.bf16.mxu0 %v1074_v8  ;;  %v1081_v15 = vld [vmem:[%s1425_s1 + $0x98] sm:$0xff]   ;;  %v1085_v19 = vld [vmem:[%s1425_s1 + $0xa0] sm:$0xff]   ;;  %v1089_v23 = vld [vmem:[%s1425_s1 + $0xa8] sm:$0xff]  }
   0x9   :  { %972 = vmatpush3.bf16.msra.mxu1 %v1073_v7  ;;  %v1090_v24 = vld [vmem:[%s1425_s1 + $0x70] sm:$0xff]   ;;  %v1094_v28 = vld [vmem:[%s1425_s1 + $0x78] sm:$0xff]   ;;  %v1097_v31 = vld [vmem:[%s1426_s0] ss:$36 sps:$4 sm:$0xff]  }
   0xa   :  { %973 = vmatprep.subr.bf16.mxu1 %v1076_v10  ;;  %v1091_v25 = vld [vmem:[%s1425_s1 + $0x30] sm:$0xff]   ;;  %v1095_v29 = vld [vmem:[%s1425_s1 + $0x38] sm:$0xff]   ;;  %v1099_v32 = vld [vmem:[%s1426_s0 + $0x4] ss:$36 sps:$4 sm:$0xff]  }
   0xb   :  { %952 = vmatpush3.bf16.msra.mxu0 %v1075_v9  ;;  %v1092_v26 = vld [vmem:[%s1425_s1 + $0xf0] sm:$0xff]   ;;  %v1096_v30 = vld [vmem:[%s1425_s1 + $0xf8] sm:$0xff]   ;;  %686 = vmatprep.mubr.bf16.mxu0 %v1099_v32  ;;  %v1101_v34 = vld [vmem:[%s1425_s1 + $0x140] sm:$0xff]  }
   0xc   :  { %953 = vmatprep.subr.bf16.mxu0 %v1078_v12  ;;  %v1093_v27 = vld [vmem:[%s1425_s1 + $0xb0] sm:$0xff]   ;;  %v1100_v33 = vld [vmem:[%s1425_s1 + $0xb8] sm:$0xff]   ;;  %v1102_v35 = vld [vmem:[%s1426_s0 + $0x8] ss:$36 sps:$4 sm:$0xff]  }
   0xd   :  { %974 = vmatpush3.bf16.msra.mxu1 %v1077_v11  ;;  %v1104_v36 = vld [vmem:[%s1426_s0 + $0xc] ss:$36 sps:$4 sm:$0xff]   ;;  %v1105_v37 = vld [vmem:[%s1425_s1 + $0x100] sm:$0xff]   ;;  %v1116_v48 = vld [vmem:[%s1425_s1 + $0x158] sm:$0xff]  }
   0xe   :  { %975 = vmatprep.subr.bf16.mxu1 %v1080_v14  ;;  %727 = vmatprep.mubr.bf16.mxu1 %v1104_v36  ;;  %v1106_v38 = vld [vmem:[%s1425_s1 + $0x1c0] sm:$0xff]   ;;  %v1108_v40 = vld [vmem:[%s1425_s1 + $0x148] sm:$0xff]   ;;  %v1112_v44 = vld [vmem:[%s1425_s1 + $0x150] sm:$0xff]  }
   0xf   :  { %954 = vmatpush3.bf16.msra.mxu0 %v1079_v13  ;;  %v1107_v39 = vld [vmem:[%s1425_s1 + $0x180] sm:$0xff]   ;;  %v1109_v41 = vld [vmem:[%s1425_s1 + $0x108] sm:$0xff]   ;;  %v1113_v45 = vld [vmem:[%s1425_s1 + $0x110] sm:$0xff]  }
  0x10   :  { %955 = vmatprep.subr.bf16.mxu0 %v1082_v16  ;;  %v1110_v42 = vld [vmem:[%s1425_s1 + $0x1c8] sm:$0xff]   ;;  %v1114_v46 = vld [vmem:[%s1425_s1 + $0x1d0] sm:$0xff]   ;;  %v1117_v49 = vld [vmem:[%s1425_s1 + $0x118] sm:$0xff]  }
  0x11   :  { %976 = vmatpush3.bf16.msra.mxu1 %v1081_v15  ;;  %v1111_v43 = vld [vmem:[%s1425_s1 + $0x188] sm:$0xff]   ;;  %v1115_v47 = vld [vmem:[%s1425_s1 + $0x190] sm:$0xff]   ;;  %v1118_v50 = vld [vmem:[%s1425_s1 + $0x1d8] sm:$0xff]  }
  0x12   :  { %977 = vmatprep.subr.bf16.mxu1 %v1084_v18  ;;  %v1119_v51 = vld [vmem:[%s1425_s1 + $0x198] sm:$0xff]   ;;  %v1120_v52 = vld [vmem:[%s1425_s1 + $0x160] sm:$0xff]   ;;  %v1124_v56 = vld [vmem:[%s1425_s1 + $0x168] sm:$0xff]  }
  0x13   :  { %956 = vmatpush3.bf16.msra.mxu0 %v1083_v17  ;;  %v1121_v53 = vld [vmem:[%s1425_s1 + $0x120] sm:$0xff]   ;;  %v1125_v57 = vld [vmem:[%s1425_s1 + $0x128] sm:$0xff]   ;;  %v1128_v60 = vld [vmem:[%s1425_s1 + $0x170] sm:$0xff]  }
  0x14   :  { %957 = vmatprep.subr.bf16.mxu0 %v1086_v20  ;;  %v1122_v54 = vld [vmem:[%s1425_s1 + $0x1e0] sm:$0xff]   ;;  %v1126_v58 = vld [vmem:[%s1425_s1 + $0x1e8] sm:$0xff]   ;;  %v1129_v61 = vld [vmem:[%s1425_s1 + $0x130] sm:$0xff]  }
  0x15   :  { %978 = vmatpush3.bf16.msra.mxu1 %v1085_v19  ;;  %v1123_v55 = vld [vmem:[%s1425_s1 + $0x1a0] sm:$0xff]   ;;  %v1127_v59 = vld [vmem:[%s1425_s1 + $0x1a8] sm:$0xff]   ;;  %v1130_v62 = vld [vmem:[%s1425_s1 + $0x1f0] sm:$0xff]  }
  0x16   :  { %979 = vmatprep.subr.bf16.mxu1 %v1088_v22  ;;  %v1131_v63 = vld [vmem:[%s1425_s1 + $0x1b0] sm:$0xff]   ;;  %v1132_v0 = vld [vmem:[%s1425_s1 + $0x178] sm:$0xff]   ;;  %v1142_v9 = vld [vmem:[%s1425_s1 + $0x200] sm:$0xff]  }
  0x17   :  { %958 = vmatpush3.bf16.msra.mxu0 %v1087_v21  ;;  %v1133_v1 = vld [vmem:[%s1425_s1 + $0x138] sm:$0xff]   ;;  %v1135_v3 = vld [vmem:[%s1426_s0 + $0x10] ss:$36 sps:$4 sm:$0xff]   ;;  %v1143_v10 = vld [vmem:[%s1425_s1 + $0x208] sm:$0xff]  }
  0x18   :  { %959 = vmatprep.subr.bf16.mxu0 %v1090_v24  ;;  %v1134_v2 = vld [vmem:[%s1425_s1 + $0x1f8] sm:$0xff]   ;;  %v1144_v11 = vld [vmem:[%s1425_s1 + $0x210] sm:$0xff]   ;;  %v1146_v13 = vld [vmem:[%s1425_s1 + $0x220] sm:$0xff]  }
  0x19   :  { %980 = vmatpush3.bf16.msra.mxu1 %v1089_v23  ;;  %v1137_v4 = vld [vmem:[%s1426_s0 + $0x14] ss:$36 sps:$4 sm:$0xff]   ;;  %v1141_v8 = vld [vmem:[%s1426_s0 + $0x1c] ss:$36 sps:$4 sm:$0xff]   ;;  %v1147_v14 = vld [vmem:[%s1425_s1 + $0x228] sm:$0xff]  }
  0x1a   :  { %981 = vmatprep.subr.bf16.mxu1 %v1092_v26  ;;  %v1138_v5 = vld [vmem:[%s1425_s1 + $0x1b8] sm:$0xff]   ;;  %v1148_v15 = vld [vmem:[%s1425_s1 + $0x230] sm:$0xff]   ;;  %v1150_v17 = vld [vmem:[%s1426_s0 + $0x20] ss:$36 sps:$4 sm:$0xff]  }
  0x1b   :  { %960 = vmatpush3.bf16.msra.mxu0 %v1091_v25  ;;  %v1139_v7 = vld [vmem:[%s1426_s0 + $0x18] ss:$36 sps:$4 sm:$0xff]   ;;  %v865_v19 = vld [vmem:[%s1427_s2] ss:$0 sm:$0xff] }
  0x1c   :  { %961 = vmatprep.subr.bf16.mxu0 %v1094_v28  ;;  %v1145_v12 = vld [vmem:[%s1425_s1 + $0x218] sm:$0xff]  }
  0x1d   :  { %982 = vmatpush3.bf16.msra.mxu1 %v1093_v27  ;;  %v1149_v16 = vld [vmem:[%s1425_s1 + $0x238] sm:$0xff]  }
  0x1e   :  { %983 = vmatprep.subr.bf16.mxu1 %v1096_v30 }
  0x1f   :  { %962 = vmatpush3.bf16.msra.mxu0 %v1095_v29 }
  0x20   :  { %991 = vmatprep.subr.bf16.mxu0 %v1101_v34 }
  0x21   :  { %984 = vmatpush3.bf16.msra.mxu1 %v1100_v33 }
  0x22   :  { %687 = vmatmul.mubr.bf16.vlgmr.msra.gmra.mrb[0].mxu0 %v1097_v31  ;;  %1013 = vmatprep.subr.bf16.mxu1 %v1106_v38 }
  0x23   :  { %992 = vmatpush3.bf16.msra.mxu0 %v1105_v37  ;;  %768 = vmatprep.mubr.bf16.mxu0 %v1137_v4 }
  0x24   :  { %728 = vmatmul.mubr.bf16.vlgmr.msra.gmra.mrb[0].mxu1 %v1102_v35  ;;  %993 = vmatprep.subr.bf16.mxu0 %v1108_v40 }
  0x25   :  { %1014 = vmatpush3.bf16.msra.mxu1 %v1107_v39  ;;  %809 = vmatprep.mubr.bf16.mxu1 %v1141_v8 }
  0x26   :  { %1015 = vmatprep.subr.bf16.mxu1 %v1110_v42 }
  0x27   :  { %994 = vmatpush3.bf16.msra.mxu0 %v1109_v41 }
  0x28   :  { %995 = vmatprep.subr.bf16.mxu0 %v1112_v44 }
  0x29   :  { %1016 = vmatpush3.bf16.msra.mxu1 %v1111_v43 }
  0x2a   :  { %1017 = vmatprep.subr.bf16.mxu1 %v1114_v46 }
  0x2b   :  { %996 = vmatpush3.bf16.msra.mxu0 %v1113_v45 }
  0x2c   :  { %997 = vmatprep.subr.bf16.mxu0 %v1116_v48 }
  0x2d   :  { %1018 = vmatpush3.bf16.msra.mxu1 %v1115_v47 }
  0x2e   :  { %1019 = vmatprep.subr.bf16.mxu1 %v1118_v50 }
  0x2f   :  { %998 = vmatpush3.bf16.msra.mxu0 %v1117_v49 }
  0x30   :  { %999 = vmatprep.subr.bf16.mxu0 %v1120_v52 }
  0x31   :  { %1020 = vmatpush3.bf16.msra.mxu1 %v1119_v51 }
  0x32   :  { %1021 = vmatprep.subr.bf16.mxu1 %v1122_v54 }
  0x33   :  { %1000 = vmatpush3.bf16.msra.mxu0 %v1121_v53 }
  0x34   :  { %1001 = vmatprep.subr.bf16.mxu0 %v1124_v56 }
  0x35   :  { %1022 = vmatpush3.bf16.msra.mxu1 %v1123_v55 }
  0x36   :  { %1023 = vmatprep.subr.bf16.mxu1 %v1126_v58 }
  0x37   :  { %1002 = vmatpush3.bf16.msra.mxu0 %v1125_v57 }
  0x38   :  { %1003 = vmatprep.subr.bf16.mxu0 %v1128_v60 }
  0x39   :  { %1024 = vmatpush3.bf16.msra.mxu1 %v1127_v59 }
  0x3a   :  { %1025 = vmatprep.subr.bf16.mxu1 %v1130_v62 }
  0x3b   :  { %1004 = vmatpush3.bf16.msra.mxu0 %v1129_v61 }
  0x3c   :  { %1005 = vmatprep.subr.bf16.mxu0 %v1132_v0 }
  0x3d   :  { %1026 = vmatpush3.bf16.msra.mxu1 %v1131_v63 }
  0x3e   :  { %1027 = vmatprep.subr.bf16.mxu1 %v1134_v2 }
  0x3f   :  { %1006 = vmatpush3.bf16.msra.mxu0 %v1133_v1 }
  0x40   :  { %1044 = vmatprep.subr.bf16.mxu0 %v1151_v6 }
  0x41   :  { %1028 = vmatpush3.bf16.msra.mxu1 %v1138_v5 }
  0x42   :  { %769 = vmatmul.mubr.bf16.vlgmr.msra.gmra.mrb[4].mxu0 %v1135_v3 }
  0x43   :  { %1060 = vmatprep.mubr.msk.bf16.mxu0 %vm1152_vm0, %v1151_v6  ;;  %1045 = vmatpush3.bf16.msra.mxu0 %v1142_v9 }
  0x44   :  { %810 = vmatmul.mubr.bf16.vlgmr.msra.gmra.mrb[4].mxu1 %v1139_v7  ;;  %1046 = vmatprep.subr.bf16.mxu0 %v1151_v6 }
  0x47   :  { %1047 = vmatpush3.bf16.msra.mxu0 %v1143_v10 }
  0x48   :  { %1048 = vmatprep.subr.bf16.mxu0 %v1151_v6 }
  0x4b   :  { %1049 = vmatpush3.bf16.msra.mxu0 %v1144_v11 }
  0x4c   :  { %1050 = vmatprep.subr.bf16.mxu0 %v1151_v6 }
  0x4f   :  { %1051 = vmatpush3.bf16.msra.mxu0 %v1145_v12 }
  0x50   :  { %1052 = vmatprep.subr.bf16.mxu0 %v1151_v6 }
  0x53   :  { %1053 = vmatpush3.bf16.msra.mxu0 %v1146_v13 }
  0x54   :  { %1054 = vmatprep.subr.bf16.mxu0 %v1151_v6 }
  0x57   :  { %1055 = vmatpush3.bf16.msra.mxu0 %v1147_v14 }
  0x58   :  { %1056 = vmatprep.subr.bf16.mxu0 %v1151_v6 }
  0x5b   :  { %1057 = vmatpush3.bf16.msra.mxu0 %v1148_v15 }
  0x5c   :  { %1058 = vmatprep.subr.bf16.mxu0 %v1151_v6 }
  0x5f   :  { %1059 = vmatpush3.bf16.msra.mxu0 %v1149_v16 }
  0x62   :  { %1061 = vmatmul.mubr.bf16.vlgmr.msra.gmra.mrb[8].mxu0 %v1150_v17 }
  0xf5   :  { %v963_v18 = vpop.f32.mrb[0].mxu0 }
  0xf6   :  { %v964_v20 = vpop.f32.mrb[1].mxu0 }
  0xf7   :  { %v965_v21 = vadd.f32 %v964_v20, %v963_v18  ;;  %v966_v22 = vpop.f32.mrb[2].mxu0  ;;  %v985_v23 = vpop.f32.mrb[0].mxu1 }
  0xf8   :  { %v967_v24 = vpop.f32.mrb[3].mxu0  ;;  %v986_v27 = vpop.f32.mrb[1].mxu1 }
  0xf9   :  { %v689_v25 = vadd.f32 %v965_v21, %v865_v19  ;;  %v968_v26 = vadd.f32 %v967_v24, %v966_v22  ;;  %v987_v28 = vadd.f32 %v986_v27, %v985_v23  ;;  %v988_v29 = vpop.f32.mrb[2].mxu1 }
  0xfa   :  { %v989_v31 = vpop.f32.mrb[3].mxu1 }
  0xfb   :  { %v692_v30 = vadd.f32 %v968_v26, %v865_v19  ;;  %v730_v32 = vadd.f32 %v987_v28, %v689_v25  ;;  %v990_v33 = vadd.f32 %v989_v31, %v988_v29 }
  0xfd   :  { %v733_v34 = vadd.f32 %v990_v33, %v692_v30 }
 0x115   :  { %v1007_v35 = vpop.f32.mrb[4].mxu0 }
 0x116   :  { %v1008_v36 = vpop.f32.mrb[5].mxu0 }
 0x117   :  { %v1009_v37 = vadd.f32 %v1008_v36, %v1007_v35  ;;  %v1010_v38 = vpop.f32.mrb[6].mxu0  ;;  %v1029_v39 = vpop.f32.mrb[4].mxu1 }
 0x118   :  { %v1011_v40 = vpop.f32.mrb[7].mxu0  ;;  %v1030_v43 = vpop.f32.mrb[5].mxu1 }
 0x119   :  { %v771_v41 = vadd.f32 %v1009_v37, %v730_v32  ;;  %v1012_v42 = vadd.f32 %v1011_v40, %v1010_v38  ;;  %v1031_v44 = vadd.f32 %v1030_v43, %v1029_v39  ;;  %v1032_v45 = vpop.f32.mrb[6].mxu1 }
 0x11a   :  { %v1033_v47 = vpop.f32.mrb[7].mxu1 }
 0x11b   :  { %v774_v46 = vadd.f32 %v1012_v42, %v733_v34  ;;  %v1034_v48 = vadd.f32 %v1033_v47, %v1032_v45  ;;  %v812_v49 = vadd.f32 %v1031_v44, %v771_v41 }
 0x11d   :  { %v815_v50 = vadd.f32 %v1034_v48, %v774_v46 }
 0x135   :  { %v852_v51 = vpop.f32.mrb[8].mxu0 }
 0x136   :  { %v853_v52 = vadd.f32 %v852_v51, %v812_v49  ;;  %v1062_v53 = vpop.f32.mrb[9].mxu0 }
 0x137   :  { %v855_v54 = vpop.f32.mrb[10].mxu0 }
 0x138   :  { %859 = vst [vmem:[%s1428_s3] sm:$0xff] %v853_v52  ;;  %v856_v55 = vadd.f32 %v855_v54, %v815_v50  ;;  %v1063_v56 = vpop.f32.mrb[11].mxu0 }
 0x13a   :  { %860 = vst [vmem:[%s1428_s3 + $0x8] sm:$0xff] %v856_v55 }

// kernel: f_net_forward.120
= control target key start
LH: loop header
LB: loop body
LE: loop exit
PB: predicated region body
PF: predicated region fallthrough
CT: control target
= control target key end

     0   :  { %v362_v0 = vmov 0.0   ;;  %vm363_vm0 = vmmov 0   ;;  %s457_s1 = inlined_call_operand.vmem [shape: bf16[128,128], index: 1, kind: input, shape index: {}]   ;;  %s458_s3 = inlined_call_operand.vmem [shape: bf16[128,128], index: 3, kind: input, shape index: {}]   ;;  %s459_s0 = inlined_call_operand.vmem [shape: bf16[16,128], index: 0, kind: input, shape index: {}]   ;;  %s460_s2 = inlined_call_operand.vmem [shape: f32[1,128], index: 2, kind: input, shape index: {}]   ;;  %s461_s4 = inlined_call_operand.vmem [shape: f32[1,128], index: 4, kind: input, shape index: {}]   ;;  %s462_s5 = inlined_call_operand.vmem [shape: f32[16,128], index: 5, kind: output, shape index: {}]  }
   0x1   :  { %303 = vmatprep.subr.bf16.mxu0 %v362_v0  ;;  %v345_v1 = vld [vmem:[%s457_s1] sm:$0xff]   ;;  %319 = vmatprep.mubr.msk.bf16.mxu0 %vm363_vm0, %v362_v0  ;;  %v346_v2 = vld [vmem:[%s457_s1 + $0x8] sm:$0xff]   ;;  %v347_v3 = vld [vmem:[%s457_s1 + $0x10] sm:$0xff]  }
   0x2   :  { %323 = vmatprep.subr.bf16.mxu1 %v362_v0  ;;  %339 = vmatprep.mubr.msk.bf16.mxu1 %vm363_vm0, %v362_v0  ;;  %v354_v4 = vld [vmem:[%s458_s3] sm:$0xff]   ;;  %v348_v5 = vld [vmem:[%s457_s1 + $0x18] sm:$0xff]   ;;  %v355_v6 = vld [vmem:[%s458_s3 + $0x8] sm:$0xff]  }
   0x3   :  { %304 = vmatpush3.bf16.msra.mxu0 %v345_v1  ;;  %324 = vmatpush3.bf16.msra.mxu1 %v354_v4  ;;  %v349_v7 = vld [vmem:[%s457_s1 + $0x20] sm:$0xff]   ;;  %v356_v8 = vld [vmem:[%s458_s3 + $0x10] sm:$0xff]   ;;  %v350_v9 = vld [vmem:[%s457_s1 + $0x28] sm:$0xff]  }
   0x4   :  { %305 = vmatprep.subr.bf16.mxu0 %v362_v0  ;;  %325 = vmatprep.subr.bf16.mxu1 %v362_v0  ;;  %v357_v10 = vld [vmem:[%s458_s3 + $0x18] sm:$0xff]   ;;  %v351_v11 = vld [vmem:[%s457_s1 + $0x30] sm:$0xff]   ;;  %v358_v12 = vld [vmem:[%s458_s3 + $0x20] sm:$0xff]  }
   0x5   :  { %v352_v13 = vld [vmem:[%s457_s1 + $0x38] sm:$0xff]   ;;  %v359_v14 = vld [vmem:[%s458_s3 + $0x28] sm:$0xff]   ;;  %v353_v15 = vld [vmem:[%s459_s0] sm:$0xff]  }
   0x6   :  { %v360_v16 = vld [vmem:[%s458_s3 + $0x30] sm:$0xff]   ;;  %v361_v17 = vld [vmem:[%s458_s3 + $0x38] sm:$0xff]   ;;  %v266_v18 = vld [vmem:[%s460_s2] ss:$0 sm:$0xff] }
   0x7   :  { %306 = vmatpush3.bf16.msra.mxu0 %v346_v2  ;;  %326 = vmatpush3.bf16.msra.mxu1 %v355_v6  ;;  %v276_v30 = vld [vmem:[%s461_s4] ss:$0 sm:$0xff] }
   0x8   :  { %307 = vmatprep.subr.bf16.mxu0 %v362_v0  ;;  %327 = vmatprep.subr.bf16.mxu1 %v362_v0 }
   0xb   :  { %308 = vmatpush3.bf16.msra.mxu0 %v347_v3  ;;  %328 = vmatpush3.bf16.msra.mxu1 %v356_v8 }
   0xc   :  { %309 = vmatprep.subr.bf16.mxu0 %v362_v0  ;;  %329 = vmatprep.subr.bf16.mxu1 %v362_v0 }
   0xf   :  { %310 = vmatpush3.bf16.msra.mxu0 %v348_v5  ;;  %330 = vmatpush3.bf16.msra.mxu1 %v357_v10 }
  0x10   :  { %311 = vmatprep.subr.bf16.mxu0 %v362_v0  ;;  %331 = vmatprep.subr.bf16.mxu1 %v362_v0 }
  0x13   :  { %312 = vmatpush3.bf16.msra.mxu0 %v349_v7  ;;  %332 = vmatpush3.bf16.msra.mxu1 %v358_v12 }
  0x14   :  { %313 = vmatprep.subr.bf16.mxu0 %v362_v0  ;;  %333 = vmatprep.subr.bf16.mxu1 %v362_v0 }
  0x17   :  { %314 = vmatpush3.bf16.msra.mxu0 %v350_v9  ;;  %334 = vmatpush3.bf16.msra.mxu1 %v359_v14 }
  0x18   :  { %315 = vmatprep.subr.bf16.mxu0 %v362_v0  ;;  %335 = vmatprep.subr.bf16.mxu1 %v362_v0 }
  0x1b   :  { %316 = vmatpush3.bf16.msra.mxu0 %v351_v11  ;;  %336 = vmatpush3.bf16.msra.mxu1 %v360_v16 }
  0x1c   :  { %317 = vmatprep.subr.bf16.mxu0 %v362_v0  ;;  %337 = vmatprep.subr.bf16.mxu1 %v362_v0 }
  0x1f   :  { %318 = vmatpush3.bf16.msra.mxu0 %v352_v13  ;;  %338 = vmatpush3.bf16.msra.mxu1 %v361_v17 }
  0x22   :  { %320 = vmatmul.mubr.bf16.vlgmr.msra.gmra.mrb[0].mxu0 %v353_v15 }
  0xf5   :  { %v134_v19 = vpop.f32.mrb[0].mxu0 }
  0xf6   :  { %v135_v20 = vadd.f32 %v266_v18, %v134_v19  ;;  %v321_v21 = vpop.f32.mrb[1].mxu0 }
  0xf7   :  { %v137_v22 = vpop.f32.mrb[2].mxu0 }
  0xf8   :  { %v143_v23 = vmul.f32 0.1, %v135_v20  ;;  %v138_v24 = vadd.f32 %v266_v18, %v137_v22  ;;  %v322_v25 = vpop.f32.mrb[3].mxu0  ;;  %vm141_vm1 = vcmp.ge.f32.partialorder %v135_v20, 0.0 }
  0xfa   :  { %vm142_vm2 = vcmp.ge.f32.partialorder %v138_v24, 0.0  ;;  %v144_v26 = vmul.f32 0.1, %v138_v24  ;;  %v145_v27 = vsel %vm141_vm1, %v135_v20, %v143_v23 }
  0xfc   :  { %v146_v28 = vsel %vm142_vm2, %v138_v24, %v144_v26 }
  0xfd   :  { %v147_v29 = vpack.c.bf16 %v146_v28, %v145_v27 }
  0xff   :  { %340 = vmatmul.mubr.bf16.vlgmr.msra.gmra.mrb[0].mxu1 %v147_v29 }
 0x1d2   :  { %v253_v31 = vpop.f32.mrb[0].mxu1 }
 0x1d3   :  { %v254_v32 = vadd.f32 %v276_v30, %v253_v31  ;;  %v341_v33 = vpop.f32.mrb[1].mxu1 }
 0x1d4   :  { %v256_v34 = vpop.f32.mrb[2].mxu1 }
 0x1d5   :  { %260 = vst [vmem:[%s462_s5] sm:$0xff] %v254_v32  ;;  %v257_v35 = vadd.f32 %v276_v30, %v256_v34  ;;  %v342_v36 = vpop.f32.mrb[3].mxu1 }
 0x1d7   :  { %261 = vst [vmem:[%s462_s5 + $0x8] sm:$0xff] %v257_v35 }

// kernel: f_net_forward.124
= control target key start
LH: loop header
LB: loop body
LE: loop exit
PB: predicated region body
PF: predicated region fallthrough
CT: control target
= control target key end

     0   :  { %v637_v33 = vmov 0.0   ;;  %vm638_vm0 = vmmov 0   ;;  %vm341_vm1 = vcmask 523264   ;;  %s791_s1 = inlined_call_operand.vmem [shape: bf16[576,128], index: 1, kind: input, shape index: {}]   ;;  %s792_s0 = inlined_call_operand.vmem [shape: bf16[16,576], index: 0, kind: input, shape index: {}]   ;;  %s793_s2 = inlined_call_operand.vmem [shape: f32[1,128], index: 2, kind: input, shape index: {}]   ;;  %s794_s3 = inlined_call_operand.vmem [shape: f32[16,128], index: 3, kind: output, shape index: {}]  }
   0x1   :  { %v590_v0 = vld [vmem:[%s791_s1 + $0x40] sm:$0xff]   ;;  %v594_v4 = vld [vmem:[%s791_s1 + $0x48] sm:$0xff]   ;;  %v598_v8 = vld [vmem:[%s791_s1 + $0x50] sm:$0xff]  }
   0x2   :  { %v591_v1 = vld [vmem:[%s791_s1] sm:$0xff]   ;;  %527 = vmatprep.subr.bf16.mxu0 %v590_v0  ;;  %v595_v5 = vld [vmem:[%s791_s1 + $0x8] sm:$0xff]   ;;  %v599_v9 = vld [vmem:[%s791_s1 + $0x10] sm:$0xff]  }
   0x3   :  { %v592_v2 = vld [vmem:[%s791_s1 + $0xc0] sm:$0xff]   ;;  %528 = vmatpush3.bf16.msra.mxu0 %v591_v1  ;;  %v596_v6 = vld [vmem:[%s791_s1 + $0xc8] sm:$0xff]   ;;  %v600_v10 = vld [vmem:[%s791_s1 + $0xd0] sm:$0xff]  }
   0x4   :  { %v593_v3 = vld [vmem:[%s791_s1 + $0x80] sm:$0xff]   ;;  %549 = vmatprep.subr.bf16.mxu1 %v592_v2  ;;  %529 = vmatprep.subr.bf16.mxu0 %v594_v4  ;;  %v597_v7 = vld [vmem:[%s791_s1 + $0x88] sm:$0xff]   ;;  %v601_v11 = vld [vmem:[%s791_s1 + $0x90] sm:$0xff]  }
   0x5   :  { %550 = vmatpush3.bf16.msra.mxu1 %v593_v3  ;;  %v602_v12 = vld [vmem:[%s791_s1 + $0x58] sm:$0xff]   ;;  %v606_v16 = vld [vmem:[%s791_s1 + $0x60] sm:$0xff]   ;;  %v610_v20 = vld [vmem:[%s791_s1 + $0x68] sm:$0xff]  }
   0x6   :  { %551 = vmatprep.subr.bf16.mxu1 %v596_v6  ;;  %v603_v13 = vld [vmem:[%s791_s1 + $0x18] sm:$0xff]   ;;  %v607_v17 = vld [vmem:[%s791_s1 + $0x20] sm:$0xff]   ;;  %v611_v21 = vld [vmem:[%s791_s1 + $0x28] sm:$0xff]  }
   0x7   :  { %530 = vmatpush3.bf16.msra.mxu0 %v595_v5  ;;  %v604_v14 = vld [vmem:[%s791_s1 + $0xd8] sm:$0xff]   ;;  %v608_v18 = vld [vmem:[%s791_s1 + $0xe0] sm:$0xff]   ;;  %v612_v22 = vld [vmem:[%s791_s1 + $0xe8] sm:$0xff]  }
   0x8   :  { %531 = vmatprep.subr.bf16.mxu0 %v598_v8  ;;  %v605_v15 = vld [vmem:[%s791_s1 + $0x98] sm:$0xff]   ;;  %v609_v19 = vld [vmem:[%s791_s1 + $0xa0] sm:$0xff]   ;;  %v613_v23 = vld [vmem:[%s791_s1 + $0xa8] sm:$0xff]  }
   0x9   :  { %552 = vmatpush3.bf16.msra.mxu1 %v597_v7  ;;  %v614_v24 = vld [vmem:[%s791_s1 + $0x70] sm:$0xff]   ;;  %v618_v28 = vld [vmem:[%s791_s1 + $0x78] sm:$0xff]   ;;  %v627_v36 = vld [vmem:[%s792_s0 + $0xc] ss:$20 sps:$4 sm:$0xff]  }
   0xa   :  { %553 = vmatprep.subr.bf16.mxu1 %v600_v10  ;;  %v615_v25 = vld [vmem:[%s791_s1 + $0x30] sm:$0xff]   ;;  %v619_v29 = vld [vmem:[%s791_s1 + $0x38] sm:$0xff]   ;;  %v628_v37 = vld [vmem:[%s791_s1 + $0x100] sm:$0xff]   ;;  %418 = vmatprep.mubr.bf16.mxu1 %v627_v36 }
   0xb   :  { %532 = vmatpush3.bf16.msra.mxu0 %v599_v9  ;;  %v616_v26 = vld [vmem:[%s791_s1 + $0xf0] sm:$0xff]   ;;  %v620_v30 = vld [vmem:[%s791_s1 + $0xf8] sm:$0xff]   ;;  %v629_v38 = vld [vmem:[%s791_s1 + $0x108] sm:$0xff]  }
   0xc   :  { %533 = vmatprep.subr.bf16.mxu0 %v602_v12  ;;  %v617_v27 = vld [vmem:[%s791_s1 + $0xb0] sm:$0xff]   ;;  %v623_v32 = vld [vmem:[%s792_s0 + $0x4] ss:$20 sps:$4 sm:$0xff]   ;;  %v625_v35 = vld [vmem:[%s792_s0 + $0x8] ss:$20 sps:$4 sm:$0xff]  }
   0xd   :  { %554 = vmatpush3.bf16.msra.mxu1 %v601_v11  ;;  %v621_v31 = vld [vmem:[%s792_s0] ss:$20 sps:$4 sm:$0xff]   ;;  %v624_v34 = vld [vmem:[%s791_s1 + $0xb8] sm:$0xff]   ;;  %377 = vmatprep.mubr.bf16.mxu0 %v623_v32  ;;  %v632_v41 = vld [vmem:[%s792_s0 + $0x10] ss:$20 sps:$4 sm:$0xff]  }
   0xe   :  { %555 = vmatprep.subr.bf16.mxu1 %v604_v14  ;;  %v630_v39 = vld [vmem:[%s791_s1 + $0x110] sm:$0xff]   ;;  %v631_v40 = vld [vmem:[%s791_s1 + $0x118] sm:$0xff]   ;;  %v484_v43 = vld [vmem:[%s793_s2] ss:$0 sm:$0xff] }
   0xf   :  { %534 = vmatpush3.bf16.msra.mxu0 %v603_v13 }
  0x10   :  { %535 = vmatprep.subr.bf16.mxu0 %v606_v16 }
  0x11   :  { %556 = vmatpush3.bf16.msra.mxu1 %v605_v15 }
  0x12   :  { %557 = vmatprep.subr.bf16.mxu1 %v608_v18 }
  0x13   :  { %536 = vmatpush3.bf16.msra.mxu0 %v607_v17 }
  0x14   :  { %537 = vmatprep.subr.bf16.mxu0 %v610_v20 }
  0x15   :  { %558 = vmatpush3.bf16.msra.mxu1 %v609_v19 }
  0x16   :  { %559 = vmatprep.subr.bf16.mxu1 %v612_v22 }
  0x17   :  { %538 = vmatpush3.bf16.msra.mxu0 %v611_v21 }
  0x18   :  { %539 = vmatprep.subr.bf16.mxu0 %v614_v24 }
  0x19   :  { %560 = vmatpush3.bf16.msra.mxu1 %v613_v23 }
  0x1a   :  { %561 = vmatprep.subr.bf16.mxu1 %v616_v26 }
  0x1b   :  { %540 = vmatpush3.bf16.msra.mxu0 %v615_v25 }
  0x1c   :  { %541 = vmatprep.subr.bf16.mxu0 %v618_v28 }
  0x1d   :  { %562 = vmatpush3.bf16.msra.mxu1 %v617_v27 }
  0x1e   :  { %563 = vmatprep.subr.bf16.mxu1 %v620_v30 }
  0x1f   :  { %542 = vmatpush3.bf16.msra.mxu0 %v619_v29 }
  0x20   :  { %576 = vmatprep.subr.bf16.mxu0 %v637_v33 }
  0x21   :  { %564 = vmatpush3.bf16.msra.mxu1 %v624_v34 }
  0x22   :  { %378 = vmatmul.mubr.bf16.vlgmr.msra.gmra.mrb[0].mxu0 %v621_v31 }
  0x23   :  { %584 = vmatprep.mubr.msk.bf16.mxu0 %vm638_vm0, %v637_v33  ;;  %577 = vmatpush3.bf16.msra.mxu0 %v628_v37 }
  0x24   :  { %419 = vmatmul.mubr.bf16.vlgmr.msra.gmra.mrb[0].mxu1 %v625_v35  ;;  %578 = vmatprep.subr.bf16.mxu0 %v637_v33 }
  0x27   :  { %579 = vmatpush3.bf16.msra.mxu0 %v629_v38 }
  0x28   :  { %580 = vmatprep.subr.bf16.mxu0 %v637_v33 }
  0x2b   :  { %581 = vmatpush3.bf16.msra.mxu0 %v630_v39 }
  0x2c   :  { %582 = vmatprep.subr.bf16.mxu0 %v637_v33 }
  0x2f   :  { %583 = vmatpush3.bf16.msra.mxu0 %v631_v40 }
  0x32   :  { %585 = vmatmul.mubr.msk.bf16.vlgmr.msra.gmra.mrb[4].mxu0 %vm341_vm1, %v632_v41 }
  0xf5   :  { %v543_v42 = vpop.f32.mrb[0].mxu0 }
  0xf6   :  { %v544_v44 = vpop.f32.mrb[1].mxu0 }
  0xf7   :  { %v545_v45 = vadd.f32 %v544_v44, %v543_v42  ;;  %v546_v46 = vpop.f32.mrb[2].mxu0  ;;  %v565_v47 = vpop.f32.mrb[0].mxu1 }
  0xf8   :  { %v547_v48 = vpop.f32.mrb[3].mxu0  ;;  %v566_v51 = vpop.f32.mrb[1].mxu1 }
  0xf9   :  { %v380_v49 = vadd.f32 %v545_v45, %v484_v43  ;;  %v548_v50 = vadd.f32 %v547_v48, %v546_v46  ;;  %v567_v52 = vadd.f32 %v566_v51, %v565_v47  ;;  %v568_v53 = vpop.f32.mrb[2].mxu1 }
  0xfa   :  { %v569_v55 = vpop.f32.mrb[3].mxu1 }
  0xfb   :  { %v383_v54 = vadd.f32 %v548_v50, %v484_v43  ;;  %v570_v56 = vadd.f32 %v569_v55, %v568_v53  ;;  %v421_v57 = vadd.f32 %v567_v52, %v380_v49 }
  0xfd   :  { %v424_v58 = vadd.f32 %v570_v56, %v383_v54 }
 0x105   :  { %v461_v59 = vpop.f32.mrb[4].mxu0 }
 0x106   :  { %v462_v60 = vadd.f32 %v461_v59, %v421_v57  ;;  %v586_v61 = vpop.f32.mrb[5].mxu0 }
 0x107   :  { %v464_v62 = vpop.f32.mrb[6].mxu0 }
 0x108   :  { %v470_v63 = vmul.f32 0.70710677, %v462_v60  ;;  %v465_v0 = vadd.f32 %v464_v62, %v424_v58  ;;  %v587_v1 = vpop.f32.mrb[7].mxu0  ;;  %v468_v4 = vmul.f32 0.5, %v462_v60 }
 0x10a   :  { %633 = verf.f32 %v470_v63  ;;  %v471_v2 = vmul.f32 0.70710677, %v465_v0  ;;  %v469_v8 = vmul.f32 0.5, %v465_v0 }
 0x10c   :  { %635 = verf.f32 %v471_v2 }
 0x114   :  { %v634_v3 = vpop.eup %633 }
 0x115   :  { %v474_v5 = vadd.f32 1.0, %v634_v3 }
 0x116   :  { %v636_v6 = vpop.eup %635 }
 0x117   :  { %v476_v7 = vmul.f32 %v474_v5, %v468_v4  ;;  %v475_v9 = vadd.f32 1.0, %v636_v6 }
 0x119   :  { %478 = vst [vmem:[%s794_s3] sm:$0xff] %v476_v7  ;;  %v477_v10 = vmul.f32 %v475_v9, %v469_v8 }
 0x11b   :  { %479 = vst [vmem:[%s794_s3 + $0x8] sm:$0xff] %v477_v10 }

// kernel: f_net_forward.128
= control target key start
LH: loop header
LB: loop body
LE: loop exit
PB: predicated region body
PF: predicated region fallthrough
CT: control target
= control target key end

     0   :  { %s2068_s1 = inlined_call_operand.vmem [shape: bf16[1152,256], index: 1, kind: input, shape index: {}]   ;;  %s2069_s0 = inlined_call_operand.vmem [shape: bf16[16,1152], index: 0, kind: input, shape index: {}]   ;;  %s2070_s2 = inlined_call_operand.vmem [shape: f32[1,256], index: 2, kind: input, shape index: {}]   ;;  %s2071_s3 = inlined_call_operand.vmem [shape: f32[16,256], index: 3, kind: output, shape index: {}]  }
   0x1   :  { %v1344_v0 = vld [vmem:[%s2068_s1 + $0x4] ss:$8 sps:$4 sm:$0xff]   ;;  %v1348_v2 = vld [vmem:[%s2068_s1] ss:$8 sps:$4 sm:$0xff]   ;;  %v1350_v4 = vld [vmem:[%s2068_s1 + $0x14] ss:$8 sps:$4 sm:$0xff]  }
   0x2   :  { %v1346_v1 = vld [vmem:[%s2068_s1 + $0x204] ss:$8 sps:$4 sm:$0xff]   ;;  %947 = vmatprep.subr.bf16.mxu1 %v1344_v0  ;;  %v1349_v3 = vld [vmem:[%s2068_s1 + $0x200] ss:$8 sps:$4 sm:$0xff]   ;;  %v1352_v5 = vld [vmem:[%s2068_s1 + $0x214] ss:$8 sps:$4 sm:$0xff]  }
   0x3   :  { %1033 = vmatprep.subr.bf16.mxu0 %v1346_v1  ;;  %948 = vmatpush1.bf16.msra.mxu1 %v1348_v2  ;;  %v1354_v6 = vld [vmem:[%s2068_s1 + $0x10] ss:$8 sps:$4 sm:$0xff]   ;;  %v1356_v8 = vld [vmem:[%s2068_s1 + $0x24] ss:$8 sps:$4 sm:$0xff]   ;;  %v1360_v10 = vld [vmem:[%s2068_s1 + $0x20] ss:$8 sps:$4 sm:$0xff]  }
   0x4   :  { %1034 = vmatpush1.bf16.msra.mxu0 %v1349_v3  ;;  %949 = vmatprep.subr.bf16.mxu1 %v1350_v4  ;;  %v1355_v7 = vld [vmem:[%s2068_s1 + $0x210] ss:$8 sps:$4 sm:$0xff]   ;;  %v1358_v9 = vld [vmem:[%s2068_s1 + $0x224] ss:$8 sps:$4 sm:$0xff]   ;;  %v1361_v11 = vld [vmem:[%s2068_s1 + $0x220] ss:$8 sps:$4 sm:$0xff]  }
   0x5   :  { %1035 = vmatprep.subr.bf16.mxu0 %v1352_v5  ;;  %v1362_v12 = vld [vmem:[%s2068_s1 + $0x34] ss:$8 sps:$4 sm:$0xff]   ;;  %v1366_v14 = vld [vmem:[%s2068_s1 + $0x30] ss:$8 sps:$4 sm:$0xff]   ;;  %v1368_v16 = vld [vmem:[%s2068_s1 + $0x44] ss:$8 sps:$4 sm:$0xff]  }
   0x6   :  { %v1364_v13 = vld [vmem:[%s2068_s1 + $0x234] ss:$8 sps:$4 sm:$0xff]   ;;  %v1367_v15 = vld [vmem:[%s2068_s1 + $0x230] ss:$8 sps:$4 sm:$0xff]   ;;  %v1370_v17 = vld [vmem:[%s2068_s1 + $0x244] ss:$8 sps:$4 sm:$0xff]  }
   0x7   :  { %950 = vmatpush1.bf16.msra.mxu1 %v1354_v6  ;;  %v1372_v18 = vld [vmem:[%s2068_s1 + $0x40] ss:$8 sps:$4 sm:$0xff]   ;;  %v1374_v20 = vld [vmem:[%s2068_s1 + $0x54] ss:$8 sps:$4 sm:$0xff]   ;;  %v1378_v22 = vld [vmem:[%s2068_s1 + $0x50] ss:$8 sps:$4 sm:$0xff]  }
   0x8   :  { %1036 = vmatpush1.bf16.msra.mxu0 %v1355_v7  ;;  %951 = vmatprep.subr.bf16.mxu1 %v1356_v8  ;;  %v1373_v19 = vld [vmem:[%s2068_s1 + $0x240] ss:$8 sps:$4 sm:$0xff]   ;;  %v1376_v21 = vld [vmem:[%s2068_s1 + $0x254] ss:$8 sps:$4 sm:$0xff]   ;;  %v1379_v23 = vld [vmem:[%s2068_s1 + $0x250] ss:$8 sps:$4 sm:$0xff]  }
   0x9   :  { %1037 = vmatprep.subr.bf16.mxu0 %v1358_v9  ;;  %v1380_v24 = vld [vmem:[%s2068_s1 + $0x64] ss:$8 sps:$4 sm:$0xff]   ;;  %v1384_v26 = vld [vmem:[%s2068_s1 + $0x60] ss:$8 sps:$4 sm:$0xff]   ;;  %v1386_v28 = vld [vmem:[%s2068_s1 + $0x74] ss:$8 sps:$4 sm:$0xff]  }
   0xa   :  { %v1382_v25 = vld [vmem:[%s2068_s1 + $0x264] ss:$8 sps:$4 sm:$0xff]   ;;  %v1385_v27 = vld [vmem:[%s2068_s1 + $0x260] ss:$8 sps:$4 sm:$0xff]   ;;  %v1388_v29 = vld [vmem:[%s2068_s1 + $0x274] ss:$8 sps:$4 sm:$0xff]  }
   0xb   :  { %952 = vmatpush1.bf16.msra.mxu1 %v1360_v10  ;;  %v1390_v30 = vld [vmem:[%s2068_s1 + $0x70] ss:$8 sps:$4 sm:$0xff]   ;;  %v1392_v32 = vld [vmem:[%s2068_s1 + $0x84] ss:$8 sps:$4 sm:$0xff]   ;;  %v1396_v34 = vld [vmem:[%s2068_s1 + $0x80] ss:$8 sps:$4 sm:$0xff]  }
   0xc   :  { %1038 = vmatpush1.bf16.msra.mxu0 %v1361_v11  ;;  %953 = vmatprep.subr.bf16.mxu1 %v1362_v12  ;;  %v1391_v31 = vld [vmem:[%s2068_s1 + $0x270] ss:$8 sps:$4 sm:$0xff]   ;;  %v1394_v33 = vld [vmem:[%s2068_s1 + $0x284] ss:$8 sps:$4 sm:$0xff]   ;;  %v1397_v35 = vld [vmem:[%s2068_s1 + $0x280] ss:$8 sps:$4 sm:$0xff]  }
   0xd   :  { %1039 = vmatprep.subr.bf16.mxu0 %v1364_v13  ;;  %v1398_v36 = vld [vmem:[%s2068_s1 + $0x94] ss:$8 sps:$4 sm:$0xff]   ;;  %v1402_v38 = vld [vmem:[%s2068_s1 + $0x90] ss:$8 sps:$4 sm:$0xff]   ;;  %v1404_v40 = vld [vmem:[%s2068_s1 + $0xa4] ss:$8 sps:$4 sm:$0xff]  }
   0xe   :  { %v1400_v37 = vld [vmem:[%s2068_s1 + $0x294] ss:$8 sps:$4 sm:$0xff]   ;;  %v1403_v39 = vld [vmem:[%s2068_s1 + $0x290] ss:$8 sps:$4 sm:$0xff]   ;;  %v1406_v41 = vld [vmem:[%s2068_s1 + $0x2a4] ss:$8 sps:$4 sm:$0xff]  }
   0xf   :  { %954 = vmatpush1.bf16.msra.mxu1 %v1366_v14  ;;  %v1408_v42 = vld [vmem:[%s2068_s1 + $0xa0] ss:$8 sps:$4 sm:$0xff]   ;;  %v1410_v44 = vld [vmem:[%s2068_s1 + $0xb4] ss:$8 sps:$4 sm:$0xff]   ;;  %v1414_v46 = vld [vmem:[%s2068_s1 + $0xb0] ss:$8 sps:$4 sm:$0xff]  }
  0x10   :  { %1040 = vmatpush1.bf16.msra.mxu0 %v1367_v15  ;;  %955 = vmatprep.subr.bf16.mxu1 %v1368_v16  ;;  %v1409_v43 = vld [vmem:[%s2068_s1 + $0x2a0] ss:$8 sps:$4 sm:$0xff]   ;;  %v1412_v45 = vld [vmem:[%s2068_s1 + $0x2b4] ss:$8 sps:$4 sm:$0xff]   ;;  %v1415_v47 = vld [vmem:[%s2068_s1 + $0x2b0] ss:$8 sps:$4 sm:$0xff]  }
  0x11   :  { %1041 = vmatprep.subr.bf16.mxu0 %v1370_v17  ;;  %v1442_v48 = vld [vmem:[%s2069_s0 + $0x4] ss:$36 sps:$4 sm:$0xff]   ;;  %v1448_v51 = vld [vmem:[%s2069_s0 + $0x14] ss:$36 sps:$4 sm:$0xff]  }
  0x12   :  { %v1416_v49 = vld [vmem:[%s2068_s1 + $0xc4] ss:$8 sps:$4 sm:$0xff]   ;;  %979 = vmatprep.mubr.bf16.mxu1 %v1442_v48  ;;  %v1420_v52 = vld [vmem:[%s2068_s1 + $0xc0] ss:$8 sps:$4 sm:$0xff]   ;;  %v1422_v54 = vld [vmem:[%s2068_s1 + $0xd4] ss:$8 sps:$4 sm:$0xff]   ;;  %1065 = vmatprep.mubr.bf16.mxu0 %v1448_v51 }
  0x13   :  { %956 = vmatpush1.bf16.msra.mxu1 %v1372_v18  ;;  %v1418_v50 = vld [vmem:[%s2068_s1 + $0x2c4] ss:$8 sps:$4 sm:$0xff]   ;;  %v1421_v53 = vld [vmem:[%s2068_s1 + $0x2c0] ss:$8 sps:$4 sm:$0xff]   ;;  %v1424_v55 = vld [vmem:[%s2068_s1 + $0x2d4] ss:$8 sps:$4 sm:$0xff]  }
  0x14   :  { %1042 = vmatpush1.bf16.msra.mxu0 %v1373_v19  ;;  %957 = vmatprep.subr.bf16.mxu1 %v1374_v20  ;;  %v1426_v56 = vld [vmem:[%s2068_s1 + $0xd0] ss:$8 sps:$4 sm:$0xff]   ;;  %v1428_v58 = vld [vmem:[%s2068_s1 + $0xe4] ss:$8 sps:$4 sm:$0xff]   ;;  %v1432_v60 = vld [vmem:[%s2068_s1 + $0xe0] ss:$8 sps:$4 sm:$0xff]  }
  0x15   :  { %1043 = vmatprep.subr.bf16.mxu0 %v1376_v21  ;;  %v1427_v57 = vld [vmem:[%s2068_s1 + $0x2d0] ss:$8 sps:$4 sm:$0xff]   ;;  %v1430_v59 = vld [vmem:[%s2068_s1 + $0x2e4] ss:$8 sps:$4 sm:$0xff]   ;;  %v1433_v61 = vld [vmem:[%s2068_s1 + $0x2e0] ss:$8 sps:$4 sm:$0xff]  }
  0x16   :  { %v1434_v62 = vld [vmem:[%s2068_s1 + $0xf4] ss:$8 sps:$4 sm:$0xff]   ;;  %v1438_v0 = vld [vmem:[%s2068_s1 + $0xf0] ss:$8 sps:$4 sm:$0xff]   ;;  %v1445_v2 = vld [vmem:[%s2068_s1 + $0x104] ss:$8 sps:$4 sm:$0xff]  }
  0x17   :  { %958 = vmatpush1.bf16.msra.mxu1 %v1378_v22  ;;  %v1436_v63 = vld [vmem:[%s2068_s1 + $0x2f4] ss:$8 sps:$4 sm:$0xff]   ;;  %v1439_v1 = vld [vmem:[%s2068_s1 + $0x2f0] ss:$8 sps:$4 sm:$0xff]   ;;  %v1451_v3 = vld [vmem:[%s2068_s1 + $0x304] ss:$8 sps:$4 sm:$0xff]  }
  0x18   :  { %1044 = vmatpush1.bf16.msra.mxu0 %v1379_v23  ;;  %959 = vmatprep.subr.bf16.mxu1 %v1380_v24  ;;  %v1440_v4 = vld [vmem:[%s2069_s0] ss:$36 sps:$4 sm:$0xff]   ;;  %v1446_v6 = vld [vmem:[%s2069_s0 + $0x10] ss:$36 sps:$4 sm:$0xff]  }
  0x19   :  { %1045 = vmatprep.subr.bf16.mxu0 %v1382_v25  ;;  %v1443_v5 = vld [vmem:[%s2068_s1 + $0x100] ss:$8 sps:$4 sm:$0xff]   ;;  %v1454_v8 = vld [vmem:[%s2068_s1 + $0x114] ss:$8 sps:$4 sm:$0xff]   ;;  %v1452_v10 = vld [vmem:[%s2068_s1 + $0x110] ss:$8 sps:$4 sm:$0xff]  }
  0x1a   :  { %v1449_v7 = vld [vmem:[%s2068_s1 + $0x300] ss:$8 sps:$4 sm:$0xff]   ;;  %v1457_v9 = vld [vmem:[%s2068_s1 + $0x314] ss:$8 sps:$4 sm:$0xff]   ;;  %v1455_v11 = vld [vmem:[%s2068_s1 + $0x310] ss:$8 sps:$4 sm:$0xff]  }
  0x1b   :  { %960 = vmatpush1.bf16.msra.mxu1 %v1384_v26  ;;  %v1460_v12 = vld [vmem:[%s2068_s1 + $0x124] ss:$8 sps:$4 sm:$0xff]   ;;  %v1458_v14 = vld [vmem:[%s2068_s1 + $0x120] ss:$8 sps:$4 sm:$0xff]   ;;  %v1466_v16 = vld [vmem:[%s2068_s1 + $0x134] ss:$8 sps:$4 sm:$0xff]  }
  0x1c   :  { %1046 = vmatpush1.bf16.msra.mxu0 %v1385_v27  ;;  %961 = vmatprep.subr.bf16.mxu1 %v1386_v28  ;;  %v1463_v13 = vld [vmem:[%s2068_s1 + $0x324] ss:$8 sps:$4 sm:$0xff]   ;;  %v1461_v15 = vld [vmem:[%s2068_s1 + $0x320] ss:$8 sps:$4 sm:$0xff]   ;;  %v1469_v17 = vld [vmem:[%s2068_s1 + $0x334] ss:$8 sps:$4 sm:$0xff]  }
  0x1d   :  { %1047 = vmatprep.subr.bf16.mxu0 %v1388_v29  ;;  %v1464_v18 = vld [vmem:[%s2068_s1 + $0x130] ss:$8 sps:$4 sm:$0xff]   ;;  %v1472_v20 = vld [vmem:[%s2068_s1 + $0x144] ss:$8 sps:$4 sm:$0xff]   ;;  %v1470_v22 = vld [vmem:[%s2068_s1 + $0x140] ss:$8 sps:$4 sm:$0xff]  }
  0x1e   :  { %v1467_v19 = vld [vmem:[%s2068_s1 + $0x330] ss:$8 sps:$4 sm:$0xff]   ;;  %v1475_v21 = vld [vmem:[%s2068_s1 + $0x344] ss:$8 sps:$4 sm:$0xff]   ;;  %v1473_v23 = vld [vmem:[%s2068_s1 + $0x340] ss:$8 sps:$4 sm:$0xff]  }
  0x1f   :  { %962 = vmatpush1.bf16.msra.mxu1 %v1390_v30  ;;  %v1478_v24 = vld [vmem:[%s2068_s1 + $0x154] ss:$8 sps:$4 sm:$0xff]   ;;  %v1476_v26 = vld [vmem:[%s2068_s1 + $0x150] ss:$8 sps:$4 sm:$0xff]   ;;  %v1484_v28 = vld [vmem:[%s2068_s1 + $0x164] ss:$8 sps:$4 sm:$0xff]  }
  0x20   :  { %1048 = vmatpush1.bf16.msra.mxu0 %v1391_v31  ;;  %963 = vmatprep.subr.bf16.mxu1 %v1392_v32  ;;  %v1481_v25 = vld [vmem:[%s2068_s1 + $0x354] ss:$8 sps:$4 sm:$0xff]   ;;  %v1479_v27 = vld [vmem:[%s2068_s1 + $0x350] ss:$8 sps:$4 sm:$0xff]   ;;  %v1487_v29 = vld [vmem:[%s2068_s1 + $0x364] ss:$8 sps:$4 sm:$0xff]  }
  0x21   :  { %1049 = vmatprep.subr.bf16.mxu0 %v1394_v33  ;;  %v1482_v30 = vld [vmem:[%s2068_s1 + $0x160] ss:$8 sps:$4 sm:$0xff]   ;;  %v1490_v32 = vld [vmem:[%s2068_s1 + $0x174] ss:$8 sps:$4 sm:$0xff]  }
  0x22   :  { %v1485_v31 = vld [vmem:[%s2068_s1 + $0x360] ss:$8 sps:$4 sm:$0xff]   ;;  %v1493_v33 = vld [vmem:[%s2068_s1 + $0x374] ss:$8 sps:$4 sm:$0xff]  }
  0x23   :  { %964 = vmatpush1.bf16.msra.mxu1 %v1396_v34  ;;  %v1544_v34 = vld [vmem:[%s2069_s0 + $0xc] ss:$36 sps:$4 sm:$0xff]   ;;  %v1506_v48 = vld [vmem:[%s2068_s1 + $0x1a0] ss:$8 sps:$4 sm:$0xff]   ;;  %v1517_v51 = vld [vmem:[%s2068_s1 + $0x3b4] ss:$8 sps:$4 sm:$0xff]  }
  0x24   :  { %1050 = vmatpush1.bf16.msra.mxu0 %v1397_v35  ;;  %965 = vmatprep.subr.bf16.mxu1 %v1398_v36  ;;  %v1547_v35 = vld [vmem:[%s2069_s0 + $0x1c] ss:$36 sps:$4 sm:$0xff]   ;;  %v1488_v36 = vld [vmem:[%s2068_s1 + $0x170] ss:$8 sps:$4 sm:$0xff]  }
  0x25   :  { %1051 = vmatprep.subr.bf16.mxu0 %v1400_v37  ;;  %v1491_v37 = vld [vmem:[%s2068_s1 + $0x370] ss:$8 sps:$4 sm:$0xff]  }
  0x27   :  { %966 = vmatpush1.bf16.msra.mxu1 %v1402_v38  ;;  %v1496_v38 = vld [vmem:[%s2068_s1 + $0x184] ss:$8 sps:$4 sm:$0xff]  }
  0x28   :  { %1052 = vmatpush1.bf16.msra.mxu0 %v1403_v39  ;;  %967 = vmatprep.subr.bf16.mxu1 %v1404_v40  ;;  %v1499_v39 = vld [vmem:[%s2068_s1 + $0x384] ss:$8 sps:$4 sm:$0xff]   ;;  %v1494_v40 = vld [vmem:[%s2068_s1 + $0x180] ss:$8 sps:$4 sm:$0xff]  }
  0x29   :  { %1053 = vmatprep.subr.bf16.mxu0 %v1406_v41  ;;  %v1497_v41 = vld [vmem:[%s2068_s1 + $0x380] ss:$8 sps:$4 sm:$0xff]  }
  0x2b   :  { %968 = vmatpush1.bf16.msra.mxu1 %v1408_v42  ;;  %v1502_v42 = vld [vmem:[%s2068_s1 + $0x194] ss:$8 sps:$4 sm:$0xff]  }
  0x2c   :  { %1054 = vmatpush1.bf16.msra.mxu0 %v1409_v43  ;;  %969 = vmatprep.subr.bf16.mxu1 %v1410_v44  ;;  %v1505_v43 = vld [vmem:[%s2068_s1 + $0x394] ss:$8 sps:$4 sm:$0xff]   ;;  %v1500_v44 = vld [vmem:[%s2068_s1 + $0x190] ss:$8 sps:$4 sm:$0xff]  }
  0x2d   :  { %1055 = vmatprep.subr.bf16.mxu0 %v1412_v45  ;;  %v1503_v45 = vld [vmem:[%s2068_s1 + $0x390] ss:$8 sps:$4 sm:$0xff]  }
  0x2f   :  { %970 = vmatpush1.bf16.msra.mxu1 %v1414_v46  ;;  %v1508_v46 = vld [vmem:[%s2068_s1 + $0x1a4] ss:$8 sps:$4 sm:$0xff]  }
  0x30   :  { %1056 = vmatpush1.bf16.msra.mxu0 %v1415_v47  ;;  %971 = vmatprep.subr.bf16.mxu1 %v1416_v49  ;;  %v1511_v47 = vld [vmem:[%s2068_s1 + $0x3a4] ss:$8 sps:$4 sm:$0xff]   ;;  %v1509_v49 = vld [vmem:[%s2068_s1 + $0x3a0] ss:$8 sps:$4 sm:$0xff]  }
  0x31   :  { %1057 = vmatprep.subr.bf16.mxu0 %v1418_v50  ;;  %v1514_v50 = vld [vmem:[%s2068_s1 + $0x1b4] ss:$8 sps:$4 sm:$0xff]  }
  0x33   :  { %972 = vmatpush1.bf16.msra.mxu1 %v1420_v52  ;;  %v1512_v52 = vld [vmem:[%s2068_s1 + $0x1b0] ss:$8 sps:$4 sm:$0xff]  }
  0x34   :  { %1058 = vmatpush1.bf16.msra.mxu0 %v1421_v53  ;;  %973 = vmatprep.subr.bf16.mxu1 %v1422_v54  ;;  %v1515_v53 = vld [vmem:[%s2068_s1 + $0x3b0] ss:$8 sps:$4 sm:$0xff]   ;;  %v1520_v54 = vld [vmem:[%s2068_s1 + $0x1c4] ss:$8 sps:$4 sm:$0xff]  }
  0x35   :  { %1059 = vmatprep.subr.bf16.mxu0 %v1424_v55  ;;  %v1523_v55 = vld [vmem:[%s2068_s1 + $0x3c4] ss:$8 sps:$4 sm:$0xff]  }
  0x37   :  { %974 = vmatpush1.bf16.msra.mxu1 %v1426_v56  ;;  %v1518_v56 = vld [vmem:[%s2068_s1 + $0x1c0] ss:$8 sps:$4 sm:$0xff]  }
  0x38   :  { %1060 = vmatpush1.bf16.msra.mxu0 %v1427_v57  ;;  %975 = vmatprep.subr.bf16.mxu1 %v1428_v58  ;;  %v1521_v57 = vld [vmem:[%s2068_s1 + $0x3c0] ss:$8 sps:$4 sm:$0xff]   ;;  %v1526_v58 = vld [vmem:[%s2068_s1 + $0x1d4] ss:$8 sps:$4 sm:$0xff]  }
  0x39   :  { %1061 = vmatprep.subr.bf16.mxu0 %v1430_v59  ;;  %v1529_v59 = vld [vmem:[%s2068_s1 + $0x3d4] ss:$8 sps:$4 sm:$0xff]  }
  0x3b   :  { %976 = vmatpush1.bf16.msra.mxu1 %v1432_v60  ;;  %v1524_v60 = vld [vmem:[%s2068_s1 + $0x1d0] ss:$8 sps:$4 sm:$0xff]  }
  0x3c   :  { %1062 = vmatpush1.bf16.msra.mxu0 %v1433_v61  ;;  %977 = vmatprep.subr.bf16.mxu1 %v1434_v62  ;;  %v1527_v61 = vld [vmem:[%s2068_s1 + $0x3d0] ss:$8 sps:$4 sm:$0xff]   ;;  %v1532_v62 = vld [vmem:[%s2068_s1 + $0x1e4] ss:$8 sps:$4 sm:$0xff]  }
  0x3d   :  { %1063 = vmatprep.subr.bf16.mxu0 %v1436_v63  ;;  %v1535_v63 = vld [vmem:[%s2068_s1 + $0x3e4] ss:$8 sps:$4 sm:$0xff]  }
  0x3f   :  { %978 = vmatpush1.bf16.msra.mxu1 %v1438_v0  ;;  %v1530_v0 = vld [vmem:[%s2068_s1 + $0x1e0] ss:$8 sps:$4 sm:$0xff]  }
  0x40   :  { %1064 = vmatpush1.bf16.msra.mxu0 %v1439_v1  ;;  %990 = vmatprep.subr.bf16.mxu1 %v1445_v2  ;;  %v1533_v1 = vld [vmem:[%s2068_s1 + $0x3e0] ss:$8 sps:$4 sm:$0xff]   ;;  %v1538_v2 = vld [vmem:[%s2068_s1 + $0x1f4] ss:$8 sps:$4 sm:$0xff]  }
  0x41   :  { %1076 = vmatprep.subr.bf16.mxu0 %v1451_v3  ;;  %v1541_v3 = vld [vmem:[%s2068_s1 + $0x3f4] ss:$8 sps:$4 sm:$0xff]  }
  0x42   :  { %980 = vmatmul.mubr.bf16.vlgmr.msra.gmra.mrb[0].mxu1 %v1440_v4  ;;  %v1536_v4 = vld [vmem:[%s2068_s1 + $0x1f0] ss:$8 sps:$4 sm:$0xff]  }
  0x43   :  { %1066 = vmatmul.mubr.bf16.vlgmr.msra.gmra.mrb[0].mxu0 %v1446_v6  ;;  %991 = vmatpush1.bf16.msra.mxu1 %v1443_v5  ;;  %v1539_v5 = vld [vmem:[%s2068_s1 + $0x3f0] ss:$8 sps:$4 sm:$0xff]   ;;  %v1550_v6 = vld [vmem:[%s2068_s1 + $0x404] ss:$8 sps:$4 sm:$0xff]  }
  0x44   :  { %1077 = vmatpush1.bf16.msra.mxu0 %v1449_v7  ;;  %992 = vmatprep.subr.bf16.mxu1 %v1454_v8  ;;  %v1542_v7 = vld [vmem:[%s2069_s0 + $0x8] ss:$36 sps:$4 sm:$0xff]   ;;  %v1545_v8 = vld [vmem:[%s2069_s0 + $0x18] ss:$36 sps:$4 sm:$0xff]  }
  0x45   :  { %1078 = vmatprep.subr.bf16.mxu0 %v1457_v9  ;;  %1022 = vmatprep.mubr.bf16.mxu1 %v1544_v34  ;;  %v1548_v9 = vld [vmem:[%s2068_s1 + $0x400] ss:$8 sps:$4 sm:$0xff]  }
  0x46   :  { %1108 = vmatprep.mubr.bf16.mxu0 %v1547_v35 }
  0x47   :  { %993 = vmatpush1.bf16.msra.mxu1 %v1452_v10  ;;  %v1553_v10 = vld [vmem:[%s2068_s1 + $0x414] ss:$8 sps:$4 sm:$0xff]  }
  0x48   :  { %1079 = vmatpush1.bf16.msra.mxu0 %v1455_v11  ;;  %994 = vmatprep.subr.bf16.mxu1 %v1460_v12  ;;  %v1551_v11 = vld [vmem:[%s2068_s1 + $0x410] ss:$8 sps:$4 sm:$0xff]   ;;  %v1573_v12 = vmov 0  }
  0x49   :  { %1080 = vmatprep.subr.bf16.mxu0 %v1463_v13  ;;  %v1556_v13 = vld [vmem:[%s2068_s1 + $0x424] ss:$8 sps:$4 sm:$0xff]  }
  0x4b   :  { %995 = vmatpush1.bf16.msra.mxu1 %v1458_v14  ;;  %v1554_v14 = vld [vmem:[%s2068_s1 + $0x420] ss:$8 sps:$4 sm:$0xff]  }
  0x4c   :  { %1081 = vmatpush1.bf16.msra.mxu0 %v1461_v15  ;;  %996 = vmatprep.subr.bf16.mxu1 %v1466_v16  ;;  %v1559_v15 = vld [vmem:[%s2068_s1 + $0x434] ss:$8 sps:$4 sm:$0xff]   ;;  %v1557_v16 = vld [vmem:[%s2068_s1 + $0x430] ss:$8 sps:$4 sm:$0xff]  }
  0x4d   :  { %1082 = vmatprep.subr.bf16.mxu0 %v1469_v17  ;;  %v1562_v17 = vld [vmem:[%s2068_s1 + $0x444] ss:$8 sps:$4 sm:$0xff]  }
  0x4f   :  { %997 = vmatpush1.bf16.msra.mxu1 %v1464_v18  ;;  %v1560_v18 = vld [vmem:[%s2068_s1 + $0x440] ss:$8 sps:$4 sm:$0xff]  }
  0x50   :  { %1083 = vmatpush1.bf16.msra.mxu0 %v1467_v19  ;;  %998 = vmatprep.subr.bf16.mxu1 %v1472_v20  ;;  %v1565_v19 = vld [vmem:[%s2068_s1 + $0x454] ss:$8 sps:$4 sm:$0xff]   ;;  %v1563_v20 = vld [vmem:[%s2068_s1 + $0x450] ss:$8 sps:$4 sm:$0xff]  }
  0x51   :  { %1084 = vmatprep.subr.bf16.mxu0 %v1475_v21  ;;  %v1568_v21 = vld [vmem:[%s2068_s1 + $0x464] ss:$8 sps:$4 sm:$0xff]  }
  0x53   :  { %999 = vmatpush1.bf16.msra.mxu1 %v1470_v22  ;;  %v1566_v22 = vld [vmem:[%s2068_s1 + $0x460] ss:$8 sps:$4 sm:$0xff]  }
  0x54   :  { %1085 = vmatpush1.bf16.msra.mxu0 %v1473_v23  ;;  %1000 = vmatprep.subr.bf16.mxu1 %v1478_v24  ;;  %v1571_v23 = vld [vmem:[%s2068_s1 + $0x474] ss:$8 sps:$4 sm:$0xff]   ;;  %v1569_v24 = vld [vmem:[%s2068_s1 + $0x470] ss:$8 sps:$4 sm:$0xff]  }
  0x55   :  { %1086 = vmatprep.subr.bf16.mxu0 %v1481_v25  ;;  %v1572_v25 = vld [vmem:[%s2069_s0 + $0x20] ss:$36 sps:$4 sm:$0xff]  }
  0x57   :  { %1001 = vmatpush1.bf16.msra.mxu1 %v1476_v26 }
  0x58   :  { %1087 = vmatpush1.bf16.msra.mxu0 %v1479_v27  ;;  %1002 = vmatprep.subr.bf16.mxu1 %v1484_v28 }
  0x59   :  { %1088 = vmatprep.subr.bf16.mxu0 %v1487_v29 }
  0x5b   :  { %1003 = vmatpush1.bf16.msra.mxu1 %v1482_v30  ;;  %v171_v30 = vlaneseq }
  0x5c   :  { %1089 = vmatpush1.bf16.msra.mxu0 %v1485_v31  ;;  %1004 = vmatprep.subr.bf16.mxu1 %v1490_v32 }
  0x5d   :  { %1090 = vmatprep.subr.bf16.mxu0 %v1493_v33  ;;  %v172_v31 = vshrl.u32 %v171_v30, 7  ;;  %v169_v33 = vld [vmem:[%s2070_s2] sm:$0x3] }
  0x5f   :  { %1005 = vmatpush1.bf16.msra.mxu1 %v1488_v36  ;;  %v173_v32 = vsub.s32 0, %v172_v31  ;;  %v177_v34 = vsub.s32 1, %v172_v31 }
  0x60   :  { %1091 = vmatpush1.bf16.msra.mxu0 %v1491_v37  ;;  %1006 = vmatprep.subr.bf16.mxu1 %v1496_v38 }
  0x61   :  { %1092 = vmatprep.subr.bf16.mxu0 %v1499_v39  ;;  %v174_v35 = vrot.slane %v169_v33, %v173_v32  ;;  %v178_v36 = vrot.slane %v169_v33, %v177_v34 }
  0x63   :  { %1007 = vmatpush1.bf16.msra.mxu1 %v1494_v40 }
  0x64   :  { %1093 = vmatpush1.bf16.msra.mxu0 %v1497_v41  ;;  %1008 = vmatprep.subr.bf16.mxu1 %v1502_v42 }
  0x65   :  { %1094 = vmatprep.subr.bf16.mxu0 %v1505_v43 }
  0x67   :  { %1009 = vmatpush1.bf16.msra.mxu1 %v1500_v44 }
  0x68   :  { %1095 = vmatpush1.bf16.msra.mxu0 %v1503_v45  ;;  %1010 = vmatprep.subr.bf16.mxu1 %v1508_v46 }
  0x69   :  { %1096 = vmatprep.subr.bf16.mxu0 %v1511_v47 }
  0x6b   :  { %1011 = vmatpush1.bf16.msra.mxu1 %v1506_v48 }
  0x6c   :  { %1097 = vmatpush1.bf16.msra.mxu0 %v1509_v49  ;;  %1012 = vmatprep.subr.bf16.mxu1 %v1514_v50 }
  0x6d   :  { %1098 = vmatprep.subr.bf16.mxu0 %v1517_v51 }
  0x6f   :  { %1013 = vmatpush1.bf16.msra.mxu1 %v1512_v52 }
  0x70   :  { %1099 = vmatpush1.bf16.msra.mxu0 %v1515_v53  ;;  %1014 = vmatprep.subr.bf16.mxu1 %v1520_v54 }
  0x71   :  { %1100 = vmatprep.subr.bf16.mxu0 %v1523_v55 }
  0x73   :  { %1015 = vmatpush1.bf16.msra.mxu1 %v1518_v56 }
  0x74   :  { %1101 = vmatpush1.bf16.msra.mxu0 %v1521_v57  ;;  %1016 = vmatprep.subr.bf16.mxu1 %v1526_v58 }
  0x75   :  { %1102 = vmatprep.subr.bf16.mxu0 %v1529_v59 }
  0x77   :  { %1017 = vmatpush1.bf16.msra.mxu1 %v1524_v60 }
  0x78   :  { %1103 = vmatpush1.bf16.msra.mxu0 %v1527_v61  ;;  %1018 = vmatprep.subr.bf16.mxu1 %v1532_v62 }
  0x79   :  { %1104 = vmatprep.subr.bf16.mxu0 %v1535_v63 }
  0x7b   :  { %1019 = vmatpush1.bf16.msra.mxu1 %v1530_v0 }
  0x7c   :  { %1105 = vmatpush1.bf16.msra.mxu0 %v1533_v1  ;;  %1020 = vmatprep.subr.bf16.mxu1 %v1538_v2 }
  0x7d   :  { %1106 = vmatprep.subr.bf16.mxu0 %v1541_v3 }
  0x7f   :  { %1021 = vmatpush1.bf16.msra.mxu1 %v1536_v4 }
  0x80   :  { %1107 = vmatpush1.bf16.msra.mxu0 %v1539_v5 }
  0x81   :  { %1119 = vmatprep.subr.bf16.mxu0 %v1550_v6 }
  0x82   :  { %1023 = vmatmul.mubr.bf16.vlgmr.msra.gmra.mrb[0].mxu1 %v1542_v7 }
  0x83   :  { %1109 = vmatmul.mubr.bf16.vlgmr.msra.gmra.mrb[0].mxu0 %v1545_v8 }
  0x84   :  { %1120 = vmatpush1.bf16.msra.mxu0 %v1548_v9  ;;  %1151 = vmatprep.mubr.bf16.mxu0 %v1573_v12 }
  0x85   :  { %1121 = vmatprep.subr.bf16.mxu0 %v1553_v10 }
  0x88   :  { %1122 = vmatpush1.bf16.msra.mxu0 %v1551_v11 }
  0x89   :  { %1123 = vmatprep.subr.bf16.mxu0 %v1556_v13 }
  0x8c   :  { %1124 = vmatpush1.bf16.msra.mxu0 %v1554_v14 }
  0x8d   :  { %1125 = vmatprep.subr.bf16.mxu0 %v1559_v15 }
  0x90   :  { %1126 = vmatpush1.bf16.msra.mxu0 %v1557_v16 }
  0x91   :  { %1127 = vmatprep.subr.bf16.mxu0 %v1562_v17 }
  0x94   :  { %1128 = vmatpush1.bf16.msra.mxu0 %v1560_v18 }
  0x95   :  { %1129 = vmatprep.subr.bf16.mxu0 %v1565_v19 }
  0x98   :  { %1130 = vmatpush1.bf16.msra.mxu0 %v1563_v20 }
  0x99   :  { %1131 = vmatprep.subr.bf16.mxu0 %v1568_v21 }
  0x9c   :  { %1132 = vmatpush1.bf16.msra.mxu0 %v1566_v22 }
  0x9d   :  { %1133 = vmatprep.subr.bf16.mxu0 %v1571_v23 }
  0xa0   :  { %1134 = vmatpush1.bf16.msra.mxu0 %v1569_v24 }
  0xa3   :  { %1152 = vmatmul.mubr.bf16.vlgmr.msra.gmra.mrb[0].mxu0 %v1572_v25 }
 0x155   :  { %v1024_v26 = vpop.f32.mrb[0].mxu1 }
 0x156   :  { %v1026_v27 = vpop.f32.mrb[1].mxu1  ;;  %v1323_v37 = vadd.f32 %v1024_v26, %v174_v35 }
 0x157   :  { %v1028_v28 = vpop.f32.mrb[2].mxu1  ;;  %v1325_v38 = vadd.f32 %v1026_v27, %v178_v36 }
 0x158   :  { %v1030_v29 = vpop.f32.mrb[3].mxu1  ;;  %v1327_v40 = vadd.f32 %v1028_v28, %v174_v35 }
 0x159   :  { %v1329_v43 = vadd.f32 %v1030_v29, %v178_v36 }
 0x176   :  { %v1153_v39 = vpop.f32.mrb[0].mxu0 }
 0x177   :  { %v1324_v41 = vadd.f32 %v1323_v37, %v1153_v39  ;;  %v1155_v42 = vpop.f32.mrb[1].mxu0 }
 0x178   :  { %v1326_v44 = vadd.f32 %v1325_v38, %v1155_v42  ;;  %v1157_v45 = vpop.f32.mrb[2].mxu0 }
 0x179   :  { %1162 = vst [vmem:[%s2071_s3] sm:$0xff] %v1324_v41  ;;  %v1328_v46 = vadd.f32 %v1327_v40, %v1157_v45  ;;  %v1159_v47 = vpop.f32.mrb[3].mxu0 }
 0x17a   :  { %1163 = vst [vmem:[%s2071_s3 + $0x8] sm:$0xff] %v1326_v44  ;;  %v1330_v48 = vadd.f32 %v1329_v43, %v1159_v47 }
 0x17b   :  { %1164 = vst [vmem:[%s2071_s3 + $0x10] sm:$0xff] %v1328_v46 }
 0x17c   :  { %1165 = vst [vmem:[%s2071_s3 + $0x18] sm:$0xff] %v1330_v48 }

// kernel: f_net_forward.129
= control target key start
LH: loop header
LB: loop body
LE: loop exit
PB: predicated region body
PF: predicated region fallthrough
CT: control target
= control target key end

     0   :  { %s1617_s0 = inlined_call_operand.vmem [shape: f32[256,128], index: 0, kind: input, shape index: {}]   ;;  %s1618_s1 = inlined_call_operand.vmem [shape: f32[256,128], index: 1, kind: output, shape index: {}]  }
   0x1   :  { %v800_v0 = vld [vmem:[%s1617_s0 + $0x10] sm:$0xff]  ;;  %v805_v1 = vld [vmem:[%s1617_s0] sm:$0xff]  ;;  %v812_v2 = vld [vmem:[%s1617_s0 + $0x18] sm:$0xff] }
   0x2   :  { %1655 = vst [vmem:[#allocation2_spill] sm:$0xff] %v800_v0  ;;  %44 = vadd.xlane.f32.xlu1 %v800_v0  ;;  %40 = vadd.xlane.f32.xlu0 %v805_v1  ;;  %1656 = vst [vmem:[#allocation3_spill] sm:$0xff] %v812_v2  ;;  %v817_v3 = vld [vmem:[%s1617_s0 + $0x8] sm:$0xff]  ;;  %v829_v5 = vld [vmem:[%s1617_s0 + $0x20] sm:$0xff]  ;;  %v136_v33 = vmul.f32 %v805_v1, %v805_v1  ;;  %v139_v34 = vmul.f32 %v812_v2, %v812_v2 }
   0x3   :  { %v824_v4 = vld [vmem:[%s1617_s0 + $0x28] sm:$0xff]  ;;  %1657 = vst [vmem:[#allocation4_spill] sm:$0xff] %v829_v5  ;;  %v836_v6 = vld [vmem:[%s1617_s0 + $0x38] sm:$0xff]  ;;  %v841_v7 = vld [vmem:[%s1617_s0 + $0x30] sm:$0xff]  ;;  %v137_v32 = vmul.f32 %v817_v3, %v817_v3  ;;  %v138_v35 = vmul.f32 %v800_v0, %v800_v0  ;;  %v140_v37 = vmul.f32 %v829_v5, %v829_v5 }
   0x4   :  { %v848_v8 = vld [vmem:[%s1617_s0 + $0x48] sm:$0xff]  ;;  %v853_v9 = vld [vmem:[%s1617_s0 + $0x40] sm:$0xff]  ;;  %v860_v10 = vld [vmem:[%s1617_s0 + $0x58] sm:$0xff]  ;;  %v141_v36 = vmul.f32 %v824_v4, %v824_v4  ;;  %v143_v38 = vmul.f32 %v836_v6, %v836_v6  ;;  %v142_v39 = vmul.f32 %v841_v7, %v841_v7 }
   0x5   :  { %1658 = vst [vmem:[#allocation5_spill] sm:$0xff] %v853_v9  ;;  %1659 = vst [vmem:[#allocation6_spill] sm:$0xff] %v860_v10  ;;  %v865_v11 = vld [vmem:[%s1617_s0 + $0x50] sm:$0xff]  ;;  %v872_v12 = vld [vmem:[%s1617_s0 + $0x68] sm:$0xff]  ;;  %v145_v40 = vmul.f32 %v848_v8, %v848_v8  ;;  %v144_v41 = vmul.f32 %v853_v9, %v853_v9  ;;  %v147_v42 = vmul.f32 %v860_v10, %v860_v10 }
   0x6   :  { %46 = vadd.xlane.f32.xlu1 %v812_v2  ;;  %42 = vadd.xlane.f32.xlu0 %v817_v3  ;;  %1660 = vst [vmem:[#allocation7_spill] sm:$0xff] %v865_v11  ;;  %1661 = vst [vmem:[#allocation8_spill] sm:$0xff] %v872_v12  ;;  %v877_v13 = vld [vmem:[%s1617_s0 + $0x60] sm:$0xff]  ;;  %v884_v14 = vld [vmem:[%s1617_s0 + $0x78] sm:$0xff]  ;;  %v146_v43 = vmul.f32 %v865_v11, %v865_v11  ;;  %v149_v44 = vmul.f32 %v872_v12, %v872_v12 }
   0x7   :  { %1662 = vst [vmem:[#allocation9_spill] sm:$0xff] %v877_v13  ;;  %1663 = vst [vmem:[#allocation10_spill] sm:$0xff] %v884_v14  ;;  %v889_v15 = vld [vmem:[%s1617_s0 + $0x70] sm:$0xff]  ;;  %v896_v16 = vld [vmem:[%s1617_s0 + $0x88] sm:$0xff]  ;;  %v148_v45 = vmul.f32 %v877_v13, %v877_v13  ;;  %v151_v46 = vmul.f32 %v884_v14, %v884_v14 }
   0x8   :  { %v901_v17 = vld [vmem:[%s1617_s0 + $0x80] sm:$0xff]  ;;  %v908_v18 = vld [vmem:[%s1617_s0 + $0x98] sm:$0xff]  ;;  %v913_v19 = vld [vmem:[%s1617_s0 + $0x90] sm:$0xff]  ;;  %v150_v47 = vmul.f32 %v889_v15, %v889_v15  ;;  %v153_v48 = vmul.f32 %v896_v16, %v896_v16 }
   0x9   :  { %v920_v20 = vld [vmem:[%s1617_s0 + $0xa8] sm:$0xff]  ;;  %v925_v21 = vld [vmem:[%s1617_s0 + $0xa0] sm:$0xff]  ;;  %v932_v22 = vld [vmem:[%s1617_s0 + $0xb8] sm:$0xff]  ;;  %v152_v49 = vmul.f32 %v901_v17, %v901_v17  ;;  %v155_v50 = vmul.f32 %v908_v18, %v908_v18  ;;  %v154_v51 = vmul.f32 %v913_v19, %v913_v19 }
   0xa   :  { %50 = vadd.xlane.f32.xlu1 %v824_v4  ;;  %48 = vadd.xlane.f32.xlu0 %v829_v5  ;;  %1664 = vst [vmem:[#allocation11_spill] sm:$0xff] %v932_v22  ;;  %v937_v23 = vld [vmem:[%s1617_s0 + $0xb0] sm:$0xff]  ;;  %v944_v24 = vld [vmem:[%s1617_s0 + $0xc8] sm:$0xff]  ;;  %v949_v25 = vld [vmem:[%s1617_s0 + $0xc0] sm:$0xff]  ;;  %v157_v52 = vmul.f32 %v920_v20, %v920_v20  ;;  %v156_v53 = vmul.f32 %v925_v21, %v925_v21 }
   0xb   :  { %1665 = vst [vmem:[#allocation12_spill] sm:$0xff] %v937_v23  ;;  %1666 = vst [vmem:[#allocation13_spill] sm:$0xff] %v944_v24  ;;  %v956_v26 = vld [vmem:[%s1617_s0 + $0xd8] sm:$0xff]  ;;  %v961_v27 = vld [vmem:[%s1617_s0 + $0xd0] sm:$0xff]  ;;  %v159_v54 = vmul.f32 %v932_v22, %v932_v22  ;;  %v158_v55 = vmul.f32 %v937_v23, %v937_v23  ;;  %v161_v56 = vmul.f32 %v944_v24, %v944_v24 }
   0xc   :  { %v968_v28 = vld [vmem:[%s1617_s0 + $0xe8] sm:$0xff]  ;;  %v973_v29 = vld [vmem:[%s1617_s0 + $0xe0] sm:$0xff]  ;;  %v980_v30 = vld [vmem:[%s1617_s0 + $0xf8] sm:$0xff]  ;;  %v160_v57 = vmul.f32 %v949_v25, %v949_v25  ;;  %v163_v58 = vmul.f32 %v956_v26, %v956_v26  ;;  %v162_v59 = vmul.f32 %v961_v27, %v961_v27 }
   0xd   :  { %v985_v31 = vld [vmem:[%s1617_s0 + $0xf0] sm:$0xff]  ;;  %v165_v60 = vmul.f32 %v968_v28, %v968_v28  ;;  %v164_v61 = vmul.f32 %v973_v29, %v973_v29  ;;  %v167_v62 = vmul.f32 %v980_v30, %v980_v30 }
   0xe   :  { %54 = vadd.xlane.f32.xlu1 %v836_v6  ;;  %52 = vadd.xlane.f32.xlu0 %v841_v7  ;;  %v166_v63 = vmul.f32 %v985_v31, %v985_v31 }
  0x12   :  { %58 = vadd.xlane.f32.xlu1 %v848_v8  ;;  %56 = vadd.xlane.f32.xlu0 %v853_v9 }
  0x16   :  { %62 = vadd.xlane.f32.xlu1 %v860_v10  ;;  %60 = vadd.xlane.f32.xlu0 %v865_v11 }
  0x1a   :  { %66 = vadd.xlane.f32.xlu1 %v872_v12  ;;  %64 = vadd.xlane.f32.xlu0 %v877_v13 }
  0x1e   :  { %70 = vadd.xlane.f32.xlu1 %v884_v14  ;;  %68 = vadd.xlane.f32.xlu0 %v889_v15 }
  0x22   :  { %74 = vadd.xlane.f32.xlu1 %v896_v16  ;;  %72 = vadd.xlane.f32.xlu0 %v901_v17 }
  0x26   :  { %78 = vadd.xlane.f32.xlu1 %v908_v18  ;;  %76 = vadd.xlane.f32.xlu0 %v913_v19 }
  0x2a   :  { %82 = vadd.xlane.f32.xlu1 %v920_v20  ;;  %80 = vadd.xlane.f32.xlu0 %v925_v21 }
  0x2e   :  { %86 = vadd.xlane.f32.xlu1 %v932_v22  ;;  %84 = vadd.xlane.f32.xlu0 %v937_v23 }
  0x32   :  { %90 = vadd.xlane.f32.xlu1 %v944_v24  ;;  %88 = vadd.xlane.f32.xlu0 %v949_v25 }
  0x36   :  { %94 = vadd.xlane.f32.xlu1 %v956_v26  ;;  %92 = vadd.xlane.f32.xlu0 %v961_v27 }
  0x3a   :  { %98 = vadd.xlane.f32.xlu1 %v968_v28  ;;  %96 = vadd.xlane.f32.xlu0 %v973_v29 }
  0x3e   :  { %102 = vadd.xlane.f32.xlu1 %v980_v30  ;;  %100 = vadd.xlane.f32.xlu0 %v985_v31 }
  0x42   :  { %170 = vadd.xlane.f32.xlu1 %v137_v32  ;;  %168 = vadd.xlane.f32.xlu0 %v136_v33 }
  0x46   :  { %174 = vadd.xlane.f32.xlu1 %v139_v34  ;;  %172 = vadd.xlane.f32.xlu0 %v138_v35 }
  0x4a   :  { %178 = vadd.xlane.f32.xlu1 %v141_v36  ;;  %176 = vadd.xlane.f32.xlu0 %v140_v37 }
  0x4e   :  { %182 = vadd.xlane.f32.xlu1 %v143_v38  ;;  %180 = vadd.xlane.f32.xlu0 %v142_v39 }
  0x52   :  { %186 = vadd.xlane.f32.xlu1 %v145_v40  ;;  %184 = vadd.xlane.f32.xlu0 %v144_v41 }
  0x56   :  { %190 = vadd.xlane.f32.xlu1 %v147_v42  ;;  %188 = vadd.xlane.f32.xlu0 %v146_v43 }
  0x5a   :  { %194 = vadd.xlane.f32.xlu1 %v149_v44  ;;  %192 = vadd.xlane.f32.xlu0 %v148_v45 }
  0x5e   :  { %198 = vadd.xlane.f32.xlu1 %v151_v46  ;;  %196 = vadd.xlane.f32.xlu0 %v150_v47 }
  0x62   :  { %202 = vadd.xlane.f32.xlu1 %v153_v48  ;;  %200 = vadd.xlane.f32.xlu0 %v152_v49 }
  0x66   :  { %206 = vadd.xlane.f32.xlu1 %v155_v50  ;;  %204 = vadd.xlane.f32.xlu0 %v154_v51 }
  0x6a   :  { %210 = vadd.xlane.f32.xlu1 %v157_v52  ;;  %208 = vadd.xlane.f32.xlu0 %v156_v53 }
  0x6e   :  { %214 = vadd.xlane.f32.xlu1 %v159_v54  ;;  %212 = vadd.xlane.f32.xlu0 %v158_v55 }
  0x72   :  { %218 = vadd.xlane.f32.xlu1 %v161_v56  ;;  %216 = vadd.xlane.f32.xlu0 %v160_v57 }
  0x76   :  { %222 = vadd.xlane.f32.xlu1 %v163_v58  ;;  %220 = vadd.xlane.f32.xlu0 %v162_v59 }
  0x7a   :  { %226 = vadd.xlane.f32.xlu1 %v165_v60  ;;  %224 = vadd.xlane.f32.xlu0 %v164_v61 }
  0x7e   :  { %230 = vadd.xlane.f32.xlu1 %v167_v62  ;;  %228 = vadd.xlane.f32.xlu0 %v166_v63 }
  0x8f   :  { %v45_v25 = vpop.xlane.xlu1 %44  ;;  %v41_v26 = vpop.xlane.xlu0 %40 }
  0x90   :  { %v1071_v51 = vmul.f32 0.25, %v45_v25  ;;  %v1073_v52 = vmul.f32 0.25, %v41_v26 }
  0x92   :  { %1667 = vst [vmem:[#allocation14_spill] sm:$0xff] %v1071_v51  ;;  %v1089_v59 = vmul.f32 %v1071_v51, %v1071_v51  ;;  %v264_v61 = vmul.f32 %v1073_v52, %v1073_v52 }
  0x93   :  { %v47_v27 = vpop.xlane.xlu1 %46  ;;  %v43_v32 = vpop.xlane.xlu0 %42 }
  0x94   :  { %v1079_v55 = vmul.f32 0.25, %v47_v27  ;;  %v1081_v56 = vmul.f32 0.25, %v43_v32 }
  0x96   :  { %1668 = vst [vmem:[#allocation15_spill] sm:$0xff] %v1079_v55  ;;  %v1105_v27 = vmul.f32 %v1079_v55, %v1079_v55 }
  0x97   :  { %v51_v33 = vpop.xlane.xlu1 %50  ;;  %v49_v34 = vpop.xlane.xlu0 %48 }
  0x98   :  { %v1083_v57 = vmul.f32 0.25, %v51_v33  ;;  %v1085_v58 = vmul.f32 0.25, %v49_v34  ;;  %v265_v34 = vmul.f32 %v1081_v56, %v1081_v56 }
  0x9a   :  { %1669 = vst [vmem:[#allocation16_spill] sm:$0xff] %v1083_v57  ;;  %1670 = vst [vmem:[#allocation17_spill] sm:$0xff] %v1085_v58  ;;  %v1121_v26 = vmul.f32 %v1083_v57, %v1083_v57 }
  0x9b   :  { %v55_v28 = vpop.xlane.xlu1 %54  ;;  %v53_v35 = vpop.xlane.xlu0 %52 }
  0x9c   :  { %v1095_v62 = vmul.f32 0.25, %v55_v28  ;;  %v1109_v33 = vmul.f32 0.25, %v53_v35  ;;  %v1127_v35 = vmul.f32 %v1085_v58, %v1085_v58 }
  0x9e   :  { %1671 = vst [vmem:[#allocation18_spill] sm:$0xff] %v1095_v62  ;;  %1672 = vst [vmem:[#allocation19_spill] sm:$0xff] %v1109_v33 }
  0x9f   :  { %v59_v36 = vpop.xlane.xlu1 %58  ;;  %v57_v29 = vpop.xlane.xlu0 %56 }
  0xa0   :  { %v1115_v60 = vmul.f32 0.25, %v59_v36  ;;  %v1117_v51 = vmul.f32 0.25, %v57_v29  ;;  %v1135_v36 = vmul.f32 %v1095_v62, %v1095_v62 }
  0xa2   :  { %1673 = vst [vmem:[#allocation20_spill] sm:$0xff] %v1115_v60  ;;  %1674 = vst [vmem:[#allocation21_spill] sm:$0xff] %v1117_v51  ;;  %v1163_v5 = vmul.f32 %v1117_v51, %v1117_v51 }
  0xa3   :  { %v63_v37 = vpop.xlane.xlu1 %62  ;;  %v61_v38 = vpop.xlane.xlu0 %60 }
  0xa4   :  { %v1129_v32 = vmul.f32 0.25, %v63_v37  ;;  %v1137_v29 = vmul.f32 0.25, %v61_v38  ;;  %v1149_v37 = vmul.f32 %v1109_v33, %v1109_v33  ;;  %v1157_v38 = vmul.f32 %v1115_v60, %v1115_v60 }
  0xa6   :  { %1675 = vst [vmem:[#allocation22_spill] sm:$0xff] %v1129_v32  ;;  %1676 = vst [vmem:[#allocation23_spill] sm:$0xff] %v1137_v29 }
  0xa7   :  { %v67_v39 = vpop.xlane.xlu1 %66  ;;  %v65_v40 = vpop.xlane.xlu0 %64 }
  0xa8   :  { %v1139_v55 = vmul.f32 0.25, %v67_v39  ;;  %v1153_v58 = vmul.f32 0.25, %v65_v40  ;;  %v1171_v40 = vmul.f32 %v1129_v32, %v1129_v32  ;;  %v1179_v39 = vmul.f32 %v1137_v29, %v1137_v29 }
  0xaa   :  { %1677 = vst [vmem:[#allocation24_spill] sm:$0xff] %v1139_v55  ;;  %1678 = vst [vmem:[#allocation25_spill] sm:$0xff] %v1153_v58  ;;  %v1185_v60 = vmul.f32 %v1139_v55, %v1139_v55 }
  0xab   :  { %v71_v30 = vpop.xlane.xlu1 %70  ;;  %v69_v41 = vpop.xlane.xlu0 %68 }
  0xac   :  { %v1165_v57 = vmul.f32 0.25, %v71_v30  ;;  %v1175_v33 = vmul.f32 0.25, %v69_v41  ;;  %v1193_v41 = vmul.f32 %v1153_v58, %v1153_v58 }
  0xae   :  { %1679 = vst [vmem:[#allocation26_spill] sm:$0xff] %v1165_v57  ;;  %v1199_v29 = vmul.f32 %v1165_v57, %v1165_v57 }
  0xaf   :  { %v75_v42 = vpop.xlane.xlu1 %74  ;;  %v1053_v31 = vpop.xlane.xlu0 %72 }
  0xb0   :  { %v1187_v62 = vmul.f32 0.25, %v75_v42  ;;  %v1202_v42 = vmul.f32 0.25, %v1053_v31 }
  0xb2   :  { %1680 = vst [vmem:[#allocation27_spill] sm:$0xff] %v1202_v42  ;;  %v1217_v58 = vmul.f32 %v1187_v62, %v1187_v62 }
  0xb3   :  { %v1055_v43 = vpop.xlane.xlu1 %78  ;;  %v1057_v44 = vpop.xlane.xlu0 %76 }
  0xb4   :  { %v1205_v11 = vmul.f32 0.25, %v1055_v43  ;;  %v1222_v43 = vmul.f32 0.25, %v1057_v44 }
  0xb6   :  { %1681 = vst [vmem:[#allocation28_spill] sm:$0xff] %v1205_v11 }
  0xb7   :  { %v1059_v45 = vpop.xlane.xlu1 %82  ;;  %v1061_v46 = vpop.xlane.xlu0 %80 }
  0xb8   :  { %v1235_v44 = vmul.f32 0.25, %v1059_v45 }
  0xbb   :  { %v1063_v47 = vpop.xlane.xlu1 %86  ;;  %v1065_v48 = vpop.xlane.xlu0 %84 }
  0xbc   :  { %v1249_v31 = vmul.f32 0.25, %v1063_v47  ;;  %v1260_v47 = vmul.f32 0.25, %v1065_v48 }
  0xbe   :  { %1682 = vst [vmem:[#allocation29_spill] sm:$0xff] %v1249_v31  ;;  %1683 = vst [vmem:[#allocation30_spill] sm:$0xff] %v1260_v47 }
  0xbf   :  { %v1067_v49 = vpop.xlane.xlu1 %90  ;;  %v1069_v50 = vpop.xlane.xlu0 %88 }
  0xc3   :  { %v1075_v53 = vpop.xlane.xlu1 %94  ;;  %v1077_v54 = vpop.xlane.xlu0 %92 }
  0xc7   :  { %v1097_v63 = vpop.xlane.xlu1 %98  ;;  %v1099_v25 = vpop.xlane.xlu0 %96 }
  0xcb   :  { %v1141_v2 = vpop.xlane.xlu1 %102  ;;  %v1143_v0 = vpop.xlane.xlu0 %100 }
  0xcf   :  { %v171_v51 = vpop.xlane.xlu1 %170  ;;  %v169_v9 = vpop.xlane.xlu0 %168 }
  0xd0   :  { %v233_v32 = vmul.f32 0.25, %v171_v51  ;;  %v232_v10 = vmul.f32 0.25, %v169_v9  ;;  %v1211_v51 = vmul.f32 %v1175_v33, %v1175_v33 }
  0xd2   :  { %v297_v9 = vsub.f32 %v233_v32, %v265_v34  ;;  %v296_v55 = vsub.f32 %v232_v10, %v264_v61  ;;  %v1226_v10 = vmul.f32 %v1202_v42, %v1202_v42  ;;  %v1232_v34 = vmul.f32 %v1205_v11, %v1205_v11 }
  0xd3   :  { %v175_v28 = vpop.xlane.xlu1 %174  ;;  %v173_v57 = vpop.xlane.xlu0 %172  ;;  %v1246_v61 = vmul.f32 0.25, %v1061_v46 }
  0xd4   :  { %v361_v14 = vadd.f32 1e-05, %v297_v9  ;;  %v360_v13 = vadd.f32 1e-05, %v296_v55  ;;  %v235_v12 = vmul.f32 0.25, %v175_v28  ;;  %v234_v32 = vmul.f32 0.25, %v173_v57 }
  0xd5   :  { %v1243_v28 = vmul.f32 %v1222_v43, %v1222_v43 }
  0xd6   :  { %652 = vrsqrt.f32 %v361_v14  ;;  %v299_v55 = vsub.f32 %v235_v12, %v1105_v27  ;;  %v298_v57 = vsub.f32 %v234_v32, %v1089_v59  ;;  %v1255_v59 = vmul.f32 %v1235_v44, %v1235_v44 }
  0xd7   :  { %654 = vrsqrt.f32 %v360_v13  ;;  %v179_v45 = vpop.xlane.xlu1 %178  ;;  %v177_v30 = vpop.xlane.xlu0 %176  ;;  %v1263_v13 = vmul.f32 0.25, %v1067_v49  ;;  %v1269_v32 = vmul.f32 %v1246_v61, %v1246_v61 }
  0xd8   :  { %v363_v42 = vadd.f32 1e-05, %v299_v55  ;;  %v362_v9 = vadd.f32 1e-05, %v298_v57  ;;  %v237_v14 = vmul.f32 0.25, %v179_v45  ;;  %v236_v11 = vmul.f32 0.25, %v177_v30 }
  0xd9   :  { %1684 = vst [vmem:[#allocation31_spill] sm:$0xff] %v1263_v13  ;;  %v1275_v57 = vmul.f32 %v1249_v31, %v1249_v31  ;;  %v1286_v55 = vmul.f32 0.25, %v1069_v50 }
  0xda   :  { %656 = vrsqrt.f32 %v363_v42  ;;  %v301_v27 = vsub.f32 %v237_v14, %v1121_v26  ;;  %v300_v30 = vsub.f32 %v236_v11, %v1127_v35  ;;  %v1281_v35 = vmul.f32 %v1260_v47, %v1260_v47 }
  0xdb   :  { %658 = vrsqrt.f32 %v362_v9  ;;  %v183_v48 = vpop.xlane.xlu1 %182  ;;  %v181_v49 = vpop.xlane.xlu0 %180  ;;  %1685 = vst [vmem:[#allocation32_spill] sm:$0xff] %v1286_v55  ;;  %v1290_v9 = vmul.f32 %v1263_v13, %v1263_v13  ;;  %v1301_v14 = vmul.f32 0.25, %v1097_v63  ;;  %v1690_v63 = vsub.f32 %v817_v3, %v1081_v56 }
  0xdc   :  { %v365_v45 = vadd.f32 1e-05, %v301_v27  ;;  %v364_v42 = vadd.f32 1e-05, %v300_v30  ;;  %v239_v46 = vmul.f32 0.25, %v183_v48  ;;  %v238_v26 = vmul.f32 0.25, %v181_v49 }
  0xdd   :  { %v1295_v48 = vmul.f32 0.25, %v1075_v53  ;;  %v1298_v49 = vmul.f32 0.25, %v1077_v54  ;;  %1688 = vst [vmem:[#allocation35_spill] sm:$0xff] %v1301_v14  ;;  %v1307_v53 = vmul.f32 %v1286_v55, %v1286_v55  ;;  %v1310_v54 = vmul.f32 0.25, %v1099_v25 }
  0xde   :  { %660 = vrsqrt.f32 %v365_v45  ;;  %v303_v27 = vsub.f32 %v239_v46, %v1135_v36  ;;  %v302_v30 = vsub.f32 %v238_v26, %v1149_v37 }
  0xdf   :  { %1686 = vst [vmem:[#allocation33_spill] sm:$0xff] %v1295_v48  ;;  %1687 = vst [vmem:[#allocation34_spill] sm:$0xff] %v1298_v49  ;;  %662 = vrsqrt.f32 %v364_v42  ;;  %v187_v50 = vpop.xlane.xlu1 %186  ;;  %v185_v11 = vpop.xlane.xlu0 %184  ;;  %v1691_v42 = vsub.f32 %v805_v1, %v1073_v52  ;;  %v1326_v25 = vmul.f32 %v1298_v49, %v1298_v49  ;;  %v1330_v1 = vmul.f32 %v1301_v14, %v1301_v14  ;;  %v1695_v49 = vld [vmem:[#allocation2_spill] sm:$0xff] }
  0xe0   :  { %v653_v12 = vpop.eup %652  ;;  %v367_v47 = vadd.f32 1e-05, %v303_v27  ;;  %v366_v23 = vadd.f32 1e-05, %v302_v30  ;;  %v241_v45 = vmul.f32 0.25, %v187_v50  ;;  %v240_v31 = vmul.f32 0.25, %v185_v11 }
  0xe1   :  { %v655_v36 = vpop.eup %654  ;;  %1689 = vst [vmem:[#allocation36_spill] sm:$0xff] %v1310_v54  ;;  %v425_v46 = vmul.f32 %v653_v12, %v1690_v63  ;;  %v1322_v30 = vmul.f32 %v1295_v48, %v1295_v48  ;;  %v1696_v48 = vld [vmem:[#allocation14_spill] sm:$0xff] }
  0xe2   :  { %v424_v26 = vmul.f32 %v655_v36, %v1691_v42  ;;  %664 = vrsqrt.f32 %v367_v47  ;;  %v305_v11 = vsub.f32 %v241_v45, %v1157_v38  ;;  %v304_v27 = vsub.f32 %v240_v31, %v1163_v5  ;;  %v1692_v47 = vld [vmem:[#allocation3_spill] sm:$0xff] }
  0xe3   :  { %v489_v50 = vmul.f32 0.70710677, %v425_v46  ;;  %666 = vrsqrt.f32 %v366_v23  ;;  %v191_v3 = vpop.xlane.xlu1 %190  ;;  %v189_v56 = vpop.xlane.xlu0 %188  ;;  %v1693_v45 = vld [vmem:[#allocation15_spill] sm:$0xff]  ;;  %v1337_v23 = vmul.f32 %v1310_v54, %v1310_v54  ;;  %v1697_v14 = vsub.f32 %v1695_v49, %v1696_v48 }
  0xe4   :  { %v657_v12 = vpop.eup %656  ;;  %v488_v52 = vmul.f32 0.70710677, %v424_v26  ;;  %v369_v38 = vadd.f32 1e-05, %v305_v11  ;;  %v243_v5 = vmul.f32 0.25, %v191_v3  ;;  %v1694_v36 = vsub.f32 %v1692_v47, %v1693_v45 }
  0xe5   :  { %v659_v31 = vpop.eup %658  ;;  %668 = verf.f32 %v489_v50  ;;  %v368_v42 = vadd.f32 1e-05, %v304_v27  ;;  %v242_v37 = vmul.f32 0.25, %v189_v56  ;;  %v1344_v3 = vmul.f32 0.25, %v1141_v2 }
  0xe6   :  { %v427_v63 = vmul.f32 %v657_v12, %v1694_v36  ;;  %670 = verf.f32 %v488_v52  ;;  %v426_v13 = vmul.f32 %v659_v31, %v1697_v14  ;;  %v307_v11 = vsub.f32 %v243_v5, %v1171_v40  ;;  %v1699_v40 = vld [vmem:[#allocation16_spill] sm:$0xff] }
  0xe7   :  { %672 = vrsqrt.f32 %v369_v38  ;;  %v306_v12 = vsub.f32 %v242_v37, %v1179_v39  ;;  %v195_v27 = vpop.xlane.xlu1 %194  ;;  %v193_v56 = vpop.xlane.xlu0 %192  ;;  %v1348_v45 = vmul.f32 0.25, %v1143_v0  ;;  %v1700_v14 = vsub.f32 %v824_v4, %v1699_v40  ;;  %v1701_v39 = vld [vmem:[#allocation4_spill] sm:$0xff]  ;;  %v1702_v37 = vld [vmem:[#allocation17_spill] sm:$0xff] }
  0xe8   :  { %v491_v50 = vmul.f32 0.70710677, %v427_v63  ;;  %v661_v47 = vpop.eup %660  ;;  %v490_v52 = vmul.f32 0.70710677, %v426_v13  ;;  %674 = vrsqrt.f32 %v368_v42  ;;  %v371_v36 = vadd.f32 1e-05, %v307_v11 }
  0xe9   :  { %1698 = vst [vmem:[#allocation3_spill] sm:$0xff] %v1348_v45  ;;  %v663_v48 = vpop.eup %662  ;;  %v429_v2 = vmul.f32 %v661_v47, %v1700_v14  ;;  %v370_v49 = vadd.f32 1e-05, %v306_v12  ;;  %v245_v5 = vmul.f32 0.25, %v195_v27  ;;  %v457_v38 = vmul.f32 0.5, %v425_v46  ;;  %v1704_v27 = vld [vmem:[#allocation18_spill] sm:$0xff] }
  0xea   :  { %676 = verf.f32 %v491_v50  ;;  %v1703_v31 = vsub.f32 %v1701_v39, %v1702_v37  ;;  %v244_v24 = vmul.f32 0.25, %v193_v56  ;;  %v456_v0 = vmul.f32 0.5, %v424_v26 }
  0xeb   :  { %678 = verf.f32 %v490_v52  ;;  %v493_v55 = vmul.f32 0.70710677, %v429_v2  ;;  %v309_v42 = vsub.f32 %v245_v5, %v1185_v60  ;;  %v199_v11 = vpop.xlane.xlu1 %198  ;;  %v197_v50 = vpop.xlane.xlu0 %196  ;;  %v459_v45 = vmul.f32 0.5, %v427_v63 }
  0xec   :  { %v428_v54 = vmul.f32 %v663_v48, %v1703_v31  ;;  %680 = vrsqrt.f32 %v371_v36  ;;  %v665_v22 = vpop.eup %664  ;;  %v308_v12 = vsub.f32 %v244_v24, %v1193_v41  ;;  %v1705_v47 = vsub.f32 %v836_v6, %v1704_v27  ;;  %v1706_v36 = vld [vmem:[#allocation19_spill] sm:$0xff] }
  0xed   :  { %682 = vrsqrt.f32 %v370_v49  ;;  %v667_v46 = vpop.eup %666  ;;  %v373_v56 = vadd.f32 1e-05, %v309_v42  ;;  %v247_v26 = vmul.f32 0.25, %v199_v11  ;;  %v1707_v60 = vsub.f32 %v841_v7, %v1706_v36 }
  0xee   :  { %v492_v4 = vmul.f32 0.70710677, %v428_v54  ;;  %684 = verf.f32 %v493_v55  ;;  %v431_v52 = vmul.f32 %v665_v22, %v1705_v47  ;;  %v372_v40 = vadd.f32 1e-05, %v308_v12 }
  0xef   :  { %v430_v48 = vmul.f32 %v667_v46, %v1707_v60  ;;  %v246_v14 = vmul.f32 0.25, %v197_v50  ;;  %v669_v63 = vpop.eup %668  ;;  %v458_v5 = vmul.f32 0.5, %v426_v13  ;;  %v311_v24 = vsub.f32 %v247_v26, %v1199_v29  ;;  %v203_v41 = vpop.xlane.xlu1 %202  ;;  %v1708_v13 = vld [vmem:[#allocation20_spill] sm:$0xff] }
  0xf0   :  { %686 = verf.f32 %v492_v4  ;;  %v495_v49 = vmul.f32 0.70710677, %v431_v52  ;;  %v201_v55 = vpop.xlane.xlu0 %200  ;;  %v671_v39 = vpop.eup %670  ;;  %v553_v6 = vadd.f32 1.0, %v669_v63  ;;  %v461_v22 = vmul.f32 0.5, %v429_v2  ;;  %v1711_v2 = vld [vmem:[#allocation21_spill] sm:$0xff] }
  0xf1   :  { %688 = vrsqrt.f32 %v373_v56  ;;  %v494_v37 = vmul.f32 0.70710677, %v430_v48  ;;  %v673_v31 = vpop.eup %672  ;;  %v552_v42 = vadd.f32 1.0, %v671_v39  ;;  %v375_v7 = vadd.f32 1e-05, %v311_v24  ;;  %v1710_v56 = vld [vmem:[#allocation5_spill] sm:$0xff] }
  0xf2   :  { %690 = vrsqrt.f32 %v372_v40  ;;  %v310_v11 = vsub.f32 %v246_v14, %v1211_v51  ;;  %v675_v50 = vpop.eup %674  ;;  %v585_v4 = vmul.f32 %v553_v6, %v457_v38  ;;  %v1709_v12 = vsub.f32 %v848_v8, %v1708_v13  ;;  %v1717_v13 = vld [vmem:[#allocation23_spill] sm:$0xff] }
  0xf3   :  { %692 = verf.f32 %v495_v49  ;;  %v249_v46 = vmul.f32 0.25, %v203_v41  ;;  %v584_v47 = vmul.f32 %v552_v42, %v456_v0  ;;  %v1712_v26 = vsub.f32 %v1710_v56, %v1711_v2  ;;  %v207_v40 = vpop.xlane.xlu1 %206  ;;  %v1714_v42 = vld [vmem:[#allocation22_spill] sm:$0xff] }
  0xf4   :  { %694 = verf.f32 %v494_v37  ;;  %v433_v29 = vmul.f32 %v673_v31, %v1709_v12  ;;  %v677_v27 = vpop.eup %676  ;;  %v374_v60 = vadd.f32 1e-05, %v310_v11  ;;  %v1372_v63 = vpop.xlane.xlu0 %204  ;;  %617 = vst [vmem:[%s1618_s1 + $0x8] sm:$0xff] %v585_v4  ;;  %v460_v8 = vmul.f32 0.5, %v428_v54  ;;  %v1713_v31 = vld [vmem:[#allocation6_spill] sm:$0xff] }
  0xf5   :  { %v432_v36 = vmul.f32 %v675_v50, %v1712_v26  ;;  %696 = vrsqrt.f32 %v375_v7  ;;  %v679_v51 = vpop.eup %678  ;;  %v555_v38 = vadd.f32 1.0, %v677_v27  ;;  %v313_v49 = vsub.f32 %v249_v46, %v1217_v58  ;;  %616 = vst [vmem:[%s1618_s1] sm:$0xff] %v584_v47  ;;  %v1716_v58 = vld [vmem:[#allocation7_spill] sm:$0xff] }
  0xf6   :  { %v497_v14 = vmul.f32 0.70710677, %v433_v29  ;;  %v681_v0 = vpop.eup %680  ;;  %v554_v24 = vadd.f32 1.0, %v679_v51  ;;  %v463_v41 = vmul.f32 0.5, %v431_v52  ;;  %698 = vrsqrt.f32 %v374_v60 }
  0xf7   :  { %v496_v39 = vmul.f32 0.70710677, %v432_v36  ;;  %v683_v6 = vpop.eup %682  ;;  %v587_v37 = vmul.f32 %v555_v38, %v459_v45  ;;  %v1715_v7 = vsub.f32 %v1713_v31, %v1714_v42  ;;  %v377_v54 = vadd.f32 1e-05, %v313_v49  ;;  %v211_v47 = vpop.xlane.xlu1 %210  ;;  %v1722_v42 = vld [vmem:[#allocation9_spill] sm:$0xff] }
  0xf8   :  { %700 = verf.f32 %v497_v14  ;;  %v685_v50 = vpop.eup %684  ;;  %v586_v4 = vmul.f32 %v554_v24, %v458_v5  ;;  %v1718_v12 = vsub.f32 %v1716_v58, %v1717_v13  ;;  %v248_v27 = vmul.f32 0.25, %v201_v55  ;;  %v209_v52 = vpop.xlane.xlu0 %208  ;;  %v1720_v24 = vld [vmem:[#allocation24_spill] sm:$0xff] }
  0xf9   :  { %v435_v11 = vmul.f32 %v681_v0, %v1715_v7  ;;  %702 = verf.f32 %v496_v39  ;;  %619 = vst [vmem:[%s1618_s1 + $0x18] sm:$0xff] %v587_v37  ;;  %v557_v45 = vadd.f32 1.0, %v685_v50  ;;  %v462_v2 = vmul.f32 0.5, %v430_v48  ;;  %v1719_v0 = vld [vmem:[#allocation8_spill] sm:$0xff]  ;;  %v1723_v7 = vld [vmem:[#allocation25_spill] sm:$0xff] }
  0xfa   :  { %v434_v46 = vmul.f32 %v683_v6, %v1718_v12  ;;  %v687_v56 = vpop.eup %686  ;;  %704 = vrsqrt.f32 %v377_v54  ;;  %618 = vst [vmem:[%s1618_s1 + $0x10] sm:$0xff] %v586_v4  ;;  %v465_v51 = vmul.f32 0.5, %v433_v29  ;;  %v312_v55 = vsub.f32 %v248_v27, %v1226_v10 }
  0xfb   :  { %v499_v26 = vmul.f32 0.70710677, %v435_v11  ;;  %v689_v60 = vpop.eup %688  ;;  %v556_v5 = vadd.f32 1.0, %v687_v56  ;;  %v589_v49 = vmul.f32 %v557_v45, %v461_v22  ;;  %v1721_v39 = vsub.f32 %v1719_v0, %v1720_v24  ;;  %v215_v29 = vpop.xlane.xlu1 %214 }
  0xfc   :  { %v498_v38 = vmul.f32 0.70710677, %v434_v46  ;;  %v691_v14 = vpop.eup %690  ;;  %v251_v48 = vmul.f32 0.25, %v207_v40  ;;  %v1724_v54 = vsub.f32 %v1722_v42, %v1723_v7  ;;  %v376_v4 = vadd.f32 1e-05, %v312_v55  ;;  %v1400_v58 = vpop.xlane.xlu0 %212 }
  0xfd   :  { %706 = verf.f32 %v499_v26  ;;  %v437_v6 = vmul.f32 %v689_v60, %v1721_v39  ;;  %v693_v37 = vpop.eup %692  ;;  %v588_v31 = vmul.f32 %v556_v5, %v460_v8  ;;  %621 = vst [vmem:[%s1618_s1 + $0x28] sm:$0xff] %v589_v49  ;;  %v464_v13 = vmul.f32 0.5, %v432_v36  ;;  %v1725_v60 = vld [vmem:[#allocation10_spill] sm:$0xff] }
  0xfe   :  { %708 = verf.f32 %v498_v38  ;;  %v436_v50 = vmul.f32 %v691_v14, %v1724_v54  ;;  %v695_v10 = vpop.eup %694  ;;  %v559_v22 = vadd.f32 1.0, %v693_v37  ;;  %v315_v40 = vsub.f32 %v251_v48, %v1232_v34  ;;  %v1726_v5 = vld [vmem:[#allocation26_spill] sm:$0xff] }
  0xff   :  { %v501_v12 = vmul.f32 0.70710677, %v437_v6  ;;  %v697_v8 = vpop.eup %696  ;;  %620 = vst [vmem:[%s1618_s1 + $0x20] sm:$0xff] %v588_v31  ;;  %v558_v27 = vadd.f32 1.0, %v695_v10  ;;  %v467_v56 = vmul.f32 0.5, %v435_v11  ;;  %710 = vrsqrt.f32 %v376_v4  ;;  %v219_v37 = vpop.xlane.xlu1 %218 }
 0x100   :  { %v500_v45 = vmul.f32 0.70710677, %v436_v50  ;;  %v591_v26 = vmul.f32 %v559_v22, %v463_v41  ;;  %v1727_v38 = vsub.f32 %v1725_v60, %v1726_v5  ;;  %v379_v36 = vadd.f32 1e-05, %v315_v40  ;;  %v699_v14 = vpop.eup %698  ;;  %v217_v42 = vpop.xlane.xlu0 %216 }
 0x101   :  { %712 = verf.f32 %v501_v12  ;;  %v590_v49 = vmul.f32 %v558_v27, %v462_v2  ;;  %v250_v34 = vmul.f32 0.25, %v1372_v63  ;;  %v253_v0 = vmul.f32 0.25, %v211_v47 }
 0x102   :  { %v1412_v55 = vmul.f32 %v697_v8, %v1727_v38  ;;  %714 = verf.f32 %v500_v45  ;;  %v701_v24 = vpop.eup %700  ;;  %623 = vst [vmem:[%s1618_s1 + $0x38] sm:$0xff] %v591_v26  ;;  %v466_v11 = vmul.f32 0.5, %v434_v46  ;;  %v1728_v39 = vsub.f32 %v889_v15, %v1175_v33 }
 0x103   :  { %716 = vrsqrt.f32 %v379_v36  ;;  %v703_v2 = vpop.eup %702  ;;  %622 = vst [vmem:[%s1618_s1 + $0x30] sm:$0xff] %v590_v49  ;;  %v561_v63 = vadd.f32 1.0, %v701_v24  ;;  %v314_v47 = vsub.f32 %v250_v34, %v1243_v28  ;;  %v317_v31 = vsub.f32 %v253_v0, %v1255_v59 }
 0x104   :  { %v503_v41 = vmul.f32 0.70710677, %v1412_v55  ;;  %v1422_v48 = vmul.f32 %v699_v14, %v1728_v39  ;;  %v252_v46 = vmul.f32 0.25, %v209_v52  ;;  %v705_v7 = vpop.eup %704  ;;  %v560_v54 = vadd.f32 1.0, %v703_v2  ;;  %v1730_v14 = vld [vmem:[#allocation27_spill] sm:$0xff] }
 0x105   :  { %v469_v4 = vmul.f32 0.5, %v437_v6  ;;  %v593_v33 = vmul.f32 %v561_v63, %v465_v51  ;;  %v1729_v10 = vsub.f32 %v896_v16, %v1187_v62  ;;  %v378_v12 = vadd.f32 1e-05, %v314_v47  ;;  %v1732_v63 = vld [vmem:[#allocation28_spill] sm:$0xff] }
 0x106   :  { %718 = verf.f32 %v503_v41  ;;  %v502_v15 = vmul.f32 0.70710677, %v1422_v48  ;;  %v381_v40 = vadd.f32 1e-05, %v317_v31  ;;  %v592_v28 = vmul.f32 %v560_v54, %v464_v13 }
 0x107   :  { %v1433_v22 = vmul.f32 %v705_v7, %v1729_v10  ;;  %v707_v8 = vpop.eup %706  ;;  %v316_v59 = vsub.f32 %v252_v46, %v1269_v32  ;;  %v255_v52 = vmul.f32 0.25, %v215_v29  ;;  %625 = vst [vmem:[%s1618_s1 + $0x48] sm:$0xff] %v593_v33  ;;  %v468_v51 = vmul.f32 0.5, %v436_v50  ;;  %v223_v29 = vpop.xlane.xlu1 %222 }
 0x108   :  { %720 = verf.f32 %v502_v15  ;;  %v709_v27 = vpop.eup %708  ;;  %v563_v6 = vadd.f32 1.0, %v707_v8  ;;  %624 = vst [vmem:[%s1618_s1 + $0x40] sm:$0xff] %v592_v28  ;;  %v254_v60 = vmul.f32 0.25, %v1400_v58  ;;  %v257_v5 = vmul.f32 0.25, %v219_v37  ;;  %v221_v50 = vpop.xlane.xlu0 %220 }
 0x109   :  { %v505_v45 = vmul.f32 0.70710677, %v1433_v22  ;;  %722 = vrsqrt.f32 %v378_v12  ;;  %v562_v16 = vadd.f32 1.0, %v709_v27  ;;  %v380_v62 = vadd.f32 1e-05, %v316_v59  ;;  %v711_v13 = vpop.eup %710 }
 0x10a   :  { %724 = vrsqrt.f32 %v381_v40  ;;  %v319_v32 = vsub.f32 %v255_v52, %v1275_v57  ;;  %v595_v26 = vmul.f32 %v563_v6, %v467_v56  ;;  %v1731_v49 = vsub.f32 %v901_v17, %v1730_v14 }
 0x10b   :  { %726 = verf.f32 %v505_v45  ;;  %v713_v38 = vpop.eup %712  ;;  %v594_v36 = vmul.f32 %v562_v16, %v466_v11  ;;  %v318_v56 = vsub.f32 %v254_v60, %v1281_v35  ;;  %v321_v58 = vsub.f32 %v257_v5, %v1290_v9  ;;  %v227_v15 = vpop.xlane.xlu1 %226 }
 0x10c   :  { %v1448_v34 = vmul.f32 %v711_v13, %v1731_v49  ;;  %728 = vrsqrt.f32 %v380_v62  ;;  %v383_v0 = vadd.f32 1e-05, %v319_v32  ;;  %v715_v24 = vpop.eup %714  ;;  %627 = vst [vmem:[%s1618_s1 + $0x58] sm:$0xff] %v595_v26  ;;  %v565_v57 = vadd.f32 1.0, %v713_v38  ;;  %v225_v33 = vpop.xlane.xlu0 %224 }
 0x10d   :  { %v256_v41 = vmul.f32 0.25, %v217_v42  ;;  %v717_v39 = vpop.eup %716  ;;  %626 = vst [vmem:[%s1618_s1 + $0x50] sm:$0xff] %v594_v36  ;;  %v564_v17 = vadd.f32 1.0, %v715_v24  ;;  %v471_v11 = vmul.f32 0.5, %v1412_v55  ;;  %v1733_v47 = vsub.f32 %v908_v18, %v1732_v63 }
 0x10e   :  { %v504_v37 = vmul.f32 0.70710677, %v1448_v34  ;;  %730 = vrsqrt.f32 %v383_v0  ;;  %v597_v2 = vmul.f32 %v565_v57, %v469_v4  ;;  %v382_v35 = vadd.f32 1e-05, %v318_v56  ;;  %v1737_v0 = vld [vmem:[#allocation3_spill] sm:$0xff] }
 0x10f   :  { %v1463_v31 = vmul.f32 %v717_v39, %v1733_v47  ;;  %v385_v9 = vadd.f32 1e-05, %v321_v58  ;;  %v596_v42 = vmul.f32 %v564_v17, %v468_v51  ;;  %v320_v7 = vsub.f32 %v256_v41, %v1307_v53  ;;  %v1738_v56 = vld [vmem:[#allocation11_spill] sm:$0xff]  ;;  %v1739_v58 = vld [vmem:[#allocation29_spill] sm:$0xff] }
 0x110   :  { %v719_v46 = vpop.eup %718  ;;  %732 = verf.f32 %v504_v37  ;;  %v259_v54 = vmul.f32 0.25, %v223_v29  ;;  %629 = vst [vmem:[%s1618_s1 + $0x68] sm:$0xff] %v597_v2  ;;  %v470_v4 = vmul.f32 0.5, %v1422_v48  ;;  %v258_v40 = vmul.f32 0.25, %v221_v50  ;;  %v229_v50 = vpop.xlane.xlu0 %228 }
 0x111   :  { %v567_v55 = vadd.f32 1.0, %v719_v46  ;;  %v507_v18 = vmul.f32 0.70710677, %v1463_v31  ;;  %734 = vrsqrt.f32 %v382_v35  ;;  %628 = vst [vmem:[%s1618_s1 + $0x60] sm:$0xff] %v596_v42  ;;  %v384_v53 = vadd.f32 1e-05, %v320_v7 }
 0x112   :  { %v721_v10 = vpop.eup %720  ;;  %736 = vrsqrt.f32 %v385_v9  ;;  %v323_v12 = vsub.f32 %v259_v54, %v1322_v30  ;;  %v261_v52 = vmul.f32 0.25, %v227_v15  ;;  %v1734_v27 = vsub.f32 %v913_v19, %v1222_v43  ;;  %v1741_v35 = vld [vmem:[#allocation12_spill] sm:$0xff]  ;;  %v1742_v9 = vld [vmem:[#allocation30_spill] sm:$0xff] }
 0x113   :  { %v723_v8 = vpop.eup %722  ;;  %v599_v28 = vmul.f32 %v567_v55, %v471_v11  ;;  %v566_v59 = vadd.f32 1.0, %v721_v10  ;;  %738 = verf.f32 %v507_v18  ;;  %v322_v45 = vsub.f32 %v258_v40, %v1326_v25  ;;  %v780_v55 = vld [vmem:[%s1617_s0 + $0xc0] sm:$0xff]  ;;  %v1746_v10 = vld [vmem:[#allocation31_spill] sm:$0xff] }
 0x114   :  { %v725_v48 = vpop.eup %724  ;;  %v1478_v6 = vmul.f32 %v723_v8, %v1734_v27  ;;  %740 = vrsqrt.f32 %v384_v53  ;;  %v387_v51 = vadd.f32 1e-05, %v323_v12  ;;  %v1735_v62 = vsub.f32 %v920_v20, %v1235_v44 }
 0x115   :  { %v727_v16 = vpop.eup %726  ;;  %631 = vst [vmem:[%s1618_s1 + $0x78] sm:$0xff] %v599_v28  ;;  %v598_v30 = vmul.f32 %v566_v59, %v470_v4  ;;  %v325_v29 = vsub.f32 %v261_v52, %v1330_v1  ;;  %v260_v19 = vmul.f32 0.25, %v225_v33  ;;  %v473_v13 = vmul.f32 0.5, %v1433_v22  ;;  %v231_v22 = vpop.xlane.xlu1 %230  ;;  %v1744_v4 = vld [vmem:[#allocation32_spill] sm:$0xff]  ;;  %v1745_v33 = vld [vmem:[#allocation13_spill] sm:$0xff] }
 0x116   :  { %v1487_v32 = vmul.f32 %v725_v48, %v1735_v62  ;;  %v729_v43 = vpop.eup %728  ;;  %v569_v26 = vadd.f32 1.0, %v727_v16  ;;  %v506_v25 = vmul.f32 0.70710677, %v1478_v6  ;;  %742 = vrsqrt.f32 %v387_v51  ;;  %v781_v52 = vld [vmem:[%s1617_s0 + $0xd8] sm:$0xff] }
 0x117   :  { %v295_v60 = vmul.f32 %v1344_v3, %v1344_v3  ;;  %630 = vst [vmem:[%s1618_s1 + $0x70] sm:$0xff] %v598_v30  ;;  %v1736_v44 = vsub.f32 %v925_v21, %v1246_v61  ;;  %v386_v5 = vadd.f32 1e-05, %v322_v45  ;;  %v389_v14 = vadd.f32 1e-05, %v325_v29  ;;  %v1748_v48 = vld [vmem:[#allocation33_spill] sm:$0xff] }
 0x118   :  { %v509_v20 = vmul.f32 0.70710677, %v1487_v32  ;;  %v731_v38 = vpop.eup %730  ;;  %v601_v36 = vmul.f32 %v569_v26, %v473_v13  ;;  %744 = verf.f32 %v506_v25  ;;  %v324_v49 = vsub.f32 %v260_v19, %v1337_v23  ;;  %v782_v13 = vld [vmem:[%s1617_s0 + $0xd0] sm:$0xff]  ;;  %v1749_v26 = vld [vmem:[#allocation34_spill] sm:$0xff] }
 0x119   :  { %v1501_v1 = vmul.f32 %v729_v43, %v1736_v44  ;;  %v294_v24 = vmul.f32 %v1737_v0, %v1737_v0  ;;  %v1740_v21 = vsub.f32 %v1738_v56, %v1739_v58  ;;  %v263_v17 = vmul.f32 0.25, %v231_v22 }
 0x11a   :  { %746 = verf.f32 %v509_v20  ;;  %v733_v41 = vpop.eup %732  ;;  %633 = vst [vmem:[%s1618_s1 + $0x88] sm:$0xff] %v601_v36  ;;  %v388_v39 = vadd.f32 1e-05, %v324_v49  ;;  %v262_v23 = vmul.f32 0.25, %v229_v50  ;;  %v472_v37 = vmul.f32 0.5, %v1448_v34  ;;  %v1750_v49 = vld [vmem:[#allocation35_spill] sm:$0xff] }
 0x11b   :  { %v508_v57 = vmul.f32 0.70710677, %v1501_v1  ;;  %v1510_v61 = vmul.f32 %v731_v38, %v1740_v21  ;;  %748 = vrsqrt.f32 %v386_v5  ;;  %v735_v11 = vpop.eup %734  ;;  %v568_v2 = vadd.f32 1.0, %v733_v41 }
 0x11c   :  { %v737_v47 = vpop.eup %736  ;;  %v1743_v46 = vsub.f32 %v1741_v35, %v1742_v9  ;;  %v327_v7 = vsub.f32 %v263_v17, %v295_v60  ;;  %v326_v54 = vsub.f32 %v262_v23, %v294_v24  ;;  %v352_v34 = vsub.f32 %v780_v55, %v1744_v4  ;;  %v1751_v17 = vld [vmem:[#allocation36_spill] sm:$0xff] }
 0x11d   :  { %750 = verf.f32 %v508_v57  ;;  %v511_v63 = vmul.f32 0.70710677, %v1510_v61  ;;  %v739_v15 = vpop.eup %738  ;;  %v600_v18 = vmul.f32 %v568_v2, %v472_v37  ;;  %v1747_v53 = vsub.f32 %v1745_v33, %v1746_v10 }
 0x11e   :  { %v1520_v42 = vmul.f32 %v735_v11, %v1743_v46  ;;  %752 = vrsqrt.f32 %v389_v14  ;;  %v741_v40 = vpop.eup %740  ;;  %v475_v8 = vmul.f32 0.5, %v1463_v31  ;;  %v571_v28 = vadd.f32 1.0, %v739_v15  ;;  %v783_v14 = vld [vmem:[%s1617_s0 + $0xe8] sm:$0xff] }
 0x11f   :  { %754 = verf.f32 %v511_v63  ;;  %v1529_v12 = vmul.f32 %v737_v47, %v1747_v53  ;;  %v355_v27 = vsub.f32 %v781_v52, %v1748_v48  ;;  %632 = vst [vmem:[%s1618_s1 + $0x80] sm:$0xff] %v600_v18  ;;  %v1541_v45 = vmul.f32 %v741_v40, %v352_v34  ;;  %v786_v53 = vld [vmem:[%s1617_s0 + $0xf0] sm:$0xff] }
 0x120   :  { %v510_v59 = vmul.f32 0.70710677, %v1520_v42  ;;  %756 = vrsqrt.f32 %v388_v39  ;;  %v391_v16 = vadd.f32 1e-05, %v327_v7  ;;  %v743_v31 = vpop.eup %742  ;;  %v603_v30 = vmul.f32 %v571_v28, %v475_v8  ;;  %v785_v7 = vld [vmem:[%s1617_s0 + $0xf8] sm:$0xff] }
 0x121   :  { %v513_v51 = vmul.f32 0.70710677, %v1529_v12  ;;  %v390_v62 = vadd.f32 1e-05, %v326_v54  ;;  %v512_v29 = vmul.f32 0.70710677, %v1541_v45  ;;  %v1544_v19 = vmul.f32 %v743_v31, %v355_v27 }
 0x122   :  { %758 = verf.f32 %v510_v59  ;;  %v745_v43 = vpop.eup %744  ;;  %v354_v25 = vsub.f32 %v782_v13, %v1749_v26  ;;  %635 = vst [vmem:[%s1618_s1 + $0x98] sm:$0xff] %v603_v30  ;;  %v474_v20 = vmul.f32 0.5, %v1478_v6  ;;  %v477_v50 = vmul.f32 0.5, %v1487_v32  ;;  %v784_v32 = vld [vmem:[%s1617_s0 + $0xe0] sm:$0xff] }
 0x123   :  { %760 = verf.f32 %v513_v51  ;;  %v570_v44 = vadd.f32 1.0, %v745_v43  ;;  %v515_v5 = vmul.f32 0.70710677, %v1544_v19  ;;  %v357_v24 = vsub.f32 %v783_v14, %v1750_v49 }
 0x124   :  { %762 = vrsqrt.f32 %v391_v16  ;;  %v747_v60 = vpop.eup %746  ;;  %v476_v21 = vmul.f32 0.5, %v1501_v1  ;;  %v356_v23 = vsub.f32 %v784_v32, %v1751_v17  ;;  %v479_v63 = vmul.f32 0.5, %v1510_v61 }
 0x125   :  { %764 = verf.f32 %v512_v29  ;;  %v749_v22 = vpop.eup %748  ;;  %v573_v38 = vadd.f32 1.0, %v747_v60  ;;  %v602_v57 = vmul.f32 %v570_v44, %v474_v20  ;;  %v359_v54 = vsub.f32 %v785_v7, %v1344_v3 }
 0x126   :  { %766 = vrsqrt.f32 %v390_v62  ;;  %v450_v56 = vmul.f32 %v749_v22, %v354_v25  ;;  %v478_v4 = vmul.f32 0.5, %v1520_v42  ;;  %v481_v33 = vmul.f32 0.5, %v1529_v12 }
 0x127   :  { %v751_v36 = vpop.eup %750  ;;  %768 = verf.f32 %v515_v5  ;;  %v605_v58 = vmul.f32 %v573_v38, %v477_v50  ;;  %634 = vst [vmem:[%s1618_s1 + $0x90] sm:$0xff] %v602_v57  ;;  %v358_v40 = vsub.f32 %v786_v53, %v1737_v0  ;;  %v480_v52 = vmul.f32 0.5, %v1541_v45 }
 0x128   :  { %v753_v6 = vpop.eup %752  ;;  %v572_v41 = vadd.f32 1.0, %v751_v36  ;;  %v514_v11 = vmul.f32 0.70710677, %v450_v56  ;;  %v483_v16 = vmul.f32 0.5, %v1544_v19  ;;  %v482_v29 = vmul.f32 0.5, %v450_v56 }
 0x129   :  { %v755_v39 = vpop.eup %754  ;;  %v453_v37 = vmul.f32 %v753_v6, %v357_v24  ;;  %637 = vst [vmem:[%s1618_s1 + $0xa8] sm:$0xff] %v605_v58 }
 0x12a   :  { %v757_v2 = vpop.eup %756  ;;  %v604_v1 = vmul.f32 %v572_v41, %v476_v21  ;;  %v575_v47 = vadd.f32 1.0, %v755_v39  ;;  %770 = verf.f32 %v514_v11 }
 0x12b   :  { %v517_v35 = vmul.f32 0.70710677, %v453_v37  ;;  %v452_v9 = vmul.f32 %v757_v2, %v356_v23  ;;  %v485_v25 = vmul.f32 0.5, %v453_v37 }
 0x12c   :  { %v759_v46 = vpop.eup %758  ;;  %636 = vst [vmem:[%s1618_s1 + $0xa0] sm:$0xff] %v604_v1  ;;  %v607_v15 = vmul.f32 %v575_v47, %v479_v63 }
 0x12d   :  { %v761_v55 = vpop.eup %760  ;;  %v574_v61 = vadd.f32 1.0, %v759_v46  ;;  %772 = verf.f32 %v517_v35  ;;  %v516_v34 = vmul.f32 0.70710677, %v452_v9  ;;  %v484_v44 = vmul.f32 0.5, %v452_v9 }
 0x12e   :  { %v763_v18 = vpop.eup %762  ;;  %639 = vst [vmem:[%s1618_s1 + $0xb8] sm:$0xff] %v607_v15  ;;  %v577_v10 = vadd.f32 1.0, %v761_v55 }
 0x12f   :  { %v765_v3 = vpop.eup %764  ;;  %v606_v8 = vmul.f32 %v574_v61, %v478_v4  ;;  %774 = verf.f32 %v516_v34  ;;  %v455_v42 = vmul.f32 %v763_v18, %v359_v54 }
 0x130   :  { %v767_v28 = vpop.eup %766  ;;  %v609_v59 = vmul.f32 %v577_v10, %v481_v33  ;;  %v576_v48 = vadd.f32 1.0, %v765_v3 }
 0x131   :  { %v769_v27 = vpop.eup %768  ;;  %638 = vst [vmem:[%s1618_s1 + $0xb0] sm:$0xff] %v606_v8  ;;  %v519_v12 = vmul.f32 0.70710677, %v455_v42  ;;  %v454_v51 = vmul.f32 %v767_v28, %v358_v40  ;;  %v487_v38 = vmul.f32 0.5, %v455_v42 }
 0x132   :  { %641 = vst [vmem:[%s1618_s1 + $0xc8] sm:$0xff] %v609_v59  ;;  %v608_v0 = vmul.f32 %v576_v48, %v480_v52  ;;  %v579_v31 = vadd.f32 1.0, %v769_v27 }
 0x133   :  { %776 = verf.f32 %v519_v12  ;;  %v518_v30 = vmul.f32 0.70710677, %v454_v51  ;;  %v486_v24 = vmul.f32 0.5, %v454_v51 }
 0x134   :  { %640 = vst [vmem:[%s1618_s1 + $0xc0] sm:$0xff] %v608_v0  ;;  %v611_v45 = vmul.f32 %v579_v31, %v483_v16  ;;  %v771_v62 = vpop.eup %770 }
 0x135   :  { %778 = verf.f32 %v518_v30  ;;  %v578_v43 = vadd.f32 1.0, %v771_v62 }
 0x136   :  { %643 = vst [vmem:[%s1618_s1 + $0xd8] sm:$0xff] %v611_v45 }
 0x137   :  { %v773_v13 = vpop.eup %772  ;;  %v610_v26 = vmul.f32 %v578_v43, %v482_v29 }
 0x138   :  { %v581_v19 = vadd.f32 1.0, %v773_v13 }
 0x139   :  { %v775_v60 = vpop.eup %774  ;;  %642 = vst [vmem:[%s1618_s1 + $0xd0] sm:$0xff] %v610_v26 }
 0x13a   :  { %v613_v20 = vmul.f32 %v581_v19, %v485_v25  ;;  %v580_v5 = vadd.f32 1.0, %v775_v60 }
 0x13c   :  { %645 = vst [vmem:[%s1618_s1 + $0xe8] sm:$0xff] %v613_v20  ;;  %v612_v22 = vmul.f32 %v580_v5, %v484_v44 }
 0x13d   :  { %v777_v50 = vpop.eup %776 }
 0x13e   :  { %644 = vst [vmem:[%s1618_s1 + $0xe0] sm:$0xff] %v612_v22  ;;  %v583_v36 = vadd.f32 1.0, %v777_v50 }
 0x13f   :  { %v779_v14 = vpop.eup %778 }
 0x140   :  { %v615_v49 = vmul.f32 %v583_v36, %v487_v38  ;;  %v582_v57 = vadd.f32 1.0, %v779_v14 }
 0x142   :  { %647 = vst [vmem:[%s1618_s1 + $0xf8] sm:$0xff] %v615_v49  ;;  %v614_v56 = vmul.f32 %v582_v57, %v486_v24 }
 0x144   :  { %646 = vst [vmem:[%s1618_s1 + $0xf0] sm:$0xff] %v614_v56 }

// kernel: f_net_forward.134
= control target key start
LH: loop header
LB: loop body
LE: loop exit
PB: predicated region body
PF: predicated region fallthrough
CT: control target
= control target key end

     0   :  { %vm1166_vm0 = vmmov 0   ;;  %s1439_s1 = inlined_call_operand.vmem [shape: bf16[1152,128], index: 1, kind: input, shape index: {}]   ;;  %s1440_s0 = inlined_call_operand.vmem [shape: bf16[16,1152], index: 0, kind: input, shape index: {}]   ;;  %s1441_s2 = inlined_call_operand.vmem [shape: f32[1,128], index: 2, kind: input, shape index: {}]   ;;  %s1442_s3 = inlined_call_operand.vmem [shape: f32[16,128], index: 3, kind: output, shape index: {}]  }
   0x1   :  { %v1076_v0 = vld [vmem:[%s1439_s1 + $0x40] sm:$0xff]   ;;  %v1080_v4 = vld [vmem:[%s1439_s1 + $0x48] sm:$0xff]   ;;  %v1084_v8 = vld [vmem:[%s1439_s1 + $0x50] sm:$0xff]  }
   0x2   :  { %v1077_v1 = vld [vmem:[%s1439_s1] sm:$0xff]   ;;  %957 = vmatprep.subr.bf16.mxu0 %v1076_v0  ;;  %v1081_v5 = vld [vmem:[%s1439_s1 + $0x8] sm:$0xff]   ;;  %v1085_v9 = vld [vmem:[%s1439_s1 + $0x10] sm:$0xff]  }
   0x3   :  { %v1078_v2 = vld [vmem:[%s1439_s1 + $0xc0] sm:$0xff]   ;;  %958 = vmatpush3.bf16.msra.mxu0 %v1077_v1  ;;  %v1082_v6 = vld [vmem:[%s1439_s1 + $0xc8] sm:$0xff]   ;;  %v1086_v10 = vld [vmem:[%s1439_s1 + $0xd0] sm:$0xff]  }
   0x4   :  { %v1079_v3 = vld [vmem:[%s1439_s1 + $0x80] sm:$0xff]   ;;  %979 = vmatprep.subr.bf16.mxu1 %v1078_v2  ;;  %959 = vmatprep.subr.bf16.mxu0 %v1080_v4  ;;  %v1083_v7 = vld [vmem:[%s1439_s1 + $0x88] sm:$0xff]   ;;  %v1087_v11 = vld [vmem:[%s1439_s1 + $0x90] sm:$0xff]  }
   0x5   :  { %980 = vmatpush3.bf16.msra.mxu1 %v1079_v3  ;;  %v1088_v12 = vld [vmem:[%s1439_s1 + $0x58] sm:$0xff]   ;;  %v1092_v16 = vld [vmem:[%s1439_s1 + $0x60] sm:$0xff]   ;;  %v1096_v20 = vld [vmem:[%s1439_s1 + $0x68] sm:$0xff]  }
   0x6   :  { %981 = vmatprep.subr.bf16.mxu1 %v1082_v6  ;;  %v1089_v13 = vld [vmem:[%s1439_s1 + $0x18] sm:$0xff]   ;;  %v1093_v17 = vld [vmem:[%s1439_s1 + $0x20] sm:$0xff]   ;;  %v1097_v21 = vld [vmem:[%s1439_s1 + $0x28] sm:$0xff]   ;;  %v1165_v6 = vmov 0.0  }
   0x7   :  { %960 = vmatpush3.bf16.msra.mxu0 %v1081_v5  ;;  %v1090_v14 = vld [vmem:[%s1439_s1 + $0xd8] sm:$0xff]   ;;  %v1094_v18 = vld [vmem:[%s1439_s1 + $0xe0] sm:$0xff]   ;;  %v1098_v22 = vld [vmem:[%s1439_s1 + $0xe8] sm:$0xff]  }
   0x8   :  { %961 = vmatprep.subr.bf16.mxu0 %v1084_v8  ;;  %v1091_v15 = vld [vmem:[%s1439_s1 + $0x98] sm:$0xff]   ;;  %v1095_v19 = vld [vmem:[%s1439_s1 + $0xa0] sm:$0xff]   ;;  %v1099_v23 = vld [vmem:[%s1439_s1 + $0xa8] sm:$0xff]  }
   0x9   :  { %982 = vmatpush3.bf16.msra.mxu1 %v1083_v7  ;;  %v1100_v24 = vld [vmem:[%s1439_s1 + $0x70] sm:$0xff]   ;;  %v1104_v28 = vld [vmem:[%s1439_s1 + $0x78] sm:$0xff]   ;;  %v1107_v31 = vld [vmem:[%s1440_s0] ss:$36 sps:$4 sm:$0xff]  }
   0xa   :  { %983 = vmatprep.subr.bf16.mxu1 %v1086_v10  ;;  %v1101_v25 = vld [vmem:[%s1439_s1 + $0x30] sm:$0xff]   ;;  %v1105_v29 = vld [vmem:[%s1439_s1 + $0x38] sm:$0xff]   ;;  %v1109_v32 = vld [vmem:[%s1440_s0 + $0x4] ss:$36 sps:$4 sm:$0xff]  }
   0xb   :  { %962 = vmatpush3.bf16.msra.mxu0 %v1085_v9  ;;  %v1102_v26 = vld [vmem:[%s1439_s1 + $0xf0] sm:$0xff]   ;;  %v1106_v30 = vld [vmem:[%s1439_s1 + $0xf8] sm:$0xff]   ;;  %686 = vmatprep.mubr.bf16.mxu0 %v1109_v32  ;;  %v1111_v34 = vld [vmem:[%s1439_s1 + $0x140] sm:$0xff]  }
   0xc   :  { %963 = vmatprep.subr.bf16.mxu0 %v1088_v12  ;;  %v1103_v27 = vld [vmem:[%s1439_s1 + $0xb0] sm:$0xff]   ;;  %v1110_v33 = vld [vmem:[%s1439_s1 + $0xb8] sm:$0xff]   ;;  %v1112_v35 = vld [vmem:[%s1440_s0 + $0x8] ss:$36 sps:$4 sm:$0xff]  }
   0xd   :  { %984 = vmatpush3.bf16.msra.mxu1 %v1087_v11  ;;  %v1114_v36 = vld [vmem:[%s1440_s0 + $0xc] ss:$36 sps:$4 sm:$0xff]   ;;  %v1115_v37 = vld [vmem:[%s1439_s1 + $0x100] sm:$0xff]   ;;  %v1126_v48 = vld [vmem:[%s1439_s1 + $0x158] sm:$0xff]  }
   0xe   :  { %985 = vmatprep.subr.bf16.mxu1 %v1090_v14  ;;  %727 = vmatprep.mubr.bf16.mxu1 %v1114_v36  ;;  %v1116_v38 = vld [vmem:[%s1439_s1 + $0x1c0] sm:$0xff]   ;;  %v1118_v40 = vld [vmem:[%s1439_s1 + $0x148] sm:$0xff]   ;;  %v1122_v44 = vld [vmem:[%s1439_s1 + $0x150] sm:$0xff]  }
   0xf   :  { %964 = vmatpush3.bf16.msra.mxu0 %v1089_v13  ;;  %v1117_v39 = vld [vmem:[%s1439_s1 + $0x180] sm:$0xff]   ;;  %v1119_v41 = vld [vmem:[%s1439_s1 + $0x108] sm:$0xff]   ;;  %v1123_v45 = vld [vmem:[%s1439_s1 + $0x110] sm:$0xff]  }
  0x10   :  { %965 = vmatprep.subr.bf16.mxu0 %v1092_v16  ;;  %v1120_v42 = vld [vmem:[%s1439_s1 + $0x1c8] sm:$0xff]   ;;  %v1124_v46 = vld [vmem:[%s1439_s1 + $0x1d0] sm:$0xff]   ;;  %v1127_v49 = vld [vmem:[%s1439_s1 + $0x118] sm:$0xff]  }
  0x11   :  { %986 = vmatpush3.bf16.msra.mxu1 %v1091_v15  ;;  %v1121_v43 = vld [vmem:[%s1439_s1 + $0x188] sm:$0xff]   ;;  %v1125_v47 = vld [vmem:[%s1439_s1 + $0x190] sm:$0xff]   ;;  %v1128_v50 = vld [vmem:[%s1439_s1 + $0x1d8] sm:$0xff]  }
  0x12   :  { %987 = vmatprep.subr.bf16.mxu1 %v1094_v18  ;;  %v1129_v51 = vld [vmem:[%s1439_s1 + $0x198] sm:$0xff]   ;;  %v1130_v52 = vld [vmem:[%s1439_s1 + $0x160] sm:$0xff]   ;;  %v1134_v56 = vld [vmem:[%s1439_s1 + $0x168] sm:$0xff]  }
  0x13   :  { %966 = vmatpush3.bf16.msra.mxu0 %v1093_v17  ;;  %v1131_v53 = vld [vmem:[%s1439_s1 + $0x120] sm:$0xff]   ;;  %v1135_v57 = vld [vmem:[%s1439_s1 + $0x128] sm:$0xff]   ;;  %v1138_v60 = vld [vmem:[%s1439_s1 + $0x170] sm:$0xff]  }
  0x14   :  { %967 = vmatprep.subr.bf16.mxu0 %v1096_v20  ;;  %v1132_v54 = vld [vmem:[%s1439_s1 + $0x1e0] sm:$0xff]   ;;  %v1136_v58 = vld [vmem:[%s1439_s1 + $0x1e8] sm:$0xff]   ;;  %v1139_v61 = vld [vmem:[%s1439_s1 + $0x130] sm:$0xff]  }
  0x15   :  { %988 = vmatpush3.bf16.msra.mxu1 %v1095_v19  ;;  %v1133_v55 = vld [vmem:[%s1439_s1 + $0x1a0] sm:$0xff]   ;;  %v1137_v59 = vld [vmem:[%s1439_s1 + $0x1a8] sm:$0xff]   ;;  %v1140_v62 = vld [vmem:[%s1439_s1 + $0x1f0] sm:$0xff]  }
  0x16   :  { %989 = vmatprep.subr.bf16.mxu1 %v1098_v22  ;;  %v1141_v63 = vld [vmem:[%s1439_s1 + $0x1b0] sm:$0xff]   ;;  %v1142_v0 = vld [vmem:[%s1439_s1 + $0x178] sm:$0xff]   ;;  %v1152_v9 = vld [vmem:[%s1439_s1 + $0x200] sm:$0xff]  }
  0x17   :  { %968 = vmatpush3.bf16.msra.mxu0 %v1097_v21  ;;  %v1143_v1 = vld [vmem:[%s1439_s1 + $0x138] sm:$0xff]   ;;  %v1145_v3 = vld [vmem:[%s1440_s0 + $0x10] ss:$36 sps:$4 sm:$0xff]   ;;  %v1153_v10 = vld [vmem:[%s1439_s1 + $0x208] sm:$0xff]  }
  0x18   :  { %969 = vmatprep.subr.bf16.mxu0 %v1100_v24  ;;  %v1144_v2 = vld [vmem:[%s1439_s1 + $0x1f8] sm:$0xff]   ;;  %v1154_v11 = vld [vmem:[%s1439_s1 + $0x210] sm:$0xff]   ;;  %v1156_v13 = vld [vmem:[%s1439_s1 + $0x220] sm:$0xff]  }
  0x19   :  { %990 = vmatpush3.bf16.msra.mxu1 %v1099_v23  ;;  %v1147_v4 = vld [vmem:[%s1440_s0 + $0x14] ss:$36 sps:$4 sm:$0xff]   ;;  %v1151_v8 = vld [vmem:[%s1440_s0 + $0x1c] ss:$36 sps:$4 sm:$0xff]   ;;  %v1157_v14 = vld [vmem:[%s1439_s1 + $0x228] sm:$0xff]  }
  0x1a   :  { %991 = vmatprep.subr.bf16.mxu1 %v1102_v26  ;;  %v1148_v5 = vld [vmem:[%s1439_s1 + $0x1b8] sm:$0xff]   ;;  %v1158_v15 = vld [vmem:[%s1439_s1 + $0x230] sm:$0xff]   ;;  %v1160_v17 = vld [vmem:[%s1440_s0 + $0x20] ss:$36 sps:$4 sm:$0xff]  }
  0x1b   :  { %970 = vmatpush3.bf16.msra.mxu0 %v1101_v25  ;;  %v1149_v7 = vld [vmem:[%s1440_s0 + $0x18] ss:$36 sps:$4 sm:$0xff]   ;;  %v875_v19 = vld [vmem:[%s1441_s2] ss:$0 sm:$0xff] }
  0x1c   :  { %971 = vmatprep.subr.bf16.mxu0 %v1104_v28  ;;  %v1155_v12 = vld [vmem:[%s1439_s1 + $0x218] sm:$0xff]  }
  0x1d   :  { %992 = vmatpush3.bf16.msra.mxu1 %v1103_v27  ;;  %v1159_v16 = vld [vmem:[%s1439_s1 + $0x238] sm:$0xff]  }
  0x1e   :  { %993 = vmatprep.subr.bf16.mxu1 %v1106_v30 }
  0x1f   :  { %972 = vmatpush3.bf16.msra.mxu0 %v1105_v29 }
  0x20   :  { %1001 = vmatprep.subr.bf16.mxu0 %v1111_v34 }
  0x21   :  { %994 = vmatpush3.bf16.msra.mxu1 %v1110_v33 }
  0x22   :  { %687 = vmatmul.mubr.bf16.vlgmr.msra.gmra.mrb[0].mxu0 %v1107_v31  ;;  %1023 = vmatprep.subr.bf16.mxu1 %v1116_v38 }
  0x23   :  { %1002 = vmatpush3.bf16.msra.mxu0 %v1115_v37  ;;  %768 = vmatprep.mubr.bf16.mxu0 %v1147_v4 }
  0x24   :  { %728 = vmatmul.mubr.bf16.vlgmr.msra.gmra.mrb[0].mxu1 %v1112_v35  ;;  %1003 = vmatprep.subr.bf16.mxu0 %v1118_v40 }
  0x25   :  { %1024 = vmatpush3.bf16.msra.mxu1 %v1117_v39  ;;  %809 = vmatprep.mubr.bf16.mxu1 %v1151_v8 }
  0x26   :  { %1025 = vmatprep.subr.bf16.mxu1 %v1120_v42 }
  0x27   :  { %1004 = vmatpush3.bf16.msra.mxu0 %v1119_v41 }
  0x28   :  { %1005 = vmatprep.subr.bf16.mxu0 %v1122_v44 }
  0x29   :  { %1026 = vmatpush3.bf16.msra.mxu1 %v1121_v43 }
  0x2a   :  { %1027 = vmatprep.subr.bf16.mxu1 %v1124_v46 }
  0x2b   :  { %1006 = vmatpush3.bf16.msra.mxu0 %v1123_v45 }
  0x2c   :  { %1007 = vmatprep.subr.bf16.mxu0 %v1126_v48 }
  0x2d   :  { %1028 = vmatpush3.bf16.msra.mxu1 %v1125_v47 }
  0x2e   :  { %1029 = vmatprep.subr.bf16.mxu1 %v1128_v50 }
  0x2f   :  { %1008 = vmatpush3.bf16.msra.mxu0 %v1127_v49 }
  0x30   :  { %1009 = vmatprep.subr.bf16.mxu0 %v1130_v52 }
  0x31   :  { %1030 = vmatpush3.bf16.msra.mxu1 %v1129_v51 }
  0x32   :  { %1031 = vmatprep.subr.bf16.mxu1 %v1132_v54 }
  0x33   :  { %1010 = vmatpush3.bf16.msra.mxu0 %v1131_v53 }
  0x34   :  { %1011 = vmatprep.subr.bf16.mxu0 %v1134_v56 }
  0x35   :  { %1032 = vmatpush3.bf16.msra.mxu1 %v1133_v55 }
  0x36   :  { %1033 = vmatprep.subr.bf16.mxu1 %v1136_v58 }
  0x37   :  { %1012 = vmatpush3.bf16.msra.mxu0 %v1135_v57 }
  0x38   :  { %1013 = vmatprep.subr.bf16.mxu0 %v1138_v60 }
  0x39   :  { %1034 = vmatpush3.bf16.msra.mxu1 %v1137_v59 }
  0x3a   :  { %1035 = vmatprep.subr.bf16.mxu1 %v1140_v62 }
  0x3b   :  { %1014 = vmatpush3.bf16.msra.mxu0 %v1139_v61 }
  0x3c   :  { %1015 = vmatprep.subr.bf16.mxu0 %v1142_v0 }
  0x3d   :  { %1036 = vmatpush3.bf16.msra.mxu1 %v1141_v63 }
  0x3e   :  { %1037 = vmatprep.subr.bf16.mxu1 %v1144_v2 }
  0x3f   :  { %1016 = vmatpush3.bf16.msra.mxu0 %v1143_v1 }
  0x40   :  { %1054 = vmatprep.subr.bf16.mxu0 %v1165_v6 }
  0x41   :  { %1038 = vmatpush3.bf16.msra.mxu1 %v1148_v5 }
  0x42   :  { %769 = vmatmul.mubr.bf16.vlgmr.msra.gmra.mrb[4].mxu0 %v1145_v3 }
  0x43   :  { %1070 = vmatprep.mubr.msk.bf16.mxu0 %vm1166_vm0, %v1165_v6  ;;  %1055 = vmatpush3.bf16.msra.mxu0 %v1152_v9 }
  0x44   :  { %810 = vmatmul.mubr.bf16.vlgmr.msra.gmra.mrb[4].mxu1 %v1149_v7  ;;  %1056 = vmatprep.subr.bf16.mxu0 %v1165_v6 }
  0x47   :  { %1057 = vmatpush3.bf16.msra.mxu0 %v1153_v10 }
  0x48   :  { %1058 = vmatprep.subr.bf16.mxu0 %v1165_v6 }
  0x4b   :  { %1059 = vmatpush3.bf16.msra.mxu0 %v1154_v11 }
  0x4c   :  { %1060 = vmatprep.subr.bf16.mxu0 %v1165_v6 }
  0x4f   :  { %1061 = vmatpush3.bf16.msra.mxu0 %v1155_v12 }
  0x50   :  { %1062 = vmatprep.subr.bf16.mxu0 %v1165_v6 }
  0x53   :  { %1063 = vmatpush3.bf16.msra.mxu0 %v1156_v13 }
  0x54   :  { %1064 = vmatprep.subr.bf16.mxu0 %v1165_v6 }
  0x57   :  { %1065 = vmatpush3.bf16.msra.mxu0 %v1157_v14 }
  0x58   :  { %1066 = vmatprep.subr.bf16.mxu0 %v1165_v6 }
  0x5b   :  { %1067 = vmatpush3.bf16.msra.mxu0 %v1158_v15 }
  0x5c   :  { %1068 = vmatprep.subr.bf16.mxu0 %v1165_v6 }
  0x5f   :  { %1069 = vmatpush3.bf16.msra.mxu0 %v1159_v16 }
  0x62   :  { %1071 = vmatmul.mubr.bf16.vlgmr.msra.gmra.mrb[8].mxu0 %v1160_v17 }
  0xf5   :  { %v973_v18 = vpop.f32.mrb[0].mxu0 }
  0xf6   :  { %v974_v20 = vpop.f32.mrb[1].mxu0 }
  0xf7   :  { %v975_v21 = vadd.f32 %v974_v20, %v973_v18  ;;  %v976_v22 = vpop.f32.mrb[2].mxu0  ;;  %v995_v23 = vpop.f32.mrb[0].mxu1 }
  0xf8   :  { %v977_v24 = vpop.f32.mrb[3].mxu0  ;;  %v996_v27 = vpop.f32.mrb[1].mxu1 }
  0xf9   :  { %v689_v25 = vadd.f32 %v975_v21, %v875_v19  ;;  %v978_v26 = vadd.f32 %v977_v24, %v976_v22  ;;  %v997_v28 = vadd.f32 %v996_v27, %v995_v23  ;;  %v998_v29 = vpop.f32.mrb[2].mxu1 }
  0xfa   :  { %v999_v31 = vpop.f32.mrb[3].mxu1 }
  0xfb   :  { %v692_v30 = vadd.f32 %v978_v26, %v875_v19  ;;  %v730_v32 = vadd.f32 %v997_v28, %v689_v25  ;;  %v1000_v33 = vadd.f32 %v999_v31, %v998_v29 }
  0xfd   :  { %v733_v34 = vadd.f32 %v1000_v33, %v692_v30 }
 0x115   :  { %v1017_v35 = vpop.f32.mrb[4].mxu0 }
 0x116   :  { %v1018_v36 = vpop.f32.mrb[5].mxu0 }
 0x117   :  { %v1019_v37 = vadd.f32 %v1018_v36, %v1017_v35  ;;  %v1020_v38 = vpop.f32.mrb[6].mxu0  ;;  %v1039_v39 = vpop.f32.mrb[4].mxu1 }
 0x118   :  { %v1021_v40 = vpop.f32.mrb[7].mxu0  ;;  %v1040_v43 = vpop.f32.mrb[5].mxu1 }
 0x119   :  { %v771_v41 = vadd.f32 %v1019_v37, %v730_v32  ;;  %v1022_v42 = vadd.f32 %v1021_v40, %v1020_v38  ;;  %v1041_v44 = vadd.f32 %v1040_v43, %v1039_v39  ;;  %v1042_v45 = vpop.f32.mrb[6].mxu1 }
 0x11a   :  { %v1043_v47 = vpop.f32.mrb[7].mxu1 }
 0x11b   :  { %v774_v46 = vadd.f32 %v1022_v42, %v733_v34  ;;  %v1044_v48 = vadd.f32 %v1043_v47, %v1042_v45  ;;  %v812_v49 = vadd.f32 %v1041_v44, %v771_v41 }
 0x11d   :  { %v815_v50 = vadd.f32 %v1044_v48, %v774_v46 }
 0x135   :  { %v852_v51 = vpop.f32.mrb[8].mxu0 }
 0x136   :  { %v853_v52 = vadd.f32 %v852_v51, %v812_v49  ;;  %v1072_v53 = vpop.f32.mrb[9].mxu0 }
 0x137   :  { %v855_v54 = vpop.f32.mrb[10].mxu0 }
 0x138   :  { %v861_v55 = vmul.f32 0.70710677, %v853_v52  ;;  %v856_v56 = vadd.f32 %v855_v54, %v815_v50  ;;  %v1073_v57 = vpop.f32.mrb[11].mxu0  ;;  %v859_v60 = vmul.f32 0.5, %v853_v52 }
 0x13a   :  { %1161 = verf.f32 %v861_v55  ;;  %v862_v58 = vmul.f32 0.70710677, %v856_v56  ;;  %v860_v0 = vmul.f32 0.5, %v856_v56 }
 0x13c   :  { %1163 = verf.f32 %v862_v58 }
 0x144   :  { %v1162_v59 = vpop.eup %1161 }
 0x145   :  { %v865_v61 = vadd.f32 1.0, %v1162_v59 }
 0x146   :  { %v1164_v62 = vpop.eup %1163 }
 0x147   :  { %v867_v63 = vmul.f32 %v865_v61, %v859_v60  ;;  %v866_v1 = vadd.f32 1.0, %v1164_v62 }
 0x149   :  { %869 = vst [vmem:[%s1442_s3] sm:$0xff] %v867_v63  ;;  %v868_v2 = vmul.f32 %v866_v1, %v860_v0 }
 0x14b   :  { %870 = vst [vmem:[%s1442_s3 + $0x8] sm:$0xff] %v868_v2 }

// kernel: f_net_forward.138
= control target key start
LH: loop header
LB: loop body
LE: loop exit
PB: predicated region body
PF: predicated region fallthrough
CT: control target
= control target key end

     0   :  { %s1222_s1 = inlined_call_operand.vmem [shape: bf16[1024,128], index: 1, kind: input, shape index: {}]   ;;  %s1223_s0 = inlined_call_operand.vmem [shape: bf16[16,1024], index: 0, kind: input, shape index: {}]   ;;  %s1224_s2 = inlined_call_operand.vmem [shape: f32[1,128], index: 2, kind: input, shape index: {}]   ;;  %s1225_s3 = inlined_call_operand.vmem [shape: f32[16,128], index: 3, kind: output, shape index: {}]  }
   0x1   :  { %v913_v0 = vld [vmem:[%s1222_s1 + $0x40] sm:$0xff]   ;;  %v917_v4 = vld [vmem:[%s1222_s1 + $0x48] sm:$0xff]   ;;  %v921_v8 = vld [vmem:[%s1222_s1 + $0x50] sm:$0xff]  }
   0x2   :  { %v914_v1 = vld [vmem:[%s1222_s1 + $0xc0] sm:$0xff]   ;;  %825 = vmatprep.subr.bf16.mxu0 %v913_v0  ;;  %v918_v5 = vld [vmem:[%s1222_s1 + $0xc8] sm:$0xff]   ;;  %v922_v9 = vld [vmem:[%s1222_s1 + $0xd0] sm:$0xff]  }
   0x3   :  { %v915_v2 = vld [vmem:[%s1222_s1] sm:$0xff]   ;;  %847 = vmatprep.subr.bf16.mxu1 %v914_v1  ;;  %v919_v6 = vld [vmem:[%s1222_s1 + $0x8] sm:$0xff]   ;;  %v923_v10 = vld [vmem:[%s1222_s1 + $0x10] sm:$0xff]  }
   0x4   :  { %v916_v3 = vld [vmem:[%s1222_s1 + $0x80] sm:$0xff]   ;;  %826 = vmatpush3.bf16.msra.mxu0 %v915_v2  ;;  %v920_v7 = vld [vmem:[%s1222_s1 + $0x88] sm:$0xff]   ;;  %v924_v11 = vld [vmem:[%s1222_s1 + $0x90] sm:$0xff]  }
   0x5   :  { %848 = vmatpush3.bf16.msra.mxu1 %v916_v3  ;;  %827 = vmatprep.subr.bf16.mxu0 %v917_v4  ;;  %v925_v12 = vld [vmem:[%s1222_s1 + $0x58] sm:$0xff]   ;;  %v929_v16 = vld [vmem:[%s1222_s1 + $0x60] sm:$0xff]   ;;  %v933_v20 = vld [vmem:[%s1222_s1 + $0x68] sm:$0xff]  }
   0x6   :  { %849 = vmatprep.subr.bf16.mxu1 %v918_v5  ;;  %v926_v13 = vld [vmem:[%s1222_s1 + $0xd8] sm:$0xff]   ;;  %v930_v17 = vld [vmem:[%s1222_s1 + $0xe0] sm:$0xff]   ;;  %v934_v21 = vld [vmem:[%s1222_s1 + $0xe8] sm:$0xff]  }
   0x7   :  { %v927_v14 = vld [vmem:[%s1222_s1 + $0x18] sm:$0xff]   ;;  %v931_v18 = vld [vmem:[%s1222_s1 + $0x20] sm:$0xff]   ;;  %v935_v22 = vld [vmem:[%s1222_s1 + $0x28] sm:$0xff]  }
   0x8   :  { %828 = vmatpush3.bf16.msra.mxu0 %v919_v6  ;;  %v928_v15 = vld [vmem:[%s1222_s1 + $0x98] sm:$0xff]   ;;  %v932_v19 = vld [vmem:[%s1222_s1 + $0xa0] sm:$0xff]   ;;  %v936_v23 = vld [vmem:[%s1222_s1 + $0xa8] sm:$0xff]  }
   0x9   :  { %850 = vmatpush3.bf16.msra.mxu1 %v920_v7  ;;  %829 = vmatprep.subr.bf16.mxu0 %v921_v8  ;;  %v937_v24 = vld [vmem:[%s1222_s1 + $0x70] sm:$0xff]   ;;  %v941_v28 = vld [vmem:[%s1222_s1 + $0x78] sm:$0xff]   ;;  %v15_v32 = vld [vmem:[%s1223_s0] sm:$0xff] }
   0xa   :  { %851 = vmatprep.subr.bf16.mxu1 %v922_v9  ;;  %v938_v25 = vld [vmem:[%s1222_s1 + $0xf0] sm:$0xff]   ;;  %v942_v29 = vld [vmem:[%s1222_s1 + $0xf8] sm:$0xff]   ;;  %v19_v33 = vld [vmem:[%s1223_s0 + $0x20] sm:$0xff] }
   0xb   :  { %v939_v26 = vld [vmem:[%s1222_s1 + $0x30] sm:$0xff]   ;;  %v943_v30 = vld [vmem:[%s1222_s1 + $0x38] sm:$0xff]   ;;  %v16_v34 = vld [vmem:[%s1223_s0 + $0x8] sm:$0xff]  ;;  %v753_v35 = vcombine.low %v15_v32, %v19_v33  ;;  %v754_v36 = vcombine.high %v15_v32, %v19_v33 }
   0xc   :  { %830 = vmatpush3.bf16.msra.mxu0 %v923_v10  ;;  %v940_v27 = vld [vmem:[%s1222_s1 + $0xb0] sm:$0xff]   ;;  %v944_v31 = vld [vmem:[%s1222_s1 + $0xb8] sm:$0xff]   ;;  %v20_v37 = vld [vmem:[%s1223_s0 + $0x28] sm:$0xff] }
   0xd   :  { %852 = vmatpush3.bf16.msra.mxu1 %v924_v11  ;;  %831 = vmatprep.subr.bf16.mxu0 %v925_v12  ;;  %v755_v38 = vcombine.low %v16_v34, %v20_v37  ;;  %v756_v39 = vcombine.high %v16_v34, %v20_v37  ;;  %v945_v40 = vld [vmem:[%s1222_s1 + $0x140] sm:$0xff]   ;;  %v949_v44 = vld [vmem:[%s1222_s1 + $0x148] sm:$0xff]   ;;  %v953_v48 = vld [vmem:[%s1222_s1 + $0x150] sm:$0xff]  }
   0xe   :  { %853 = vmatprep.subr.bf16.mxu1 %v926_v13  ;;  %614 = vmatprep.mubr.bf16.mxu0 %v754_v36  ;;  %v946_v41 = vld [vmem:[%s1222_s1 + $0x1c0] sm:$0xff]   ;;  %v950_v45 = vld [vmem:[%s1222_s1 + $0x1c8] sm:$0xff]   ;;  %v954_v49 = vld [vmem:[%s1222_s1 + $0x1d0] sm:$0xff]  }
   0xf   :  { %655 = vmatprep.mubr.bf16.mxu1 %v756_v39  ;;  %v947_v42 = vld [vmem:[%s1222_s1 + $0x100] sm:$0xff]   ;;  %v951_v46 = vld [vmem:[%s1222_s1 + $0x108] sm:$0xff]   ;;  %v955_v50 = vld [vmem:[%s1222_s1 + $0x110] sm:$0xff]  }
  0x10   :  { %832 = vmatpush3.bf16.msra.mxu0 %v927_v14  ;;  %v948_v43 = vld [vmem:[%s1222_s1 + $0x180] sm:$0xff]   ;;  %v952_v47 = vld [vmem:[%s1222_s1 + $0x188] sm:$0xff]   ;;  %v956_v51 = vld [vmem:[%s1222_s1 + $0x190] sm:$0xff]  }
  0x11   :  { %854 = vmatpush3.bf16.msra.mxu1 %v928_v15  ;;  %833 = vmatprep.subr.bf16.mxu0 %v929_v16  ;;  %v957_v52 = vld [vmem:[%s1222_s1 + $0x158] sm:$0xff]   ;;  %v961_v56 = vld [vmem:[%s1222_s1 + $0x160] sm:$0xff]   ;;  %v965_v60 = vld [vmem:[%s1222_s1 + $0x168] sm:$0xff]  }
  0x12   :  { %855 = vmatprep.subr.bf16.mxu1 %v930_v17  ;;  %v958_v53 = vld [vmem:[%s1222_s1 + $0x1d8] sm:$0xff]   ;;  %v962_v57 = vld [vmem:[%s1222_s1 + $0x1e0] sm:$0xff]   ;;  %v966_v61 = vld [vmem:[%s1222_s1 + $0x1e8] sm:$0xff]  }
  0x13   :  { %v959_v54 = vld [vmem:[%s1222_s1 + $0x118] sm:$0xff]   ;;  %v963_v58 = vld [vmem:[%s1222_s1 + $0x120] sm:$0xff]   ;;  %v967_v62 = vld [vmem:[%s1222_s1 + $0x128] sm:$0xff]  }
  0x14   :  { %834 = vmatpush3.bf16.msra.mxu0 %v931_v18  ;;  %v960_v55 = vld [vmem:[%s1222_s1 + $0x198] sm:$0xff]   ;;  %v964_v59 = vld [vmem:[%s1222_s1 + $0x1a0] sm:$0xff]   ;;  %v968_v63 = vld [vmem:[%s1222_s1 + $0x1a8] sm:$0xff]  }
  0x15   :  { %856 = vmatpush3.bf16.msra.mxu1 %v932_v19  ;;  %835 = vmatprep.subr.bf16.mxu0 %v933_v20  ;;  %v969_v0 = vld [vmem:[%s1222_s1 + $0x170] sm:$0xff]   ;;  %v973_v4 = vld [vmem:[%s1222_s1 + $0x178] sm:$0xff]   ;;  %v752_v18 = vld [vmem:[%s1224_s2] ss:$0 sm:$0xff] }
  0x16   :  { %857 = vmatprep.subr.bf16.mxu1 %v934_v21  ;;  %v970_v1 = vld [vmem:[%s1222_s1 + $0x1f0] sm:$0xff]   ;;  %v974_v5 = vld [vmem:[%s1222_s1 + $0x1f8] sm:$0xff]  }
  0x17   :  { %v971_v2 = vld [vmem:[%s1222_s1 + $0x130] sm:$0xff]   ;;  %v975_v6 = vld [vmem:[%s1222_s1 + $0x138] sm:$0xff]  }
  0x18   :  { %836 = vmatpush3.bf16.msra.mxu0 %v935_v22  ;;  %v972_v3 = vld [vmem:[%s1222_s1 + $0x1b0] sm:$0xff]   ;;  %v976_v7 = vld [vmem:[%s1222_s1 + $0x1b8] sm:$0xff]  }
  0x19   :  { %858 = vmatpush3.bf16.msra.mxu1 %v936_v23  ;;  %837 = vmatprep.subr.bf16.mxu0 %v937_v24  ;;  %v17_v8 = vld [vmem:[%s1223_s0 + $0x10] sm:$0xff]  ;;  %v18_v12 = vld [vmem:[%s1223_s0 + $0x18] sm:$0xff] }
  0x1a   :  { %859 = vmatprep.subr.bf16.mxu1 %v938_v25  ;;  %v21_v9 = vld [vmem:[%s1223_s0 + $0x30] sm:$0xff]  ;;  %v22_v13 = vld [vmem:[%s1223_s0 + $0x38] sm:$0xff] }
  0x1b   :  { %v757_v10 = vcombine.low %v17_v8, %v21_v9  ;;  %v758_v11 = vcombine.high %v17_v8, %v21_v9  ;;  %v759_v14 = vcombine.low %v18_v12, %v22_v13  ;;  %v760_v15 = vcombine.high %v18_v12, %v22_v13 }
  0x1c   :  { %838 = vmatpush3.bf16.msra.mxu0 %v939_v26 }
  0x1d   :  { %860 = vmatpush3.bf16.msra.mxu1 %v940_v27  ;;  %839 = vmatprep.subr.bf16.mxu0 %v941_v28 }
  0x1e   :  { %861 = vmatprep.subr.bf16.mxu1 %v942_v29 }
  0x20   :  { %840 = vmatpush3.bf16.msra.mxu0 %v943_v30 }
  0x21   :  { %862 = vmatpush3.bf16.msra.mxu1 %v944_v31  ;;  %869 = vmatprep.subr.bf16.mxu0 %v945_v40 }
  0x22   :  { %891 = vmatprep.subr.bf16.mxu1 %v946_v41 }
  0x23   :  { %615 = vmatmul.mubr.bf16.vlgmr.msra.gmra.mrb[0].mxu0 %v753_v35 }
  0x24   :  { %656 = vmatmul.mubr.bf16.vlgmr.msra.gmra.mrb[0].mxu1 %v755_v38  ;;  %870 = vmatpush3.bf16.msra.mxu0 %v947_v42 }
  0x25   :  { %892 = vmatpush3.bf16.msra.mxu1 %v948_v43  ;;  %871 = vmatprep.subr.bf16.mxu0 %v949_v44 }
  0x26   :  { %893 = vmatprep.subr.bf16.mxu1 %v950_v45  ;;  %696 = vmatprep.mubr.bf16.mxu0 %v758_v11 }
  0x27   :  { %737 = vmatprep.mubr.bf16.mxu1 %v760_v15 }
  0x28   :  { %872 = vmatpush3.bf16.msra.mxu0 %v951_v46 }
  0x29   :  { %894 = vmatpush3.bf16.msra.mxu1 %v952_v47  ;;  %873 = vmatprep.subr.bf16.mxu0 %v953_v48 }
  0x2a   :  { %895 = vmatprep.subr.bf16.mxu1 %v954_v49 }
  0x2c   :  { %874 = vmatpush3.bf16.msra.mxu0 %v955_v50 }
  0x2d   :  { %896 = vmatpush3.bf16.msra.mxu1 %v956_v51  ;;  %875 = vmatprep.subr.bf16.mxu0 %v957_v52 }
  0x2e   :  { %897 = vmatprep.subr.bf16.mxu1 %v958_v53 }
  0x30   :  { %876 = vmatpush3.bf16.msra.mxu0 %v959_v54 }
  0x31   :  { %898 = vmatpush3.bf16.msra.mxu1 %v960_v55  ;;  %877 = vmatprep.subr.bf16.mxu0 %v961_v56 }
  0x32   :  { %899 = vmatprep.subr.bf16.mxu1 %v962_v57 }
  0x34   :  { %878 = vmatpush3.bf16.msra.mxu0 %v963_v58 }
  0x35   :  { %900 = vmatpush3.bf16.msra.mxu1 %v964_v59  ;;  %879 = vmatprep.subr.bf16.mxu0 %v965_v60 }
  0x36   :  { %901 = vmatprep.subr.bf16.mxu1 %v966_v61 }
  0x38   :  { %880 = vmatpush3.bf16.msra.mxu0 %v967_v62 }
  0x39   :  { %902 = vmatpush3.bf16.msra.mxu1 %v968_v63  ;;  %881 = vmatprep.subr.bf16.mxu0 %v969_v0 }
  0x3a   :  { %903 = vmatprep.subr.bf16.mxu1 %v970_v1 }
  0x3c   :  { %882 = vmatpush3.bf16.msra.mxu0 %v971_v2 }
  0x3d   :  { %904 = vmatpush3.bf16.msra.mxu1 %v972_v3  ;;  %883 = vmatprep.subr.bf16.mxu0 %v973_v4 }
  0x3e   :  { %905 = vmatprep.subr.bf16.mxu1 %v974_v5 }
  0x40   :  { %884 = vmatpush3.bf16.msra.mxu0 %v975_v6 }
  0x41   :  { %906 = vmatpush3.bf16.msra.mxu1 %v976_v7 }
  0x43   :  { %697 = vmatmul.mubr.bf16.vlgmr.msra.gmra.mrb[4].mxu0 %v757_v10 }
  0x44   :  { %738 = vmatmul.mubr.bf16.vlgmr.msra.gmra.mrb[4].mxu1 %v759_v14 }
  0xf6   :  { %v841_v16 = vpop.f32.mrb[0].mxu0 }
  0xf7   :  { %v863_v17 = vpop.f32.mrb[0].mxu1  ;;  %v842_v19 = vpop.f32.mrb[1].mxu0 }
  0xf8   :  { %v843_v20 = vadd.f32 %v842_v19, %v841_v16  ;;  %v864_v21 = vpop.f32.mrb[1].mxu1  ;;  %v844_v22 = vpop.f32.mrb[2].mxu0 }
  0xf9   :  { %v865_v23 = vadd.f32 %v864_v21, %v863_v17  ;;  %v866_v24 = vpop.f32.mrb[2].mxu1  ;;  %v845_v25 = vpop.f32.mrb[3].mxu0 }
  0xfa   :  { %v617_v26 = vadd.f32 %v843_v20, %v752_v18  ;;  %v846_v27 = vadd.f32 %v845_v25, %v844_v22  ;;  %v867_v28 = vpop.f32.mrb[3].mxu1 }
  0xfb   :  { %v868_v29 = vadd.f32 %v867_v28, %v866_v24 }
  0xfc   :  { %v658_v30 = vadd.f32 %v865_v23, %v617_v26  ;;  %v620_v31 = vadd.f32 %v846_v27, %v752_v18 }
  0xfe   :  { %v661_v32 = vadd.f32 %v868_v29, %v620_v31 }
 0x116   :  { %v885_v33 = vpop.f32.mrb[4].mxu0 }
 0x117   :  { %v907_v34 = vpop.f32.mrb[4].mxu1  ;;  %v886_v35 = vpop.f32.mrb[5].mxu0 }
 0x118   :  { %v887_v36 = vadd.f32 %v886_v35, %v885_v33  ;;  %v908_v37 = vpop.f32.mrb[5].mxu1  ;;  %v888_v38 = vpop.f32.mrb[6].mxu0 }
 0x119   :  { %v909_v39 = vadd.f32 %v908_v37, %v907_v34  ;;  %v910_v40 = vpop.f32.mrb[6].mxu1  ;;  %v889_v41 = vpop.f32.mrb[7].mxu0 }
 0x11a   :  { %v699_v42 = vadd.f32 %v887_v36, %v658_v30  ;;  %v890_v43 = vadd.f32 %v889_v41, %v888_v38  ;;  %v911_v44 = vpop.f32.mrb[7].mxu1 }
 0x11b   :  { %v912_v45 = vadd.f32 %v911_v44, %v910_v40 }
 0x11c   :  { %v740_v46 = vadd.f32 %v909_v39, %v699_v42  ;;  %v702_v47 = vadd.f32 %v890_v43, %v661_v32 }
 0x11e   :  { %746 = vst [vmem:[%s1225_s3] sm:$0xff] %v740_v46  ;;  %v743_v48 = vadd.f32 %v912_v45, %v702_v47 }
 0x120   :  { %747 = vst [vmem:[%s1225_s3 + $0x8] sm:$0xff] %v743_v48 }

// kernel: f_net_forward.143
= control target key start
LH: loop header
LB: loop body
LE: loop exit
PB: predicated region body
PF: predicated region fallthrough
CT: control target
= control target key end

     0   :  { %s2704_s1 = inlined_call_operand.vmem [shape: bf16[2304,128], index: 1, kind: input, shape index: {}]   ;;  %s2705_s0 = inlined_call_operand.vmem [shape: bf16[16,2304], index: 0, kind: input, shape index: {}]   ;;  %s2706_s2 = inlined_call_operand.vmem [shape: f32[1,128], index: 2, kind: input, shape index: {}]   ;;  %s2707_s3 = inlined_call_operand.vmem [shape: f32[16,128], index: 3, kind: output, shape index: {}]  }
   0x1   :  { %v2018_v0 = vld [vmem:[%s2704_s1 + $0x40] sm:$0xff]   ;;  %v2022_v4 = vld [vmem:[%s2704_s1 + $0x48] sm:$0xff]   ;;  %v2026_v8 = vld [vmem:[%s2704_s1 + $0x50] sm:$0xff]  }
   0x2   :  { %v2019_v1 = vld [vmem:[%s2704_s1] sm:$0xff]   ;;  %1820 = vmatprep.subr.bf16.mxu0 %v2018_v0  ;;  %v2023_v5 = vld [vmem:[%s2704_s1 + $0x8] sm:$0xff]   ;;  %v2027_v9 = vld [vmem:[%s2704_s1 + $0x10] sm:$0xff]  }
   0x3   :  { %v2020_v2 = vld [vmem:[%s2704_s1 + $0xc0] sm:$0xff]   ;;  %1821 = vmatpush3.bf16.msra.mxu0 %v2019_v1  ;;  %v2024_v6 = vld [vmem:[%s2704_s1 + $0xc8] sm:$0xff]   ;;  %v2028_v10 = vld [vmem:[%s2704_s1 + $0xd0] sm:$0xff]  }
   0x4   :  { %v2021_v3 = vld [vmem:[%s2704_s1 + $0x80] sm:$0xff]   ;;  %1842 = vmatprep.subr.bf16.mxu1 %v2020_v2  ;;  %1822 = vmatprep.subr.bf16.mxu0 %v2022_v4  ;;  %v2025_v7 = vld [vmem:[%s2704_s1 + $0x88] sm:$0xff]   ;;  %v2029_v11 = vld [vmem:[%s2704_s1 + $0x90] sm:$0xff]  }
   0x5   :  { %1843 = vmatpush3.bf16.msra.mxu1 %v2021_v3  ;;  %v2030_v12 = vld [vmem:[%s2704_s1 + $0x58] sm:$0xff]   ;;  %v2034_v16 = vld [vmem:[%s2704_s1 + $0x60] sm:$0xff]   ;;  %v2038_v20 = vld [vmem:[%s2704_s1 + $0x68] sm:$0xff]  }
   0x6   :  { %1844 = vmatprep.subr.bf16.mxu1 %v2024_v6  ;;  %v2031_v13 = vld [vmem:[%s2704_s1 + $0x18] sm:$0xff]   ;;  %v2035_v17 = vld [vmem:[%s2704_s1 + $0x20] sm:$0xff]   ;;  %v2039_v21 = vld [vmem:[%s2704_s1 + $0x28] sm:$0xff]  }
   0x7   :  { %1823 = vmatpush3.bf16.msra.mxu0 %v2023_v5  ;;  %v2032_v14 = vld [vmem:[%s2704_s1 + $0xd8] sm:$0xff]   ;;  %v2036_v18 = vld [vmem:[%s2704_s1 + $0xe0] sm:$0xff]   ;;  %v2040_v22 = vld [vmem:[%s2704_s1 + $0xe8] sm:$0xff]  }
   0x8   :  { %1824 = vmatprep.subr.bf16.mxu0 %v2026_v8  ;;  %v2033_v15 = vld [vmem:[%s2704_s1 + $0x98] sm:$0xff]   ;;  %v2037_v19 = vld [vmem:[%s2704_s1 + $0xa0] sm:$0xff]   ;;  %v2041_v23 = vld [vmem:[%s2704_s1 + $0xa8] sm:$0xff]  }
   0x9   :  { %1845 = vmatpush3.bf16.msra.mxu1 %v2025_v7  ;;  %v2042_v24 = vld [vmem:[%s2704_s1 + $0x70] sm:$0xff]   ;;  %v2046_v28 = vld [vmem:[%s2704_s1 + $0x78] sm:$0xff]   ;;  %v2049_v31 = vld [vmem:[%s2705_s0] ss:$72 sps:$4 sm:$0xff]  }
   0xa   :  { %1846 = vmatprep.subr.bf16.mxu1 %v2028_v10  ;;  %v2043_v25 = vld [vmem:[%s2704_s1 + $0x30] sm:$0xff]   ;;  %v2047_v29 = vld [vmem:[%s2704_s1 + $0x38] sm:$0xff]   ;;  %v2051_v32 = vld [vmem:[%s2705_s0 + $0x4] ss:$72 sps:$4 sm:$0xff]  }
   0xb   :  { %1825 = vmatpush3.bf16.msra.mxu0 %v2027_v9  ;;  %v2044_v26 = vld [vmem:[%s2704_s1 + $0xf0] sm:$0xff]   ;;  %v2048_v30 = vld [vmem:[%s2704_s1 + $0xf8] sm:$0xff]   ;;  %1314 = vmatprep.mubr.bf16.mxu0 %v2051_v32  ;;  %v2053_v34 = vld [vmem:[%s2704_s1 + $0x140] sm:$0xff]  }
   0xc   :  { %1826 = vmatprep.subr.bf16.mxu0 %v2030_v12  ;;  %v2045_v27 = vld [vmem:[%s2704_s1 + $0xb0] sm:$0xff]   ;;  %v2052_v33 = vld [vmem:[%s2704_s1 + $0xb8] sm:$0xff]   ;;  %v2057_v37 = vld [vmem:[%s2704_s1 + $0x100] sm:$0xff]  }
   0xd   :  { %1847 = vmatpush3.bf16.msra.mxu1 %v2029_v11  ;;  %v2054_v35 = vld [vmem:[%s2705_s0 + $0x8] ss:$72 sps:$4 sm:$0xff]   ;;  %v2056_v36 = vld [vmem:[%s2705_s0 + $0xc] ss:$72 sps:$4 sm:$0xff]   ;;  %v2058_v38 = vld [vmem:[%s2704_s1 + $0x1c0] sm:$0xff]  }
   0xe   :  { %1848 = vmatprep.subr.bf16.mxu1 %v2032_v14  ;;  %1355 = vmatprep.mubr.bf16.mxu1 %v2056_v36  ;;  %v2059_v39 = vld [vmem:[%s2704_s1 + $0x180] sm:$0xff]   ;;  %v2060_v40 = vld [vmem:[%s2704_s1 + $0x148] sm:$0xff]   ;;  %v2064_v44 = vld [vmem:[%s2704_s1 + $0x150] sm:$0xff]  }
   0xf   :  { %1827 = vmatpush3.bf16.msra.mxu0 %v2031_v13  ;;  %v2061_v41 = vld [vmem:[%s2704_s1 + $0x108] sm:$0xff]   ;;  %v2065_v45 = vld [vmem:[%s2704_s1 + $0x110] sm:$0xff]   ;;  %v2068_v48 = vld [vmem:[%s2704_s1 + $0x158] sm:$0xff]  }
  0x10   :  { %1828 = vmatprep.subr.bf16.mxu0 %v2034_v16  ;;  %v2062_v42 = vld [vmem:[%s2704_s1 + $0x1c8] sm:$0xff]   ;;  %v2066_v46 = vld [vmem:[%s2704_s1 + $0x1d0] sm:$0xff]   ;;  %v2069_v49 = vld [vmem:[%s2704_s1 + $0x118] sm:$0xff]  }
  0x11   :  { %1849 = vmatpush3.bf16.msra.mxu1 %v2033_v15  ;;  %v2063_v43 = vld [vmem:[%s2704_s1 + $0x188] sm:$0xff]   ;;  %v2067_v47 = vld [vmem:[%s2704_s1 + $0x190] sm:$0xff]   ;;  %v2070_v50 = vld [vmem:[%s2704_s1 + $0x1d8] sm:$0xff]  }
  0x12   :  { %1850 = vmatprep.subr.bf16.mxu1 %v2036_v18  ;;  %v2071_v51 = vld [vmem:[%s2704_s1 + $0x198] sm:$0xff]   ;;  %v2072_v52 = vld [vmem:[%s2704_s1 + $0x160] sm:$0xff]   ;;  %v2076_v56 = vld [vmem:[%s2704_s1 + $0x168] sm:$0xff]  }
  0x13   :  { %1829 = vmatpush3.bf16.msra.mxu0 %v2035_v17  ;;  %v2073_v53 = vld [vmem:[%s2704_s1 + $0x120] sm:$0xff]   ;;  %v2077_v57 = vld [vmem:[%s2704_s1 + $0x128] sm:$0xff]   ;;  %v2080_v60 = vld [vmem:[%s2704_s1 + $0x170] sm:$0xff]  }
  0x14   :  { %1830 = vmatprep.subr.bf16.mxu0 %v2038_v20  ;;  %v2074_v54 = vld [vmem:[%s2704_s1 + $0x1e0] sm:$0xff]   ;;  %v2078_v58 = vld [vmem:[%s2704_s1 + $0x1e8] sm:$0xff]   ;;  %v2081_v61 = vld [vmem:[%s2704_s1 + $0x130] sm:$0xff]  }
  0x15   :  { %1851 = vmatpush3.bf16.msra.mxu1 %v2037_v19  ;;  %v2075_v55 = vld [vmem:[%s2704_s1 + $0x1a0] sm:$0xff]   ;;  %v2079_v59 = vld [vmem:[%s2704_s1 + $0x1a8] sm:$0xff]   ;;  %v2082_v62 = vld [vmem:[%s2704_s1 + $0x1f0] sm:$0xff]  }
  0x16   :  { %1852 = vmatprep.subr.bf16.mxu1 %v2040_v22  ;;  %v2083_v63 = vld [vmem:[%s2704_s1 + $0x1b0] sm:$0xff]   ;;  %v2084_v0 = vld [vmem:[%s2704_s1 + $0x178] sm:$0xff]   ;;  %v2091_v6 = vld [vmem:[%s2704_s1 + $0x240] sm:$0xff]  }
  0x17   :  { %1831 = vmatpush3.bf16.msra.mxu0 %v2039_v21  ;;  %v2085_v1 = vld [vmem:[%s2704_s1 + $0x138] sm:$0xff]   ;;  %v2095_v9 = vld [vmem:[%s2704_s1 + $0x200] sm:$0xff]   ;;  %v2098_v12 = vld [vmem:[%s2704_s1 + $0x248] sm:$0xff]  }
  0x18   :  { %1832 = vmatprep.subr.bf16.mxu0 %v2042_v24  ;;  %v2086_v2 = vld [vmem:[%s2704_s1 + $0x1f8] sm:$0xff]   ;;  %v2096_v10 = vld [vmem:[%s2704_s1 + $0x2c0] sm:$0xff]   ;;  %v2099_v13 = vld [vmem:[%s2704_s1 + $0x208] sm:$0xff]  }
  0x19   :  { %1853 = vmatpush3.bf16.msra.mxu1 %v2041_v23  ;;  %v2087_v3 = vld [vmem:[%s2705_s0 + $0x10] ss:$72 sps:$4 sm:$0xff]   ;;  %v2089_v4 = vld [vmem:[%s2705_s0 + $0x14] ss:$72 sps:$4 sm:$0xff]   ;;  %v2097_v11 = vld [vmem:[%s2704_s1 + $0x280] sm:$0xff]  }
  0x1a   :  { %1854 = vmatprep.subr.bf16.mxu1 %v2044_v26  ;;  %v2090_v5 = vld [vmem:[%s2704_s1 + $0x1b8] sm:$0xff]   ;;  %v2100_v14 = vld [vmem:[%s2704_s1 + $0x2c8] sm:$0xff]   ;;  %v2102_v16 = vld [vmem:[%s2704_s1 + $0x250] sm:$0xff]  }
  0x1b   :  { %1833 = vmatpush3.bf16.msra.mxu0 %v2043_v25  ;;  %v2092_v7 = vld [vmem:[%s2705_s0 + $0x18] ss:$72 sps:$4 sm:$0xff]   ;;  %v2094_v8 = vld [vmem:[%s2705_s0 + $0x1c] ss:$72 sps:$4 sm:$0xff]   ;;  %v2101_v15 = vld [vmem:[%s2704_s1 + $0x288] sm:$0xff]  }
  0x1c   :  { %1834 = vmatprep.subr.bf16.mxu0 %v2046_v28  ;;  %v2103_v17 = vld [vmem:[%s2704_s1 + $0x210] sm:$0xff]   ;;  %v2106_v20 = vld [vmem:[%s2704_s1 + $0x258] sm:$0xff]   ;;  %v2110_v24 = vld [vmem:[%s2704_s1 + $0x260] sm:$0xff]  }
  0x1d   :  { %1855 = vmatpush3.bf16.msra.mxu1 %v2045_v27  ;;  %v2104_v18 = vld [vmem:[%s2704_s1 + $0x2d0] sm:$0xff]   ;;  %v2107_v21 = vld [vmem:[%s2704_s1 + $0x218] sm:$0xff]   ;;  %v2111_v25 = vld [vmem:[%s2704_s1 + $0x220] sm:$0xff]  }
  0x1e   :  { %1856 = vmatprep.subr.bf16.mxu1 %v2048_v30  ;;  %v2105_v19 = vld [vmem:[%s2704_s1 + $0x290] sm:$0xff]   ;;  %v2108_v22 = vld [vmem:[%s2704_s1 + $0x2d8] sm:$0xff]   ;;  %v2112_v26 = vld [vmem:[%s2704_s1 + $0x2e0] sm:$0xff]  }
  0x1f   :  { %1835 = vmatpush3.bf16.msra.mxu0 %v2047_v29  ;;  %v2109_v23 = vld [vmem:[%s2704_s1 + $0x298] sm:$0xff]   ;;  %v2113_v27 = vld [vmem:[%s2704_s1 + $0x2a0] sm:$0xff]   ;;  %v2114_v28 = vld [vmem:[%s2704_s1 + $0x268] sm:$0xff]  }
  0x20   :  { %1864 = vmatprep.subr.bf16.mxu0 %v2053_v34  ;;  %v2115_v29 = vld [vmem:[%s2704_s1 + $0x228] sm:$0xff]   ;;  %v2118_v32 = vld [vmem:[%s2704_s1 + $0x270] sm:$0xff]   ;;  %v2122_v36 = vld [vmem:[%s2704_s1 + $0x278] sm:$0xff]  }
  0x21   :  { %1857 = vmatpush3.bf16.msra.mxu1 %v2052_v33  ;;  %v2116_v30 = vld [vmem:[%s2704_s1 + $0x2e8] sm:$0xff]   ;;  %v2119_v33 = vld [vmem:[%s2704_s1 + $0x230] sm:$0xff]  }
  0x22   :  { %1315 = vmatmul.mubr.bf16.vlgmr.msra.gmra.mrb[0].mxu0 %v2049_v31  ;;  %1886 = vmatprep.subr.bf16.mxu1 %v2058_v38  ;;  %v2117_v31 = vld [vmem:[%s2704_s1 + $0x2a8] sm:$0xff]   ;;  %v2120_v34 = vld [vmem:[%s2704_s1 + $0x2f0] sm:$0xff]   ;;  %v2124_v38 = vld [vmem:[%s2704_s1 + $0x2f8] sm:$0xff]  }
  0x23   :  { %1865 = vmatpush3.bf16.msra.mxu0 %v2057_v37  ;;  %1396 = vmatprep.mubr.bf16.mxu0 %v2089_v4  ;;  %v2123_v37 = vld [vmem:[%s2704_s1 + $0x238] sm:$0xff]   ;;  %v2156_v4 = vld [vmem:[%s2704_s1 + $0x370] sm:$0xff]  }
  0x24   :  { %1356 = vmatmul.mubr.bf16.vlgmr.msra.gmra.mrb[0].mxu1 %v2054_v35  ;;  %1866 = vmatprep.subr.bf16.mxu0 %v2060_v40  ;;  %v2121_v35 = vld [vmem:[%s2704_s1 + $0x2b0] sm:$0xff]   ;;  %v2127_v40 = vld [vmem:[%s2705_s0 + $0x24] ss:$72 sps:$4 sm:$0xff]  }
  0x25   :  { %1887 = vmatpush3.bf16.msra.mxu1 %v2059_v39  ;;  %1437 = vmatprep.mubr.bf16.mxu1 %v2094_v8  ;;  %v2125_v39 = vld [vmem:[%s2705_s0 + $0x20] ss:$72 sps:$4 sm:$0xff]   ;;  %v2160_v8 = vld [vmem:[%s2704_s1 + $0x378] sm:$0xff]  }
  0x26   :  { %1888 = vmatprep.subr.bf16.mxu1 %v2062_v42  ;;  %v2129_v42 = vld [vmem:[%s2704_s1 + $0x340] sm:$0xff]  }
  0x27   :  { %1867 = vmatpush3.bf16.msra.mxu0 %v2061_v41  ;;  %v2128_v41 = vld [vmem:[%s2704_s1 + $0x2b8] sm:$0xff]  }
  0x28   :  { %1868 = vmatprep.subr.bf16.mxu0 %v2064_v44  ;;  %v2132_v44 = vld [vmem:[%s2705_s0 + $0x2c] ss:$72 sps:$4 sm:$0xff]  }
  0x29   :  { %1889 = vmatpush3.bf16.msra.mxu1 %v2063_v43  ;;  %v2130_v43 = vld [vmem:[%s2705_s0 + $0x28] ss:$72 sps:$4 sm:$0xff]  }
  0x2a   :  { %1890 = vmatprep.subr.bf16.mxu1 %v2066_v46  ;;  %v2134_v46 = vld [vmem:[%s2704_s1 + $0x3c0] sm:$0xff]  }
  0x2b   :  { %1869 = vmatpush3.bf16.msra.mxu0 %v2065_v45  ;;  %v2133_v45 = vld [vmem:[%s2704_s1 + $0x300] sm:$0xff]  }
  0x2c   :  { %1870 = vmatprep.subr.bf16.mxu0 %v2068_v48  ;;  %v2136_v48 = vld [vmem:[%s2704_s1 + $0x348] sm:$0xff]  }
  0x2d   :  { %1891 = vmatpush3.bf16.msra.mxu1 %v2067_v47  ;;  %v2135_v47 = vld [vmem:[%s2704_s1 + $0x380] sm:$0xff]  }
  0x2e   :  { %1892 = vmatprep.subr.bf16.mxu1 %v2070_v50  ;;  %v2138_v50 = vld [vmem:[%s2704_s1 + $0x3c8] sm:$0xff]  }
  0x2f   :  { %1871 = vmatpush3.bf16.msra.mxu0 %v2069_v49  ;;  %v2137_v49 = vld [vmem:[%s2704_s1 + $0x308] sm:$0xff]  }
  0x30   :  { %1872 = vmatprep.subr.bf16.mxu0 %v2072_v52  ;;  %v2140_v52 = vld [vmem:[%s2704_s1 + $0x350] sm:$0xff]  }
  0x31   :  { %1893 = vmatpush3.bf16.msra.mxu1 %v2071_v51  ;;  %v2139_v51 = vld [vmem:[%s2704_s1 + $0x388] sm:$0xff]  }
  0x32   :  { %1894 = vmatprep.subr.bf16.mxu1 %v2074_v54  ;;  %v2142_v54 = vld [vmem:[%s2704_s1 + $0x3d0] sm:$0xff]  }
  0x33   :  { %1873 = vmatpush3.bf16.msra.mxu0 %v2073_v53  ;;  %v2141_v53 = vld [vmem:[%s2704_s1 + $0x310] sm:$0xff]  }
  0x34   :  { %1874 = vmatprep.subr.bf16.mxu0 %v2076_v56  ;;  %v2144_v56 = vld [vmem:[%s2704_s1 + $0x358] sm:$0xff]  }
  0x35   :  { %1895 = vmatpush3.bf16.msra.mxu1 %v2075_v55  ;;  %v2143_v55 = vld [vmem:[%s2704_s1 + $0x390] sm:$0xff]  }
  0x36   :  { %1896 = vmatprep.subr.bf16.mxu1 %v2078_v58  ;;  %v2146_v58 = vld [vmem:[%s2704_s1 + $0x3d8] sm:$0xff]  }
  0x37   :  { %1875 = vmatpush3.bf16.msra.mxu0 %v2077_v57  ;;  %v2145_v57 = vld [vmem:[%s2704_s1 + $0x318] sm:$0xff]  }
  0x38   :  { %1876 = vmatprep.subr.bf16.mxu0 %v2080_v60  ;;  %v2148_v60 = vld [vmem:[%s2704_s1 + $0x360] sm:$0xff]  }
  0x39   :  { %1897 = vmatpush3.bf16.msra.mxu1 %v2079_v59  ;;  %v2147_v59 = vld [vmem:[%s2704_s1 + $0x398] sm:$0xff]  }
  0x3a   :  { %1898 = vmatprep.subr.bf16.mxu1 %v2082_v62  ;;  %v2150_v62 = vld [vmem:[%s2704_s1 + $0x3e0] sm:$0xff]  }
  0x3b   :  { %1877 = vmatpush3.bf16.msra.mxu0 %v2081_v61  ;;  %v2149_v61 = vld [vmem:[%s2704_s1 + $0x320] sm:$0xff]  }
  0x3c   :  { %1878 = vmatprep.subr.bf16.mxu0 %v2084_v0  ;;  %v2152_v0 = vld [vmem:[%s2704_s1 + $0x368] sm:$0xff]  }
  0x3d   :  { %1899 = vmatpush3.bf16.msra.mxu1 %v2083_v63  ;;  %v2151_v63 = vld [vmem:[%s2704_s1 + $0x3a0] sm:$0xff]  }
  0x3e   :  { %1900 = vmatprep.subr.bf16.mxu1 %v2086_v2  ;;  %v2154_v2 = vld [vmem:[%s2704_s1 + $0x3e8] sm:$0xff]  }
  0x3f   :  { %1879 = vmatpush3.bf16.msra.mxu0 %v2085_v1  ;;  %v2153_v1 = vld [vmem:[%s2704_s1 + $0x328] sm:$0xff]  }
  0x40   :  { %1908 = vmatprep.subr.bf16.mxu0 %v2091_v6  ;;  %v2158_v6 = vld [vmem:[%s2704_s1 + $0x3f0] sm:$0xff]  }
  0x41   :  { %1901 = vmatpush3.bf16.msra.mxu1 %v2090_v5  ;;  %v2157_v5 = vld [vmem:[%s2704_s1 + $0x330] sm:$0xff]  }
  0x42   :  { %1397 = vmatmul.mubr.bf16.vlgmr.msra.gmra.mrb[4].mxu0 %v2087_v3  ;;  %1930 = vmatprep.subr.bf16.mxu1 %v2096_v10  ;;  %v2155_v3 = vld [vmem:[%s2704_s1 + $0x3a8] sm:$0xff]   ;;  %v2162_v10 = vld [vmem:[%s2704_s1 + $0x3f8] sm:$0xff]  }
  0x43   :  { %1909 = vmatpush3.bf16.msra.mxu0 %v2095_v9  ;;  %1478 = vmatprep.mubr.bf16.mxu0 %v2127_v40  ;;  %v2161_v9 = vld [vmem:[%s2704_s1 + $0x338] sm:$0xff]  }
  0x44   :  { %1438 = vmatmul.mubr.bf16.vlgmr.msra.gmra.mrb[4].mxu1 %v2092_v7  ;;  %1910 = vmatprep.subr.bf16.mxu0 %v2098_v12  ;;  %v2159_v7 = vld [vmem:[%s2704_s1 + $0x3b0] sm:$0xff]  }
  0x45   :  { %1931 = vmatpush3.bf16.msra.mxu1 %v2097_v11  ;;  %1519 = vmatprep.mubr.bf16.mxu1 %v2132_v44  ;;  %v2163_v11 = vld [vmem:[%s2705_s0 + $0x30] ss:$72 sps:$4 sm:$0xff]   ;;  %v2165_v12 = vld [vmem:[%s2705_s0 + $0x34] ss:$72 sps:$4 sm:$0xff]  }
  0x46   :  { %1932 = vmatprep.subr.bf16.mxu1 %v2100_v14  ;;  %v2167_v14 = vld [vmem:[%s2704_s1 + $0x440] sm:$0xff]  }
  0x47   :  { %1911 = vmatpush3.bf16.msra.mxu0 %v2099_v13  ;;  %v2166_v13 = vld [vmem:[%s2704_s1 + $0x3b8] sm:$0xff]  }
  0x48   :  { %1912 = vmatprep.subr.bf16.mxu0 %v2102_v16  ;;  %v2170_v16 = vld [vmem:[%s2705_s0 + $0x3c] ss:$72 sps:$4 sm:$0xff]  }
  0x49   :  { %1933 = vmatpush3.bf16.msra.mxu1 %v2101_v15  ;;  %v2168_v15 = vld [vmem:[%s2705_s0 + $0x38] ss:$72 sps:$4 sm:$0xff]  }
  0x4a   :  { %1934 = vmatprep.subr.bf16.mxu1 %v2104_v18  ;;  %v2172_v18 = vld [vmem:[%s2704_s1 + $0x448] sm:$0xff]  }
  0x4b   :  { %1913 = vmatpush3.bf16.msra.mxu0 %v2103_v17  ;;  %v2171_v17 = vld [vmem:[%s2704_s1 + $0x400] sm:$0xff]  }
  0x4c   :  { %1914 = vmatprep.subr.bf16.mxu0 %v2106_v20  ;;  %v2174_v20 = vld [vmem:[%s2704_s1 + $0x450] sm:$0xff]  }
  0x4d   :  { %1935 = vmatpush3.bf16.msra.mxu1 %v2105_v19  ;;  %v2173_v19 = vld [vmem:[%s2704_s1 + $0x408] sm:$0xff]  }
  0x4e   :  { %1936 = vmatprep.subr.bf16.mxu1 %v2108_v22  ;;  %v2176_v22 = vld [vmem:[%s2704_s1 + $0x458] sm:$0xff]  }
  0x4f   :  { %1915 = vmatpush3.bf16.msra.mxu0 %v2107_v21  ;;  %v2175_v21 = vld [vmem:[%s2704_s1 + $0x410] sm:$0xff]  }
  0x50   :  { %1916 = vmatprep.subr.bf16.mxu0 %v2110_v24  ;;  %v2178_v24 = vld [vmem:[%s2704_s1 + $0x460] sm:$0xff]  }
  0x51   :  { %1937 = vmatpush3.bf16.msra.mxu1 %v2109_v23  ;;  %v2177_v23 = vld [vmem:[%s2704_s1 + $0x418] sm:$0xff]  }
  0x52   :  { %1938 = vmatprep.subr.bf16.mxu1 %v2112_v26  ;;  %v2180_v26 = vld [vmem:[%s2704_s1 + $0x468] sm:$0xff]  }
  0x53   :  { %1917 = vmatpush3.bf16.msra.mxu0 %v2111_v25  ;;  %v2179_v25 = vld [vmem:[%s2704_s1 + $0x420] sm:$0xff]  }
  0x54   :  { %1918 = vmatprep.subr.bf16.mxu0 %v2114_v28  ;;  %v2181_v28 = vld [vmem:[%s2704_s1 + $0x428] sm:$0xff]  }
  0x55   :  { %1939 = vmatpush3.bf16.msra.mxu1 %v2113_v27  ;;  %v2188_v27 = vld [vmem:[%s2705_s0 + $0x44] ss:$72 sps:$4 sm:$0xff]  }
  0x56   :  { %1940 = vmatprep.subr.bf16.mxu1 %v2116_v30  ;;  %v2183_v30 = vld [vmem:[%s2704_s1 + $0x430] sm:$0xff]  }
  0x57   :  { %1919 = vmatpush3.bf16.msra.mxu0 %v2115_v29  ;;  %v2182_v29 = vld [vmem:[%s2704_s1 + $0x470] sm:$0xff]  }
  0x58   :  { %1920 = vmatprep.subr.bf16.mxu0 %v2118_v32  ;;  %v2185_v32 = vld [vmem:[%s2704_s1 + $0x438] sm:$0xff]  }
  0x59   :  { %1941 = vmatpush3.bf16.msra.mxu1 %v2117_v31  ;;  %v2184_v31 = vld [vmem:[%s2704_s1 + $0x478] sm:$0xff]  }
  0x5a   :  { %1942 = vmatprep.subr.bf16.mxu1 %v2120_v34 }
  0x5b   :  { %1921 = vmatpush3.bf16.msra.mxu0 %v2119_v33  ;;  %v2186_v33 = vld [vmem:[%s2705_s0 + $0x40] ss:$72 sps:$4 sm:$0xff]  }
  0x5c   :  { %1922 = vmatprep.subr.bf16.mxu0 %v2122_v36 }
  0x5d   :  { %1943 = vmatpush3.bf16.msra.mxu1 %v2121_v35  ;;  %v1657_v35 = vld [vmem:[%s2706_s2] ss:$0 sm:$0xff] }
  0x5e   :  { %1944 = vmatprep.subr.bf16.mxu1 %v2124_v38 }
  0x5f   :  { %1923 = vmatpush3.bf16.msra.mxu0 %v2123_v37 }
  0x60   :  { %1952 = vmatprep.subr.bf16.mxu0 %v2129_v42 }
  0x61   :  { %1945 = vmatpush3.bf16.msra.mxu1 %v2128_v41 }
  0x62   :  { %1479 = vmatmul.mubr.bf16.vlgmr.msra.gmra.mrb[8].mxu0 %v2125_v39  ;;  %1974 = vmatprep.subr.bf16.mxu1 %v2134_v46 }
  0x63   :  { %1953 = vmatpush3.bf16.msra.mxu0 %v2133_v45  ;;  %1560 = vmatprep.mubr.bf16.mxu0 %v2165_v12 }
  0x64   :  { %1520 = vmatmul.mubr.bf16.vlgmr.msra.gmra.mrb[8].mxu1 %v2130_v43  ;;  %1954 = vmatprep.subr.bf16.mxu0 %v2136_v48 }
  0x65   :  { %1975 = vmatpush3.bf16.msra.mxu1 %v2135_v47  ;;  %1601 = vmatprep.mubr.bf16.mxu1 %v2170_v16 }
  0x66   :  { %1976 = vmatprep.subr.bf16.mxu1 %v2138_v50 }
  0x67   :  { %1955 = vmatpush3.bf16.msra.mxu0 %v2137_v49 }
  0x68   :  { %1956 = vmatprep.subr.bf16.mxu0 %v2140_v52 }
  0x69   :  { %1977 = vmatpush3.bf16.msra.mxu1 %v2139_v51 }
  0x6a   :  { %1978 = vmatprep.subr.bf16.mxu1 %v2142_v54 }
  0x6b   :  { %1957 = vmatpush3.bf16.msra.mxu0 %v2141_v53 }
  0x6c   :  { %1958 = vmatprep.subr.bf16.mxu0 %v2144_v56 }
  0x6d   :  { %1979 = vmatpush3.bf16.msra.mxu1 %v2143_v55 }
  0x6e   :  { %1980 = vmatprep.subr.bf16.mxu1 %v2146_v58 }
  0x6f   :  { %1959 = vmatpush3.bf16.msra.mxu0 %v2145_v57 }
  0x70   :  { %1960 = vmatprep.subr.bf16.mxu0 %v2148_v60 }
  0x71   :  { %1981 = vmatpush3.bf16.msra.mxu1 %v2147_v59 }
  0x72   :  { %1982 = vmatprep.subr.bf16.mxu1 %v2150_v62 }
  0x73   :  { %1961 = vmatpush3.bf16.msra.mxu0 %v2149_v61 }
  0x74   :  { %1962 = vmatprep.subr.bf16.mxu0 %v2152_v0 }
  0x75   :  { %1983 = vmatpush3.bf16.msra.mxu1 %v2151_v63 }
  0x76   :  { %1984 = vmatprep.subr.bf16.mxu1 %v2154_v2 }
  0x77   :  { %1963 = vmatpush3.bf16.msra.mxu0 %v2153_v1 }
  0x78   :  { %1964 = vmatprep.subr.bf16.mxu0 %v2156_v4 }
  0x79   :  { %1985 = vmatpush3.bf16.msra.mxu1 %v2155_v3 }
  0x7a   :  { %1986 = vmatprep.subr.bf16.mxu1 %v2158_v6 }
  0x7b   :  { %1965 = vmatpush3.bf16.msra.mxu0 %v2157_v5 }
  0x7c   :  { %1966 = vmatprep.subr.bf16.mxu0 %v2160_v8 }
  0x7d   :  { %1987 = vmatpush3.bf16.msra.mxu1 %v2159_v7 }
  0x7e   :  { %1988 = vmatprep.subr.bf16.mxu1 %v2162_v10 }
  0x7f   :  { %1967 = vmatpush3.bf16.msra.mxu0 %v2161_v9 }
  0x80   :  { %1996 = vmatprep.subr.bf16.mxu0 %v2167_v14 }
  0x81   :  { %1989 = vmatpush3.bf16.msra.mxu1 %v2166_v13 }
  0x82   :  { %1561 = vmatmul.mubr.bf16.vlgmr.msra.gmra.mrb[12].mxu0 %v2163_v11 }
  0x83   :  { %1997 = vmatpush3.bf16.msra.mxu0 %v2171_v17  ;;  %1642 = vmatprep.mubr.bf16.mxu0 %v2188_v27 }
  0x84   :  { %1602 = vmatmul.mubr.bf16.vlgmr.msra.gmra.mrb[12].mxu1 %v2168_v15  ;;  %1998 = vmatprep.subr.bf16.mxu0 %v2172_v18 }
  0x87   :  { %1999 = vmatpush3.bf16.msra.mxu0 %v2173_v19 }
  0x88   :  { %2000 = vmatprep.subr.bf16.mxu0 %v2174_v20 }
  0x8b   :  { %2001 = vmatpush3.bf16.msra.mxu0 %v2175_v21 }
  0x8c   :  { %2002 = vmatprep.subr.bf16.mxu0 %v2176_v22 }
  0x8f   :  { %2003 = vmatpush3.bf16.msra.mxu0 %v2177_v23 }
  0x90   :  { %2004 = vmatprep.subr.bf16.mxu0 %v2178_v24 }
  0x93   :  { %2005 = vmatpush3.bf16.msra.mxu0 %v2179_v25 }
  0x94   :  { %2006 = vmatprep.subr.bf16.mxu0 %v2180_v26 }
  0x97   :  { %2007 = vmatpush3.bf16.msra.mxu0 %v2181_v28 }
  0x98   :  { %2008 = vmatprep.subr.bf16.mxu0 %v2182_v29 }
  0x9b   :  { %2009 = vmatpush3.bf16.msra.mxu0 %v2183_v30 }
  0x9c   :  { %2010 = vmatprep.subr.bf16.mxu0 %v2184_v31 }
  0x9f   :  { %2011 = vmatpush3.bf16.msra.mxu0 %v2185_v32 }
  0xa2   :  { %1643 = vmatmul.mubr.bf16.vlgmr.msra.gmra.mrb[16].mxu0 %v2186_v33 }
  0xf5   :  { %v1836_v34 = vpop.f32.mrb[0].mxu0 }
  0xf6   :  { %v1837_v36 = vpop.f32.mrb[1].mxu0 }
  0xf7   :  { %v1838_v37 = vadd.f32 %v1837_v36, %v1836_v34  ;;  %v1839_v38 = vpop.f32.mrb[2].mxu0  ;;  %v1858_v39 = vpop.f32.mrb[0].mxu1 }
  0xf8   :  { %v1840_v40 = vpop.f32.mrb[3].mxu0  ;;  %v1859_v43 = vpop.f32.mrb[1].mxu1 }
  0xf9   :  { %v1317_v41 = vadd.f32 %v1838_v37, %v1657_v35  ;;  %v1841_v42 = vadd.f32 %v1840_v40, %v1839_v38  ;;  %v1860_v44 = vadd.f32 %v1859_v43, %v1858_v39  ;;  %v1861_v45 = vpop.f32.mrb[2].mxu1 }
  0xfa   :  { %v1862_v47 = vpop.f32.mrb[3].mxu1 }
  0xfb   :  { %v1320_v46 = vadd.f32 %v1841_v42, %v1657_v35  ;;  %v1358_v48 = vadd.f32 %v1860_v44, %v1317_v41  ;;  %v1863_v49 = vadd.f32 %v1862_v47, %v1861_v45 }
  0xfd   :  { %v1361_v50 = vadd.f32 %v1863_v49, %v1320_v46 }
 0x115   :  { %v1880_v51 = vpop.f32.mrb[4].mxu0 }
 0x116   :  { %v1881_v52 = vpop.f32.mrb[5].mxu0 }
 0x117   :  { %v1882_v53 = vadd.f32 %v1881_v52, %v1880_v51  ;;  %v1883_v54 = vpop.f32.mrb[6].mxu0  ;;  %v1902_v57 = vpop.f32.mrb[4].mxu1 }
 0x118   :  { %v1884_v55 = vpop.f32.mrb[7].mxu0  ;;  %v1903_v59 = vpop.f32.mrb[5].mxu1 }
 0x119   :  { %v1399_v56 = vadd.f32 %v1882_v53, %v1358_v48  ;;  %v1885_v58 = vadd.f32 %v1884_v55, %v1883_v54  ;;  %v1904_v61 = vadd.f32 %v1903_v59, %v1902_v57  ;;  %v1905_v62 = vpop.f32.mrb[6].mxu1 }
 0x11a   :  { %v1906_v63 = vpop.f32.mrb[7].mxu1 }
 0x11b   :  { %v1402_v60 = vadd.f32 %v1885_v58, %v1361_v50  ;;  %v1440_v0 = vadd.f32 %v1904_v61, %v1399_v56  ;;  %v1907_v1 = vadd.f32 %v1906_v63, %v1905_v62 }
 0x11d   :  { %v1443_v2 = vadd.f32 %v1907_v1, %v1402_v60 }
 0x135   :  { %v1924_v3 = vpop.f32.mrb[8].mxu0 }
 0x136   :  { %v1925_v4 = vpop.f32.mrb[9].mxu0 }
 0x137   :  { %v1926_v5 = vadd.f32 %v1925_v4, %v1924_v3  ;;  %v1927_v6 = vpop.f32.mrb[10].mxu0  ;;  %v1946_v7 = vpop.f32.mrb[8].mxu1 }
 0x138   :  { %v1928_v8 = vpop.f32.mrb[11].mxu0  ;;  %v1947_v11 = vpop.f32.mrb[9].mxu1 }
 0x139   :  { %v1481_v9 = vadd.f32 %v1926_v5, %v1440_v0  ;;  %v1929_v10 = vadd.f32 %v1928_v8, %v1927_v6  ;;  %v1948_v12 = vadd.f32 %v1947_v11, %v1946_v7  ;;  %v1949_v13 = vpop.f32.mrb[10].mxu1 }
 0x13a   :  { %v1950_v15 = vpop.f32.mrb[11].mxu1 }
 0x13b   :  { %v1484_v14 = vadd.f32 %v1929_v10, %v1443_v2  ;;  %v1522_v16 = vadd.f32 %v1948_v12, %v1481_v9  ;;  %v1951_v17 = vadd.f32 %v1950_v15, %v1949_v13 }
 0x13d   :  { %v1525_v18 = vadd.f32 %v1951_v17, %v1484_v14 }
 0x155   :  { %v1968_v19 = vpop.f32.mrb[12].mxu0 }
 0x156   :  { %v1969_v20 = vpop.f32.mrb[13].mxu0 }
 0x157   :  { %v1970_v21 = vadd.f32 %v1969_v20, %v1968_v19  ;;  %v1971_v22 = vpop.f32.mrb[14].mxu0  ;;  %v1990_v23 = vpop.f32.mrb[12].mxu1 }
 0x158   :  { %v1972_v24 = vpop.f32.mrb[15].mxu0  ;;  %v1991_v27 = vpop.f32.mrb[13].mxu1 }
 0x159   :  { %v1563_v25 = vadd.f32 %v1970_v21, %v1522_v16  ;;  %v1973_v26 = vadd.f32 %v1972_v24, %v1971_v22  ;;  %v1992_v28 = vadd.f32 %v1991_v27, %v1990_v23  ;;  %v1993_v29 = vpop.f32.mrb[14].mxu1 }
 0x15a   :  { %v1994_v31 = vpop.f32.mrb[15].mxu1 }
 0x15b   :  { %v1566_v30 = vadd.f32 %v1973_v26, %v1525_v18  ;;  %v1604_v32 = vadd.f32 %v1992_v28, %v1563_v25  ;;  %v1995_v33 = vadd.f32 %v1994_v31, %v1993_v29 }
 0x15d   :  { %v1607_v34 = vadd.f32 %v1995_v33, %v1566_v30 }
 0x175   :  { %v2012_v35 = vpop.f32.mrb[16].mxu0 }
 0x176   :  { %v2013_v36 = vpop.f32.mrb[17].mxu0 }
 0x177   :  { %v2014_v37 = vadd.f32 %v2013_v36, %v2012_v35  ;;  %v2015_v38 = vpop.f32.mrb[18].mxu0 }
 0x178   :  { %v2016_v39 = vpop.f32.mrb[19].mxu0 }
 0x179   :  { %v1645_v40 = vadd.f32 %v2014_v37, %v1604_v32  ;;  %v2017_v41 = vadd.f32 %v2016_v39, %v2015_v38 }
 0x17b   :  { %1651 = vst [vmem:[%s2707_s3] sm:$0xff] %v1645_v40  ;;  %v1648_v42 = vadd.f32 %v2017_v41, %v1607_v34 }
 0x17d   :  { %1652 = vst [vmem:[%s2707_s3 + $0x8] sm:$0xff] %v1648_v42 }

// kernel: f_net_forward.153
= control target key start
LH: loop header
LB: loop body
LE: loop exit
PB: predicated region body
PF: predicated region fallthrough
CT: control target
= control target key end

     0   :  { %s646_s1 = inlined_call_operand.vmem [shape: bf16[512,128], index: 1, kind: input, shape index: {}]   ;;  %s647_s0 = inlined_call_operand.vmem [shape: bf16[16,512], index: 0, kind: input, shape index: {}]   ;;  %s648_s2 = inlined_call_operand.vmem [shape: f32[1,128], index: 2, kind: input, shape index: {}]   ;;  %s649_s3 = inlined_call_operand.vmem [shape: f32[16,128], index: 3, kind: output, shape index: {}]  }
   0x1   :  { %v471_v0 = vld [vmem:[%s646_s1 + $0x40] sm:$0xff]   ;;  %v475_v4 = vld [vmem:[%s646_s1 + $0x48] sm:$0xff]   ;;  %v479_v8 = vld [vmem:[%s646_s1 + $0x50] sm:$0xff]  }
   0x2   :  { %v472_v1 = vld [vmem:[%s646_s1 + $0xc0] sm:$0xff]   ;;  %427 = vmatprep.subr.bf16.mxu0 %v471_v0  ;;  %v476_v5 = vld [vmem:[%s646_s1 + $0xc8] sm:$0xff]   ;;  %v480_v9 = vld [vmem:[%s646_s1 + $0xd0] sm:$0xff]  }
   0x3   :  { %v473_v2 = vld [vmem:[%s646_s1] sm:$0xff]   ;;  %449 = vmatprep.subr.bf16.mxu1 %v472_v1  ;;  %v477_v6 = vld [vmem:[%s646_s1 + $0x8] sm:$0xff]   ;;  %v481_v10 = vld [vmem:[%s646_s1 + $0x10] sm:$0xff]  }
   0x4   :  { %v474_v3 = vld [vmem:[%s646_s1 + $0x80] sm:$0xff]   ;;  %428 = vmatpush3.bf16.msra.mxu0 %v473_v2  ;;  %v478_v7 = vld [vmem:[%s646_s1 + $0x88] sm:$0xff]   ;;  %v482_v11 = vld [vmem:[%s646_s1 + $0x90] sm:$0xff]  }
   0x5   :  { %450 = vmatpush3.bf16.msra.mxu1 %v474_v3  ;;  %429 = vmatprep.subr.bf16.mxu0 %v475_v4  ;;  %v483_v12 = vld [vmem:[%s646_s1 + $0x58] sm:$0xff]   ;;  %v487_v16 = vld [vmem:[%s646_s1 + $0x60] sm:$0xff]   ;;  %v491_v20 = vld [vmem:[%s646_s1 + $0x68] sm:$0xff]  }
   0x6   :  { %451 = vmatprep.subr.bf16.mxu1 %v476_v5  ;;  %v484_v13 = vld [vmem:[%s646_s1 + $0xd8] sm:$0xff]   ;;  %v488_v17 = vld [vmem:[%s646_s1 + $0xe0] sm:$0xff]   ;;  %v492_v21 = vld [vmem:[%s646_s1 + $0xe8] sm:$0xff]  }
   0x7   :  { %v485_v14 = vld [vmem:[%s646_s1 + $0x18] sm:$0xff]   ;;  %v489_v18 = vld [vmem:[%s646_s1 + $0x20] sm:$0xff]   ;;  %v493_v22 = vld [vmem:[%s646_s1 + $0x28] sm:$0xff]  }
   0x8   :  { %430 = vmatpush3.bf16.msra.mxu0 %v477_v6  ;;  %v486_v15 = vld [vmem:[%s646_s1 + $0x98] sm:$0xff]   ;;  %v490_v19 = vld [vmem:[%s646_s1 + $0xa0] sm:$0xff]   ;;  %v494_v23 = vld [vmem:[%s646_s1 + $0xa8] sm:$0xff]  }
   0x9   :  { %452 = vmatpush3.bf16.msra.mxu1 %v478_v7  ;;  %431 = vmatprep.subr.bf16.mxu0 %v479_v8  ;;  %v495_v24 = vld [vmem:[%s646_s1 + $0x70] sm:$0xff]   ;;  %v499_v28 = vld [vmem:[%s646_s1 + $0x78] sm:$0xff]   ;;  %v390_v38 = vld [vmem:[%s648_s2] ss:$0 sm:$0xff] }
   0xa   :  { %453 = vmatprep.subr.bf16.mxu1 %v480_v9  ;;  %v496_v25 = vld [vmem:[%s646_s1 + $0xf0] sm:$0xff]   ;;  %v500_v29 = vld [vmem:[%s646_s1 + $0xf8] sm:$0xff]  }
   0xb   :  { %v497_v26 = vld [vmem:[%s646_s1 + $0x30] sm:$0xff]   ;;  %v501_v30 = vld [vmem:[%s646_s1 + $0x38] sm:$0xff]  }
   0xc   :  { %432 = vmatpush3.bf16.msra.mxu0 %v481_v10  ;;  %v498_v27 = vld [vmem:[%s646_s1 + $0xb0] sm:$0xff]   ;;  %v502_v31 = vld [vmem:[%s646_s1 + $0xb8] sm:$0xff]  }
   0xd   :  { %454 = vmatpush3.bf16.msra.mxu1 %v482_v11  ;;  %433 = vmatprep.subr.bf16.mxu0 %v483_v12  ;;  %v503_v32 = vld [vmem:[%s647_s0] ss:$16 sps:$4 sm:$0xff]   ;;  %v505_v33 = vld [vmem:[%s647_s0 + $0x4] ss:$16 sps:$4 sm:$0xff]   ;;  %v506_v34 = vld [vmem:[%s647_s0 + $0x8] ss:$16 sps:$4 sm:$0xff]  }
   0xe   :  { %455 = vmatprep.subr.bf16.mxu1 %v484_v13  ;;  %v508_v35 = vld [vmem:[%s647_s0 + $0xc] ss:$16 sps:$4 sm:$0xff]   ;;  %334 = vmatprep.mubr.bf16.mxu0 %v505_v33 }
   0xf   :  { %375 = vmatprep.mubr.bf16.mxu1 %v508_v35 }
  0x10   :  { %434 = vmatpush3.bf16.msra.mxu0 %v485_v14 }
  0x11   :  { %456 = vmatpush3.bf16.msra.mxu1 %v486_v15  ;;  %435 = vmatprep.subr.bf16.mxu0 %v487_v16 }
  0x12   :  { %457 = vmatprep.subr.bf16.mxu1 %v488_v17 }
  0x14   :  { %436 = vmatpush3.bf16.msra.mxu0 %v489_v18 }
  0x15   :  { %458 = vmatpush3.bf16.msra.mxu1 %v490_v19  ;;  %437 = vmatprep.subr.bf16.mxu0 %v491_v20 }
  0x16   :  { %459 = vmatprep.subr.bf16.mxu1 %v492_v21 }
  0x18   :  { %438 = vmatpush3.bf16.msra.mxu0 %v493_v22 }
  0x19   :  { %460 = vmatpush3.bf16.msra.mxu1 %v494_v23  ;;  %439 = vmatprep.subr.bf16.mxu0 %v495_v24 }
  0x1a   :  { %461 = vmatprep.subr.bf16.mxu1 %v496_v25 }
  0x1c   :  { %440 = vmatpush3.bf16.msra.mxu0 %v497_v26 }
  0x1d   :  { %462 = vmatpush3.bf16.msra.mxu1 %v498_v27  ;;  %441 = vmatprep.subr.bf16.mxu0 %v499_v28 }
  0x1e   :  { %463 = vmatprep.subr.bf16.mxu1 %v500_v29 }
  0x20   :  { %442 = vmatpush3.bf16.msra.mxu0 %v501_v30 }
  0x21   :  { %464 = vmatpush3.bf16.msra.mxu1 %v502_v31 }
  0x23   :  { %335 = vmatmul.mubr.bf16.vlgmr.msra.gmra.mrb[0].mxu0 %v503_v32 }
  0x24   :  { %376 = vmatmul.mubr.bf16.vlgmr.msra.gmra.mrb[0].mxu1 %v506_v34 }
  0xf6   :  { %v443_v36 = vpop.f32.mrb[0].mxu0 }
  0xf7   :  { %v465_v37 = vpop.f32.mrb[0].mxu1  ;;  %v444_v39 = vpop.f32.mrb[1].mxu0 }
  0xf8   :  { %v445_v40 = vadd.f32 %v444_v39, %v443_v36  ;;  %v466_v41 = vpop.f32.mrb[1].mxu1  ;;  %v446_v42 = vpop.f32.mrb[2].mxu0 }
  0xf9   :  { %v467_v43 = vadd.f32 %v466_v41, %v465_v37  ;;  %v468_v44 = vpop.f32.mrb[2].mxu1  ;;  %v447_v45 = vpop.f32.mrb[3].mxu0 }
  0xfa   :  { %v337_v46 = vadd.f32 %v445_v40, %v390_v38  ;;  %v448_v47 = vadd.f32 %v447_v45, %v446_v42  ;;  %v469_v48 = vpop.f32.mrb[3].mxu1 }
  0xfb   :  { %v470_v49 = vadd.f32 %v469_v48, %v468_v44 }
  0xfc   :  { %v378_v50 = vadd.f32 %v467_v43, %v337_v46  ;;  %v340_v51 = vadd.f32 %v448_v47, %v390_v38 }
  0xfe   :  { %384 = vst [vmem:[%s649_s3] sm:$0xff] %v378_v50  ;;  %v381_v52 = vadd.f32 %v470_v49, %v340_v51 }
 0x100   :  { %385 = vst [vmem:[%s649_s3 + $0x8] sm:$0xff] %v381_v52 }

// kernel: f_net_forward.158
= control target key start
LH: loop header
LB: loop body
LE: loop exit
PB: predicated region body
PF: predicated region fallthrough
CT: control target
= control target key end

     0   :  { %s1978_s1 = inlined_call_operand.vmem [shape: bf16[1152,128], index: 1, kind: input, shape index: {}]   ;;  %s1979_s0 = inlined_call_operand.vmem [shape: bf16[64,1152], index: 0, kind: input, shape index: {}]   ;;  %s1980_s2 = inlined_call_operand.vmem [shape: f32[1,128], index: 2, kind: input, shape index: {}]   ;;  %s1981_s3 = inlined_call_operand.vmem [shape: f32[64,128], index: 3, kind: output, shape index: {}]  }
   0x1   :  { %v1480_v0 = vld [vmem:[%s1978_s1 + $0x40] sm:$0xff]   ;;  %v1484_v4 = vld [vmem:[%s1978_s1 + $0x48] sm:$0xff]   ;;  %v1488_v8 = vld [vmem:[%s1978_s1 + $0x50] sm:$0xff]  }
   0x2   :  { %v1481_v1 = vld [vmem:[%s1978_s1 + $0xc0] sm:$0xff]   ;;  %1268 = vmatprep.subr.bf16.mxu0 %v1480_v0  ;;  %v1485_v5 = vld [vmem:[%s1978_s1 + $0xc8] sm:$0xff]   ;;  %v1489_v9 = vld [vmem:[%s1978_s1 + $0xd0] sm:$0xff]  }
   0x3   :  { %v1482_v2 = vld [vmem:[%s1978_s1] sm:$0xff]   ;;  %1308 = vmatprep.subr.bf16.mxu1 %v1481_v1  ;;  %v1486_v6 = vld [vmem:[%s1978_s1 + $0x8] sm:$0xff]   ;;  %v1490_v10 = vld [vmem:[%s1978_s1 + $0x10] sm:$0xff]  }
   0x4   :  { %v1483_v3 = vld [vmem:[%s1978_s1 + $0x80] sm:$0xff]   ;;  %1269 = vmatpush3.bf16.msra.mxu0 %v1482_v2  ;;  %v1487_v7 = vld [vmem:[%s1978_s1 + $0x88] sm:$0xff]   ;;  %v1491_v11 = vld [vmem:[%s1978_s1 + $0x90] sm:$0xff]  }
   0x5   :  { %1309 = vmatpush3.bf16.msra.mxu1 %v1483_v3  ;;  %1270 = vmatprep.subr.bf16.mxu0 %v1484_v4  ;;  %v1492_v12 = vld [vmem:[%s1978_s1 + $0x58] sm:$0xff]   ;;  %v1496_v16 = vld [vmem:[%s1978_s1 + $0x60] sm:$0xff]   ;;  %v1500_v20 = vld [vmem:[%s1978_s1 + $0x68] sm:$0xff]  }
   0x6   :  { %1310 = vmatprep.subr.bf16.mxu1 %v1485_v5  ;;  %v1493_v13 = vld [vmem:[%s1978_s1 + $0xd8] sm:$0xff]   ;;  %v1497_v17 = vld [vmem:[%s1978_s1 + $0xe0] sm:$0xff]   ;;  %v1501_v21 = vld [vmem:[%s1978_s1 + $0xe8] sm:$0xff]  }
   0x7   :  { %v1494_v14 = vld [vmem:[%s1978_s1 + $0x18] sm:$0xff]   ;;  %v1498_v18 = vld [vmem:[%s1978_s1 + $0x20] sm:$0xff]   ;;  %v1502_v22 = vld [vmem:[%s1978_s1 + $0x28] sm:$0xff]  }
   0x8   :  { %1271 = vmatpush3.bf16.msra.mxu0 %v1486_v6  ;;  %v1495_v15 = vld [vmem:[%s1978_s1 + $0x98] sm:$0xff]   ;;  %v1499_v19 = vld [vmem:[%s1978_s1 + $0xa0] sm:$0xff]   ;;  %v1503_v23 = vld [vmem:[%s1978_s1 + $0xa8] sm:$0xff]  }
   0x9   :  { %1311 = vmatpush3.bf16.msra.mxu1 %v1487_v7  ;;  %1272 = vmatprep.subr.bf16.mxu0 %v1488_v8  ;;  %v1504_v24 = vld [vmem:[%s1978_s1 + $0x70] sm:$0xff]   ;;  %v1508_v28 = vld [vmem:[%s1978_s1 + $0x78] sm:$0xff]   ;;  %v1512_v32 = vld [vmem:[%s1979_s0] ss:$36 sps:$4 sm:$0xff]  }
   0xa   :  { %1312 = vmatprep.subr.bf16.mxu1 %v1489_v9  ;;  %v1505_v25 = vld [vmem:[%s1978_s1 + $0xf0] sm:$0xff]   ;;  %v1509_v29 = vld [vmem:[%s1978_s1 + $0xf8] sm:$0xff]   ;;  %v1514_v33 = vld [vmem:[%s1979_s0 + $0x4] ss:$36 sps:$4 sm:$0xff]  }
   0xb   :  { %v1506_v26 = vld [vmem:[%s1978_s1 + $0x30] sm:$0xff]   ;;  %v1510_v30 = vld [vmem:[%s1978_s1 + $0x38] sm:$0xff]   ;;  %v1515_v34 = vld [vmem:[%s1979_s0 + $0x8] ss:$36 sps:$4 sm:$0xff]   ;;  %854 = vmatprep.mubr.bf16.mxu0 %v1514_v33 }
   0xc   :  { %1273 = vmatpush3.bf16.msra.mxu0 %v1490_v10  ;;  %v1507_v27 = vld [vmem:[%s1978_s1 + $0xb0] sm:$0xff]   ;;  %v1511_v31 = vld [vmem:[%s1978_s1 + $0xb8] sm:$0xff]   ;;  %v1518_v36 = vld [vmem:[%s1978_s1 + $0x140] sm:$0xff]  }
   0xd   :  { %1313 = vmatpush3.bf16.msra.mxu1 %v1491_v11  ;;  %1274 = vmatprep.subr.bf16.mxu0 %v1492_v12  ;;  %v1517_v35 = vld [vmem:[%s1979_s0 + $0xc] ss:$36 sps:$4 sm:$0xff]   ;;  %v1519_v37 = vld [vmem:[%s1978_s1 + $0x1c0] sm:$0xff]   ;;  %v1528_v45 = vld [vmem:[%s1979_s0 + $0x54] ss:$36 sps:$4 sm:$0xff]  }
   0xe   :  { %1314 = vmatprep.subr.bf16.mxu1 %v1493_v13  ;;  %919 = vmatprep.mubr.bf16.mxu1 %v1517_v35  ;;  %v1520_v38 = vld [vmem:[%s1978_s1 + $0x100] sm:$0xff]   ;;  %v1522_v40 = vld [vmem:[%s1978_s1 + $0x148] sm:$0xff]   ;;  %v1531_v47 = vld [vmem:[%s1979_s0 + $0x50] ss:$36 sps:$4 sm:$0xff]  }
   0xf   :  { %v1521_v39 = vld [vmem:[%s1978_s1 + $0x180] sm:$0xff]   ;;  %v1523_v41 = vld [vmem:[%s1978_s1 + $0x1c8] sm:$0xff]   ;;  %v1532_v48 = vld [vmem:[%s1978_s1 + $0x150] sm:$0xff]  }
  0x10   :  { %1275 = vmatpush3.bf16.msra.mxu0 %v1494_v14  ;;  %v1524_v42 = vld [vmem:[%s1978_s1 + $0x108] sm:$0xff]   ;;  %v1533_v49 = vld [vmem:[%s1978_s1 + $0x1d0] sm:$0xff]   ;;  %v1536_v52 = vld [vmem:[%s1978_s1 + $0x158] sm:$0xff]  }
  0x11   :  { %1315 = vmatpush3.bf16.msra.mxu1 %v1495_v15  ;;  %1276 = vmatprep.subr.bf16.mxu0 %v1496_v16  ;;  %v1525_v43 = vld [vmem:[%s1978_s1 + $0x188] sm:$0xff]   ;;  %v1534_v50 = vld [vmem:[%s1978_s1 + $0x110] sm:$0xff]   ;;  %v1537_v53 = vld [vmem:[%s1978_s1 + $0x1d8] sm:$0xff]  }
  0x12   :  { %1316 = vmatprep.subr.bf16.mxu1 %v1497_v17  ;;  %v1526_v44 = vld [vmem:[%s1979_s0 + $0x4c] ss:$36 sps:$4 sm:$0xff]   ;;  %v1538_v54 = vld [vmem:[%s1978_s1 + $0x118] sm:$0xff]   ;;  %v1546_v60 = vld [vmem:[%s1978_s1 + $0x160] sm:$0xff]  }
  0x13   :  { %v1530_v46 = vld [vmem:[%s1979_s0 + $0x48] ss:$36 sps:$4 sm:$0xff]   ;;  %v1535_v51 = vld [vmem:[%s1978_s1 + $0x190] sm:$0xff]   ;;  %v1539_v55 = vld [vmem:[%s1978_s1 + $0x198] sm:$0xff]  }
  0x14   :  { %1277 = vmatpush3.bf16.msra.mxu0 %v1498_v18  ;;  %v1540_v56 = vld [vmem:[%s1979_s0 + $0x94] ss:$36 sps:$4 sm:$0xff]   ;;  %v1542_v57 = vld [vmem:[%s1979_s0 + $0x9c] ss:$36 sps:$4 sm:$0xff]   ;;  %v1550_v0 = vld [vmem:[%s1978_s1 + $0x168] sm:$0xff]  }
  0x15   :  { %1317 = vmatpush3.bf16.msra.mxu1 %v1499_v19  ;;  %1278 = vmatprep.subr.bf16.mxu0 %v1500_v20  ;;  %v1544_v58 = vld [vmem:[%s1979_s0 + $0x90] ss:$36 sps:$4 sm:$0xff]   ;;  %v1545_v59 = vld [vmem:[%s1979_s0 + $0x98] ss:$36 sps:$4 sm:$0xff]   ;;  %v1547_v61 = vld [vmem:[%s1978_s1 + $0x1e0] sm:$0xff]  }
  0x16   :  { %1318 = vmatprep.subr.bf16.mxu1 %v1501_v21  ;;  %v1548_v62 = vld [vmem:[%s1978_s1 + $0x120] sm:$0xff]   ;;  %v1551_v1 = vld [vmem:[%s1978_s1 + $0x1e8] sm:$0xff]   ;;  %v1558_v6 = vld [vmem:[%s1979_s0 + $0xd8] ss:$36 sps:$4 sm:$0xff]  }
  0x17   :  { %v1549_v63 = vld [vmem:[%s1978_s1 + $0x1a0] sm:$0xff]   ;;  %v1552_v2 = vld [vmem:[%s1978_s1 + $0x128] sm:$0xff]   ;;  %v1560_v8 = vld [vmem:[%s1978_s1 + $0x170] sm:$0xff]  }
  0x18   :  { %1279 = vmatpush3.bf16.msra.mxu0 %v1502_v22  ;;  %v1553_v3 = vld [vmem:[%s1978_s1 + $0x1a8] sm:$0xff]   ;;  %v1554_v4 = vld [vmem:[%s1979_s0 + $0xdc] ss:$36 sps:$4 sm:$0xff]   ;;  %v1561_v9 = vld [vmem:[%s1978_s1 + $0x1f0] sm:$0xff]  }
  0x19   :  { %1319 = vmatpush3.bf16.msra.mxu1 %v1503_v23  ;;  %1280 = vmatprep.subr.bf16.mxu0 %v1504_v24  ;;  %v1556_v5 = vld [vmem:[%s1979_s0 + $0xe4] ss:$36 sps:$4 sm:$0xff]   ;;  %v1562_v10 = vld [vmem:[%s1978_s1 + $0x130] sm:$0xff]   ;;  %v1564_v12 = vld [vmem:[%s1978_s1 + $0x178] sm:$0xff]  }
  0x1a   :  { %1320 = vmatprep.subr.bf16.mxu1 %v1505_v25  ;;  %v1559_v7 = vld [vmem:[%s1979_s0 + $0xe0] ss:$36 sps:$4 sm:$0xff]   ;;  %v1563_v11 = vld [vmem:[%s1978_s1 + $0x1b0] sm:$0xff]   ;;  %v1565_v13 = vld [vmem:[%s1978_s1 + $0x1f8] sm:$0xff]  }
  0x1b   :  { %v1566_v14 = vld [vmem:[%s1978_s1 + $0x138] sm:$0xff]   ;;  %v1568_v16 = vld [vmem:[%s1979_s0 + $0x10] ss:$36 sps:$4 sm:$0xff]   ;;  %v1574_v20 = vld [vmem:[%s1978_s1 + $0x200] sm:$0xff]  }
  0x1c   :  { %1281 = vmatpush3.bf16.msra.mxu0 %v1506_v26  ;;  %v1567_v15 = vld [vmem:[%s1978_s1 + $0x1b8] sm:$0xff]   ;;  %v1575_v21 = vld [vmem:[%s1978_s1 + $0x208] sm:$0xff]   ;;  %v1581_v25 = vld [vmem:[%s1979_s0 + $0x60] ss:$36 sps:$4 sm:$0xff]  }
  0x1d   :  { %1321 = vmatpush3.bf16.msra.mxu1 %v1507_v27  ;;  %1282 = vmatprep.subr.bf16.mxu0 %v1508_v28  ;;  %v1570_v17 = vld [vmem:[%s1979_s0 + $0x14] ss:$36 sps:$4 sm:$0xff]   ;;  %v1573_v19 = vld [vmem:[%s1979_s0 + $0x1c] ss:$36 sps:$4 sm:$0xff]   ;;  %v1578_v23 = vld [vmem:[%s1979_s0 + $0x64] ss:$36 sps:$4 sm:$0xff]  }
  0x1e   :  { %1322 = vmatprep.subr.bf16.mxu1 %v1509_v29  ;;  %v1571_v18 = vld [vmem:[%s1979_s0 + $0x18] ss:$36 sps:$4 sm:$0xff]   ;;  %v1582_v26 = vld [vmem:[%s1978_s1 + $0x210] sm:$0xff]   ;;  %v1584_v27 = vld [vmem:[%s1979_s0 + $0xa4] ss:$36 sps:$4 sm:$0xff]  }
  0x1f   :  { %v1576_v22 = vld [vmem:[%s1979_s0 + $0x5c] ss:$36 sps:$4 sm:$0xff]   ;;  %v1586_v28 = vld [vmem:[%s1979_s0 + $0xac] ss:$36 sps:$4 sm:$0xff]  }
  0x20   :  { %1283 = vmatpush3.bf16.msra.mxu0 %v1510_v30  ;;  %v1580_v24 = vld [vmem:[%s1979_s0 + $0x58] ss:$36 sps:$4 sm:$0xff]   ;;  %v1588_v30 = vld [vmem:[%s1979_s0 + $0xa0] ss:$36 sps:$4 sm:$0xff]   ;;  %v1592_v33 = vld [vmem:[%s1979_s0 + $0xec] ss:$36 sps:$4 sm:$0xff]  }
  0x21   :  { %1323 = vmatpush3.bf16.msra.mxu1 %v1511_v31  ;;  %1348 = vmatprep.subr.bf16.mxu0 %v1518_v36  ;;  %v1583_v29 = vld [vmem:[%s1978_s1 + $0x218] sm:$0xff]   ;;  %v1589_v31 = vld [vmem:[%s1979_s0 + $0xa8] ss:$36 sps:$4 sm:$0xff]  }
  0x22   :  { %1388 = vmatprep.subr.bf16.mxu1 %v1519_v37  ;;  %v1591_v35 = vld [vmem:[%s1978_s1 + $0x228] sm:$0xff]   ;;  %v1598_v37 = vld [vmem:[%s1978_s1 + $0x230] sm:$0xff]  }
  0x23   :  { %855 = vmatmul.mubr.bf16.vlgmr.msra.gmra.mrb[0].mxu0 %v1512_v32  ;;  %v1590_v32 = vld [vmem:[%s1978_s1 + $0x220] sm:$0xff]   ;;  %v1596_v36 = vld [vmem:[%s1979_s0 + $0xe8] ss:$36 sps:$4 sm:$0xff]  }
  0x24   :  { %920 = vmatmul.mubr.bf16.vlgmr.msra.gmra.mrb[0].mxu1 %v1515_v34  ;;  %1349 = vmatpush3.bf16.msra.mxu0 %v1520_v38  ;;  %v1594_v34 = vld [vmem:[%s1979_s0 + $0xf4] ss:$36 sps:$4 sm:$0xff]  }
  0x25   :  { %1389 = vmatpush3.bf16.msra.mxu1 %v1521_v39  ;;  %1350 = vmatprep.subr.bf16.mxu0 %v1522_v40  ;;  %v1597_v38 = vld [vmem:[%s1979_s0 + $0xf0] ss:$36 sps:$4 sm:$0xff]   ;;  %v1600_v39 = vld [vmem:[%s1979_s0 + $0x20] ss:$36 sps:$4 sm:$0xff]  }
  0x26   :  { %1390 = vmatprep.subr.bf16.mxu1 %v1523_v41  ;;  %862 = vmatprep.mubr.bf16.mxu0 %v1526_v44  ;;  %v1601_v40 = vld [vmem:[%s1979_s0 + $0xb0] ss:$36 sps:$4 sm:$0xff]   ;;  %v1599_v41 = vld [vmem:[%s1978_s1 + $0x238] sm:$0xff]  }
  0x27   :  { %927 = vmatprep.mubr.bf16.mxu1 %v1528_v45 }
  0x28   :  { %1351 = vmatpush3.bf16.msra.mxu0 %v1524_v42  ;;  %v1602_v42 = vld [vmem:[%s1979_s0 + $0x68] ss:$36 sps:$4 sm:$0xff]  }
  0x29   :  { %1391 = vmatpush3.bf16.msra.mxu1 %v1525_v43  ;;  %1352 = vmatprep.subr.bf16.mxu0 %v1532_v48  ;;  %v1603_v43 = vld [vmem:[%s1979_s0 + $0xf8] ss:$36 sps:$4 sm:$0xff]  }
  0x2a   :  { %1392 = vmatprep.subr.bf16.mxu1 %v1533_v49 }
  0x2b   :  { %863 = vmatmul.mubr.bf16.gmra.mrb[4].mxu0 %v1530_v46  ;;  %v1159_v46 = vld [vmem:[%s1980_s2] ss:$0 sm:$0xff] }
  0x2c   :  { %928 = vmatmul.mubr.bf16.gmra.mrb[4].mxu1 %v1531_v47  ;;  %1353 = vmatpush3.bf16.msra.mxu0 %v1534_v50 }
  0x2d   :  { %1393 = vmatpush3.bf16.msra.mxu1 %v1535_v51  ;;  %1354 = vmatprep.subr.bf16.mxu0 %v1536_v52 }
  0x2e   :  { %1394 = vmatprep.subr.bf16.mxu1 %v1537_v53  ;;  %870 = vmatprep.mubr.bf16.mxu0 %v1540_v56 }
  0x2f   :  { %935 = vmatprep.mubr.bf16.mxu1 %v1542_v57 }
  0x30   :  { %1355 = vmatpush3.bf16.msra.mxu0 %v1538_v54 }
  0x31   :  { %1395 = vmatpush3.bf16.msra.mxu1 %v1539_v55  ;;  %1356 = vmatprep.subr.bf16.mxu0 %v1546_v60 }
  0x32   :  { %1396 = vmatprep.subr.bf16.mxu1 %v1547_v61 }
  0x33   :  { %871 = vmatmul.mubr.bf16.gmra.mrb[8].mxu0 %v1544_v58 }
  0x34   :  { %936 = vmatmul.mubr.bf16.gmra.mrb[8].mxu1 %v1545_v59  ;;  %1357 = vmatpush3.bf16.msra.mxu0 %v1548_v62 }
  0x35   :  { %1397 = vmatpush3.bf16.msra.mxu1 %v1549_v63  ;;  %1358 = vmatprep.subr.bf16.mxu0 %v1550_v0 }
  0x36   :  { %1398 = vmatprep.subr.bf16.mxu1 %v1551_v1  ;;  %878 = vmatprep.mubr.bf16.mxu0 %v1554_v4 }
  0x37   :  { %943 = vmatprep.mubr.bf16.mxu1 %v1556_v5 }
  0x38   :  { %1359 = vmatpush3.bf16.msra.mxu0 %v1552_v2 }
  0x39   :  { %1399 = vmatpush3.bf16.msra.mxu1 %v1553_v3  ;;  %1360 = vmatprep.subr.bf16.mxu0 %v1560_v8 }
  0x3a   :  { %1400 = vmatprep.subr.bf16.mxu1 %v1561_v9 }
  0x3b   :  { %879 = vmatmul.mubr.bf16.gmra.mrb[12].mxu0 %v1558_v6 }
  0x3c   :  { %944 = vmatmul.mubr.bf16.gmra.mrb[12].mxu1 %v1559_v7  ;;  %1361 = vmatpush3.bf16.msra.mxu0 %v1562_v10 }
  0x3d   :  { %1401 = vmatpush3.bf16.msra.mxu1 %v1563_v11  ;;  %1362 = vmatprep.subr.bf16.mxu0 %v1564_v12 }
  0x3e   :  { %1402 = vmatprep.subr.bf16.mxu1 %v1565_v13  ;;  %984 = vmatprep.mubr.bf16.mxu0 %v1570_v17 }
  0x3f   :  { %1049 = vmatprep.mubr.bf16.mxu1 %v1573_v19 }
  0x40   :  { %1363 = vmatpush3.bf16.msra.mxu0 %v1566_v14 }
  0x41   :  { %1403 = vmatpush3.bf16.msra.mxu1 %v1567_v15  ;;  %1440 = vmatprep.subr.bf16.mxu0 %v1574_v20 }
  0x42   :  { %1464 = vmatprep.subr.bf16.mxu1 %v1574_v20 }
  0x43   :  { %985 = vmatmul.mubr.bf16.vlgmr.msra.gmra.mrb[16].mxu0 %v1568_v16 }
  0x44   :  { %1050 = vmatmul.mubr.bf16.vlgmr.msra.gmra.mrb[16].mxu1 %v1571_v18  ;;  %1441 = vmatpush3.bf16.msra.mxu0 %v1574_v20 }
  0x45   :  { %1472 = vmatpush3.bf16.msra.mxu1 %v1574_v20  ;;  %1442 = vmatprep.subr.bf16.mxu0 %v1575_v21 }
  0x46   :  { %1465 = vmatprep.subr.bf16.mxu1 %v1575_v21  ;;  %992 = vmatprep.mubr.bf16.mxu0 %v1576_v22 }
  0x47   :  { %1057 = vmatprep.mubr.bf16.mxu1 %v1578_v23 }
  0x48   :  { %1443 = vmatpush3.bf16.msra.mxu0 %v1575_v21 }
  0x49   :  { %1473 = vmatpush3.bf16.msra.mxu1 %v1575_v21  ;;  %1444 = vmatprep.subr.bf16.mxu0 %v1582_v26 }
  0x4a   :  { %1466 = vmatprep.subr.bf16.mxu1 %v1582_v26 }
  0x4b   :  { %993 = vmatmul.mubr.bf16.gmra.mrb[20].mxu0 %v1580_v24 }
  0x4c   :  { %1058 = vmatmul.mubr.bf16.gmra.mrb[20].mxu1 %v1581_v25  ;;  %1000 = vmatprep.mubr.bf16.mxu0 %v1584_v27 }
  0x4d   :  { %1445 = vmatpush3.bf16.msra.mxu0 %v1582_v26  ;;  %1065 = vmatprep.mubr.bf16.mxu1 %v1586_v28 }
  0x4e   :  { %1474 = vmatpush3.bf16.msra.mxu1 %v1582_v26  ;;  %1446 = vmatprep.subr.bf16.mxu0 %v1583_v29 }
  0x4f   :  { %1467 = vmatprep.subr.bf16.mxu1 %v1583_v29 }
  0x51   :  { %1447 = vmatpush3.bf16.msra.mxu0 %v1583_v29 }
  0x52   :  { %1475 = vmatpush3.bf16.msra.mxu1 %v1583_v29  ;;  %1448 = vmatprep.subr.bf16.mxu0 %v1590_v32 }
  0x53   :  { %1001 = vmatmul.mubr.bf16.gmra.mrb[24].mxu0 %v1588_v30  ;;  %1468 = vmatprep.subr.bf16.mxu1 %v1590_v32 }
  0x54   :  { %1066 = vmatmul.mubr.bf16.gmra.mrb[24].mxu1 %v1589_v31  ;;  %1008 = vmatprep.mubr.bf16.mxu0 %v1592_v33 }
  0x55   :  { %1449 = vmatpush3.bf16.msra.mxu0 %v1590_v32  ;;  %1073 = vmatprep.mubr.bf16.mxu1 %v1594_v34 }
  0x56   :  { %1476 = vmatpush3.bf16.msra.mxu1 %v1590_v32  ;;  %1450 = vmatprep.subr.bf16.mxu0 %v1591_v35 }
  0x57   :  { %1469 = vmatprep.subr.bf16.mxu1 %v1591_v35 }
  0x59   :  { %1451 = vmatpush3.bf16.msra.mxu0 %v1591_v35 }
  0x5a   :  { %1477 = vmatpush3.bf16.msra.mxu1 %v1591_v35  ;;  %1452 = vmatprep.subr.bf16.mxu0 %v1598_v37 }
  0x5b   :  { %1009 = vmatmul.mubr.bf16.gmra.mrb[28].mxu0 %v1596_v36  ;;  %1470 = vmatprep.subr.bf16.mxu1 %v1598_v37 }
  0x5c   :  { %1074 = vmatmul.mubr.bf16.gmra.mrb[28].mxu1 %v1597_v38  ;;  %1456 = vmatprep.mubr.bf16.mxu0 %v1600_v39 }
  0x5d   :  { %1453 = vmatpush3.bf16.msra.mxu0 %v1598_v37  ;;  %1460 = vmatprep.mubr.bf16.mxu1 %v1601_v40 }
  0x5e   :  { %1478 = vmatpush3.bf16.msra.mxu1 %v1598_v37  ;;  %1454 = vmatprep.subr.bf16.mxu0 %v1599_v41 }
  0x5f   :  { %1471 = vmatprep.subr.bf16.mxu1 %v1599_v41 }
  0x61   :  { %1455 = vmatpush3.bf16.msra.mxu0 %v1599_v41 }
  0x62   :  { %1479 = vmatpush3.bf16.msra.mxu1 %v1599_v41 }
  0x64   :  { %1457 = vmatmul.mubr.bf16.vlgmr.msra.gmra.mrb[32].mxu0 %v1602_v42 }
  0x65   :  { %1461 = vmatmul.mubr.bf16.vlgmr.msra.gmra.mrb[32].mxu1 %v1603_v43 }
  0xf6   :  { %v1284_v44 = vpop.f32.mrb[0].mxu0 }
  0xf7   :  { %v1324_v45 = vpop.f32.mrb[0].mxu1  ;;  %v1285_v47 = vpop.f32.mrb[1].mxu0 }
  0xf8   :  { %v1286_v48 = vadd.f32 %v1285_v47, %v1284_v44  ;;  %v1325_v49 = vpop.f32.mrb[1].mxu1  ;;  %v1287_v50 = vpop.f32.mrb[2].mxu0 }
  0xf9   :  { %v1326_v51 = vadd.f32 %v1325_v49, %v1324_v45  ;;  %v1327_v52 = vpop.f32.mrb[2].mxu1  ;;  %v1288_v53 = vpop.f32.mrb[3].mxu0 }
  0xfa   :  { %v857_v54 = vadd.f32 %v1286_v48, %v1159_v46  ;;  %v1289_v55 = vadd.f32 %v1288_v53, %v1287_v50  ;;  %v1328_v56 = vpop.f32.mrb[3].mxu1 }
  0xfb   :  { %v1329_v57 = vadd.f32 %v1328_v56, %v1327_v52 }
  0xfc   :  { %v922_v58 = vadd.f32 %v1326_v51, %v857_v54  ;;  %v860_v59 = vadd.f32 %v1289_v55, %v1159_v46 }
  0xfe   :  { %v925_v60 = vadd.f32 %v1329_v57, %v860_v59  ;;  %v1290_v61 = vpop.f32.mrb[4].mxu0 }
  0xff   :  { %v1330_v62 = vpop.f32.mrb[4].mxu1  ;;  %v1291_v63 = vpop.f32.mrb[5].mxu0 }
 0x100   :  { %v1292_v0 = vadd.f32 %v1291_v63, %v1290_v61  ;;  %v1331_v1 = vpop.f32.mrb[5].mxu1  ;;  %v1293_v2 = vpop.f32.mrb[6].mxu0 }
 0x101   :  { %v1332_v3 = vadd.f32 %v1331_v1, %v1330_v62  ;;  %v1333_v4 = vpop.f32.mrb[6].mxu1  ;;  %v1294_v5 = vpop.f32.mrb[7].mxu0 }
 0x102   :  { %v865_v6 = vadd.f32 %v1292_v0, %v1159_v46  ;;  %v1295_v7 = vadd.f32 %v1294_v5, %v1293_v2  ;;  %v1334_v8 = vpop.f32.mrb[7].mxu1 }
 0x103   :  { %v1335_v9 = vadd.f32 %v1334_v8, %v1333_v4 }
 0x104   :  { %v930_v10 = vadd.f32 %v1332_v3, %v865_v6  ;;  %v868_v11 = vadd.f32 %v1295_v7, %v1159_v46 }
 0x106   :  { %v933_v12 = vadd.f32 %v1335_v9, %v868_v11  ;;  %v1296_v13 = vpop.f32.mrb[8].mxu0 }
 0x107   :  { %v1336_v14 = vpop.f32.mrb[8].mxu1  ;;  %v1297_v15 = vpop.f32.mrb[9].mxu0 }
 0x108   :  { %v1298_v16 = vadd.f32 %v1297_v15, %v1296_v13  ;;  %v1337_v17 = vpop.f32.mrb[9].mxu1  ;;  %v1299_v18 = vpop.f32.mrb[10].mxu0 }
 0x109   :  { %v1338_v19 = vadd.f32 %v1337_v17, %v1336_v14  ;;  %v1339_v20 = vpop.f32.mrb[10].mxu1  ;;  %v1300_v21 = vpop.f32.mrb[11].mxu0 }
 0x10a   :  { %v873_v22 = vadd.f32 %v1298_v16, %v1159_v46  ;;  %v1301_v23 = vadd.f32 %v1300_v21, %v1299_v18  ;;  %v1340_v24 = vpop.f32.mrb[11].mxu1 }
 0x10b   :  { %v1341_v25 = vadd.f32 %v1340_v24, %v1339_v20 }
 0x10c   :  { %v938_v26 = vadd.f32 %v1338_v19, %v873_v22  ;;  %v876_v27 = vadd.f32 %v1301_v23, %v1159_v46 }
 0x10e   :  { %v941_v28 = vadd.f32 %v1341_v25, %v876_v27  ;;  %v1302_v29 = vpop.f32.mrb[12].mxu0 }
 0x10f   :  { %v1342_v30 = vpop.f32.mrb[12].mxu1  ;;  %v1303_v31 = vpop.f32.mrb[13].mxu0 }
 0x110   :  { %v1343_v32 = vpop.f32.mrb[13].mxu1  ;;  %v1304_v33 = vadd.f32 %v1303_v31, %v1302_v29  ;;  %v1305_v35 = vpop.f32.mrb[14].mxu0 }
 0x111   :  { %v1344_v34 = vadd.f32 %v1343_v32, %v1342_v30  ;;  %v1345_v36 = vpop.f32.mrb[14].mxu1  ;;  %v1306_v37 = vpop.f32.mrb[15].mxu0 }
 0x112   :  { %v1346_v38 = vpop.f32.mrb[15].mxu1  ;;  %v881_v39 = vadd.f32 %v1304_v33, %v1159_v46  ;;  %v1307_v40 = vadd.f32 %v1306_v37, %v1305_v35 }
 0x113   :  { %v1347_v41 = vadd.f32 %v1346_v38, %v1345_v36 }
 0x114   :  { %v946_v42 = vadd.f32 %v1344_v34, %v881_v39  ;;  %v884_v43 = vadd.f32 %v1307_v40, %v1159_v46 }
 0x116   :  { %v949_v44 = vadd.f32 %v1347_v41, %v884_v43  ;;  %v1364_v45 = vpop.f32.mrb[16].mxu0 }
 0x117   :  { %v1365_v47 = vpop.f32.mrb[17].mxu0  ;;  %v1404_v48 = vpop.f32.mrb[16].mxu1 }
 0x118   :  { %v1366_v49 = vadd.f32 %v1365_v47, %v1364_v45  ;;  %v1367_v50 = vpop.f32.mrb[18].mxu0  ;;  %v1405_v51 = vpop.f32.mrb[17].mxu1 }
 0x119   :  { %v1368_v52 = vpop.f32.mrb[19].mxu0  ;;  %v1406_v54 = vadd.f32 %v1405_v51, %v1404_v48  ;;  %v1407_v55 = vpop.f32.mrb[18].mxu1 }
 0x11a   :  { %v987_v53 = vadd.f32 %v1366_v49, %v922_v58  ;;  %v1369_v56 = vadd.f32 %v1368_v52, %v1367_v50  ;;  %v1408_v57 = vpop.f32.mrb[19].mxu1 }
 0x11b   :  { %v1409_v61 = vadd.f32 %v1408_v57, %v1407_v55 }
 0x11c   :  { %v990_v59 = vadd.f32 %v1369_v56, %v925_v60  ;;  %v1052_v62 = vadd.f32 %v1406_v54, %v987_v53 }
 0x11e   :  { %v1370_v63 = vpop.f32.mrb[20].mxu0  ;;  %v1951_v0 = vadd.f32 %v1409_v61, %v990_v59 }
 0x11f   :  { %v1371_v46 = vpop.f32.mrb[21].mxu0  ;;  %v1410_v1 = vpop.f32.mrb[20].mxu1 }
 0x120   :  { %v1372_v2 = vadd.f32 %v1371_v46, %v1370_v63  ;;  %v1373_v3 = vpop.f32.mrb[22].mxu0  ;;  %v1411_v4 = vpop.f32.mrb[21].mxu1 }
 0x121   :  { %v1374_v5 = vpop.f32.mrb[23].mxu0  ;;  %v1412_v7 = vadd.f32 %v1411_v4, %v1410_v1  ;;  %v1413_v8 = vpop.f32.mrb[22].mxu1 }
 0x122   :  { %v995_v6 = vadd.f32 %v1372_v2, %v930_v10  ;;  %v1375_v58 = vadd.f32 %v1374_v5, %v1373_v3  ;;  %v1414_v9 = vpop.f32.mrb[23].mxu1 }
 0x123   :  { %v1415_v13 = vadd.f32 %v1414_v9, %v1413_v8 }
 0x124   :  { %v998_v11 = vadd.f32 %v1375_v58, %v933_v12  ;;  %v1060_v14 = vadd.f32 %v1412_v7, %v995_v6 }
 0x126   :  { %v1376_v60 = vpop.f32.mrb[24].mxu0  ;;  %v1063_v15 = vadd.f32 %v1415_v13, %v998_v11 }
 0x127   :  { %v1377_v16 = vpop.f32.mrb[25].mxu0  ;;  %v1416_v17 = vpop.f32.mrb[24].mxu1 }
 0x128   :  { %v1378_v18 = vadd.f32 %v1377_v16, %v1376_v60  ;;  %v1379_v19 = vpop.f32.mrb[26].mxu0  ;;  %v1417_v20 = vpop.f32.mrb[25].mxu1 }
 0x129   :  { %v1380_v21 = vpop.f32.mrb[27].mxu0  ;;  %v1418_v23 = vadd.f32 %v1417_v20, %v1416_v17  ;;  %v1419_v24 = vpop.f32.mrb[26].mxu1 }
 0x12a   :  { %v1003_v22 = vadd.f32 %v1378_v18, %v938_v26  ;;  %v1381_v25 = vadd.f32 %v1380_v21, %v1379_v19  ;;  %v1420_v10 = vpop.f32.mrb[27].mxu1 }
 0x12b   :  { %v1421_v29 = vadd.f32 %v1420_v10, %v1419_v24 }
 0x12c   :  { %v1006_v27 = vadd.f32 %v1381_v25, %v941_v28  ;;  %v1068_v30 = vadd.f32 %v1418_v23, %v1003_v22 }
 0x12e   :  { %v1382_v31 = vpop.f32.mrb[28].mxu0  ;;  %v1071_v12 = vadd.f32 %v1421_v29, %v1006_v27 }
 0x12f   :  { %v1383_v32 = vpop.f32.mrb[29].mxu0  ;;  %v1422_v33 = vpop.f32.mrb[28].mxu1 }
 0x130   :  { %v1384_v34 = vadd.f32 %v1383_v32, %v1382_v31  ;;  %v1385_v35 = vpop.f32.mrb[30].mxu0  ;;  %v1423_v36 = vpop.f32.mrb[29].mxu1 }
 0x131   :  { %v1386_v37 = vpop.f32.mrb[31].mxu0  ;;  %v1424_v39 = vadd.f32 %v1423_v36, %v1422_v33  ;;  %v1425_v40 = vpop.f32.mrb[30].mxu1 }
 0x132   :  { %v1011_v38 = vadd.f32 %v1384_v34, %v946_v42  ;;  %v1387_v41 = vadd.f32 %v1386_v37, %v1385_v35  ;;  %v1426_v26 = vpop.f32.mrb[31].mxu1 }
 0x133   :  { %v1427_v45 = vadd.f32 %v1426_v26, %v1425_v40 }
 0x134   :  { %v1014_v43 = vadd.f32 %v1387_v41, %v949_v44  ;;  %v1076_v47 = vadd.f32 %v1424_v39, %v1011_v38 }
 0x136   :  { %v1079_v48 = vadd.f32 %v1427_v45, %v1014_v43 }
 0x137   :  { %v1458_v28 = vpop.f32.mrb[32].mxu0 }
 0x138   :  { %v1125_v49 = vadd.f32 %v1458_v28, %v1060_v14  ;;  %v1462_v50 = vpop.f32.mrb[32].mxu1  ;;  %v1116_v51 = vpop.f32.mrb[33].mxu0 }
 0x139   :  { %v1141_v52 = vadd.f32 %v1462_v50, %v1076_v47  ;;  %v1117_v53 = vadd.f32 %v1116_v51, %v1052_v62  ;;  %v1132_v54 = vpop.f32.mrb[33].mxu1  ;;  %v1459_v55 = vpop.f32.mrb[34].mxu0 }
 0x13a   :  { %1149 = vst [vmem:[%s1981_s3 + $0x10] sm:$0xff] %v1125_v49  ;;  %v1133_v42 = vadd.f32 %v1132_v54, %v1068_v30  ;;  %v1128_v56 = vadd.f32 %v1459_v55, %v1063_v15  ;;  %v1463_v57 = vpop.f32.mrb[34].mxu1  ;;  %v1119_v59 = vpop.f32.mrb[35].mxu0 }
 0x13b   :  { %1153 = vst [vmem:[%s1981_s3 + $0x30] sm:$0xff] %v1141_v52  ;;  %1147 = vst [vmem:[%s1981_s3] sm:$0xff] %v1117_v53  ;;  %v1144_v44 = vadd.f32 %v1463_v57, %v1079_v48  ;;  %v1120_v61 = vadd.f32 %v1119_v59, %v1951_v0  ;;  %v1135_v62 = vpop.f32.mrb[35].mxu1 }
 0x13c   :  { %1151 = vst [vmem:[%s1981_s3 + $0x20] sm:$0xff] %v1133_v42  ;;  %1150 = vst [vmem:[%s1981_s3 + $0x18] sm:$0xff] %v1128_v56  ;;  %v1136_v63 = vadd.f32 %v1135_v62, %v1071_v12 }
 0x13d   :  { %1154 = vst [vmem:[%s1981_s3 + $0x38] sm:$0xff] %v1144_v44  ;;  %1148 = vst [vmem:[%s1981_s3 + $0x8] sm:$0xff] %v1120_v61 }
 0x13e   :  { %1152 = vst [vmem:[%s1981_s3 + $0x28] sm:$0xff] %v1136_v63 }

// kernel: f_net_forward.169
= control target key start
LH: loop header
LB: loop body
LE: loop exit
PB: predicated region body
PF: predicated region fallthrough
CT: control target
= control target key end

     0   :  { %s503_s1 = inlined_call_operand.vmem [shape: bf16[256,128], index: 1, kind: input, shape index: {}]   ;;  %s504_s0 = inlined_call_operand.vmem [shape: bf16[64,256], index: 0, kind: input, shape index: {}]   ;;  %s505_s2 = inlined_call_operand.vmem [shape: f32[1,128], index: 2, kind: input, shape index: {}]   ;;  %s506_s3 = inlined_call_operand.vmem [shape: f32[64,128], index: 3, kind: output, shape index: {}]  }
   0x1   :  { %v356_v0 = vld [vmem:[%s503_s1 + $0x40] sm:$0xff]   ;;  %v358_v2 = vld [vmem:[%s503_s1 + $0x48] sm:$0xff]   ;;  %v360_v4 = vld [vmem:[%s503_s1 + $0x50] sm:$0xff]  }
   0x2   :  { %v357_v1 = vld [vmem:[%s503_s1] sm:$0xff]   ;;  %300 = vmatprep.subr.bf16.mxu0 %v356_v0  ;;  %340 = vmatprep.subr.bf16.mxu1 %v356_v0  ;;  %v359_v3 = vld [vmem:[%s503_s1 + $0x8] sm:$0xff]   ;;  %v361_v5 = vld [vmem:[%s503_s1 + $0x10] sm:$0xff]  }
   0x3   :  { %301 = vmatpush3.bf16.msra.mxu0 %v357_v1  ;;  %348 = vmatpush3.bf16.msra.mxu1 %v357_v1  ;;  %v362_v6 = vld [vmem:[%s503_s1 + $0x58] sm:$0xff]   ;;  %v364_v8 = vld [vmem:[%s503_s1 + $0x60] sm:$0xff]   ;;  %v366_v10 = vld [vmem:[%s503_s1 + $0x68] sm:$0xff]  }
   0x4   :  { %302 = vmatprep.subr.bf16.mxu0 %v358_v2  ;;  %341 = vmatprep.subr.bf16.mxu1 %v358_v2  ;;  %v363_v7 = vld [vmem:[%s503_s1 + $0x18] sm:$0xff]   ;;  %v365_v9 = vld [vmem:[%s503_s1 + $0x20] sm:$0xff]   ;;  %v367_v13 = vld [vmem:[%s503_s1 + $0x28] sm:$0xff]  }
   0x5   :  { %v374_v11 = vld [vmem:[%s504_s0 + $0x4] ss:$8 sps:$4 sm:$0xff]   ;;  %v368_v14 = vld [vmem:[%s503_s1 + $0x70] sm:$0xff]   ;;  %v370_v16 = vld [vmem:[%s503_s1 + $0x78] sm:$0xff]  }
   0x6   :  { %v377_v12 = vld [vmem:[%s504_s0 + $0x24] ss:$8 sps:$4 sm:$0xff]   ;;  %230 = vmatprep.mubr.bf16.mxu0 %v374_v11  ;;  %v369_v15 = vld [vmem:[%s503_s1 + $0x30] sm:$0xff]   ;;  %v371_v17 = vld [vmem:[%s503_s1 + $0x38] sm:$0xff]  }
   0x7   :  { %303 = vmatpush3.bf16.msra.mxu0 %v359_v3  ;;  %349 = vmatpush3.bf16.msra.mxu1 %v359_v3  ;;  %v372_v18 = vld [vmem:[%s504_s0] ss:$8 sps:$4 sm:$0xff]   ;;  %v378_v20 = vld [vmem:[%s504_s0 + $0x14] ss:$8 sps:$4 sm:$0xff]   ;;  %v382_v22 = vld [vmem:[%s504_s0 + $0x10] ss:$8 sps:$4 sm:$0xff]  }
   0x8   :  { %304 = vmatprep.subr.bf16.mxu0 %v360_v4  ;;  %342 = vmatprep.subr.bf16.mxu1 %v360_v4  ;;  %v375_v19 = vld [vmem:[%s504_s0 + $0x20] ss:$8 sps:$4 sm:$0xff]   ;;  %v380_v21 = vld [vmem:[%s504_s0 + $0x34] ss:$8 sps:$4 sm:$0xff]   ;;  %v383_v23 = vld [vmem:[%s504_s0 + $0x30] ss:$8 sps:$4 sm:$0xff]  }
   0x9   :  { %246 = vmatprep.mubr.bf16.mxu1 %v377_v12  ;;  %v275_v26 = vld [vmem:[%s505_s2] ss:$0 sm:$0xff] }
   0xb   :  { %305 = vmatpush3.bf16.msra.mxu0 %v361_v5  ;;  %350 = vmatpush3.bf16.msra.mxu1 %v361_v5 }
   0xc   :  { %306 = vmatprep.subr.bf16.mxu0 %v362_v6  ;;  %343 = vmatprep.subr.bf16.mxu1 %v362_v6 }
   0xf   :  { %307 = vmatpush3.bf16.msra.mxu0 %v363_v7  ;;  %351 = vmatpush3.bf16.msra.mxu1 %v363_v7 }
  0x10   :  { %308 = vmatprep.subr.bf16.mxu0 %v364_v8  ;;  %344 = vmatprep.subr.bf16.mxu1 %v364_v8 }
  0x13   :  { %309 = vmatpush3.bf16.msra.mxu0 %v365_v9  ;;  %352 = vmatpush3.bf16.msra.mxu1 %v365_v9 }
  0x14   :  { %310 = vmatprep.subr.bf16.mxu0 %v366_v10  ;;  %345 = vmatprep.subr.bf16.mxu1 %v366_v10 }
  0x17   :  { %311 = vmatpush3.bf16.msra.mxu0 %v367_v13  ;;  %353 = vmatpush3.bf16.msra.mxu1 %v367_v13 }
  0x18   :  { %312 = vmatprep.subr.bf16.mxu0 %v368_v14  ;;  %346 = vmatprep.subr.bf16.mxu1 %v368_v14 }
  0x1b   :  { %313 = vmatpush3.bf16.msra.mxu0 %v369_v15  ;;  %354 = vmatpush3.bf16.msra.mxu1 %v369_v15 }
  0x1c   :  { %314 = vmatprep.subr.bf16.mxu0 %v370_v16  ;;  %347 = vmatprep.subr.bf16.mxu1 %v370_v16 }
  0x1f   :  { %315 = vmatpush3.bf16.msra.mxu0 %v371_v17  ;;  %355 = vmatpush3.bf16.msra.mxu1 %v371_v17 }
  0x22   :  { %231 = vmatmul.mubr.bf16.vlgmr.msra.gmra.mrb[0].mxu0 %v372_v18  ;;  %247 = vmatmul.mubr.bf16.vlgmr.msra.gmra.mrb[0].mxu1 %v375_v19 }
  0x23   :  { %238 = vmatprep.mubr.bf16.mxu0 %v378_v20  ;;  %254 = vmatprep.mubr.bf16.mxu1 %v380_v21 }
  0x2a   :  { %239 = vmatmul.mubr.bf16.gmra.mrb[4].mxu0 %v382_v22  ;;  %255 = vmatmul.mubr.bf16.gmra.mrb[4].mxu1 %v383_v23 }
  0xf5   :  { %v316_v24 = vpop.f32.mrb[0].mxu0  ;;  %v328_v25 = vpop.f32.mrb[0].mxu1 }
  0xf6   :  { %v317_v27 = vpop.f32.mrb[1].mxu0  ;;  %v329_v28 = vpop.f32.mrb[1].mxu1 }
  0xf7   :  { %v318_v29 = vadd.f32 %v317_v27, %v316_v24  ;;  %v330_v30 = vadd.f32 %v329_v28, %v328_v25  ;;  %v319_v31 = vpop.f32.mrb[2].mxu0  ;;  %v331_v32 = vpop.f32.mrb[2].mxu1 }
  0xf8   :  { %v320_v33 = vpop.f32.mrb[3].mxu0  ;;  %v332_v34 = vpop.f32.mrb[3].mxu1 }
  0xf9   :  { %v233_v35 = vadd.f32 %v318_v29, %v275_v26  ;;  %v249_v36 = vadd.f32 %v330_v30, %v275_v26  ;;  %v321_v37 = vadd.f32 %v320_v33, %v319_v31  ;;  %v333_v38 = vadd.f32 %v332_v34, %v331_v32 }
  0xfb   :  { %263 = vst [vmem:[%s506_s3] sm:$0xff] %v233_v35  ;;  %267 = vst [vmem:[%s506_s3 + $0x20] sm:$0xff] %v249_v36  ;;  %v236_v39 = vadd.f32 %v321_v37, %v275_v26  ;;  %v252_v40 = vadd.f32 %v333_v38, %v275_v26 }
  0xfd   :  { %264 = vst [vmem:[%s506_s3 + $0x8] sm:$0xff] %v236_v39  ;;  %268 = vst [vmem:[%s506_s3 + $0x28] sm:$0xff] %v252_v40  ;;  %v322_v41 = vpop.f32.mrb[4].mxu0  ;;  %v334_v42 = vpop.f32.mrb[4].mxu1 }
  0xfe   :  { %v323_v43 = vpop.f32.mrb[5].mxu0  ;;  %v335_v44 = vpop.f32.mrb[5].mxu1 }
  0xff   :  { %v324_v45 = vadd.f32 %v323_v43, %v322_v41  ;;  %v336_v46 = vadd.f32 %v335_v44, %v334_v42  ;;  %v325_v47 = vpop.f32.mrb[6].mxu0  ;;  %v337_v48 = vpop.f32.mrb[6].mxu1 }
 0x100   :  { %v326_v49 = vpop.f32.mrb[7].mxu0  ;;  %v338_v50 = vpop.f32.mrb[7].mxu1 }
 0x101   :  { %v241_v51 = vadd.f32 %v324_v45, %v275_v26  ;;  %v257_v52 = vadd.f32 %v336_v46, %v275_v26  ;;  %v327_v53 = vadd.f32 %v326_v49, %v325_v47  ;;  %v339_v54 = vadd.f32 %v338_v50, %v337_v48 }
 0x103   :  { %265 = vst [vmem:[%s506_s3 + $0x10] sm:$0xff] %v241_v51  ;;  %269 = vst [vmem:[%s506_s3 + $0x30] sm:$0xff] %v257_v52  ;;  %v244_v55 = vadd.f32 %v327_v53, %v275_v26  ;;  %v260_v56 = vadd.f32 %v339_v54, %v275_v26 }
 0x105   :  { %266 = vst [vmem:[%s506_s3 + $0x18] sm:$0xff] %v244_v55  ;;  %270 = vst [vmem:[%s506_s3 + $0x38] sm:$0xff] %v260_v56 }

// kernel: f_net_forward.173
= control target key start
LH: loop header
LB: loop body
LE: loop exit
PB: predicated region body
PF: predicated region fallthrough
CT: control target
= control target key end

     0   :  { %vm806_vm0 = vcmask 523264   ;;  %s2574_s1 = inlined_call_operand.vmem [shape: bf16[576,128], index: 1, kind: input, shape index: {}]   ;;  %s2575_s0 = inlined_call_operand.vmem [shape: bf16[256,576], index: 0, kind: input, shape index: {}]   ;;  %s2576_s2 = inlined_call_operand.vmem [shape: f32[1,128], index: 2, kind: input, shape index: {}]   ;;  %s2577_s3 = inlined_call_operand.vmem [shape: f32[256,128], index: 3, kind: output, shape index: {}]  }
   0x1   :  { %v1807_v0 = vld [vmem:[%s2574_s1 + $0x40] sm:$0xff]   ;;  %v1809_v2 = vld [vmem:[%s2574_s1 + $0x48] sm:$0xff]   ;;  %v1811_v4 = vld [vmem:[%s2574_s1 + $0x50] sm:$0xff]  }
   0x2   :  { %v1808_v1 = vld [vmem:[%s2574_s1] sm:$0xff]   ;;  %1507 = vmatprep.subr.bf16.mxu0 %v1807_v0  ;;  %1791 = vmatprep.subr.bf16.mxu1 %v1807_v0  ;;  %v1810_v3 = vld [vmem:[%s2574_s1 + $0x8] sm:$0xff]   ;;  %v1812_v5 = vld [vmem:[%s2574_s1 + $0x10] sm:$0xff]  }
   0x3   :  { %1508 = vmatpush3.bf16.msra.mxu0 %v1808_v1  ;;  %1799 = vmatpush3.bf16.msra.mxu1 %v1808_v1  ;;  %v1813_v6 = vld [vmem:[%s2574_s1 + $0x58] sm:$0xff]   ;;  %v1815_v8 = vld [vmem:[%s2574_s1 + $0x60] sm:$0xff]   ;;  %v1817_v10 = vld [vmem:[%s2574_s1 + $0x68] sm:$0xff]  }
   0x4   :  { %1509 = vmatprep.subr.bf16.mxu0 %v1809_v2  ;;  %1792 = vmatprep.subr.bf16.mxu1 %v1809_v2  ;;  %v1814_v7 = vld [vmem:[%s2574_s1 + $0x18] sm:$0xff]   ;;  %v1816_v9 = vld [vmem:[%s2574_s1 + $0x20] sm:$0xff]   ;;  %v1818_v13 = vld [vmem:[%s2574_s1 + $0x28] sm:$0xff]  }
   0x5   :  { %v1825_v11 = vld [vmem:[%s2575_s0 + $0x4] ss:$20 sps:$4 sm:$0xff]   ;;  %v1819_v14 = vld [vmem:[%s2574_s1 + $0x70] sm:$0xff]   ;;  %v1831_v23 = vld [vmem:[%s2574_s1 + $0xc8] sm:$0xff]  }
   0x6   :  { %v1828_v12 = vld [vmem:[%s2575_s0 + $0x1e4] ss:$20 sps:$4 sm:$0xff]   ;;  %887 = vmatprep.mubr.bf16.mxu0 %v1825_v11  ;;  %v1820_v15 = vld [vmem:[%s2574_s1 + $0x30] sm:$0xff]   ;;  %v1834_v24 = vld [vmem:[%s2575_s0 + $0x2c] ss:$20 sps:$4 sm:$0xff]  }
   0x7   :  { %1510 = vmatpush3.bf16.msra.mxu0 %v1810_v3  ;;  %1800 = vmatpush3.bf16.msra.mxu1 %v1810_v3  ;;  %v1821_v16 = vld [vmem:[%s2574_s1 + $0x78] sm:$0xff]   ;;  %v1829_v18 = vld [vmem:[%s2574_s1 + $0xc0] sm:$0xff]   ;;  %v1833_v26 = vld [vmem:[%s2574_s1 + $0x88] sm:$0xff]  }
   0x8   :  { %1511 = vmatprep.subr.bf16.mxu0 %v1811_v4  ;;  %1793 = vmatprep.subr.bf16.mxu1 %v1811_v4  ;;  %v1822_v17 = vld [vmem:[%s2574_s1 + $0x38] sm:$0xff]   ;;  %v1832_v19 = vld [vmem:[%s2574_s1 + $0x100] sm:$0xff]   ;;  %v1840_v28 = vld [vmem:[%s2574_s1 + $0xd0] sm:$0xff]  }
   0x9   :  { %983 = vmatprep.mubr.bf16.mxu1 %v1828_v12  ;;  %v1823_v20 = vld [vmem:[%s2575_s0] ss:$20 sps:$4 sm:$0xff]   ;;  %v1838_v27 = vld [vmem:[%s2575_s0 + $0x28] ss:$20 sps:$4 sm:$0xff]   ;;  %v1848_v36 = vld [vmem:[%s2575_s0 + $0x50] ss:$20 sps:$4 sm:$0xff]  }
   0xa   :  { %v1826_v21 = vld [vmem:[%s2575_s0 + $0x1e0] ss:$20 sps:$4 sm:$0xff]   ;;  %v1839_v29 = vld [vmem:[%s2575_s0 + $0x208] ss:$20 sps:$4 sm:$0xff]   ;;  %v1849_v38 = vld [vmem:[%s2575_s0 + $0x230] ss:$20 sps:$4 sm:$0xff]  }
   0xb   :  { %1512 = vmatpush3.bf16.msra.mxu0 %v1812_v5  ;;  %1801 = vmatpush3.bf16.msra.mxu1 %v1812_v5  ;;  %v1830_v22 = vld [vmem:[%s2574_s1 + $0x80] sm:$0xff]   ;;  %v1841_v30 = vld [vmem:[%s2574_s1 + $0x90] sm:$0xff]   ;;  %v1842_v31 = vld [vmem:[%s2574_s1 + $0xd8] sm:$0xff]  }
   0xc   :  { %1513 = vmatprep.subr.bf16.mxu0 %v1813_v6  ;;  %1794 = vmatprep.subr.bf16.mxu1 %v1813_v6  ;;  %v1836_v25 = vld [vmem:[%s2575_s0 + $0x20c] ss:$20 sps:$4 sm:$0xff]   ;;  %v1844_v32 = vld [vmem:[%s2575_s0 + $0x54] ss:$20 sps:$4 sm:$0xff]   ;;  %v1843_v34 = vld [vmem:[%s2574_s1 + $0x98] sm:$0xff]  }
   0xd   :  { %v1846_v33 = vld [vmem:[%s2575_s0 + $0x234] ss:$20 sps:$4 sm:$0xff]   ;;  %v1850_v37 = vld [vmem:[%s2574_s1 + $0xe0] sm:$0xff]   ;;  %v1854_v41 = vld [vmem:[%s2575_s0 + $0x7c] ss:$20 sps:$4 sm:$0xff]  }
   0xe   :  { %v1863_v35 = vld [vmem:[%s2574_s1 + $0x108] sm:$0xff]   ;;  %v1851_v39 = vld [vmem:[%s2574_s1 + $0xa0] sm:$0xff]   ;;  %v1856_v42 = vld [vmem:[%s2575_s0 + $0x25c] ss:$20 sps:$4 sm:$0xff]  }
   0xf   :  { %1514 = vmatpush3.bf16.msra.mxu0 %v1814_v7  ;;  %1802 = vmatpush3.bf16.msra.mxu1 %v1814_v7  ;;  %v1852_v40 = vld [vmem:[%s2574_s1 + $0xe8] sm:$0xff]   ;;  %v1860_v46 = vld [vmem:[%s2574_s1 + $0xf0] sm:$0xff]   ;;  %v1862_v49 = vld [vmem:[%s2574_s1 + $0xf8] sm:$0xff]  }
  0x10   :  { %1515 = vmatprep.subr.bf16.mxu0 %v1815_v8  ;;  %1795 = vmatprep.subr.bf16.mxu1 %v1815_v8  ;;  %v1853_v43 = vld [vmem:[%s2574_s1 + $0xa8] sm:$0xff]   ;;  %v1883_v47 = vld [vmem:[%s2574_s1 + $0x110] sm:$0xff]   ;;  %v1865_v50 = vld [vmem:[%s2575_s0 + $0xa4] ss:$20 sps:$4 sm:$0xff]  }
  0x11   :  { %v1858_v44 = vld [vmem:[%s2575_s0 + $0x78] ss:$20 sps:$4 sm:$0xff]   ;;  %v1861_v48 = vld [vmem:[%s2574_s1 + $0xb0] sm:$0xff]   ;;  %v1867_v53 = vld [vmem:[%s2575_s0 + $0x8] ss:$20 sps:$4 sm:$0xff]  }
  0x12   :  { %v1859_v45 = vld [vmem:[%s2575_s0 + $0x258] ss:$20 sps:$4 sm:$0xff]   ;;  %v1870_v54 = vld [vmem:[%s2575_s0 + $0xa0] ss:$20 sps:$4 sm:$0xff]   ;;  %v1875_v58 = vld [vmem:[%s2575_s0 + $0xc8] ss:$20 sps:$4 sm:$0xff]  }
  0x13   :  { %1516 = vmatpush3.bf16.msra.mxu0 %v1816_v9  ;;  %1803 = vmatpush3.bf16.msra.mxu1 %v1816_v9  ;;  %v1869_v51 = vld [vmem:[%s2575_s0 + $0xc] ss:$20 sps:$4 sm:$0xff]   ;;  %v1864_v52 = vld [vmem:[%s2574_s1 + $0xb8] sm:$0xff]   ;;  %v1873_v57 = vld [vmem:[%s2575_s0 + $0x34] ss:$20 sps:$4 sm:$0xff]  }
  0x14   :  { %1517 = vmatprep.subr.bf16.mxu0 %v1817_v10  ;;  %1796 = vmatprep.subr.bf16.mxu1 %v1817_v10  ;;  %v1871_v55 = vld [vmem:[%s2575_s0 + $0xcc] ss:$20 sps:$4 sm:$0xff]   ;;  %v1902_v56 = vld [vmem:[%s2574_s1 + $0x118] sm:$0xff]   ;;  %v1876_v59 = vld [vmem:[%s2575_s0 + $0x30] ss:$20 sps:$4 sm:$0xff]  }
  0x15   :  { %v1877_v60 = vld [vmem:[%s2575_s0 + $0xf4] ss:$20 sps:$4 sm:$0xff]   ;;  %v1879_v61 = vld [vmem:[%s2575_s0 + $0x5c] ss:$20 sps:$4 sm:$0xff]   ;;  %v1882_v63 = vld [vmem:[%s2575_s0 + $0x58] ss:$20 sps:$4 sm:$0xff]  }
  0x16   :  { %v1881_v62 = vld [vmem:[%s2575_s0 + $0xf0] ss:$20 sps:$4 sm:$0xff]   ;;  %v1888_v2 = vld [vmem:[%s2575_s0 + $0x118] ss:$20 sps:$4 sm:$0xff]   ;;  %v1889_v3 = vld [vmem:[%s2575_s0 + $0x80] ss:$20 sps:$4 sm:$0xff]  }
  0x17   :  { %1518 = vmatpush3.bf16.msra.mxu0 %v1818_v13  ;;  %1804 = vmatpush3.bf16.msra.mxu1 %v1818_v13  ;;  %v1884_v0 = vld [vmem:[%s2575_s0 + $0x11c] ss:$20 sps:$4 sm:$0xff]   ;;  %v1886_v1 = vld [vmem:[%s2575_s0 + $0x84] ss:$20 sps:$4 sm:$0xff]   ;;  %v1892_v5 = vld [vmem:[%s2575_s0 + $0xac] ss:$20 sps:$4 sm:$0xff]  }
  0x18   :  { %1519 = vmatprep.subr.bf16.mxu0 %v1819_v14  ;;  %1797 = vmatprep.subr.bf16.mxu1 %v1819_v14  ;;  %v1890_v4 = vld [vmem:[%s2575_s0 + $0x144] ss:$20 sps:$4 sm:$0xff]   ;;  %v1894_v6 = vld [vmem:[%s2575_s0 + $0x140] ss:$20 sps:$4 sm:$0xff]   ;;  %v1895_v7 = vld [vmem:[%s2575_s0 + $0xa8] ss:$20 sps:$4 sm:$0xff]  }
  0x19   :  { %v1896_v8 = vld [vmem:[%s2575_s0 + $0x16c] ss:$20 sps:$4 sm:$0xff]   ;;  %v1898_v9 = vld [vmem:[%s2575_s0 + $0xd4] ss:$20 sps:$4 sm:$0xff]   ;;  %v1901_v11 = vld [vmem:[%s2575_s0 + $0xd0] ss:$20 sps:$4 sm:$0xff]  }
  0x1a   :  { %v1900_v10 = vld [vmem:[%s2575_s0 + $0x168] ss:$20 sps:$4 sm:$0xff]   ;;  %v1907_v14 = vld [vmem:[%s2575_s0 + $0x190] ss:$20 sps:$4 sm:$0xff]  }
  0x1b   :  { %1520 = vmatpush3.bf16.msra.mxu0 %v1820_v15  ;;  %1805 = vmatpush3.bf16.msra.mxu1 %v1820_v15  ;;  %v1903_v12 = vld [vmem:[%s2575_s0 + $0x194] ss:$20 sps:$4 sm:$0xff]   ;;  %v1905_v13 = vld [vmem:[%s2575_s0 + $0xfc] ss:$20 sps:$4 sm:$0xff]   ;;  %v1908_v15 = vld [vmem:[%s2575_s0 + $0xf8] ss:$20 sps:$4 sm:$0xff]  }
  0x1c   :  { %1521 = vmatprep.subr.bf16.mxu0 %v1821_v16  ;;  %1798 = vmatprep.subr.bf16.mxu1 %v1821_v16  ;;  %v1909_v16 = vld [vmem:[%s2575_s0 + $0x1bc] ss:$20 sps:$4 sm:$0xff]  }
  0x1f   :  { %1522 = vmatpush3.bf16.msra.mxu0 %v1822_v17  ;;  %1806 = vmatpush3.bf16.msra.mxu1 %v1822_v17  ;;  %v1911_v17 = vld [vmem:[%s2575_s0 + $0x124] ss:$20 sps:$4 sm:$0xff]  }
  0x20   :  { %1619 = vmatprep.subr.bf16.mxu1 %v1829_v18  ;;  %1751 = vmatprep.subr.bf16.mxu0 %v1832_v19  ;;  %v1913_v18 = vld [vmem:[%s2575_s0 + $0x1b8] ss:$20 sps:$4 sm:$0xff]  }
  0x22   :  { %888 = vmatmul.mubr.bf16.vlgmr.msra.gmra.mrb[0].mxu0 %v1823_v20  ;;  %984 = vmatmul.mubr.bf16.vlgmr.msra.gmra.mrb[0].mxu1 %v1826_v21  ;;  %v1915_v20 = vld [vmem:[%s2575_s0 + $0x14c] ss:$20 sps:$4 sm:$0xff]   ;;  %v1917_v21 = vld [vmem:[%s2575_s0 + $0x10] ss:$20 sps:$4 sm:$0xff]  }
  0x23   :  { %1620 = vmatpush3.bf16.msra.mxu1 %v1830_v22  ;;  %1752 = vmatpush3.bf16.msra.mxu0 %v1832_v19  ;;  %v1914_v19 = vld [vmem:[%s2575_s0 + $0x120] ss:$20 sps:$4 sm:$0xff]   ;;  %v1918_v22 = vld [vmem:[%s2575_s0 + $0x148] ss:$20 sps:$4 sm:$0xff]  }
  0x24   :  { %1621 = vmatprep.subr.bf16.mxu1 %v1831_v23  ;;  %895 = vmatprep.mubr.bf16.mxu0 %v1834_v24  ;;  %v1919_v23 = vld [vmem:[%s2575_s0 + $0x38] ss:$20 sps:$4 sm:$0xff]   ;;  %v1920_v24 = vld [vmem:[%s2575_s0 + $0x174] ss:$20 sps:$4 sm:$0xff]  }
  0x25   :  { %991 = vmatprep.mubr.bf16.mxu1 %v1836_v25  ;;  %1753 = vmatprep.subr.bf16.mxu0 %v1863_v35  ;;  %v1922_v25 = vld [vmem:[%s2575_s0 + $0x60] ss:$20 sps:$4 sm:$0xff]  }
  0x27   :  { %1622 = vmatpush3.bf16.msra.mxu1 %v1833_v26  ;;  %1754 = vmatpush3.bf16.msra.mxu0 %v1863_v35  ;;  %v1923_v26 = vld [vmem:[%s2575_s0 + $0x170] ss:$20 sps:$4 sm:$0xff]   ;;  %v1934_v35 = vld [vmem:[%s2575_s0 + $0x128] ss:$20 sps:$4 sm:$0xff]  }
  0x28   :  { %1623 = vmatprep.subr.bf16.mxu1 %v1840_v28  ;;  %1755 = vmatprep.subr.bf16.mxu0 %v1883_v47  ;;  %v1925_v28 = vld [vmem:[%s2575_s0 + $0x19c] ss:$20 sps:$4 sm:$0xff]  }
  0x2a   :  { %896 = vmatmul.mubr.bf16.gmra.mrb[4].mxu0 %v1838_v27  ;;  %992 = vmatmul.mubr.bf16.gmra.mrb[4].mxu1 %v1839_v29  ;;  %v1924_v27 = vld [vmem:[%s2575_s0 + $0x88] ss:$20 sps:$4 sm:$0xff]   ;;  %v1927_v29 = vld [vmem:[%s2575_s0 + $0xb0] ss:$20 sps:$4 sm:$0xff]  }
  0x2b   :  { %1624 = vmatpush3.bf16.msra.mxu1 %v1841_v30  ;;  %903 = vmatprep.mubr.bf16.mxu0 %v1844_v32  ;;  %v1928_v30 = vld [vmem:[%s2575_s0 + $0x198] ss:$20 sps:$4 sm:$0xff]  }
  0x2c   :  { %1625 = vmatprep.subr.bf16.mxu1 %v1842_v31  ;;  %999 = vmatprep.mubr.bf16.mxu1 %v1846_v33  ;;  %v1929_v31 = vld [vmem:[%s2575_s0 + $0xd8] ss:$20 sps:$4 sm:$0xff]   ;;  %v1932_v33 = vld [vmem:[%s2575_s0 + $0x100] ss:$20 sps:$4 sm:$0xff]  }
  0x2d   :  { %1756 = vmatpush3.bf16.msra.mxu0 %v1883_v47  ;;  %v1930_v32 = vld [vmem:[%s2575_s0 + $0x1c4] ss:$20 sps:$4 sm:$0xff]  }
  0x2e   :  { %1757 = vmatprep.subr.bf16.mxu0 %v1902_v56  ;;  %v1949_v47 = vld [vmem:[%s2575_s0 + $0x218] ss:$20 sps:$4 sm:$0xff]  }
  0x2f   :  { %1626 = vmatpush3.bf16.msra.mxu1 %v1843_v34  ;;  %v1933_v34 = vld [vmem:[%s2575_s0 + $0x1c0] ss:$20 sps:$4 sm:$0xff]  }
  0x30   :  { %1627 = vmatprep.subr.bf16.mxu1 %v1850_v37  ;;  %v1937_v37 = vld [vmem:[%s2575_s0 + $0x150] ss:$20 sps:$4 sm:$0xff]  }
  0x31   :  { %1758 = vmatpush3.bf16.msra.mxu0 %v1902_v56 }
  0x32   :  { %904 = vmatmul.mubr.bf16.gmra.mrb[8].mxu0 %v1848_v36  ;;  %1000 = vmatmul.mubr.bf16.gmra.mrb[8].mxu1 %v1849_v38  ;;  %v1935_v36 = vld [vmem:[%s2575_s0 + $0x1ec] ss:$20 sps:$4 sm:$0xff]   ;;  %v1938_v38 = vld [vmem:[%s2575_s0 + $0x1e8] ss:$20 sps:$4 sm:$0xff]  }
  0x33   :  { %1628 = vmatpush3.bf16.msra.mxu1 %v1851_v39  ;;  %911 = vmatprep.mubr.bf16.mxu0 %v1854_v41  ;;  %v1939_v39 = vld [vmem:[%s2575_s0 + $0x178] ss:$20 sps:$4 sm:$0xff]   ;;  %v1942_v41 = vld [vmem:[%s2575_s0 + $0x1a0] ss:$20 sps:$4 sm:$0xff]  }
  0x34   :  { %1629 = vmatprep.subr.bf16.mxu1 %v1852_v40  ;;  %1007 = vmatprep.mubr.bf16.mxu1 %v1856_v42  ;;  %v1940_v40 = vld [vmem:[%s2575_s0 + $0x214] ss:$20 sps:$4 sm:$0xff]   ;;  %v1943_v42 = vld [vmem:[%s2575_s0 + $0x210] ss:$20 sps:$4 sm:$0xff]  }
  0x37   :  { %1630 = vmatpush3.bf16.msra.mxu1 %v1853_v43  ;;  %v1944_v43 = vld [vmem:[%s2575_s0 + $0x1c8] ss:$20 sps:$4 sm:$0xff]  }
  0x38   :  { %1631 = vmatprep.subr.bf16.mxu1 %v1860_v46  ;;  %v1948_v46 = vld [vmem:[%s2575_s0 + $0x238] ss:$20 sps:$4 sm:$0xff]  }
  0x3a   :  { %912 = vmatmul.mubr.bf16.gmra.mrb[12].mxu0 %v1858_v44  ;;  %1008 = vmatmul.mubr.bf16.gmra.mrb[12].mxu1 %v1859_v45  ;;  %v1945_v44 = vld [vmem:[%s2575_s0 + $0x23c] ss:$20 sps:$4 sm:$0xff]  }
  0x3b   :  { %1632 = vmatpush3.bf16.msra.mxu1 %v1861_v48  ;;  %919 = vmatprep.mubr.bf16.mxu0 %v1865_v50  ;;  %v1947_v45 = vld [vmem:[%s2575_s0 + $0x1f0] ss:$20 sps:$4 sm:$0xff]   ;;  %v1953_v50 = vld [vmem:[%s2575_s0 + $0x260] ss:$20 sps:$4 sm:$0xff]  }
  0x3c   :  { %1633 = vmatprep.subr.bf16.mxu1 %v1862_v49  ;;  %1048 = vmatprep.mubr.bf16.mxu1 %v1869_v51  ;;  %v1950_v48 = vld [vmem:[%s2575_s0 + $0x264] ss:$20 sps:$4 sm:$0xff]   ;;  %v1952_v49 = vld [vmem:[%s2575_s0 + $0x240] ss:$20 sps:$4 sm:$0xff]   ;;  %v1954_v51 = vld [vmem:[%s2575_s0 + $0x268] ss:$20 sps:$4 sm:$0xff]  }
  0x3f   :  { %1634 = vmatpush3.bf16.msra.mxu1 %v1864_v52 }
  0x42   :  { %920 = vmatmul.mubr.bf16.gmra.mrb[16].mxu0 %v1870_v54  ;;  %1049 = vmatmul.mubr.bf16.vlgmr.msra.gmra.mrb[16].mxu1 %v1867_v53 }
  0x43   :  { %927 = vmatprep.mubr.bf16.mxu0 %v1871_v55  ;;  %1056 = vmatprep.mubr.bf16.mxu1 %v1873_v57 }
  0x4a   :  { %928 = vmatmul.mubr.bf16.gmra.mrb[20].mxu0 %v1875_v58  ;;  %1057 = vmatmul.mubr.bf16.gmra.mrb[20].mxu1 %v1876_v59 }
  0x4b   :  { %935 = vmatprep.mubr.bf16.mxu0 %v1877_v60  ;;  %1064 = vmatprep.mubr.bf16.mxu1 %v1879_v61 }
  0x52   :  { %936 = vmatmul.mubr.bf16.gmra.mrb[24].mxu0 %v1881_v62  ;;  %1065 = vmatmul.mubr.bf16.gmra.mrb[24].mxu1 %v1882_v63 }
  0x53   :  { %943 = vmatprep.mubr.bf16.mxu0 %v1884_v0  ;;  %1072 = vmatprep.mubr.bf16.mxu1 %v1886_v1 }
  0x5a   :  { %944 = vmatmul.mubr.bf16.gmra.mrb[28].mxu0 %v1888_v2  ;;  %1073 = vmatmul.mubr.bf16.gmra.mrb[28].mxu1 %v1889_v3 }
  0x5b   :  { %951 = vmatprep.mubr.bf16.mxu0 %v1890_v4  ;;  %1080 = vmatprep.mubr.bf16.mxu1 %v1892_v5 }
  0x62   :  { %952 = vmatmul.mubr.bf16.gmra.mrb[32].mxu0 %v1894_v6  ;;  %1081 = vmatmul.mubr.bf16.gmra.mrb[32].mxu1 %v1895_v7 }
  0x63   :  { %959 = vmatprep.mubr.bf16.mxu0 %v1896_v8  ;;  %1088 = vmatprep.mubr.bf16.mxu1 %v1898_v9 }
  0x6a   :  { %960 = vmatmul.mubr.bf16.gmra.mrb[36].mxu0 %v1900_v10  ;;  %1089 = vmatmul.mubr.bf16.gmra.mrb[36].mxu1 %v1901_v11 }
  0x6b   :  { %967 = vmatprep.mubr.bf16.mxu0 %v1903_v12  ;;  %1096 = vmatprep.mubr.bf16.mxu1 %v1905_v13 }
  0x72   :  { %968 = vmatmul.mubr.bf16.gmra.mrb[40].mxu0 %v1907_v14  ;;  %1097 = vmatmul.mubr.bf16.gmra.mrb[40].mxu1 %v1908_v15 }
  0x73   :  { %975 = vmatprep.mubr.bf16.mxu0 %v1909_v16  ;;  %1104 = vmatprep.mubr.bf16.mxu1 %v1911_v17 }
  0x7a   :  { %976 = vmatmul.mubr.bf16.gmra.mrb[44].mxu0 %v1913_v18  ;;  %1105 = vmatmul.mubr.bf16.gmra.mrb[44].mxu1 %v1914_v19 }
  0x7b   :  { %1112 = vmatprep.mubr.bf16.mxu1 %v1915_v20  ;;  %1759 = vmatprep.mubr.msk.bf16.mxu0 %vm806_vm0, %v1917_v21 }
  0x82   :  { %1113 = vmatmul.mubr.bf16.gmra.mrb[48].mxu1 %v1918_v22  ;;  %1760 = vmatmul.mubr.msk.bf16.vlgmr.msra.gmra.mrb[48].mxu0 %vm806_vm0, %v1919_v23 }
  0x83   :  { %1120 = vmatprep.mubr.bf16.mxu1 %v1920_v24  ;;  %1763 = vmatprep.mubr.msk.bf16.mxu0 %vm806_vm0, %v1922_v25 }
  0x8a   :  { %1121 = vmatmul.mubr.bf16.gmra.mrb[52].mxu1 %v1923_v26  ;;  %1764 = vmatmul.mubr.msk.bf16.gmra.mrb[52].mxu0 %vm806_vm0, %v1924_v27 }
  0x8b   :  { %1128 = vmatprep.mubr.bf16.mxu1 %v1925_v28  ;;  %1767 = vmatprep.mubr.msk.bf16.mxu0 %vm806_vm0, %v1927_v29 }
  0x92   :  { %1129 = vmatmul.mubr.bf16.gmra.mrb[56].mxu1 %v1928_v30  ;;  %1768 = vmatmul.mubr.msk.bf16.gmra.mrb[56].mxu0 %vm806_vm0, %v1929_v31 }
  0x93   :  { %1136 = vmatprep.mubr.bf16.mxu1 %v1930_v32  ;;  %1771 = vmatprep.mubr.msk.bf16.mxu0 %vm806_vm0, %v1932_v33 }
  0x9a   :  { %1137 = vmatmul.mubr.bf16.gmra.mrb[60].mxu1 %v1933_v34  ;;  %1772 = vmatmul.mubr.msk.bf16.gmra.mrb[60].mxu0 %vm806_vm0, %v1934_v35 }
  0x9b   :  { %1144 = vmatprep.mubr.bf16.mxu1 %v1935_v36  ;;  %1775 = vmatprep.mubr.msk.bf16.mxu0 %vm806_vm0, %v1937_v37 }
  0xa2   :  { %1145 = vmatmul.mubr.bf16.gmra.mrb[64].mxu1 %v1938_v38  ;;  %1776 = vmatmul.mubr.msk.bf16.gmra.mrb[64].mxu0 %vm806_vm0, %v1939_v39  ;;  %v2358_v38 = vld [vmem:[%s2576_s2] ss:$0 sm:$0xff] }
  0xa3   :  { %1152 = vmatprep.mubr.bf16.mxu1 %v1940_v40  ;;  %1779 = vmatprep.mubr.msk.bf16.mxu0 %vm806_vm0, %v1942_v41 }
  0xaa   :  { %1153 = vmatmul.mubr.bf16.gmra.mrb[68].mxu1 %v1943_v42  ;;  %1780 = vmatmul.mubr.msk.bf16.gmra.mrb[68].mxu0 %vm806_vm0, %v1944_v43 }
  0xab   :  { %1160 = vmatprep.mubr.bf16.mxu1 %v1945_v44  ;;  %1783 = vmatprep.mubr.msk.bf16.mxu0 %vm806_vm0, %v1947_v45 }
  0xb2   :  { %1161 = vmatmul.mubr.bf16.gmra.mrb[72].mxu1 %v1948_v46  ;;  %1784 = vmatmul.mubr.msk.bf16.gmra.mrb[72].mxu0 %vm806_vm0, %v1949_v47 }
  0xb3   :  { %1168 = vmatprep.mubr.bf16.mxu1 %v1950_v48  ;;  %1787 = vmatprep.mubr.msk.bf16.mxu0 %vm806_vm0, %v1952_v49 }
  0xba   :  { %1169 = vmatmul.mubr.bf16.gmra.mrb[76].mxu1 %v1953_v50  ;;  %1788 = vmatmul.mubr.msk.bf16.gmra.mrb[76].mxu0 %vm806_vm0, %v1954_v51 }
  0xf5   :  { %v1595_v52 = vpop.f32.mrb[0].mxu1  ;;  %v1523_v53 = vpop.f32.mrb[0].mxu0 }
  0xf6   :  { %v1596_v54 = vpop.f32.mrb[1].mxu1  ;;  %v1524_v55 = vpop.f32.mrb[1].mxu0 }
  0xf7   :  { %v2339_v56 = vadd.f32 %v1596_v54, %v1595_v52  ;;  %v1598_v57 = vpop.f32.mrb[2].mxu1  ;;  %v1525_v58 = vadd.f32 %v1524_v55, %v1523_v53  ;;  %v1526_v59 = vpop.f32.mrb[2].mxu0 }
  0xf8   :  { %v1599_v60 = vpop.f32.mrb[3].mxu1  ;;  %v1527_v61 = vpop.f32.mrb[3].mxu0 }
  0xf9   :  { %v2341_v62 = vadd.f32 %v1599_v60, %v1598_v57  ;;  %v1528_v63 = vadd.f32 %v1527_v61, %v1526_v59  ;;  %v890_v41 = vadd.f32 %v1525_v58, %v2358_v38 }
  0xfb   :  { %v893_v48 = vadd.f32 %v1528_v63, %v2358_v38 }
  0xfd   :  { %v1601_v0 = vpop.f32.mrb[4].mxu1  ;;  %v1529_v1 = vpop.f32.mrb[4].mxu0 }
  0xfe   :  { %v1602_v2 = vpop.f32.mrb[5].mxu1  ;;  %v1530_v3 = vpop.f32.mrb[5].mxu0 }
  0xff   :  { %v2343_v4 = vadd.f32 %v1602_v2, %v1601_v0  ;;  %v1604_v5 = vpop.f32.mrb[6].mxu1  ;;  %v1531_v6 = vadd.f32 %v1530_v3, %v1529_v1  ;;  %v1532_v7 = vpop.f32.mrb[6].mxu0 }
 0x100   :  { %v1605_v8 = vpop.f32.mrb[7].mxu1  ;;  %v1533_v9 = vpop.f32.mrb[7].mxu0 }
 0x101   :  { %v2345_v10 = vadd.f32 %v1605_v8, %v1604_v5  ;;  %v1534_v11 = vadd.f32 %v1533_v9, %v1532_v7  ;;  %v898_v58 = vadd.f32 %v1531_v6, %v2358_v38 }
 0x103   :  { %v901_v63 = vadd.f32 %v1534_v11, %v2358_v38 }
 0x105   :  { %v1607_v12 = vpop.f32.mrb[8].mxu1  ;;  %v1535_v13 = vpop.f32.mrb[8].mxu0 }
 0x106   :  { %v1608_v14 = vpop.f32.mrb[9].mxu1  ;;  %v1536_v15 = vpop.f32.mrb[9].mxu0 }
 0x107   :  { %v2347_v16 = vadd.f32 %v1608_v14, %v1607_v12  ;;  %v1610_v17 = vpop.f32.mrb[10].mxu1  ;;  %v1537_v18 = vadd.f32 %v1536_v15, %v1535_v13  ;;  %v1538_v19 = vpop.f32.mrb[10].mxu0 }
 0x108   :  { %v1611_v20 = vpop.f32.mrb[11].mxu1  ;;  %v1539_v21 = vpop.f32.mrb[11].mxu0 }
 0x109   :  { %v2349_v22 = vadd.f32 %v1611_v20, %v1610_v17  ;;  %v1540_v23 = vadd.f32 %v1539_v21, %v1538_v19  ;;  %v906_v6 = vadd.f32 %v1537_v18, %v2358_v38 }
 0x10b   :  { %v909_v11 = vadd.f32 %v1540_v23, %v2358_v38 }
 0x10d   :  { %v1613_v24 = vpop.f32.mrb[12].mxu1  ;;  %v1541_v25 = vpop.f32.mrb[12].mxu0 }
 0x10e   :  { %v1614_v26 = vpop.f32.mrb[13].mxu1  ;;  %v1542_v27 = vpop.f32.mrb[13].mxu0 }
 0x10f   :  { %v2351_v28 = vadd.f32 %v1614_v26, %v1613_v24  ;;  %v1616_v29 = vpop.f32.mrb[14].mxu1  ;;  %v1543_v30 = vadd.f32 %v1542_v27, %v1541_v25  ;;  %v1544_v31 = vpop.f32.mrb[14].mxu0 }
 0x110   :  { %v1617_v32 = vpop.f32.mrb[15].mxu1  ;;  %v1545_v33 = vpop.f32.mrb[15].mxu0 }
 0x111   :  { %v2353_v34 = vadd.f32 %v1617_v32, %v1616_v29  ;;  %v1546_v35 = vadd.f32 %v1545_v33, %v1544_v31  ;;  %v914_v18 = vadd.f32 %v1543_v30, %v2358_v38 }
 0x113   :  { %v917_v23 = vadd.f32 %v1546_v35, %v2358_v38 }
 0x115   :  { %v1635_v36 = vpop.f32.mrb[16].mxu1  ;;  %v1547_v37 = vpop.f32.mrb[16].mxu0 }
 0x116   :  { %v1636_v39 = vpop.f32.mrb[17].mxu1  ;;  %v1548_v40 = vpop.f32.mrb[17].mxu0 }
 0x117   :  { %v1637_v42 = vadd.f32 %v1636_v39, %v1635_v36  ;;  %v1638_v43 = vpop.f32.mrb[18].mxu1  ;;  %v1549_v44 = vadd.f32 %v1548_v40, %v1547_v37  ;;  %v1550_v45 = vpop.f32.mrb[18].mxu0 }
 0x118   :  { %v1639_v46 = vpop.f32.mrb[19].mxu1  ;;  %v1551_v47 = vpop.f32.mrb[19].mxu0 }
 0x119   :  { %v1640_v49 = vadd.f32 %v1639_v46, %v1638_v43  ;;  %v1552_v50 = vadd.f32 %v1551_v47, %v1550_v45  ;;  %v2362_v51 = vadd.f32 %v1637_v42, %v890_v41  ;;  %v922_v30 = vadd.f32 %v1549_v44, %v2358_v38 }
 0x11b   :  { %v2364_v52 = vadd.f32 %v1640_v49, %v893_v48  ;;  %v925_v35 = vadd.f32 %v1552_v50, %v2358_v38 }
 0x11d   :  { %v1641_v53 = vpop.f32.mrb[20].mxu1  ;;  %v1553_v54 = vpop.f32.mrb[20].mxu0 }
 0x11e   :  { %v1642_v55 = vpop.f32.mrb[21].mxu1  ;;  %v1554_v57 = vpop.f32.mrb[21].mxu0 }
 0x11f   :  { %v1643_v59 = vadd.f32 %v1642_v55, %v1641_v53  ;;  %v1644_v60 = vpop.f32.mrb[22].mxu1  ;;  %v1555_v61 = vadd.f32 %v1554_v57, %v1553_v54  ;;  %v1556_v0 = vpop.f32.mrb[22].mxu0 }
 0x120   :  { %v1645_v1 = vpop.f32.mrb[23].mxu1  ;;  %v1557_v2 = vpop.f32.mrb[23].mxu0 }
 0x121   :  { %v1646_v3 = vadd.f32 %v1645_v1, %v1644_v60  ;;  %v1558_v5 = vadd.f32 %v1557_v2, %v1556_v0  ;;  %v2368_v7 = vadd.f32 %v1643_v59, %v898_v58 }
 0x123   :  { %v2370_v8 = vadd.f32 %v1646_v3, %v901_v63 }
 0x125   :  { %v1647_v9 = vpop.f32.mrb[24].mxu1  ;;  %v1559_v12 = vpop.f32.mrb[24].mxu0 }
 0x126   :  { %v1648_v13 = vpop.f32.mrb[25].mxu1  ;;  %v1560_v14 = vpop.f32.mrb[25].mxu0 }
 0x127   :  { %v1649_v15 = vadd.f32 %v1648_v13, %v1647_v9  ;;  %v1650_v17 = vpop.f32.mrb[26].mxu1  ;;  %v1561_v19 = vadd.f32 %v1560_v14, %v1559_v12  ;;  %v1562_v20 = vpop.f32.mrb[26].mxu0 }
 0x128   :  { %v1651_v21 = vpop.f32.mrb[27].mxu1  ;;  %v1563_v24 = vpop.f32.mrb[27].mxu0 }
 0x129   :  { %v1652_v25 = vadd.f32 %v1651_v21, %v1650_v17  ;;  %v1564_v26 = vadd.f32 %v1563_v24, %v1562_v20  ;;  %v2374_v27 = vadd.f32 %v1649_v15, %v906_v6  ;;  %v930_v6 = vadd.f32 %v1555_v61, %v2358_v38 }
 0x12b   :  { %v2376_v29 = vadd.f32 %v1652_v25, %v909_v11  ;;  %v933_v11 = vadd.f32 %v1558_v5, %v2358_v38 }
 0x12d   :  { %v1653_v31 = vpop.f32.mrb[28].mxu1  ;;  %v1565_v32 = vpop.f32.mrb[28].mxu0 }
 0x12e   :  { %v1654_v33 = vpop.f32.mrb[29].mxu1  ;;  %v1566_v36 = vpop.f32.mrb[29].mxu0 }
 0x12f   :  { %v1655_v37 = vadd.f32 %v1654_v33, %v1653_v31  ;;  %v1656_v39 = vpop.f32.mrb[30].mxu1  ;;  %v1567_v40 = vadd.f32 %v1566_v36, %v1565_v32  ;;  %v1568_v41 = vpop.f32.mrb[30].mxu0 }
 0x130   :  { %v1657_v42 = vpop.f32.mrb[31].mxu1  ;;  %v1569_v43 = vpop.f32.mrb[31].mxu0 }
 0x131   :  { %v1658_v45 = vadd.f32 %v1657_v42, %v1656_v39  ;;  %v1570_v46 = vadd.f32 %v1569_v43, %v1568_v41  ;;  %v2380_v47 = vadd.f32 %v1655_v37, %v914_v18  ;;  %v938_v39 = vadd.f32 %v1561_v19, %v2358_v38 }
 0x133   :  { %v2382_v48 = vadd.f32 %v1658_v45, %v917_v23 }
 0x135   :  { %v1659_v49 = vpop.f32.mrb[32].mxu1  ;;  %v1571_v53 = vpop.f32.mrb[32].mxu0 }
 0x136   :  { %v1660_v54 = vpop.f32.mrb[33].mxu1  ;;  %v1572_v55 = vpop.f32.mrb[33].mxu0 }
 0x137   :  { %v1661_v57 = vadd.f32 %v1660_v54, %v1659_v49  ;;  %v1662_v58 = vpop.f32.mrb[34].mxu1  ;;  %v2385_v59 = vadd.f32 %v1572_v55, %v1571_v53  ;;  %v1574_v60 = vpop.f32.mrb[34].mxu0  ;;  %v941_v49 = vadd.f32 %v1564_v26, %v2358_v38 }
 0x138   :  { %v1663_v0 = vpop.f32.mrb[35].mxu1  ;;  %v1575_v1 = vpop.f32.mrb[35].mxu0 }
 0x139   :  { %v1664_v2 = vadd.f32 %v1663_v0, %v1662_v58  ;;  %v2388_v63 = vadd.f32 %v1575_v1, %v1574_v60  ;;  %v2390_v3 = vadd.f32 %v1661_v57, %v922_v30  ;;  %v946_v0 = vadd.f32 %v1567_v40, %v2358_v38 }
 0x13b   :  { %v2392_v9 = vadd.f32 %v1664_v2, %v925_v35 }
 0x13d   :  { %v1665_v12 = vpop.f32.mrb[36].mxu1  ;;  %v1577_v13 = vpop.f32.mrb[36].mxu0 }
 0x13e   :  { %v1666_v14 = vpop.f32.mrb[37].mxu1  ;;  %v1578_v44 = vpop.f32.mrb[37].mxu0 }
 0x13f   :  { %v1667_v15 = vadd.f32 %v1666_v14, %v1665_v12  ;;  %v1668_v17 = vpop.f32.mrb[38].mxu1  ;;  %v2395_v20 = vadd.f32 %v1578_v44, %v1577_v13  ;;  %v1580_v21 = vpop.f32.mrb[38].mxu0  ;;  %v949_v14 = vadd.f32 %v1570_v46, %v2358_v38 }
 0x140   :  { %v1669_v24 = vpop.f32.mrb[39].mxu1  ;;  %v1581_v50 = vpop.f32.mrb[39].mxu0 }
 0x141   :  { %v1670_v25 = vadd.f32 %v1669_v24, %v1668_v17  ;;  %v2398_v31 = vadd.f32 %v1581_v50, %v1580_v21  ;;  %v2400_v32 = vadd.f32 %v1667_v15, %v930_v6 }
 0x143   :  { %v2402_v33 = vadd.f32 %v1670_v25, %v933_v11  ;;  %v954_v25 = vadd.f32 %v2385_v59, %v2358_v38 }
 0x145   :  { %v1671_v36 = vpop.f32.mrb[40].mxu1  ;;  %v1583_v18 = vpop.f32.mrb[40].mxu0 }
 0x146   :  { %v1672_v37 = vpop.f32.mrb[41].mxu1  ;;  %v1584_v61 = vpop.f32.mrb[41].mxu0 }
 0x147   :  { %v1673_v41 = vadd.f32 %v1672_v37, %v1671_v36  ;;  %v1674_v42 = vpop.f32.mrb[42].mxu1  ;;  %v2405_v43 = vadd.f32 %v1584_v61, %v1583_v18  ;;  %v1586_v23 = vpop.f32.mrb[42].mxu0 }
 0x148   :  { %v1675_v45 = vpop.f32.mrb[43].mxu1  ;;  %v1587_v5 = vpop.f32.mrb[43].mxu0 }
 0x149   :  { %v1676_v53 = vadd.f32 %v1675_v45, %v1674_v42  ;;  %v2408_v54 = vadd.f32 %v1587_v5, %v1586_v23  ;;  %v2410_v55 = vadd.f32 %v1673_v41, %v938_v39 }
 0x14b   :  { %v2412_v30 = vadd.f32 %v1676_v53, %v941_v49 }
 0x14d   :  { %v1677_v57 = vpop.f32.mrb[44].mxu1  ;;  %v1589_v58 = vpop.f32.mrb[44].mxu0 }
 0x14e   :  { %v1678_v60 = vpop.f32.mrb[45].mxu1  ;;  %v1590_v19 = vpop.f32.mrb[45].mxu0 }
 0x14f   :  { %v1679_v1 = vadd.f32 %v1678_v60, %v1677_v57  ;;  %v1680_v35 = vpop.f32.mrb[46].mxu1  ;;  %v2415_v2 = vadd.f32 %v1590_v19, %v1589_v58  ;;  %v1592_v12 = vpop.f32.mrb[46].mxu0 }
 0x150   :  { %v1681_v13 = vpop.f32.mrb[47].mxu1  ;;  %v1593_v26 = vpop.f32.mrb[47].mxu0 }
 0x151   :  { %v1682_v44 = vadd.f32 %v1681_v13, %v1680_v35  ;;  %v2418_v6 = vadd.f32 %v1593_v26, %v1592_v12  ;;  %v2420_v15 = vadd.f32 %v1679_v1, %v946_v0 }
 0x153   :  { %v2422_v17 = vadd.f32 %v1682_v44, %v949_v14  ;;  %v970_v44 = vadd.f32 %v2405_v43, %v2358_v38 }
 0x155   :  { %v1683_v21 = vpop.f32.mrb[48].mxu1  ;;  %v1761_v24 = vpop.f32.mrb[48].mxu0 }
 0x156   :  { %v1220_v40 = vadd.f32 %v1761_v24, %v2368_v7  ;;  %v1684_v50 = vpop.f32.mrb[49].mxu1  ;;  %v1211_v11 = vpop.f32.mrb[49].mxu0  ;;  %v957_v7 = vadd.f32 %v2388_v63, %v2358_v38 }
 0x157   :  { %v1685_v36 = vadd.f32 %v1684_v50, %v1683_v21  ;;  %v1212_v18 = vadd.f32 %v1211_v11, %v2362_v51  ;;  %v1686_v46 = vpop.f32.mrb[50].mxu1  ;;  %v1762_v37 = vpop.f32.mrb[50].mxu0 }
 0x158   :  { %1340 = vst [vmem:[%s2577_s3 + $0x10] sm:$0xff] %v1220_v40  ;;  %v1223_v61 = vadd.f32 %v1762_v37, %v2370_v8  ;;  %v1687_v39 = vpop.f32.mrb[51].mxu1  ;;  %v1214_v41 = vpop.f32.mrb[51].mxu0 }
 0x159   :  { %1338 = vst [vmem:[%s2577_s3] sm:$0xff] %v1212_v18  ;;  %v1688_v59 = vadd.f32 %v1687_v39, %v1686_v46  ;;  %v1215_v51 = vadd.f32 %v1214_v41, %v2364_v52  ;;  %v2438_v42 = vadd.f32 %v1685_v36, %v954_v25  ;;  %v962_v52 = vadd.f32 %v2395_v20, %v2358_v38 }
 0x15a   :  { %1341 = vst [vmem:[%s2577_s3 + $0x18] sm:$0xff] %v1223_v61  ;;  %v978_v39 = vadd.f32 %v2415_v2, %v2358_v38 }
 0x15b   :  { %1339 = vst [vmem:[%s2577_s3 + $0x8] sm:$0xff] %v1215_v51  ;;  %v2446_v8 = vadd.f32 %v1688_v59, %v957_v7 }
 0x15d   :  { %v1689_v63 = vpop.f32.mrb[52].mxu1  ;;  %v1765_v23 = vpop.f32.mrb[52].mxu0 }
 0x15e   :  { %v1236_v45 = vadd.f32 %v1765_v23, %v2380_v47  ;;  %v1690_v5 = vpop.f32.mrb[53].mxu1  ;;  %v1227_v49 = vpop.f32.mrb[53].mxu0  ;;  %v965_v47 = vadd.f32 %v2398_v31, %v2358_v38 }
 0x15f   :  { %v1691_v53 = vadd.f32 %v1690_v5, %v1689_v63  ;;  %v1228_v57 = vadd.f32 %v1227_v49, %v2374_v27  ;;  %v1692_v58 = vpop.f32.mrb[54].mxu1  ;;  %v1766_v60 = vpop.f32.mrb[54].mxu0 }
 0x160   :  { %1344 = vst [vmem:[%s2577_s3 + $0x30] sm:$0xff] %v1236_v45  ;;  %v1239_v19 = vadd.f32 %v1766_v60, %v2382_v48  ;;  %v1693_v0 = vpop.f32.mrb[55].mxu1  ;;  %v1230_v1 = vpop.f32.mrb[55].mxu0 }
 0x161   :  { %1342 = vst [vmem:[%s2577_s3 + $0x20] sm:$0xff] %v1228_v57  ;;  %v1694_v20 = vadd.f32 %v1693_v0, %v1692_v58  ;;  %v1231_v27 = vadd.f32 %v1230_v1, %v2376_v29  ;;  %v1123_v35 = vadd.f32 %v1691_v53, %v962_v52  ;;  %v986_v57 = vadd.f32 %v2339_v56, %v2358_v38 }
 0x162   :  { %1345 = vst [vmem:[%s2577_s3 + $0x38] sm:$0xff] %v1239_v19 }
 0x163   :  { %1343 = vst [vmem:[%s2577_s3 + $0x28] sm:$0xff] %v1231_v27  ;;  %v1126_v48 = vadd.f32 %v1694_v20, %v965_v47  ;;  %v989_v20 = vadd.f32 %v2341_v62, %v2358_v38 }
 0x165   :  { %v1695_v12 = vpop.f32.mrb[56].mxu1  ;;  %v1769_v13 = vpop.f32.mrb[56].mxu0 }
 0x166   :  { %v1252_v31 = vadd.f32 %v1769_v13, %v2400_v32  ;;  %v1696_v26 = vpop.f32.mrb[57].mxu1  ;;  %v1243_v14 = vpop.f32.mrb[57].mxu0  ;;  %v973_v32 = vadd.f32 %v2408_v54, %v2358_v38 }
 0x167   :  { %v1697_v29 = vadd.f32 %v1696_v26, %v1695_v12  ;;  %v1244_v21 = vadd.f32 %v1243_v14, %v2390_v3  ;;  %v1698_v24 = vpop.f32.mrb[58].mxu1  ;;  %v1770_v40 = vpop.f32.mrb[58].mxu0  ;;  %v994_v26 = vadd.f32 %v2343_v4, %v2358_v38 }
 0x168   :  { %1348 = vst [vmem:[%s2577_s3 + $0x50] sm:$0xff] %v1252_v31  ;;  %v1255_v50 = vadd.f32 %v1770_v40, %v2402_v33  ;;  %v1699_v11 = vpop.f32.mrb[59].mxu1  ;;  %v1246_v25 = vpop.f32.mrb[59].mxu0 }
 0x169   :  { %1346 = vst [vmem:[%s2577_s3 + $0x40] sm:$0xff] %v1244_v21  ;;  %v1700_v43 = vadd.f32 %v1699_v11, %v1698_v24  ;;  %v1247_v3 = vadd.f32 %v1246_v25, %v2392_v9  ;;  %v1131_v36 = vadd.f32 %v1697_v29, %v970_v44 }
 0x16a   :  { %1349 = vst [vmem:[%s2577_s3 + $0x58] sm:$0xff] %v1255_v50  ;;  %v997_v50 = vadd.f32 %v2345_v10, %v2358_v38 }
 0x16b   :  { %1347 = vst [vmem:[%s2577_s3 + $0x48] sm:$0xff] %v1247_v3  ;;  %v1134_v33 = vadd.f32 %v1700_v43, %v973_v32 }
 0x16d   :  { %v1701_v18 = vpop.f32.mrb[60].mxu1  ;;  %v1773_v46 = vpop.f32.mrb[60].mxu0 }
 0x16e   :  { %v1268_v54 = vadd.f32 %v1773_v46, %v2420_v15  ;;  %v1702_v37 = vpop.f32.mrb[61].mxu1  ;;  %v1259_v61 = vpop.f32.mrb[61].mxu0  ;;  %v981_v15 = vadd.f32 %v2418_v6, %v2358_v38  ;;  %v1002_v46 = vadd.f32 %v2347_v16, %v2358_v38 }
 0x16f   :  { %v1703_v9 = vadd.f32 %v1702_v37, %v1701_v18  ;;  %v1260_v41 = vadd.f32 %v1259_v61, %v2410_v55  ;;  %v1704_v7 = vpop.f32.mrb[62].mxu1  ;;  %v1774_v59 = vpop.f32.mrb[62].mxu0 }
 0x170   :  { %1352 = vst [vmem:[%s2577_s3 + $0x70] sm:$0xff] %v1268_v54  ;;  %v1271_v51 = vadd.f32 %v1774_v59, %v2422_v17  ;;  %v1705_v63 = vpop.f32.mrb[63].mxu1  ;;  %v1262_v23 = vpop.f32.mrb[63].mxu0 }
 0x171   :  { %1350 = vst [vmem:[%s2577_s3 + $0x60] sm:$0xff] %v1260_v41  ;;  %v1706_v2 = vadd.f32 %v1705_v63, %v1704_v7  ;;  %v1263_v55 = vadd.f32 %v1262_v23, %v2412_v30  ;;  %v1139_v45 = vadd.f32 %v1703_v9, %v978_v39  ;;  %v1005_v7 = vadd.f32 %v2349_v22, %v2358_v38 }
 0x172   :  { %1353 = vst [vmem:[%s2577_s3 + $0x78] sm:$0xff] %v1271_v51 }
 0x173   :  { %1351 = vst [vmem:[%s2577_s3 + $0x68] sm:$0xff] %v1263_v55  ;;  %v1142_v17 = vadd.f32 %v1706_v2, %v981_v15  ;;  %v1010_v55 = vadd.f32 %v2351_v28, %v2358_v38 }
 0x175   :  { %v1707_v5 = vpop.f32.mrb[64].mxu1  ;;  %v1777_v49 = vpop.f32.mrb[64].mxu0 }
 0x176   :  { %v1284_v6 = vadd.f32 %v1777_v49, %v1123_v35  ;;  %v1708_v52 = vpop.f32.mrb[65].mxu1  ;;  %v1275_v53 = vpop.f32.mrb[65].mxu0 }
 0x177   :  { %v1709_v58 = vadd.f32 %v1708_v52, %v1707_v5  ;;  %v1276_v30 = vadd.f32 %v1275_v53, %v2438_v42  ;;  %v1710_v60 = vpop.f32.mrb[66].mxu1  ;;  %v1778_v19 = vpop.f32.mrb[66].mxu0  ;;  %v1013_v53 = vadd.f32 %v2353_v34, %v2358_v38 }
 0x178   :  { %1356 = vst [vmem:[%s2577_s3 + $0x90] sm:$0xff] %v1284_v6  ;;  %v1287_v0 = vadd.f32 %v1778_v19, %v1126_v48  ;;  %v1711_v1 = vpop.f32.mrb[67].mxu1  ;;  %v1278_v47 = vpop.f32.mrb[67].mxu0 }
 0x179   :  { %1354 = vst [vmem:[%s2577_s3 + $0x80] sm:$0xff] %v1276_v30  ;;  %v1712_v56 = vadd.f32 %v1711_v1, %v1710_v60  ;;  %v1279_v27 = vadd.f32 %v1278_v47, %v2446_v8  ;;  %v1147_v42 = vadd.f32 %v1709_v58, %v986_v57 }
 0x17a   :  { %1357 = vst [vmem:[%s2577_s3 + $0x98] sm:$0xff] %v1287_v0 }
 0x17b   :  { %1355 = vst [vmem:[%s2577_s3 + $0x88] sm:$0xff] %v1279_v27  ;;  %v1150_v35 = vadd.f32 %v1712_v56, %v989_v20 }
 0x17d   :  { %v1713_v48 = vpop.f32.mrb[68].mxu1  ;;  %v1781_v12 = vpop.f32.mrb[68].mxu0 }
 0x17e   :  { %v1300_v62 = vadd.f32 %v1781_v12, %v1139_v45  ;;  %v1714_v13 = vpop.f32.mrb[69].mxu1  ;;  %v1291_v31 = vpop.f32.mrb[69].mxu0 }
 0x17f   :  { %v1715_v14 = vadd.f32 %v1714_v13, %v1713_v48  ;;  %v1292_v8 = vadd.f32 %v1291_v31, %v1131_v36  ;;  %v1716_v44 = vpop.f32.mrb[70].mxu1  ;;  %v1782_v29 = vpop.f32.mrb[70].mxu0 }
 0x180   :  { %1360 = vst [vmem:[%s2577_s3 + $0xb0] sm:$0xff] %v1300_v62  ;;  %v1303_v21 = vadd.f32 %v1782_v29, %v1142_v17  ;;  %v1717_v24 = vpop.f32.mrb[71].mxu1  ;;  %v1294_v40 = vpop.f32.mrb[71].mxu0 }
 0x181   :  { %1358 = vst [vmem:[%s2577_s3 + $0xa0] sm:$0xff] %v1292_v8  ;;  %v1718_v11 = vadd.f32 %v1717_v24, %v1716_v44  ;;  %v1295_v4 = vadd.f32 %v1294_v40, %v1134_v33  ;;  %v1155_v25 = vadd.f32 %v1715_v14, %v994_v26 }
 0x182   :  { %1361 = vst [vmem:[%s2577_s3 + $0xb8] sm:$0xff] %v1303_v21 }
 0x183   :  { %1359 = vst [vmem:[%s2577_s3 + $0xa8] sm:$0xff] %v1295_v4  ;;  %v1158_v32 = vadd.f32 %v1718_v11, %v997_v50 }
 0x185   :  { %v1719_v43 = vpop.f32.mrb[72].mxu1  ;;  %v1785_v3 = vpop.f32.mrb[72].mxu0 }
 0x186   :  { %v1316_v36 = vadd.f32 %v1785_v3, %v1155_v25  ;;  %v1720_v10 = vpop.f32.mrb[73].mxu1  ;;  %v1307_v18 = vpop.f32.mrb[73].mxu0 }
 0x187   :  { %v1721_v54 = vadd.f32 %v1720_v10, %v1719_v43  ;;  %v1308_v33 = vadd.f32 %v1307_v18, %v1147_v42  ;;  %v1722_v37 = vpop.f32.mrb[74].mxu1  ;;  %v1786_v61 = vpop.f32.mrb[74].mxu0 }
 0x188   :  { %1364 = vst [vmem:[%s2577_s3 + $0xd0] sm:$0xff] %v1316_v36  ;;  %v1319_v39 = vadd.f32 %v1786_v61, %v1158_v32  ;;  %v1723_v9 = vpop.f32.mrb[75].mxu1  ;;  %v1310_v41 = vpop.f32.mrb[75].mxu0 }
 0x189   :  { %1362 = vst [vmem:[%s2577_s3 + $0xc0] sm:$0xff] %v1308_v33  ;;  %v1724_v59 = vadd.f32 %v1723_v9, %v1722_v37  ;;  %v1311_v16 = vadd.f32 %v1310_v41, %v1150_v35  ;;  %v1163_v51 = vadd.f32 %v1721_v54, %v1002_v46 }
 0x18a   :  { %1365 = vst [vmem:[%s2577_s3 + $0xd8] sm:$0xff] %v1319_v39 }
 0x18b   :  { %1363 = vst [vmem:[%s2577_s3 + $0xc8] sm:$0xff] %v1311_v16  ;;  %v1166_v63 = vadd.f32 %v1724_v59, %v1005_v7 }
 0x18d   :  { %v1725_v23 = vpop.f32.mrb[76].mxu1  ;;  %v1789_v15 = vpop.f32.mrb[76].mxu0 }
 0x18e   :  { %v1726_v2 = vpop.f32.mrb[77].mxu1  ;;  %v1323_v22 = vpop.f32.mrb[77].mxu0 }
 0x18f   :  { %v1727_v45 = vadd.f32 %v1726_v2, %v1725_v23  ;;  %v1324_v17 = vadd.f32 %v1323_v22, %v1163_v51  ;;  %v1728_v5 = vpop.f32.mrb[78].mxu1  ;;  %v1790_v49 = vpop.f32.mrb[78].mxu0 }
 0x190   :  { %v1729_v6 = vpop.f32.mrb[79].mxu1  ;;  %v1326_v52 = vpop.f32.mrb[79].mxu0 }
 0x191   :  { %v1171_v57 = vadd.f32 %v1727_v45, %v1010_v55  ;;  %1366 = vst [vmem:[%s2577_s3 + $0xe0] sm:$0xff] %v1324_v17  ;;  %v1730_v58 = vadd.f32 %v1729_v6, %v1728_v5  ;;  %v1327_v30 = vadd.f32 %v1326_v52, %v1166_v63 }
 0x193   :  { %v1332_v60 = vadd.f32 %v1789_v15, %v1171_v57  ;;  %v1174_v19 = vadd.f32 %v1730_v58, %v1013_v53  ;;  %1367 = vst [vmem:[%s2577_s3 + $0xe8] sm:$0xff] %v1327_v30 }
 0x195   :  { %1368 = vst [vmem:[%s2577_s3 + $0xf0] sm:$0xff] %v1332_v60  ;;  %v1335_v28 = vadd.f32 %v1790_v49, %v1174_v19 }
 0x197   :  { %1369 = vst [vmem:[%s2577_s3 + $0xf8] sm:$0xff] %v1335_v28 }

</bundles_post_ra>
